<compile_context>
chip_gen: v7x
topology: tpu7x:2x2x1
jax: 0.10.0
libtpu: 0.0.40
codegen_flags: <defaults>
</compile_context>

<pallas_src>
import functools
import math

import jax
import jax.numpy as jnp
from jax.experimental import pallas as pl
from jax.experimental.pallas import tpu as pltpu

# ------------------------- configuration -------------------------
LMAX = 1
K = (LMAX + 1) ** 2          # 4 SH coefficients
C = 16                       # sphere_channels
NUM_LAYERS = 2
NUM_HEADS = 2
ALPHA_C = 4                  # attn_alpha_channels
VALUE_C = 4                  # attn_value_channels
ATTN_HIDDEN = 16             # attn_hidden_channels
FFN_HIDDEN = 32              # ffn_hidden_channels
EDGE_CH = 16                 # edge_channels
NUM_GAUSS = 32               # distance basis (600 in reference)
MAX_ELEM = 16                # max_num_elements
CUTOFF = 5.0                 # max_radius
AVG_DEGREE = 23.395238876342773

L_OF_COEFF = (0, 1, 1, 1)                                   # coefficient -> degree l
BAL = tuple(1.0 / ((2 * l + 1) * (LMAX + 1)) for l in L_OF_COEFF)
GAUSS_DELTA = CUTOFF / (NUM_GAUSS - 1)
GAUSS_COEFF = -0.5 / (2.0 * GAUSS_DELTA) ** 2


# ------------------------- in-kernel helpers (pure value functions) ----------
def _mm(a, b):
    return jnp.dot(a, b, preferred_element_type=jnp.float32)


def _silu(x):
    return x * jax.nn.sigmoid(x)


def _layer_norm(x, g, b, eps=1e-5):
    mu = jnp.mean(x, axis=-1, keepdims=True)
    var = jnp.mean((x - mu) ** 2, axis=-1, keepdims=True)
    return (x - mu) * jax.lax.rsqrt(var + eps) * g + b


def _radial(layers, x):
    """RadialFunction: [Linear, LayerNorm, SiLU]* + final Linear."""
    n = len(layers)
    for i, lyr in enumerate(layers):
        x = _mm(x, lyr["w"]) + lyr["b"]
        if i < n - 1:
            x = _layer_norm(x, lyr["ln_g"], lyr["ln_b"])
            x = _silu(x)
    return x


def _rms_norm_sh(x2, w2):
    """EquivariantRMSNormArraySphericalHarmonicsV2 on [rows, K*C] layout."""
    c = x2.shape[1] // K
    ms = None
    for k in range(K):
        blk = x2[:, k * c:(k + 1) * c]
        m = jnp.mean(blk * blk, axis=1, keepdims=True) * BAL[k]
        ms = m if ms is None else ms + m
    inv = jax.lax.rsqrt(ms + 1e-12)
    return x2 * inv * w2


def _rot_l1(wig, x2, d, inverse):
    """Block-diag Wigner rotation (lmax=1) as batched VPU broadcast-mul-adds.

    wig: [E, 9] row-major l=1 Wigner block.  x2: [E, K*d].  l=0 passes through.
    """
    out = [x2[:, :d]]
    for i in range(3):
        acc = None
        for j in range(3):
            col = 3 * j + i if inverse else 3 * i + j
            term = wig[:, col:col + 1] * x2[:, (j + 1) * d:(j + 2) * d]
            acc = term if acc is None else acc + term
        out.append(acc)
    return jnp.concatenate(out, axis=1)


def _so2_conv(x2, p, c_in, c_out, extra):
    """SO(2) convolution (lmax=mmax=1, shared weights) on [E, K*c_in] layout."""
    # m = 0 block: coefficients (0,0) and (1,0)
    x0 = jnp.concatenate([x2[:, :c_in], x2[:, 2 * c_in:3 * c_in]], axis=1)
    y0 = _mm(x0, p["w0"]) + p["b0"]
    out0, out2 = y0[:, :c_out], y0[:, c_out:2 * c_out]
    extra_out = y0[:, 2 * c_out:2 * c_out + extra] if extra > 0 else None
    # m = 1 block: (real, imag) = (m=+1, m=-1), complex mult with prepacked wc
    xr, xi = x2[:, 3 * c_in:4 * c_in], x2[:, c_in:2 * c_in]
    y1 = _mm(jnp.concatenate([xr, xi], axis=1), p["wc"])
    yr, yi = y1[:, :c_out], y1[:, c_out:2 * c_out]
    return jnp.concatenate([out0, yi, out2, yr], axis=1), extra_out


def _so3_linear(x2, w0, b0, w1, c_in):
    """SO3_LinearV2: per-degree linear, bias only on l=0."""
    parts = [_mm(x2[:, :c_in], w0) + b0]
    for k in range(1, K):
        parts.append(_mm(x2[:, k * c_in:(k + 1) * c_in], w1))
    return jnp.concatenate(parts, axis=1)


def _gate_act(x2, c):
    """Equivariant gate activation (stand-in for separable S2 activation)."""
    s = x2[:, :c]
    gate = jax.nn.sigmoid(s)
    parts = [s * gate]                                   # SiLU on l=0
    for k in range(1, K):
        parts.append(x2[:, k * c:(k + 1) * c] * gate)
    return jnp.concatenate(parts, axis=1)


def _attention(p, y2, wig, g_src, g_dst, s_dst, edge_feat):
    """SO(2)-conv graph attention on fully VMEM-resident tensors."""
    # gather + per-coefficient src||dst concat, rotate to the edge frame
    xs, xd = _mm(g_src, y2), _mm(g_dst, y2)
    msg = jnp.concatenate(
        [jnp.concatenate([xs[:, k * C:(k + 1) * C], xd[:, k * C:(k + 1) * C]],
                         axis=1) for k in range(K)], axis=1)      # [E, K*2C]=128 lanes
    msg = _rot_l1(wig, msg, 2 * C, inverse=False)

    edge_inv = _radial(p["rad"], edge_feat)                        # [E, EDGE_CH]
    hidden, alpha_feat = _so2_conv(msg, p["c1"], 2 * C, ATTN_HIDDEN,
                                   NUM_HEADS * ALPHA_C)
    gate_e = _silu(_mm(edge_inv, p["edge_gate_w"]) + p["edge_gate_b"])
    hidden = hidden * jnp.concatenate([gate_e] * K, axis=1)
    hidden = _gate_act(hidden, ATTN_HIDDEN)
    values, _ = _so2_conv(hidden, p["c2"], ATTN_HIDDEN,
                          NUM_HEADS * VALUE_C, 0)                  # [E, K*H*V]

    # attention logits -> per-destination (segment) softmax, per head
    logits = []
    for h in range(NUM_HEADS):
        a = alpha_feat[:, h * ALPHA_C:(h + 1) * ALPHA_C]
        a = _layer_norm(a, p["alpha_ln_g"], p["alpha_ln_b"])
        a = _silu(a) * (1.0 / 0.6)
        logits.append(jnp.sum(a * p["alpha_dot"][h:h + 1, :], axis=1,
                              keepdims=True))                      # [E,1]
    m = logits[0]
    for h in range(1, NUM_HEADS):
        m = jnp.maximum(m, logits[h])
    m = jnp.max(m, axis=0, keepdims=True)          # global max (cancels in ratio)
    aw = []
    for h in range(NUM_HEADS):
        num = jnp.exp(logits[h] - m)                               # [E,1]
        denom = _mm(s_dst, num)                                    # [N,1] seg-sum
        aw.append(num / (_mm(g_dst, denom) + 1e-9))                # [E,1]

    # weight values per (coefficient, head), rotate back, scatter-sum to targets
    hv = NUM_HEADS * VALUE_C
    parts = []
    for k in range(K):
        for h in range(NUM_HEADS):
            blk = values[:, k * hv + h * VALUE_C:k * hv + (h + 1) * VALUE_C]
            parts.append(blk * aw[h])
    v = jnp.concatenate(parts, axis=1)                             # [E, K*H*V]
    v = _rot_l1(wig, v, hv, inverse=True)
    out = _mm(s_dst, v)                                            # [N, K*H*V]
    return _so3_linear(out, p["proj_w0"], p["proj_b0"], p["proj_w1"], hv)


def _feed_forward(p, y2):
    h = _so3_linear(y2, p["f1_w0"], p["f1_b0"], p["f1_w1"], C)
    h = _gate_act(h, FFN_HIDDEN)
    return _so3_linear(h, p["f2_w0"], p["f2_b0"], p["f2_w1"], FFN_HIDDEN)


# ------------------------- the single fused kernel -------------------------
def _forward_kernel(*refs, treedef, n_act, n_nodes):
    out_ref = refs[-1]
    acts = [r[...] for r in refs[:n_act]]
    leaves = [r[...] for r in refs[n_act:-1]]
    params = jax.tree_util.tree_unflatten(treedef, leaves)

    x0_scalar, dist, wig, g_src, g_dst, s_dst, ab_deg = acts[:7]
    ab_layers = acts[7:]

    # GaussianSmearing(0, cutoff, NUM_GAUSS, 2.0) -- fused (EUP exp)
    offs = jax.lax.broadcasted_iota(jnp.int32, (1, NUM_GAUSS), 1).astype(jnp.float32)
    diff = dist - offs * GAUSS_DELTA
    gauss = jnp.exp(GAUSS_COEFF * diff * diff)                     # [E, NUM_GAUSS]

    # EdgeDegreeEmbedding: radial MLP -> m=0 coeffs -> rotate back -> scatter
    m0 = _radial(params["edge_deg_rad"],
                 jnp.concatenate([gauss, ab_deg], axis=1))         # [E, 2C]
    m0c0, m0c2 = m0[:, :C], m0[:, C:2 * C]
    emb = jnp.concatenate([m0c0,
                           wig[:, 3:4] * m0c2,
                           wig[:, 4:5] * m0c2,
                           wig[:, 5:6] * m0c2], axis=1)            # [E, K*C]
    deg = _mm(s_dst, emb) * (1.0 / AVG_DEGREE)                     # [N, K*C]

    # initial SO3 embedding: l=0 from atom-type embedding, plus edge degree
    x2 = jnp.concatenate(
        [x0_scalar, jnp.zeros((n_nodes, (K - 1) * C), jnp.float32)], axis=1) + deg

    # transformer blocks (unrolled)
    for li, blk in enumerate(params["blocks"]):
        edge_feat = jnp.concatenate([gauss, ab_layers[li]], axis=1)
        y2 = _rms_norm_sh(x2, blk["norm1_w"])
        x2 = x2 + _attention(blk["attn"], y2, wig, g_src, g_dst, s_dst, edge_feat)
        y2 = _rms_norm_sh(x2, blk["norm2_w"])
        x2 = x2 + _feed_forward(blk["ffn"], y2)

    # final equivariant RMS norm
    out_ref[...] = _rms_norm_sh(x2, params["final_norm_w"])


# ------------------------- parameter init -------------------------
def _linear_params(key, fan_in, fan_out, init="normal"):
    std = 1.0 / math.sqrt(fan_in)
    if init == "normal":
        w = std * jax.random.normal(key, (fan_in, fan_out), jnp.float32)
    else:
        w = jax.random.uniform(key, (fan_in, fan_out), jnp.float32, -std, std)
    return w, jnp.zeros((fan_out,), jnp.float32)


def _radial_params(key, dims):
    layers = []
    ks = jax.random.split(key, len(dims) - 1)
    for i in range(len(dims) - 1):
        w, b = _linear_params(ks[i], dims[i], dims[i + 1], init="uniform")
        layers.append({"w": w, "b": b,
                       "ln_g": jnp.ones((dims[i + 1],), jnp.float32),
                       "ln_b": jnp.zeros((dims[i + 1],), jnp.float32)})
    return layers


def _so2_params(key, c_in, c_out, extra):
    k1, k2, k3 = jax.random.split(key, 3)
    std0 = 1.0 / math.sqrt(2 * c_in)
    std1 = 1.0 / math.sqrt(c_in)
    return {"w0": std0 * jax.random.normal(k1, (2 * c_in, 2 * c_out + extra), jnp.float32),
            "b0": jnp.zeros((2 * c_out + extra,), jnp.float32),
            "wr": std1 * jax.random.normal(k2, (c_in, c_out), jnp.float32),
            "wi": std1 * jax.random.normal(k3, (c_in, c_out), jnp.float32)}


def init_params(key):
    keys = iter(jax.random.split(key, 256))
    nk = lambda: next(keys)
    p = {"sphere_embedding": jax.random.normal(nk(), (MAX_ELEM, C), jnp.float32)}
    rad_in = NUM_GAUSS + 2 * EDGE_CH
    p["edge_deg"] = {
        "src_embed": jax.random.normal(nk(), (MAX_ELEM, EDGE_CH), jnp.float32),
        "tgt_embed": jax.random.normal(nk(), (MAX_ELEM, EDGE_CH), jnp.float32),
        "rad": _radial_params(nk(), [rad_in, EDGE_CH, EDGE_CH, 2 * C]),
    }
    blocks = []
    for _ in range(NUM_LAYERS):
        blk = {"norm1_w": jnp.ones((1, K, C), jnp.float32),
               "norm2_w": jnp.ones((1, K, C), jnp.float32)}
        attn = {
            "src_embed": jax.random.normal(nk(), (MAX_ELEM, EDGE_CH), jnp.float32),
            "tgt_embed": jax.random.normal(nk(), (MAX_ELEM, EDGE_CH), jnp.float32),
            "rad": _radial_params(nk(), [rad_in, EDGE_CH, EDGE_CH]),
            "c1": _so2_params(nk(), 2 * C, ATTN_HIDDEN, NUM_HEADS * ALPHA_C),
            "c2": _so2_params(nk(), ATTN_HIDDEN, NUM_HEADS * VALUE_C, 0),
            "alpha_ln_g": jnp.ones((ALPHA_C,), jnp.float32),
            "alpha_ln_b": jnp.zeros((ALPHA_C,), jnp.float32),
            "alpha_dot": (1.0 / math.sqrt(ALPHA_C))
            * jax.random.normal(nk(), (NUM_HEADS, ALPHA_C), jnp.float32),
        }
        attn["edge_gate_w"], attn["edge_gate_b"] = _linear_params(nk(), EDGE_CH, ATTN_HIDDEN)
        attn["proj_w0"], attn["proj_b0"] = _linear_params(nk(), NUM_HEADS * VALUE_C, C)
        attn["proj_w1"], _ = _linear_params(nk(), NUM_HEADS * VALUE_C, C)
        blk["attn"] = attn
        ffn = {}
        ffn["f1_w0"], ffn["f1_b0"] = _linear_params(nk(), C, FFN_HIDDEN)
        ffn["f1_w1"], _ = _linear_params(nk(), C, FFN_HIDDEN)
        ffn["f2_w0"], ffn["f2_b0"] = _linear_params(nk(), FFN_HIDDEN, C)
        ffn["f2_w1"], _ = _linear_params(nk(), FFN_HIDDEN, C)
        blk["ffn"] = ffn
        blocks.append(blk)
    p["blocks"] = blocks
    p["final_norm_w"] = jnp.ones((1, K, C), jnp.float32)
    return p


# ------------------------- parameter packing for the kernel -------------------
def _row(v):
    return jnp.asarray(v, jnp.float32).reshape(1, -1)


def _pack_radial(layers):
    packed = []
    n = len(layers)
    for i, lyr in enumerate(layers):
        d = {"w": jnp.asarray(lyr["w"], jnp.float32), "b": _row(lyr["b"])}
        if i < n - 1:
            d["ln_g"] = _row(lyr["ln_g"])
            d["ln_b"] = _row(lyr["ln_b"])
        packed.append(d)
    return packed


def _pack_so2(p):
    # hoist the 2x2 complex-weight block construction out of the kernel
    wc = jnp.concatenate(
        [jnp.concatenate([p["wr"], p["wi"]], axis=1),
         jnp.concatenate([-p["wi"], p["wr"]], axis=1)], axis=0)
    return {"w0": p["w0"], "b0": _row(p["b0"]), "wc": wc}


def _pack_params(params):
    packed = {"edge_deg_rad": _pack_radial(params["edge_deg"]["rad"]),
              "final_norm_w": params["final_norm_w"].reshape(1, K * C),
              "blocks": []}
    for blk in params["blocks"]:
        a, f = blk["attn"], blk["ffn"]
        packed["blocks"].append({
            "norm1_w": blk["norm1_w"].reshape(1, K * C),
            "norm2_w": blk["norm2_w"].reshape(1, K * C),
            "attn": {
                "rad": _pack_radial(a["rad"]),
                "c1": _pack_so2(a["c1"]),
                "c2": _pack_so2(a["c2"]),
                "edge_gate_w": a["edge_gate_w"], "edge_gate_b": _row(a["edge_gate_b"]),
                "alpha_ln_g": _row(a["alpha_ln_g"]), "alpha_ln_b": _row(a["alpha_ln_b"]),
                "alpha_dot": a["alpha_dot"],
                "proj_w0": a["proj_w0"], "proj_b0": _row(a["proj_b0"]),
                "proj_w1": a["proj_w1"],
            },
            "ffn": {
                "f1_w0": f["f1_w0"], "f1_b0": _row(f["f1_b0"]), "f1_w1": f["f1_w1"],
                "f2_w0": f["f2_w0"], "f2_b0": _row(f["f2_b0"]), "f2_w1": f["f2_w1"],
            },
        })
    return packed


# ------------------------- JAX-side geometry helpers -------------------------
def init_edge_rot_mat(edge_vec):
    d = jnp.linalg.norm(edge_vec, axis=1, keepdims=True)
    norm_x = edge_vec / jnp.maximum(d, 1e-9)
    ref1 = jnp.array([1.0, 0.0, 0.0], jnp.float32)
    ref2 = jnp.array([0.0, 0.0, 1.0], jnp.float32)
    use2 = jnp.abs(norm_x @ ref1)[:, None] > 0.99
    ref = jnp.where(use2, ref2, ref1)
    norm_z = jnp.cross(norm_x, ref)
    norm_z = norm_z / jnp.maximum(jnp.linalg.norm(norm_z, axis=1, keepdims=True), 1e-9)
    norm_y = jnp.cross(norm_x, norm_z)
    norm_y = norm_y / jnp.maximum(jnp.linalg.norm(norm_y, axis=1, keepdims=True), 1e-9)
    # rows (z, x, y): maps the edge direction onto +y (OCP convention)
    return jnp.stack([norm_z, norm_x, norm_y], axis=1)


# ------------------------- model forward -------------------------
def forward(params, atomic_numbers, pos, edge_index):
    n = atomic_numbers.shape[0]
    src, dst = edge_index[0], edge_index[1]
    e = src.shape[0]

    edge_vec = pos[src] - pos[dst]
    edge_dist = jnp.linalg.norm(edge_vec, axis=1).reshape(e, 1).astype(jnp.float32)
    rot = init_edge_rot_mat(edge_vec)
    # real Wigner-D l=1 block, e3nn SH ordering (Y^-1,Y^0,Y^1) ~ (y,z,x)
    perm = jnp.array([1, 2, 0])
    wig = rot[:, perm][:, :, perm].reshape(e, 9).astype(jnp.float32)

    # gather / scatter operators for the tiny graph (contracted in-kernel)
    g_src = jax.nn.one_hot(src, n, dtype=jnp.float32)              # [E, N]
    g_dst = jax.nn.one_hot(dst, n, dtype=jnp.float32)              # [E, N]
    s_dst = g_dst.T                                                # [N, E]

    # atom-type gathers (plain XLA gathers; pre-concatenated src||tgt tables)
    an_src, an_dst = atomic_numbers[src], atomic_numbers[dst]
    x0 = params["sphere_embedding"][atomic_numbers].astype(jnp.float32)
    ed = params["edge_deg"]
    ab_deg = jnp.concatenate([ed["src_embed"][an_src], ed["tgt_embed"][an_dst]], axis=1)
    ab_layers = [jnp.concatenate([blk["attn"]["src_embed"][an_src],
                                  blk["attn"]["tgt_embed"][an_dst]], axis=1)
                 for blk in params["blocks"]]

    packed = _pack_params(params)
    leaves, treedef = jax.tree_util.tree_flatten(packed)
    acts = [x0, edge_dist, wig, g_src, g_dst, s_dst, ab_deg] + ab_layers

    out2 = pl.pallas_call(
        functools.partial(_forward_kernel, treedef=treedef, n_act=len(acts),
                          n_nodes=n),
        out_shape=jax.ShapeDtypeStruct((n, K * C), jnp.float32),
        compiler_params=pltpu.CompilerParams(vmem_limit_bytes=64 * 1024 * 1024),
    )(*acts, *leaves)

    # to_e3nn_embeddings()[1]: e3nn layout [N, C x 0e | C x 1e] = [N, C + 3C]
    y = out2.reshape(n, K, C)
    scalars = y[:, 0, :]
    vectors = jnp.transpose(y[:, 1:4, :], (0, 2, 1)).reshape(n, 3 * C)
    return jnp.concatenate([scalars, vectors], axis=1)


# ------------------------- main -------------------------
if __name__ == "__main__":
    key = jax.random.PRNGKey(0)
    kp, ka, kpos = jax.random.split(key, 3)
    params = init_params(kp)

    n_atoms = 8
    atomic_numbers = jax.random.randint(ka, (n_atoms,), 1, MAX_ELEM)
    pos = 1.5 * jax.random.normal(kpos, (n_atoms, 3), jnp.float32)
    # deterministic small graph: each atom -> next two atoms (E = 16 edges)
    idx = jnp.arange(n_atoms)
    src = jnp.concatenate([idx, idx])
    dst = jnp.concatenate([(idx + 1) % n_atoms, (idx + 2) % n_atoms])
    edge_index = jnp.stack([src, dst])

    out = jax.jit(forward)(params, atomic_numbers, pos, edge_index)
    out = jax.block_until_ready(out)

    assert out.shape == (n_atoms, K * C), out.shape
    assert bool(jnp.all(jnp.isfinite(out)))
    print("KERNEL_OK")
</pallas_src>

<mosaic_0001>
module attributes {stable_mosaic.version = 11 : i64} {
  func.func @_forward_kernel(%arg0: memref<8x16xf32, #tpu.memory_space<vmem>>, %arg1: memref<16x1xf32, #tpu.memory_space<vmem>>, %arg2: memref<16x9xf32, #tpu.memory_space<vmem>>, %arg3: memref<16x8xf32, #tpu.memory_space<vmem>>, %arg4: memref<16x8xf32, #tpu.memory_space<vmem>>, %arg5: memref<8x16xf32, #tpu.memory_space<vmem>>, %arg6: memref<16x32xf32, #tpu.memory_space<vmem>>, %arg7: memref<16x32xf32, #tpu.memory_space<vmem>>, %arg8: memref<16x32xf32, #tpu.memory_space<vmem>>, %arg9: memref<2x4xf32, #tpu.memory_space<vmem>>, %arg10: memref<1x4xf32, #tpu.memory_space<vmem>>, %arg11: memref<1x4xf32, #tpu.memory_space<vmem>>, %arg12: memref<1x40xf32, #tpu.memory_space<vmem>>, %arg13: memref<64x40xf32, #tpu.memory_space<vmem>>, %arg14: memref<64x32xf32, #tpu.memory_space<vmem>>, %arg15: memref<1x16xf32, #tpu.memory_space<vmem>>, %arg16: memref<32x16xf32, #tpu.memory_space<vmem>>, %arg17: memref<32x16xf32, #tpu.memory_space<vmem>>, %arg18: memref<1x16xf32, #tpu.memory_space<vmem>>, %arg19: memref<16x16xf32, #tpu.memory_space<vmem>>, %arg20: memref<1x16xf32, #tpu.memory_space<vmem>>, %arg21: memref<8x16xf32, #tpu.memory_space<vmem>>, %arg22: memref<8x16xf32, #tpu.memory_space<vmem>>, %arg23: memref<1x16xf32, #tpu.memory_space<vmem>>, %arg24: memref<1x16xf32, #tpu.memory_space<vmem>>, %arg25: memref<1x16xf32, #tpu.memory_space<vmem>>, %arg26: memref<64x16xf32, #tpu.memory_space<vmem>>, %arg27: memref<1x16xf32, #tpu.memory_space<vmem>>, %arg28: memref<16x16xf32, #tpu.memory_space<vmem>>, %arg29: memref<1x32xf32, #tpu.memory_space<vmem>>, %arg30: memref<16x32xf32, #tpu.memory_space<vmem>>, %arg31: memref<16x32xf32, #tpu.memory_space<vmem>>, %arg32: memref<1x16xf32, #tpu.memory_space<vmem>>, %arg33: memref<32x16xf32, #tpu.memory_space<vmem>>, %arg34: memref<32x16xf32, #tpu.memory_space<vmem>>, %arg35: memref<1x64xf32, #tpu.memory_space<vmem>>, %arg36: memref<1x64xf32, #tpu.memory_space<vmem>>, %arg37: memref<2x4xf32, #tpu.memory_space<vmem>>, %arg38: memref<1x4xf32, #tpu.memory_space<vmem>>, %arg39: memref<1x4xf32, #tpu.memory_space<vmem>>, %arg40: memref<1x40xf32, #tpu.memory_space<vmem>>, %arg41: memref<64x40xf32, #tpu.memory_space<vmem>>, %arg42: memref<64x32xf32, #tpu.memory_space<vmem>>, %arg43: memref<1x16xf32, #tpu.memory_space<vmem>>, %arg44: memref<32x16xf32, #tpu.memory_space<vmem>>, %arg45: memref<32x16xf32, #tpu.memory_space<vmem>>, %arg46: memref<1x16xf32, #tpu.memory_space<vmem>>, %arg47: memref<16x16xf32, #tpu.memory_space<vmem>>, %arg48: memref<1x16xf32, #tpu.memory_space<vmem>>, %arg49: memref<8x16xf32, #tpu.memory_space<vmem>>, %arg50: memref<8x16xf32, #tpu.memory_space<vmem>>, %arg51: memref<1x16xf32, #tpu.memory_space<vmem>>, %arg52: memref<1x16xf32, #tpu.memory_space<vmem>>, %arg53: memref<1x16xf32, #tpu.memory_space<vmem>>, %arg54: memref<64x16xf32, #tpu.memory_space<vmem>>, %arg55: memref<1x16xf32, #tpu.memory_space<vmem>>, %arg56: memref<16x16xf32, #tpu.memory_space<vmem>>, %arg57: memref<1x32xf32, #tpu.memory_space<vmem>>, %arg58: memref<16x32xf32, #tpu.memory_space<vmem>>, %arg59: memref<16x32xf32, #tpu.memory_space<vmem>>, %arg60: memref<1x16xf32, #tpu.memory_space<vmem>>, %arg61: memref<32x16xf32, #tpu.memory_space<vmem>>, %arg62: memref<32x16xf32, #tpu.memory_space<vmem>>, %arg63: memref<1x64xf32, #tpu.memory_space<vmem>>, %arg64: memref<1x64xf32, #tpu.memory_space<vmem>>, %arg65: memref<1x16xf32, #tpu.memory_space<vmem>>, %arg66: memref<1x16xf32, #tpu.memory_space<vmem>>, %arg67: memref<1x16xf32, #tpu.memory_space<vmem>>, %arg68: memref<64x16xf32, #tpu.memory_space<vmem>>, %arg69: memref<1x16xf32, #tpu.memory_space<vmem>>, %arg70: memref<1x16xf32, #tpu.memory_space<vmem>>, %arg71: memref<1x16xf32, #tpu.memory_space<vmem>>, %arg72: memref<16x16xf32, #tpu.memory_space<vmem>>, %arg73: memref<1x32xf32, #tpu.memory_space<vmem>>, %arg74: memref<16x32xf32, #tpu.memory_space<vmem>>, %arg75: memref<1x64xf32, #tpu.memory_space<vmem>>, %arg76: memref<8x64xf32, #tpu.memory_space<vmem>>) attributes {dimension_semantics = [], scalar_prefetch = 0 : i64, scratch_operands = 0 : i64, tpu.core_type = #tpu.core_type<tc>} {
    %c0 = arith.constant 0 : index
    %c0_0 = arith.constant 0 : index
    %0 = vector.load %arg0[%c0, %c0_0] : memref<8x16xf32, #tpu.memory_space<vmem>>, vector<8x16xf32>
    %c0_1 = arith.constant 0 : index
    %c0_2 = arith.constant 0 : index
    %1 = vector.load %arg1[%c0_1, %c0_2] : memref<16x1xf32, #tpu.memory_space<vmem>>, vector<16x1xf32>
    %c0_3 = arith.constant 0 : index
    %c0_4 = arith.constant 0 : index
    %2 = vector.load %arg2[%c0_3, %c0_4] : memref<16x9xf32, #tpu.memory_space<vmem>>, vector<16x9xf32>
    %c0_5 = arith.constant 0 : index
    %c0_6 = arith.constant 0 : index
    %3 = vector.load %arg3[%c0_5, %c0_6] : memref<16x8xf32, #tpu.memory_space<vmem>>, vector<16x8xf32>
    %c0_7 = arith.constant 0 : index
    %c0_8 = arith.constant 0 : index
    %4 = vector.load %arg4[%c0_7, %c0_8] : memref<16x8xf32, #tpu.memory_space<vmem>>, vector<16x8xf32>
    %c0_9 = arith.constant 0 : index
    %c0_10 = arith.constant 0 : index
    %5 = vector.load %arg5[%c0_9, %c0_10] : memref<8x16xf32, #tpu.memory_space<vmem>>, vector<8x16xf32>
    %c0_11 = arith.constant 0 : index
    %c0_12 = arith.constant 0 : index
    %6 = vector.load %arg6[%c0_11, %c0_12] : memref<16x32xf32, #tpu.memory_space<vmem>>, vector<16x32xf32>
    %c0_13 = arith.constant 0 : index
    %c0_14 = arith.constant 0 : index
    %7 = vector.load %arg7[%c0_13, %c0_14] : memref<16x32xf32, #tpu.memory_space<vmem>>, vector<16x32xf32>
    %c0_15 = arith.constant 0 : index
    %c0_16 = arith.constant 0 : index
    %8 = vector.load %arg8[%c0_15, %c0_16] : memref<16x32xf32, #tpu.memory_space<vmem>>, vector<16x32xf32>
    %c0_17 = arith.constant 0 : index
    %c0_18 = arith.constant 0 : index
    %9 = vector.load %arg9[%c0_17, %c0_18] : memref<2x4xf32, #tpu.memory_space<vmem>>, vector<2x4xf32>
    %c0_19 = arith.constant 0 : index
    %c0_20 = arith.constant 0 : index
    %10 = vector.load %arg10[%c0_19, %c0_20] : memref<1x4xf32, #tpu.memory_space<vmem>>, vector<1x4xf32>
    %c0_21 = arith.constant 0 : index
    %c0_22 = arith.constant 0 : index
    %11 = vector.load %arg11[%c0_21, %c0_22] : memref<1x4xf32, #tpu.memory_space<vmem>>, vector<1x4xf32>
    %c0_23 = arith.constant 0 : index
    %c0_24 = arith.constant 0 : index
    %12 = vector.load %arg12[%c0_23, %c0_24] : memref<1x40xf32, #tpu.memory_space<vmem>>, vector<1x40xf32>
    %c0_25 = arith.constant 0 : index
    %c0_26 = arith.constant 0 : index
    %13 = vector.load %arg13[%c0_25, %c0_26] : memref<64x40xf32, #tpu.memory_space<vmem>>, vector<64x40xf32>
    %c0_27 = arith.constant 0 : index
    %c0_28 = arith.constant 0 : index
    %14 = vector.load %arg14[%c0_27, %c0_28] : memref<64x32xf32, #tpu.memory_space<vmem>>, vector<64x32xf32>
    %c0_29 = arith.constant 0 : index
    %c0_30 = arith.constant 0 : index
    %15 = vector.load %arg15[%c0_29, %c0_30] : memref<1x16xf32, #tpu.memory_space<vmem>>, vector<1x16xf32>
    %c0_31 = arith.constant 0 : index
    %c0_32 = arith.constant 0 : index
    %16 = vector.load %arg16[%c0_31, %c0_32] : memref<32x16xf32, #tpu.memory_space<vmem>>, vector<32x16xf32>
    %c0_33 = arith.constant 0 : index
    %c0_34 = arith.constant 0 : index
    %17 = vector.load %arg17[%c0_33, %c0_34] : memref<32x16xf32, #tpu.memory_space<vmem>>, vector<32x16xf32>
    %c0_35 = arith.constant 0 : index
    %c0_36 = arith.constant 0 : index
    %18 = vector.load %arg18[%c0_35, %c0_36] : memref<1x16xf32, #tpu.memory_space<vmem>>, vector<1x16xf32>
    %c0_37 = arith.constant 0 : index
    %c0_38 = arith.constant 0 : index
    %19 = vector.load %arg19[%c0_37, %c0_38] : memref<16x16xf32, #tpu.memory_space<vmem>>, vector<16x16xf32>
    %c0_39 = arith.constant 0 : index
    %c0_40 = arith.constant 0 : index
    %20 = vector.load %arg20[%c0_39, %c0_40] : memref<1x16xf32, #tpu.memory_space<vmem>>, vector<1x16xf32>
    %c0_41 = arith.constant 0 : index
    %c0_42 = arith.constant 0 : index
    %21 = vector.load %arg21[%c0_41, %c0_42] : memref<8x16xf32, #tpu.memory_space<vmem>>, vector<8x16xf32>
    %c0_43 = arith.constant 0 : index
    %c0_44 = arith.constant 0 : index
    %22 = vector.load %arg22[%c0_43, %c0_44] : memref<8x16xf32, #tpu.memory_space<vmem>>, vector<8x16xf32>
    %c0_45 = arith.constant 0 : index
    %c0_46 = arith.constant 0 : index
    %23 = vector.load %arg23[%c0_45, %c0_46] : memref<1x16xf32, #tpu.memory_space<vmem>>, vector<1x16xf32>
    %c0_47 = arith.constant 0 : index
    %c0_48 = arith.constant 0 : index
    %24 = vector.load %arg24[%c0_47, %c0_48] : memref<1x16xf32, #tpu.memory_space<vmem>>, vector<1x16xf32>
    %c0_49 = arith.constant 0 : index
    %c0_50 = arith.constant 0 : index
    %25 = vector.load %arg25[%c0_49, %c0_50] : memref<1x16xf32, #tpu.memory_space<vmem>>, vector<1x16xf32>
    %c0_51 = arith.constant 0 : index
    %c0_52 = arith.constant 0 : index
    %26 = vector.load %arg26[%c0_51, %c0_52] : memref<64x16xf32, #tpu.memory_space<vmem>>, vector<64x16xf32>
    %c0_53 = arith.constant 0 : index
    %c0_54 = arith.constant 0 : index
    %27 = vector.load %arg27[%c0_53, %c0_54] : memref<1x16xf32, #tpu.memory_space<vmem>>, vector<1x16xf32>
    %c0_55 = arith.constant 0 : index
    %c0_56 = arith.constant 0 : index
    %28 = vector.load %arg28[%c0_55, %c0_56] : memref<16x16xf32, #tpu.memory_space<vmem>>, vector<16x16xf32>
    %c0_57 = arith.constant 0 : index
    %c0_58 = arith.constant 0 : index
    %29 = vector.load %arg29[%c0_57, %c0_58] : memref<1x32xf32, #tpu.memory_space<vmem>>, vector<1x32xf32>
    %c0_59 = arith.constant 0 : index
    %c0_60 = arith.constant 0 : index
    %30 = vector.load %arg30[%c0_59, %c0_60] : memref<16x32xf32, #tpu.memory_space<vmem>>, vector<16x32xf32>
    %c0_61 = arith.constant 0 : index
    %c0_62 = arith.constant 0 : index
    %31 = vector.load %arg31[%c0_61, %c0_62] : memref<16x32xf32, #tpu.memory_space<vmem>>, vector<16x32xf32>
    %c0_63 = arith.constant 0 : index
    %c0_64 = arith.constant 0 : index
    %32 = vector.load %arg32[%c0_63, %c0_64] : memref<1x16xf32, #tpu.memory_space<vmem>>, vector<1x16xf32>
    %c0_65 = arith.constant 0 : index
    %c0_66 = arith.constant 0 : index
    %33 = vector.load %arg33[%c0_65, %c0_66] : memref<32x16xf32, #tpu.memory_space<vmem>>, vector<32x16xf32>
    %c0_67 = arith.constant 0 : index
    %c0_68 = arith.constant 0 : index
    %34 = vector.load %arg34[%c0_67, %c0_68] : memref<32x16xf32, #tpu.memory_space<vmem>>, vector<32x16xf32>
    %c0_69 = arith.constant 0 : index
    %c0_70 = arith.constant 0 : index
    %35 = vector.load %arg35[%c0_69, %c0_70] : memref<1x64xf32, #tpu.memory_space<vmem>>, vector<1x64xf32>
    %c0_71 = arith.constant 0 : index
    %c0_72 = arith.constant 0 : index
    %36 = vector.load %arg36[%c0_71, %c0_72] : memref<1x64xf32, #tpu.memory_space<vmem>>, vector<1x64xf32>
    %c0_73 = arith.constant 0 : index
    %c0_74 = arith.constant 0 : index
    %37 = vector.load %arg37[%c0_73, %c0_74] : memref<2x4xf32, #tpu.memory_space<vmem>>, vector<2x4xf32>
    %c0_75 = arith.constant 0 : index
    %c0_76 = arith.constant 0 : index
    %38 = vector.load %arg38[%c0_75, %c0_76] : memref<1x4xf32, #tpu.memory_space<vmem>>, vector<1x4xf32>
    %c0_77 = arith.constant 0 : index
    %c0_78 = arith.constant 0 : index
    %39 = vector.load %arg39[%c0_77, %c0_78] : memref<1x4xf32, #tpu.memory_space<vmem>>, vector<1x4xf32>
    %c0_79 = arith.constant 0 : index
    %c0_80 = arith.constant 0 : index
    %40 = vector.load %arg40[%c0_79, %c0_80] : memref<1x40xf32, #tpu.memory_space<vmem>>, vector<1x40xf32>
    %c0_81 = arith.constant 0 : index
    %c0_82 = arith.constant 0 : index
    %41 = vector.load %arg41[%c0_81, %c0_82] : memref<64x40xf32, #tpu.memory_space<vmem>>, vector<64x40xf32>
    %c0_83 = arith.constant 0 : index
    %c0_84 = arith.constant 0 : index
    %42 = vector.load %arg42[%c0_83, %c0_84] : memref<64x32xf32, #tpu.memory_space<vmem>>, vector<64x32xf32>
    %c0_85 = arith.constant 0 : index
    %c0_86 = arith.constant 0 : index
    %43 = vector.load %arg43[%c0_85, %c0_86] : memref<1x16xf32, #tpu.memory_space<vmem>>, vector<1x16xf32>
    %c0_87 = arith.constant 0 : index
    %c0_88 = arith.constant 0 : index
    %44 = vector.load %arg44[%c0_87, %c0_88] : memref<32x16xf32, #tpu.memory_space<vmem>>, vector<32x16xf32>
    %c0_89 = arith.constant 0 : index
    %c0_90 = arith.constant 0 : index
    %45 = vector.load %arg45[%c0_89, %c0_90] : memref<32x16xf32, #tpu.memory_space<vmem>>, vector<32x16xf32>
    %c0_91 = arith.constant 0 : index
    %c0_92 = arith.constant 0 : index
    %46 = vector.load %arg46[%c0_91, %c0_92] : memref<1x16xf32, #tpu.memory_space<vmem>>, vector<1x16xf32>
    %c0_93 = arith.constant 0 : index
    %c0_94 = arith.constant 0 : index
    %47 = vector.load %arg47[%c0_93, %c0_94] : memref<16x16xf32, #tpu.memory_space<vmem>>, vector<16x16xf32>
    %c0_95 = arith.constant 0 : index
    %c0_96 = arith.constant 0 : index
    %48 = vector.load %arg48[%c0_95, %c0_96] : memref<1x16xf32, #tpu.memory_space<vmem>>, vector<1x16xf32>
    %c0_97 = arith.constant 0 : index
    %c0_98 = arith.constant 0 : index
    %49 = vector.load %arg49[%c0_97, %c0_98] : memref<8x16xf32, #tpu.memory_space<vmem>>, vector<8x16xf32>
    %c0_99 = arith.constant 0 : index
    %c0_100 = arith.constant 0 : index
    %50 = vector.load %arg50[%c0_99, %c0_100] : memref<8x16xf32, #tpu.memory_space<vmem>>, vector<8x16xf32>
    %c0_101 = arith.constant 0 : index
    %c0_102 = arith.constant 0 : index
    %51 = vector.load %arg51[%c0_101, %c0_102] : memref<1x16xf32, #tpu.memory_space<vmem>>, vector<1x16xf32>
    %c0_103 = arith.constant 0 : index
    %c0_104 = arith.constant 0 : index
    %52 = vector.load %arg52[%c0_103, %c0_104] : memref<1x16xf32, #tpu.memory_space<vmem>>, vector<1x16xf32>
    %c0_105 = arith.constant 0 : index
    %c0_106 = arith.constant 0 : index
    %53 = vector.load %arg53[%c0_105, %c0_106] : memref<1x16xf32, #tpu.memory_space<vmem>>, vector<1x16xf32>
    %c0_107 = arith.constant 0 : index
    %c0_108 = arith.constant 0 : index
    %54 = vector.load %arg54[%c0_107, %c0_108] : memref<64x16xf32, #tpu.memory_space<vmem>>, vector<64x16xf32>
    %c0_109 = arith.constant 0 : index
    %c0_110 = arith.constant 0 : index
    %55 = vector.load %arg55[%c0_109, %c0_110] : memref<1x16xf32, #tpu.memory_space<vmem>>, vector<1x16xf32>
    %c0_111 = arith.constant 0 : index
    %c0_112 = arith.constant 0 : index
    %56 = vector.load %arg56[%c0_111, %c0_112] : memref<16x16xf32, #tpu.memory_space<vmem>>, vector<16x16xf32>
    %c0_113 = arith.constant 0 : index
    %c0_114 = arith.constant 0 : index
    %57 = vector.load %arg57[%c0_113, %c0_114] : memref<1x32xf32, #tpu.memory_space<vmem>>, vector<1x32xf32>
    %c0_115 = arith.constant 0 : index
    %c0_116 = arith.constant 0 : index
    %58 = vector.load %arg58[%c0_115, %c0_116] : memref<16x32xf32, #tpu.memory_space<vmem>>, vector<16x32xf32>
    %c0_117 = arith.constant 0 : index
    %c0_118 = arith.constant 0 : index
    %59 = vector.load %arg59[%c0_117, %c0_118] : memref<16x32xf32, #tpu.memory_space<vmem>>, vector<16x32xf32>
    %c0_119 = arith.constant 0 : index
    %c0_120 = arith.constant 0 : index
    %60 = vector.load %arg60[%c0_119, %c0_120] : memref<1x16xf32, #tpu.memory_space<vmem>>, vector<1x16xf32>
    %c0_121 = arith.constant 0 : index
    %c0_122 = arith.constant 0 : index
    %61 = vector.load %arg61[%c0_121, %c0_122] : memref<32x16xf32, #tpu.memory_space<vmem>>, vector<32x16xf32>
    %c0_123 = arith.constant 0 : index
    %c0_124 = arith.constant 0 : index
    %62 = vector.load %arg62[%c0_123, %c0_124] : memref<32x16xf32, #tpu.memory_space<vmem>>, vector<32x16xf32>
    %c0_125 = arith.constant 0 : index
    %c0_126 = arith.constant 0 : index
    %63 = vector.load %arg63[%c0_125, %c0_126] : memref<1x64xf32, #tpu.memory_space<vmem>>, vector<1x64xf32>
    %c0_127 = arith.constant 0 : index
    %c0_128 = arith.constant 0 : index
    %64 = vector.load %arg64[%c0_127, %c0_128] : memref<1x64xf32, #tpu.memory_space<vmem>>, vector<1x64xf32>
    %c0_129 = arith.constant 0 : index
    %c0_130 = arith.constant 0 : index
    %65 = vector.load %arg65[%c0_129, %c0_130] : memref<1x16xf32, #tpu.memory_space<vmem>>, vector<1x16xf32>
    %c0_131 = arith.constant 0 : index
    %c0_132 = arith.constant 0 : index
    %66 = vector.load %arg66[%c0_131, %c0_132] : memref<1x16xf32, #tpu.memory_space<vmem>>, vector<1x16xf32>
    %c0_133 = arith.constant 0 : index
    %c0_134 = arith.constant 0 : index
    %67 = vector.load %arg67[%c0_133, %c0_134] : memref<1x16xf32, #tpu.memory_space<vmem>>, vector<1x16xf32>
    %c0_135 = arith.constant 0 : index
    %c0_136 = arith.constant 0 : index
    %68 = vector.load %arg68[%c0_135, %c0_136] : memref<64x16xf32, #tpu.memory_space<vmem>>, vector<64x16xf32>
    %c0_137 = arith.constant 0 : index
    %c0_138 = arith.constant 0 : index
    %69 = vector.load %arg69[%c0_137, %c0_138] : memref<1x16xf32, #tpu.memory_space<vmem>>, vector<1x16xf32>
    %c0_139 = arith.constant 0 : index
    %c0_140 = arith.constant 0 : index
    %70 = vector.load %arg70[%c0_139, %c0_140] : memref<1x16xf32, #tpu.memory_space<vmem>>, vector<1x16xf32>
    %c0_141 = arith.constant 0 : index
    %c0_142 = arith.constant 0 : index
    %71 = vector.load %arg71[%c0_141, %c0_142] : memref<1x16xf32, #tpu.memory_space<vmem>>, vector<1x16xf32>
    %c0_143 = arith.constant 0 : index
    %c0_144 = arith.constant 0 : index
    %72 = vector.load %arg72[%c0_143, %c0_144] : memref<16x16xf32, #tpu.memory_space<vmem>>, vector<16x16xf32>
    %c0_145 = arith.constant 0 : index
    %c0_146 = arith.constant 0 : index
    %73 = vector.load %arg73[%c0_145, %c0_146] : memref<1x32xf32, #tpu.memory_space<vmem>>, vector<1x32xf32>
    %c0_147 = arith.constant 0 : index
    %c0_148 = arith.constant 0 : index
    %74 = vector.load %arg74[%c0_147, %c0_148] : memref<16x32xf32, #tpu.memory_space<vmem>>, vector<16x32xf32>
    %c0_149 = arith.constant 0 : index
    %c0_150 = arith.constant 0 : index
    %75 = vector.load %arg75[%c0_149, %c0_150] : memref<1x64xf32, #tpu.memory_space<vmem>>, vector<1x64xf32>
    %76 = tpu.iota {dimensions = array<i32: 1>} : vector<1x32xi32>
    %77 = arith.sitofp %76 : vector<1x32xi32> to vector<1x32xf32>
    %cst = arith.constant 0.161290318 : f32
    %78 = vector.broadcast %cst : f32 to vector<1x32xf32>
    %79 = arith.mulf %77, %78 : vector<1x32xf32>
    %80 = vector.broadcast %1 : vector<16x1xf32> to vector<16x32xf32>
    %81 = vector.broadcast %79 : vector<1x32xf32> to vector<16x32xf32>
    %82 = arith.subf %80, %81 : vector<16x32xf32>
    %cst_151 = arith.constant -4.805000e+00 : f32
    %83 = vector.broadcast %cst_151 : f32 to vector<16x32xf32>
    %84 = arith.mulf %83, %82 : vector<16x32xf32>
    %85 = arith.mulf %84, %82 : vector<16x32xf32>
    %86 = math.exp %85 : vector<16x32xf32>
    %87 = tpu.concatenate %86, %6 in 1 : vector<16x32xf32>, vector<16x32xf32> -> vector<16x64xf32>
    %cst_152 = arith.constant dense<0.000000e+00> : vector<16x16xf32>
    %88 = tpu.matmul %87, %68, %cst_152 {dimension_numbers = #tpu.dot_dimension_numbers<[1], [0], [0], [1], [0, 0, 1, 1], [], []>} : vector<16x64xf32>, vector<64x16xf32>, vector<16x16xf32> -> vector<16x16xf32>
    %89 = vector.broadcast %65 : vector<1x16xf32> to vector<16x16xf32>
    %90 = arith.addf %88, %89 : vector<16x16xf32>
    %cst_153 = arith.constant dense<0.000000e+00> : vector<16xf32>
    %91 = vector.multi_reduction <add>, %90, %cst_153 [1] : vector<16x16xf32> to vector<16xf32>
    %92 = vector.shape_cast %91 : vector<16xf32> to vector<16x1xf32>
    %cst_154 = arith.constant 1.600000e+01 : f32
    %93 = vector.broadcast %cst_154 : f32 to vector<16x1xf32>
    %94 = arith.divf %92, %93 : vector<16x1xf32>
    %95 = vector.broadcast %94 : vector<16x1xf32> to vector<16x16xf32>
    %96 = arith.subf %90, %95 : vector<16x16xf32>
    %97 = arith.mulf %96, %96 : vector<16x16xf32>
    %cst_155 = arith.constant dense<0.000000e+00> : vector<16xf32>
    %98 = vector.multi_reduction <add>, %97, %cst_155 [1] : vector<16x16xf32> to vector<16xf32>
    %99 = vector.shape_cast %98 : vector<16xf32> to vector<16x1xf32>
    %cst_156 = arith.constant 1.600000e+01 : f32
    %100 = vector.broadcast %cst_156 : f32 to vector<16x1xf32>
    %101 = arith.divf %99, %100 : vector<16x1xf32>
    %102 = vector.broadcast %94 : vector<16x1xf32> to vector<16x16xf32>
    %103 = arith.subf %90, %102 : vector<16x16xf32>
    %cst_157 = arith.constant 9.99999974E-6 : f32
    %104 = vector.broadcast %cst_157 : f32 to vector<16x1xf32>
    %105 = arith.addf %101, %104 : vector<16x1xf32>
    %106 = math.rsqrt %105 : vector<16x1xf32>
    %107 = vector.broadcast %106 : vector<16x1xf32> to vector<16x16xf32>
    %108 = arith.mulf %103, %107 : vector<16x16xf32>
    %109 = vector.broadcast %67 : vector<1x16xf32> to vector<16x16xf32>
    %110 = arith.mulf %108, %109 : vector<16x16xf32>
    %111 = vector.broadcast %66 : vector<1x16xf32> to vector<16x16xf32>
    %112 = arith.addf %110, %111 : vector<16x16xf32>
    %113 = arith.negf %112 : vector<16x16xf32>
    %114 = math.exp %113 : vector<16x16xf32>
    %cst_158 = arith.constant 1.000000e+00 : f32
    %115 = vector.broadcast %cst_158 : f32 to vector<16x16xf32>
    %116 = arith.addf %115, %114 : vector<16x16xf32>
    %117 = arith.divf %115, %116 : vector<16x16xf32>
    %118 = arith.mulf %112, %117 : vector<16x16xf32>
    %cst_159 = arith.constant dense<0.000000e+00> : vector<16x16xf32>
    %119 = tpu.matmul %118, %72, %cst_159 {dimension_numbers = #tpu.dot_dimension_numbers<[1], [0], [0], [1], [0, 0, 1, 1], [], []>} : vector<16x16xf32>, vector<16x16xf32>, vector<16x16xf32> -> vector<16x16xf32>
    %120 = vector.broadcast %69 : vector<1x16xf32> to vector<16x16xf32>
    %121 = arith.addf %119, %120 : vector<16x16xf32>
    %cst_160 = arith.constant dense<0.000000e+00> : vector<16xf32>
    %122 = vector.multi_reduction <add>, %121, %cst_160 [1] : vector<16x16xf32> to vector<16xf32>
    %123 = vector.shape_cast %122 : vector<16xf32> to vector<16x1xf32>
    %cst_161 = arith.constant 1.600000e+01 : f32
    %124 = vector.broadcast %cst_161 : f32 to vector<16x1xf32>
    %125 = arith.divf %123, %124 : vector<16x1xf32>
    %126 = vector.broadcast %125 : vector<16x1xf32> to vector<16x16xf32>
    %127 = arith.subf %121, %126 : vector<16x16xf32>
    %128 = arith.mulf %127, %127 : vector<16x16xf32>
    %cst_162 = arith.constant dense<0.000000e+00> : vector<16xf32>
    %129 = vector.multi_reduction <add>, %128, %cst_162 [1] : vector<16x16xf32> to vector<16xf32>
    %130 = vector.shape_cast %129 : vector<16xf32> to vector<16x1xf32>
    %cst_163 = arith.constant 1.600000e+01 : f32
    %131 = vector.broadcast %cst_163 : f32 to vector<16x1xf32>
    %132 = arith.divf %130, %131 : vector<16x1xf32>
    %133 = vector.broadcast %125 : vector<16x1xf32> to vector<16x16xf32>
    %134 = arith.subf %121, %133 : vector<16x16xf32>
    %cst_164 = arith.constant 9.99999974E-6 : f32
    %135 = vector.broadcast %cst_164 : f32 to vector<16x1xf32>
    %136 = arith.addf %132, %135 : vector<16x1xf32>
    %137 = math.rsqrt %136 : vector<16x1xf32>
    %138 = vector.broadcast %137 : vector<16x1xf32> to vector<16x16xf32>
    %139 = arith.mulf %134, %138 : vector<16x16xf32>
    %140 = vector.broadcast %71 : vector<1x16xf32> to vector<16x16xf32>
    %141 = arith.mulf %139, %140 : vector<16x16xf32>
    %142 = vector.broadcast %70 : vector<1x16xf32> to vector<16x16xf32>
    %143 = arith.addf %141, %142 : vector<16x16xf32>
    %144 = arith.negf %143 : vector<16x16xf32>
    %145 = math.exp %144 : vector<16x16xf32>
    %cst_165 = arith.constant 1.000000e+00 : f32
    %146 = vector.broadcast %cst_165 : f32 to vector<16x16xf32>
    %147 = arith.addf %146, %145 : vector<16x16xf32>
    %148 = arith.divf %146, %147 : vector<16x16xf32>
    %149 = arith.mulf %143, %148 : vector<16x16xf32>
    %cst_166 = arith.constant dense<0.000000e+00> : vector<16x32xf32>
    %150 = tpu.matmul %149, %74, %cst_166 {dimension_numbers = #tpu.dot_dimension_numbers<[1], [0], [0], [1], [0, 0, 1, 1], [], []>} : vector<16x16xf32>, vector<16x32xf32>, vector<16x32xf32> -> vector<16x32xf32>
    %151 = vector.broadcast %73 : vector<1x32xf32> to vector<16x32xf32>
    %152 = arith.addf %150, %151 : vector<16x32xf32>
    %153 = vector.extract_strided_slice %152 {offsets = [0, 0], sizes = [16, 16], strides = [1, 1]} : vector<16x32xf32> to vector<16x16xf32>
    %154 = vector.extract_strided_slice %152 {offsets = [0, 16], sizes = [16, 16], strides = [1, 1]} : vector<16x32xf32> to vector<16x16xf32>
    %155 = vector.extract_strided_slice %2 {offsets = [0, 3], sizes = [16, 1], strides = [1, 1]} : vector<16x9xf32> to vector<16x1xf32>
    %156 = vector.broadcast %155 : vector<16x1xf32> to vector<16x16xf32>
    %157 = arith.mulf %156, %154 : vector<16x16xf32>
    %158 = vector.extract_strided_slice %2 {offsets = [0, 4], sizes = [16, 1], strides = [1, 1]} : vector<16x9xf32> to vector<16x1xf32>
    %159 = vector.broadcast %158 : vector<16x1xf32> to vector<16x16xf32>
    %160 = arith.mulf %159, %154 : vector<16x16xf32>
    %161 = vector.extract_strided_slice %2 {offsets = [0, 5], sizes = [16, 1], strides = [1, 1]} : vector<16x9xf32> to vector<16x1xf32>
    %162 = vector.broadcast %161 : vector<16x1xf32> to vector<16x16xf32>
    %163 = arith.mulf %162, %154 : vector<16x16xf32>
    %164 = tpu.concatenate %153, %157, %160, %163 in 1 : vector<16x16xf32>, vector<16x16xf32>, vector<16x16xf32>, vector<16x16xf32> -> vector<16x64xf32>
    %cst_167 = arith.constant dense<0.000000e+00> : vector<8x64xf32>
    %165 = tpu.matmul %5, %164, %cst_167 {dimension_numbers = #tpu.dot_dimension_numbers<[1], [0], [0], [1], [0, 0, 1, 1], [], []>} : vector<8x16xf32>, vector<16x64xf32>, vector<8x64xf32> -> vector<8x64xf32>
    %cst_168 = arith.constant 0.0427437387 : f32
    %166 = vector.broadcast %cst_168 : f32 to vector<8x64xf32>
    %167 = arith.mulf %165, %166 : vector<8x64xf32>
    %cst_169 = arith.constant 0.000000e+00 : f32
    %168 = vector.broadcast %cst_169 : f32 to vector<8x48xf32>
    %169 = tpu.concatenate %0, %168 in 1 : vector<8x16xf32>, vector<8x48xf32> -> vector<8x64xf32>
    %170 = arith.addf %169, %167 : vector<8x64xf32>
    %171 = tpu.concatenate %86, %7 in 1 : vector<16x32xf32>, vector<16x32xf32> -> vector<16x64xf32>
    %172 = vector.extract_strided_slice %170 {offsets = [0, 0], sizes = [8, 16], strides = [1, 1]} : vector<8x64xf32> to vector<8x16xf32>
    %173 = arith.mulf %172, %172 : vector<8x16xf32>
    %cst_170 = arith.constant dense<0.000000e+00> : vector<8xf32>
    %174 = vector.multi_reduction <add>, %173, %cst_170 [1] : vector<8x16xf32> to vector<8xf32>
    %175 = vector.shape_cast %174 : vector<8xf32> to vector<8x1xf32>
    %cst_171 = arith.constant 1.600000e+01 : f32
    %176 = vector.broadcast %cst_171 : f32 to vector<8x1xf32>
    %177 = arith.divf %175, %176 : vector<8x1xf32>
    %cst_172 = arith.constant 5.000000e-01 : f32
    %178 = vector.broadcast %cst_172 : f32 to vector<8x1xf32>
    %179 = arith.mulf %177, %178 : vector<8x1xf32>
    %180 = vector.extract_strided_slice %170 {offsets = [0, 16], sizes = [8, 16], strides = [1, 1]} : vector<8x64xf32> to vector<8x16xf32>
    %181 = arith.mulf %180, %180 : vector<8x16xf32>
    %cst_173 = arith.constant dense<0.000000e+00> : vector<8xf32>
    %182 = vector.multi_reduction <add>, %181, %cst_173 [1] : vector<8x16xf32> to vector<8xf32>
    %183 = vector.shape_cast %182 : vector<8xf32> to vector<8x1xf32>
    %cst_174 = arith.constant 1.600000e+01 : f32
    %184 = vector.broadcast %cst_174 : f32 to vector<8x1xf32>
    %185 = arith.divf %183, %184 : vector<8x1xf32>
    %cst_175 = arith.constant 0.166666672 : f32
    %186 = vector.broadcast %cst_175 : f32 to vector<8x1xf32>
    %187 = arith.mulf %185, %186 : vector<8x1xf32>
    %188 = arith.addf %179, %187 : vector<8x1xf32>
    %189 = vector.extract_strided_slice %170 {offsets = [0, 32], sizes = [8, 16], strides = [1, 1]} : vector<8x64xf32> to vector<8x16xf32>
    %190 = arith.mulf %189, %189 : vector<8x16xf32>
    %cst_176 = arith.constant dense<0.000000e+00> : vector<8xf32>
    %191 = vector.multi_reduction <add>, %190, %cst_176 [1] : vector<8x16xf32> to vector<8xf32>
    %192 = vector.shape_cast %191 : vector<8xf32> to vector<8x1xf32>
    %cst_177 = arith.constant 1.600000e+01 : f32
    %193 = vector.broadcast %cst_177 : f32 to vector<8x1xf32>
    %194 = arith.divf %192, %193 : vector<8x1xf32>
    %cst_178 = arith.constant 0.166666672 : f32
    %195 = vector.broadcast %cst_178 : f32 to vector<8x1xf32>
    %196 = arith.mulf %194, %195 : vector<8x1xf32>
    %197 = arith.addf %188, %196 : vector<8x1xf32>
    %198 = vector.extract_strided_slice %170 {offsets = [0, 48], sizes = [8, 16], strides = [1, 1]} : vector<8x64xf32> to vector<8x16xf32>
    %199 = arith.mulf %198, %198 : vector<8x16xf32>
    %cst_179 = arith.constant dense<0.000000e+00> : vector<8xf32>
    %200 = vector.multi_reduction <add>, %199, %cst_179 [1] : vector<8x16xf32> to vector<8xf32>
    %201 = vector.shape_cast %200 : vector<8xf32> to vector<8x1xf32>
    %cst_180 = arith.constant 1.600000e+01 : f32
    %202 = vector.broadcast %cst_180 : f32 to vector<8x1xf32>
    %203 = arith.divf %201, %202 : vector<8x1xf32>
    %cst_181 = arith.constant 0.166666672 : f32
    %204 = vector.broadcast %cst_181 : f32 to vector<8x1xf32>
    %205 = arith.mulf %203, %204 : vector<8x1xf32>
    %206 = arith.addf %197, %205 : vector<8x1xf32>
    %cst_182 = arith.constant 9.99999996E-13 : f32
    %207 = vector.broadcast %cst_182 : f32 to vector<8x1xf32>
    %208 = arith.addf %206, %207 : vector<8x1xf32>
    %209 = math.rsqrt %208 : vector<8x1xf32>
    %210 = vector.broadcast %209 : vector<8x1xf32> to vector<8x64xf32>
    %211 = arith.mulf %170, %210 : vector<8x64xf32>
    %212 = vector.broadcast %35 : vector<1x64xf32> to vector<8x64xf32>
    %213 = arith.mulf %211, %212 : vector<8x64xf32>
    %cst_183 = arith.constant dense<0.000000e+00> : vector<16x64xf32>
    %214 = tpu.matmul %3, %213, %cst_183 {dimension_numbers = #tpu.dot_dimension_numbers<[1], [0], [0], [1], [0, 0, 1, 1], [], []>} : vector<16x8xf32>, vector<8x64xf32>, vector<16x64xf32> -> vector<16x64xf32>
    %cst_184 = arith.constant dense<0.000000e+00> : vector<16x64xf32>
    %215 = tpu.matmul %4, %213, %cst_184 {dimension_numbers = #tpu.dot_dimension_numbers<[1], [0], [0], [1], [0, 0, 1, 1], [], []>} : vector<16x8xf32>, vector<8x64xf32>, vector<16x64xf32> -> vector<16x64xf32>
    %216 = vector.extract_strided_slice %214 {offsets = [0, 0], sizes = [16, 16], strides = [1, 1]} : vector<16x64xf32> to vector<16x16xf32>
    %217 = vector.extract_strided_slice %215 {offsets = [0, 0], sizes = [16, 16], strides = [1, 1]} : vector<16x64xf32> to vector<16x16xf32>
    %218 = tpu.concatenate %216, %217 in 1 : vector<16x16xf32>, vector<16x16xf32> -> vector<16x32xf32>
    %219 = vector.extract_strided_slice %214 {offsets = [0, 16], sizes = [16, 16], strides = [1, 1]} : vector<16x64xf32> to vector<16x16xf32>
    %220 = vector.extract_strided_slice %215 {offsets = [0, 16], sizes = [16, 16], strides = [1, 1]} : vector<16x64xf32> to vector<16x16xf32>
    %221 = tpu.concatenate %219, %220 in 1 : vector<16x16xf32>, vector<16x16xf32> -> vector<16x32xf32>
    %222 = vector.extract_strided_slice %214 {offsets = [0, 32], sizes = [16, 16], strides = [1, 1]} : vector<16x64xf32> to vector<16x16xf32>
    %223 = vector.extract_strided_slice %215 {offsets = [0, 32], sizes = [16, 16], strides = [1, 1]} : vector<16x64xf32> to vector<16x16xf32>
    %224 = tpu.concatenate %222, %223 in 1 : vector<16x16xf32>, vector<16x16xf32> -> vector<16x32xf32>
    %225 = vector.extract_strided_slice %214 {offsets = [0, 48], sizes = [16, 16], strides = [1, 1]} : vector<16x64xf32> to vector<16x16xf32>
    %226 = vector.extract_strided_slice %215 {offsets = [0, 48], sizes = [16, 16], strides = [1, 1]} : vector<16x64xf32> to vector<16x16xf32>
    %227 = tpu.concatenate %225, %226 in 1 : vector<16x16xf32>, vector<16x16xf32> -> vector<16x32xf32>
    %228 = tpu.concatenate %218, %221, %224, %227 in 1 : vector<16x32xf32>, vector<16x32xf32>, vector<16x32xf32>, vector<16x32xf32> -> vector<16x128xf32>
    %229 = vector.extract_strided_slice %228 {offsets = [0, 0], sizes = [16, 32], strides = [1, 1]} : vector<16x128xf32> to vector<16x32xf32>
    %230 = vector.extract_strided_slice %2 {offsets = [0, 0], sizes = [16, 1], strides = [1, 1]} : vector<16x9xf32> to vector<16x1xf32>
    %231 = vector.extract_strided_slice %228 {offsets = [0, 32], sizes = [16, 32], strides = [1, 1]} : vector<16x128xf32> to vector<16x32xf32>
    %232 = vector.broadcast %230 : vector<16x1xf32> to vector<16x32xf32>
    %233 = arith.mulf %232, %231 : vector<16x32xf32>
    %234 = vector.extract_strided_slice %2 {offsets = [0, 1], sizes = [16, 1], strides = [1, 1]} : vector<16x9xf32> to vector<16x1xf32>
    %235 = vector.extract_strided_slice %228 {offsets = [0, 64], sizes = [16, 32], strides = [1, 1]} : vector<16x128xf32> to vector<16x32xf32>
    %236 = vector.broadcast %234 : vector<16x1xf32> to vector<16x32xf32>
    %237 = arith.mulf %236, %235 : vector<16x32xf32>
    %238 = arith.addf %233, %237 : vector<16x32xf32>
    %239 = vector.extract_strided_slice %2 {offsets = [0, 2], sizes = [16, 1], strides = [1, 1]} : vector<16x9xf32> to vector<16x1xf32>
    %240 = vector.extract_strided_slice %228 {offsets = [0, 96], sizes = [16, 32], strides = [1, 1]} : vector<16x128xf32> to vector<16x32xf32>
    %241 = vector.broadcast %239 : vector<16x1xf32> to vector<16x32xf32>
    %242 = arith.mulf %241, %240 : vector<16x32xf32>
    %243 = arith.addf %238, %242 : vector<16x32xf32>
    %244 = vector.extract_strided_slice %2 {offsets = [0, 3], sizes = [16, 1], strides = [1, 1]} : vector<16x9xf32> to vector<16x1xf32>
    %245 = vector.extract_strided_slice %228 {offsets = [0, 32], sizes = [16, 32], strides = [1, 1]} : vector<16x128xf32> to vector<16x32xf32>
    %246 = vector.broadcast %244 : vector<16x1xf32> to vector<16x32xf32>
    %247 = arith.mulf %246, %245 : vector<16x32xf32>
    %248 = vector.extract_strided_slice %2 {offsets = [0, 4], sizes = [16, 1], strides = [1, 1]} : vector<16x9xf32> to vector<16x1xf32>
    %249 = vector.extract_strided_slice %228 {offsets = [0, 64], sizes = [16, 32], strides = [1, 1]} : vector<16x128xf32> to vector<16x32xf32>
    %250 = vector.broadcast %248 : vector<16x1xf32> to vector<16x32xf32>
    %251 = arith.mulf %250, %249 : vector<16x32xf32>
    %252 = arith.addf %247, %251 : vector<16x32xf32>
    %253 = vector.extract_strided_slice %2 {offsets = [0, 5], sizes = [16, 1], strides = [1, 1]} : vector<16x9xf32> to vector<16x1xf32>
    %254 = vector.extract_strided_slice %228 {offsets = [0, 96], sizes = [16, 32], strides = [1, 1]} : vector<16x128xf32> to vector<16x32xf32>
    %255 = vector.broadcast %253 : vector<16x1xf32> to vector<16x32xf32>
    %256 = arith.mulf %255, %254 : vector<16x32xf32>
    %257 = arith.addf %252, %256 : vector<16x32xf32>
    %258 = vector.extract_strided_slice %2 {offsets = [0, 6], sizes = [16, 1], strides = [1, 1]} : vector<16x9xf32> to vector<16x1xf32>
    %259 = vector.extract_strided_slice %228 {offsets = [0, 32], sizes = [16, 32], strides = [1, 1]} : vector<16x128xf32> to vector<16x32xf32>
    %260 = vector.broadcast %258 : vector<16x1xf32> to vector<16x32xf32>
    %261 = arith.mulf %260, %259 : vector<16x32xf32>
    %262 = vector.extract_strided_slice %2 {offsets = [0, 7], sizes = [16, 1], strides = [1, 1]} : vector<16x9xf32> to vector<16x1xf32>
    %263 = vector.extract_strided_slice %228 {offsets = [0, 64], sizes = [16, 32], strides = [1, 1]} : vector<16x128xf32> to vector<16x32xf32>
    %264 = vector.broadcast %262 : vector<16x1xf32> to vector<16x32xf32>
    %265 = arith.mulf %264, %263 : vector<16x32xf32>
    %266 = arith.addf %261, %265 : vector<16x32xf32>
    %267 = vector.extract_strided_slice %2 {offsets = [0, 8], sizes = [16, 1], strides = [1, 1]} : vector<16x9xf32> to vector<16x1xf32>
    %268 = vector.extract_strided_slice %228 {offsets = [0, 96], sizes = [16, 32], strides = [1, 1]} : vector<16x128xf32> to vector<16x32xf32>
    %269 = vector.broadcast %267 : vector<16x1xf32> to vector<16x32xf32>
    %270 = arith.mulf %269, %268 : vector<16x32xf32>
    %271 = arith.addf %266, %270 : vector<16x32xf32>
    %272 = tpu.concatenate %229, %243, %257, %271 in 1 : vector<16x32xf32>, vector<16x32xf32>, vector<16x32xf32>, vector<16x32xf32> -> vector<16x128xf32>
    %cst_185 = arith.constant dense<0.000000e+00> : vector<16x16xf32>
    %273 = tpu.matmul %171, %26, %cst_185 {dimension_numbers = #tpu.dot_dimension_numbers<[1], [0], [0], [1], [0, 0, 1, 1], [], []>} : vector<16x64xf32>, vector<64x16xf32>, vector<16x16xf32> -> vector<16x16xf32>
    %274 = vector.broadcast %23 : vector<1x16xf32> to vector<16x16xf32>
    %275 = arith.addf %273, %274 : vector<16x16xf32>
    %cst_186 = arith.constant dense<0.000000e+00> : vector<16xf32>
    %276 = vector.multi_reduction <add>, %275, %cst_186 [1] : vector<16x16xf32> to vector<16xf32>
    %277 = vector.shape_cast %276 : vector<16xf32> to vector<16x1xf32>
    %cst_187 = arith.constant 1.600000e+01 : f32
    %278 = vector.broadcast %cst_187 : f32 to vector<16x1xf32>
    %279 = arith.divf %277, %278 : vector<16x1xf32>
    %280 = vector.broadcast %279 : vector<16x1xf32> to vector<16x16xf32>
    %281 = arith.subf %275, %280 : vector<16x16xf32>
    %282 = arith.mulf %281, %281 : vector<16x16xf32>
    %cst_188 = arith.constant dense<0.000000e+00> : vector<16xf32>
    %283 = vector.multi_reduction <add>, %282, %cst_188 [1] : vector<16x16xf32> to vector<16xf32>
    %284 = vector.shape_cast %283 : vector<16xf32> to vector<16x1xf32>
    %cst_189 = arith.constant 1.600000e+01 : f32
    %285 = vector.broadcast %cst_189 : f32 to vector<16x1xf32>
    %286 = arith.divf %284, %285 : vector<16x1xf32>
    %287 = vector.broadcast %279 : vector<16x1xf32> to vector<16x16xf32>
    %288 = arith.subf %275, %287 : vector<16x16xf32>
    %cst_190 = arith.constant 9.99999974E-6 : f32
    %289 = vector.broadcast %cst_190 : f32 to vector<16x1xf32>
    %290 = arith.addf %286, %289 : vector<16x1xf32>
    %291 = math.rsqrt %290 : vector<16x1xf32>
    %292 = vector.broadcast %291 : vector<16x1xf32> to vector<16x16xf32>
    %293 = arith.mulf %288, %292 : vector<16x16xf32>
    %294 = vector.broadcast %25 : vector<1x16xf32> to vector<16x16xf32>
    %295 = arith.mulf %293, %294 : vector<16x16xf32>
    %296 = vector.broadcast %24 : vector<1x16xf32> to vector<16x16xf32>
    %297 = arith.addf %295, %296 : vector<16x16xf32>
    %298 = arith.negf %297 : vector<16x16xf32>
    %299 = math.exp %298 : vector<16x16xf32>
    %cst_191 = arith.constant 1.000000e+00 : f32
    %300 = vector.broadcast %cst_191 : f32 to vector<16x16xf32>
    %301 = arith.addf %300, %299 : vector<16x16xf32>
    %302 = arith.divf %300, %301 : vector<16x16xf32>
    %303 = arith.mulf %297, %302 : vector<16x16xf32>
    %cst_192 = arith.constant dense<0.000000e+00> : vector<16x16xf32>
    %304 = tpu.matmul %303, %28, %cst_192 {dimension_numbers = #tpu.dot_dimension_numbers<[1], [0], [0], [1], [0, 0, 1, 1], [], []>} : vector<16x16xf32>, vector<16x16xf32>, vector<16x16xf32> -> vector<16x16xf32>
    %305 = vector.broadcast %27 : vector<1x16xf32> to vector<16x16xf32>
    %306 = arith.addf %304, %305 : vector<16x16xf32>
    %307 = vector.extract_strided_slice %272 {offsets = [0, 0], sizes = [16, 32], strides = [1, 1]} : vector<16x128xf32> to vector<16x32xf32>
    %308 = vector.extract_strided_slice %272 {offsets = [0, 64], sizes = [16, 32], strides = [1, 1]} : vector<16x128xf32> to vector<16x32xf32>
    %309 = tpu.concatenate %307, %308 in 1 : vector<16x32xf32>, vector<16x32xf32> -> vector<16x64xf32>
    %cst_193 = arith.constant dense<0.000000e+00> : vector<16x40xf32>
    %310 = tpu.matmul %309, %13, %cst_193 {dimension_numbers = #tpu.dot_dimension_numbers<[1], [0], [0], [1], [0, 0, 1, 1], [], []>} : vector<16x64xf32>, vector<64x40xf32>, vector<16x40xf32> -> vector<16x40xf32>
    %311 = vector.broadcast %12 : vector<1x40xf32> to vector<16x40xf32>
    %312 = arith.addf %310, %311 : vector<16x40xf32>
    %313 = vector.extract_strided_slice %312 {offsets = [0, 0], sizes = [16, 16], strides = [1, 1]} : vector<16x40xf32> to vector<16x16xf32>
    %314 = vector.extract_strided_slice %312 {offsets = [0, 16], sizes = [16, 16], strides = [1, 1]} : vector<16x40xf32> to vector<16x16xf32>
    %315 = vector.extract_strided_slice %312 {offsets = [0, 32], sizes = [16, 8], strides = [1, 1]} : vector<16x40xf32> to vector<16x8xf32>
    %316 = vector.extract_strided_slice %272 {offsets = [0, 96], sizes = [16, 32], strides = [1, 1]} : vector<16x128xf32> to vector<16x32xf32>
    %317 = vector.extract_strided_slice %272 {offsets = [0, 32], sizes = [16, 32], strides = [1, 1]} : vector<16x128xf32> to vector<16x32xf32>
    %318 = tpu.concatenate %316, %317 in 1 : vector<16x32xf32>, vector<16x32xf32> -> vector<16x64xf32>
    %cst_194 = arith.constant dense<0.000000e+00> : vector<16x32xf32>
    %319 = tpu.matmul %318, %14, %cst_194 {dimension_numbers = #tpu.dot_dimension_numbers<[1], [0], [0], [1], [0, 0, 1, 1], [], []>} : vector<16x64xf32>, vector<64x32xf32>, vector<16x32xf32> -> vector<16x32xf32>
    %320 = vector.extract_strided_slice %319 {offsets = [0, 0], sizes = [16, 16], strides = [1, 1]} : vector<16x32xf32> to vector<16x16xf32>
    %321 = vector.extract_strided_slice %319 {offsets = [0, 16], sizes = [16, 16], strides = [1, 1]} : vector<16x32xf32> to vector<16x16xf32>
    %322 = tpu.concatenate %313, %321, %314, %320 in 1 : vector<16x16xf32>, vector<16x16xf32>, vector<16x16xf32>, vector<16x16xf32> -> vector<16x64xf32>
    %cst_195 = arith.constant dense<0.000000e+00> : vector<16x16xf32>
    %323 = tpu.matmul %306, %19, %cst_195 {dimension_numbers = #tpu.dot_dimension_numbers<[1], [0], [0], [1], [0, 0, 1, 1], [], []>} : vector<16x16xf32>, vector<16x16xf32>, vector<16x16xf32> -> vector<16x16xf32>
    %324 = vector.broadcast %18 : vector<1x16xf32> to vector<16x16xf32>
    %325 = arith.addf %323, %324 : vector<16x16xf32>
    %326 = arith.negf %325 : vector<16x16xf32>
    %327 = math.exp %326 : vector<16x16xf32>
    %cst_196 = arith.constant 1.000000e+00 : f32
    %328 = vector.broadcast %cst_196 : f32 to vector<16x16xf32>
    %329 = arith.addf %328, %327 : vector<16x16xf32>
    %330 = arith.divf %328, %329 : vector<16x16xf32>
    %331 = arith.mulf %325, %330 : vector<16x16xf32>
    %332 = tpu.concatenate %331, %331, %331, %331 in 1 : vector<16x16xf32>, vector<16x16xf32>, vector<16x16xf32>, vector<16x16xf32> -> vector<16x64xf32>
    %333 = arith.mulf %322, %332 : vector<16x64xf32>
    %334 = vector.extract_strided_slice %333 {offsets = [0, 0], sizes = [16, 16], strides = [1, 1]} : vector<16x64xf32> to vector<16x16xf32>
    %335 = arith.negf %334 : vector<16x16xf32>
    %336 = math.exp %335 : vector<16x16xf32>
    %cst_197 = arith.constant 1.000000e+00 : f32
    %337 = vector.broadcast %cst_197 : f32 to vector<16x16xf32>
    %338 = arith.addf %337, %336 : vector<16x16xf32>
    %339 = arith.divf %337, %338 : vector<16x16xf32>
    %340 = arith.mulf %334, %339 : vector<16x16xf32>
    %341 = vector.extract_strided_slice %333 {offsets = [0, 16], sizes = [16, 16], strides = [1, 1]} : vector<16x64xf32> to vector<16x16xf32>
    %342 = arith.mulf %341, %339 : vector<16x16xf32>
    %343 = vector.extract_strided_slice %333 {offsets = [0, 32], sizes = [16, 16], strides = [1, 1]} : vector<16x64xf32> to vector<16x16xf32>
    %344 = arith.mulf %343, %339 : vector<16x16xf32>
    %345 = vector.extract_strided_slice %333 {offsets = [0, 48], sizes = [16, 16], strides = [1, 1]} : vector<16x64xf32> to vector<16x16xf32>
    %346 = arith.mulf %345, %339 : vector<16x16xf32>
    %347 = tpu.concatenate %340, %342, %344, %346 in 1 : vector<16x16xf32>, vector<16x16xf32>, vector<16x16xf32>, vector<16x16xf32> -> vector<16x64xf32>
    %348 = vector.extract_strided_slice %347 {offsets = [0, 0], sizes = [16, 16], strides = [1, 1]} : vector<16x64xf32> to vector<16x16xf32>
    %349 = vector.extract_strided_slice %347 {offsets = [0, 32], sizes = [16, 16], strides = [1, 1]} : vector<16x64xf32> to vector<16x16xf32>
    %350 = tpu.concatenate %348, %349 in 1 : vector<16x16xf32>, vector<16x16xf32> -> vector<16x32xf32>
    %cst_198 = arith.constant dense<0.000000e+00> : vector<16x16xf32>
    %351 = tpu.matmul %350, %16, %cst_198 {dimension_numbers = #tpu.dot_dimension_numbers<[1], [0], [0], [1], [0, 0, 1, 1], [], []>} : vector<16x32xf32>, vector<32x16xf32>, vector<16x16xf32> -> vector<16x16xf32>
    %352 = vector.broadcast %15 : vector<1x16xf32> to vector<16x16xf32>
    %353 = arith.addf %351, %352 : vector<16x16xf32>
    %354 = vector.extract_strided_slice %353 {offsets = [0, 0], sizes = [16, 8], strides = [1, 1]} : vector<16x16xf32> to vector<16x8xf32>
    %355 = vector.extract_strided_slice %353 {offsets = [0, 8], sizes = [16, 8], strides = [1, 1]} : vector<16x16xf32> to vector<16x8xf32>
    %356 = vector.extract_strided_slice %347 {offsets = [0, 48], sizes = [16, 16], strides = [1, 1]} : vector<16x64xf32> to vector<16x16xf32>
    %357 = vector.extract_strided_slice %347 {offsets = [0, 16], sizes = [16, 16], strides = [1, 1]} : vector<16x64xf32> to vector<16x16xf32>
    %358 = tpu.concatenate %356, %357 in 1 : vector<16x16xf32>, vector<16x16xf32> -> vector<16x32xf32>
    %cst_199 = arith.constant dense<0.000000e+00> : vector<16x16xf32>
    %359 = tpu.matmul %358, %17, %cst_199 {dimension_numbers = #tpu.dot_dimension_numbers<[1], [0], [0], [1], [0, 0, 1, 1], [], []>} : vector<16x32xf32>, vector<32x16xf32>, vector<16x16xf32> -> vector<16x16xf32>
    %360 = vector.extract_strided_slice %359 {offsets = [0, 0], sizes = [16, 8], strides = [1, 1]} : vector<16x16xf32> to vector<16x8xf32>
    %361 = vector.extract_strided_slice %359 {offsets = [0, 8], sizes = [16, 8], strides = [1, 1]} : vector<16x16xf32> to vector<16x8xf32>
    %362 = tpu.concatenate %354, %361, %355, %360 in 1 : vector<16x8xf32>, vector<16x8xf32>, vector<16x8xf32>, vector<16x8xf32> -> vector<16x32xf32>
    %363 = vector.extract_strided_slice %315 {offsets = [0, 0], sizes = [16, 4], strides = [1, 1]} : vector<16x8xf32> to vector<16x4xf32>
    %cst_200 = arith.constant dense<0.000000e+00> : vector<16xf32>
    %364 = vector.multi_reduction <add>, %363, %cst_200 [1] : vector<16x4xf32> to vector<16xf32>
    %365 = vector.shape_cast %364 : vector<16xf32> to vector<16x1xf32>
    %cst_201 = arith.constant 4.000000e+00 : f32
    %366 = vector.broadcast %cst_201 : f32 to vector<16x1xf32>
    %367 = arith.divf %365, %366 : vector<16x1xf32>
    %368 = vector.broadcast %367 : vector<16x1xf32> to vector<16x4xf32>
    %369 = arith.subf %363, %368 : vector<16x4xf32>
    %370 = arith.mulf %369, %369 : vector<16x4xf32>
    %cst_202 = arith.constant dense<0.000000e+00> : vector<16xf32>
    %371 = vector.multi_reduction <add>, %370, %cst_202 [1] : vector<16x4xf32> to vector<16xf32>
    %372 = vector.shape_cast %371 : vector<16xf32> to vector<16x1xf32>
    %cst_203 = arith.constant 4.000000e+00 : f32
    %373 = vector.broadcast %cst_203 : f32 to vector<16x1xf32>
    %374 = arith.divf %372, %373 : vector<16x1xf32>
    %375 = vector.broadcast %367 : vector<16x1xf32> to vector<16x4xf32>
    %376 = arith.subf %363, %375 : vector<16x4xf32>
    %cst_204 = arith.constant 9.99999974E-6 : f32
    %377 = vector.broadcast %cst_204 : f32 to vector<16x1xf32>
    %378 = arith.addf %374, %377 : vector<16x1xf32>
    %379 = math.rsqrt %378 : vector<16x1xf32>
    %380 = vector.broadcast %379 : vector<16x1xf32> to vector<16x4xf32>
    %381 = arith.mulf %376, %380 : vector<16x4xf32>
    %382 = vector.broadcast %11 : vector<1x4xf32> to vector<16x4xf32>
    %383 = arith.mulf %381, %382 : vector<16x4xf32>
    %384 = vector.broadcast %10 : vector<1x4xf32> to vector<16x4xf32>
    %385 = arith.addf %383, %384 : vector<16x4xf32>
    %386 = arith.negf %385 : vector<16x4xf32>
    %387 = math.exp %386 : vector<16x4xf32>
    %cst_205 = arith.constant 1.000000e+00 : f32
    %388 = vector.broadcast %cst_205 : f32 to vector<16x4xf32>
    %389 = arith.addf %388, %387 : vector<16x4xf32>
    %390 = arith.divf %388, %389 : vector<16x4xf32>
    %391 = arith.mulf %385, %390 : vector<16x4xf32>
    %cst_206 = arith.constant 1.66666663 : f32
    %392 = vector.broadcast %cst_206 : f32 to vector<16x4xf32>
    %393 = arith.mulf %391, %392 : vector<16x4xf32>
    %394 = vector.extract_strided_slice %9 {offsets = [0, 0], sizes = [1, 4], strides = [1, 1]} : vector<2x4xf32> to vector<1x4xf32>
    %395 = vector.broadcast %394 : vector<1x4xf32> to vector<16x4xf32>
    %396 = arith.mulf %393, %395 : vector<16x4xf32>
    %cst_207 = arith.constant dense<0.000000e+00> : vector<16xf32>
    %397 = vector.multi_reduction <add>, %396, %cst_207 [1] : vector<16x4xf32> to vector<16xf32>
    %398 = vector.shape_cast %397 : vector<16xf32> to vector<16x1xf32>
    %399 = vector.extract_strided_slice %315 {offsets = [0, 4], sizes = [16, 4], strides = [1, 1]} : vector<16x8xf32> to vector<16x4xf32>
    %cst_208 = arith.constant dense<0.000000e+00> : vector<16xf32>
    %400 = vector.multi_reduction <add>, %399, %cst_208 [1] : vector<16x4xf32> to vector<16xf32>
    %401 = vector.shape_cast %400 : vector<16xf32> to vector<16x1xf32>
    %cst_209 = arith.constant 4.000000e+00 : f32
    %402 = vector.broadcast %cst_209 : f32 to vector<16x1xf32>
    %403 = arith.divf %401, %402 : vector<16x1xf32>
    %404 = vector.broadcast %403 : vector<16x1xf32> to vector<16x4xf32>
    %405 = arith.subf %399, %404 : vector<16x4xf32>
    %406 = arith.mulf %405, %405 : vector<16x4xf32>
    %cst_210 = arith.constant dense<0.000000e+00> : vector<16xf32>
    %407 = vector.multi_reduction <add>, %406, %cst_210 [1] : vector<16x4xf32> to vector<16xf32>
    %408 = vector.shape_cast %407 : vector<16xf32> to vector<16x1xf32>
    %cst_211 = arith.constant 4.000000e+00 : f32
    %409 = vector.broadcast %cst_211 : f32 to vector<16x1xf32>
    %410 = arith.divf %408, %409 : vector<16x1xf32>
    %411 = vector.broadcast %403 : vector<16x1xf32> to vector<16x4xf32>
    %412 = arith.subf %399, %411 : vector<16x4xf32>
    %cst_212 = arith.constant 9.99999974E-6 : f32
    %413 = vector.broadcast %cst_212 : f32 to vector<16x1xf32>
    %414 = arith.addf %410, %413 : vector<16x1xf32>
    %415 = math.rsqrt %414 : vector<16x1xf32>
    %416 = vector.broadcast %415 : vector<16x1xf32> to vector<16x4xf32>
    %417 = arith.mulf %412, %416 : vector<16x4xf32>
    %418 = vector.broadcast %11 : vector<1x4xf32> to vector<16x4xf32>
    %419 = arith.mulf %417, %418 : vector<16x4xf32>
    %420 = vector.broadcast %10 : vector<1x4xf32> to vector<16x4xf32>
    %421 = arith.addf %419, %420 : vector<16x4xf32>
    %422 = arith.negf %421 : vector<16x4xf32>
    %423 = math.exp %422 : vector<16x4xf32>
    %cst_213 = arith.constant 1.000000e+00 : f32
    %424 = vector.broadcast %cst_213 : f32 to vector<16x4xf32>
    %425 = arith.addf %424, %423 : vector<16x4xf32>
    %426 = arith.divf %424, %425 : vector<16x4xf32>
    %427 = arith.mulf %421, %426 : vector<16x4xf32>
    %cst_214 = arith.constant 1.66666663 : f32
    %428 = vector.broadcast %cst_214 : f32 to vector<16x4xf32>
    %429 = arith.mulf %427, %428 : vector<16x4xf32>
    %430 = vector.extract_strided_slice %9 {offsets = [1, 0], sizes = [1, 4], strides = [1, 1]} : vector<2x4xf32> to vector<1x4xf32>
    %431 = vector.broadcast %430 : vector<1x4xf32> to vector<16x4xf32>
    %432 = arith.mulf %429, %431 : vector<16x4xf32>
    %cst_215 = arith.constant dense<0.000000e+00> : vector<16xf32>
    %433 = vector.multi_reduction <add>, %432, %cst_215 [1] : vector<16x4xf32> to vector<16xf32>
    %434 = vector.shape_cast %433 : vector<16xf32> to vector<16x1xf32>
    %435 = arith.maximumf %398, %434 : vector<16x1xf32>
    %cst_216 = arith.constant dense<0xFF800000> : vector<1xf32>
    %436 = vector.multi_reduction <maximumf>, %435, %cst_216 [0] : vector<16x1xf32> to vector<1xf32>
    %437 = vector.shape_cast %436 : vector<1xf32> to vector<1x1xf32>
    %438 = vector.broadcast %437 : vector<1x1xf32> to vector<16x1xf32>
    %439 = arith.subf %398, %438 : vector<16x1xf32>
    %440 = math.exp %439 : vector<16x1xf32>
    %cst_217 = arith.constant dense<0.000000e+00> : vector<8x1xf32>
    %441 = tpu.matmul %5, %440, %cst_217 {dimension_numbers = #tpu.dot_dimension_numbers<[1], [0], [0], [1], [0, 0, 1, 1], [], []>} : vector<8x16xf32>, vector<16x1xf32>, vector<8x1xf32> -> vector<8x1xf32>
    %cst_218 = arith.constant dense<0.000000e+00> : vector<16x1xf32>
    %442 = tpu.matmul %4, %441, %cst_218 {dimension_numbers = #tpu.dot_dimension_numbers<[1], [0], [0], [1], [0, 0, 1, 1], [], []>} : vector<16x8xf32>, vector<8x1xf32>, vector<16x1xf32> -> vector<16x1xf32>
    %cst_219 = arith.constant 9.99999971E-10 : f32
    %443 = vector.broadcast %cst_219 : f32 to vector<16x1xf32>
    %444 = arith.addf %442, %443 : vector<16x1xf32>
    %445 = arith.divf %440, %444 : vector<16x1xf32>
    %446 = vector.broadcast %437 : vector<1x1xf32> to vector<16x1xf32>
    %447 = arith.subf %434, %446 : vector<16x1xf32>
    %448 = math.exp %447 : vector<16x1xf32>
    %cst_220 = arith.constant dense<0.000000e+00> : vector<8x1xf32>
    %449 = tpu.matmul %5, %448, %cst_220 {dimension_numbers = #tpu.dot_dimension_numbers<[1], [0], [0], [1], [0, 0, 1, 1], [], []>} : vector<8x16xf32>, vector<16x1xf32>, vector<8x1xf32> -> vector<8x1xf32>
    %cst_221 = arith.constant dense<0.000000e+00> : vector<16x1xf32>
    %450 = tpu.matmul %4, %449, %cst_221 {dimension_numbers = #tpu.dot_dimension_numbers<[1], [0], [0], [1], [0, 0, 1, 1], [], []>} : vector<16x8xf32>, vector<8x1xf32>, vector<16x1xf32> -> vector<16x1xf32>
    %cst_222 = arith.constant 9.99999971E-10 : f32
    %451 = vector.broadcast %cst_222 : f32 to vector<16x1xf32>
    %452 = arith.addf %450, %451 : vector<16x1xf32>
    %453 = arith.divf %448, %452 : vector<16x1xf32>
    %454 = vector.extract_strided_slice %362 {offsets = [0, 0], sizes = [16, 4], strides = [1, 1]} : vector<16x32xf32> to vector<16x4xf32>
    %455 = vector.broadcast %445 : vector<16x1xf32> to vector<16x4xf32>
    %456 = arith.mulf %454, %455 : vector<16x4xf32>
    %457 = vector.extract_strided_slice %362 {offsets = [0, 4], sizes = [16, 4], strides = [1, 1]} : vector<16x32xf32> to vector<16x4xf32>
    %458 = vector.broadcast %453 : vector<16x1xf32> to vector<16x4xf32>
    %459 = arith.mulf %457, %458 : vector<16x4xf32>
    %460 = vector.extract_strided_slice %362 {offsets = [0, 8], sizes = [16, 4], strides = [1, 1]} : vector<16x32xf32> to vector<16x4xf32>
    %461 = vector.broadcast %445 : vector<16x1xf32> to vector<16x4xf32>
    %462 = arith.mulf %460, %461 : vector<16x4xf32>
    %463 = vector.extract_strided_slice %362 {offsets = [0, 12], sizes = [16, 4], strides = [1, 1]} : vector<16x32xf32> to vector<16x4xf32>
    %464 = vector.broadcast %453 : vector<16x1xf32> to vector<16x4xf32>
    %465 = arith.mulf %463, %464 : vector<16x4xf32>
    %466 = vector.extract_strided_slice %362 {offsets = [0, 16], sizes = [16, 4], strides = [1, 1]} : vector<16x32xf32> to vector<16x4xf32>
    %467 = vector.broadcast %445 : vector<16x1xf32> to vector<16x4xf32>
    %468 = arith.mulf %466, %467 : vector<16x4xf32>
    %469 = vector.extract_strided_slice %362 {offsets = [0, 20], sizes = [16, 4], strides = [1, 1]} : vector<16x32xf32> to vector<16x4xf32>
    %470 = vector.broadcast %453 : vector<16x1xf32> to vector<16x4xf32>
    %471 = arith.mulf %469, %470 : vector<16x4xf32>
    %472 = vector.extract_strided_slice %362 {offsets = [0, 24], sizes = [16, 4], strides = [1, 1]} : vector<16x32xf32> to vector<16x4xf32>
    %473 = vector.broadcast %445 : vector<16x1xf32> to vector<16x4xf32>
    %474 = arith.mulf %472, %473 : vector<16x4xf32>
    %475 = vector.extract_strided_slice %362 {offsets = [0, 28], sizes = [16, 4], strides = [1, 1]} : vector<16x32xf32> to vector<16x4xf32>
    %476 = vector.broadcast %453 : vector<16x1xf32> to vector<16x4xf32>
    %477 = arith.mulf %475, %476 : vector<16x4xf32>
    %478 = tpu.concatenate %456, %459, %462, %465, %468, %471, %474, %477 in 1 : vector<16x4xf32>, vector<16x4xf32>, vector<16x4xf32>, vector<16x4xf32>, vector<16x4xf32>, vector<16x4xf32>, vector<16x4xf32>, vector<16x4xf32> -> vector<16x32xf32>
    %479 = vector.extract_strided_slice %478 {offsets = [0, 0], sizes = [16, 8], strides = [1, 1]} : vector<16x32xf32> to vector<16x8xf32>
    %480 = vector.extract_strided_slice %2 {offsets = [0, 0], sizes = [16, 1], strides = [1, 1]} : vector<16x9xf32> to vector<16x1xf32>
    %481 = vector.extract_strided_slice %478 {offsets = [0, 8], sizes = [16, 8], strides = [1, 1]} : vector<16x32xf32> to vector<16x8xf32>
    %482 = vector.broadcast %480 : vector<16x1xf32> to vector<16x8xf32>
    %483 = arith.mulf %482, %481 : vector<16x8xf32>
    %484 = vector.extract_strided_slice %2 {offsets = [0, 3], sizes = [16, 1], strides = [1, 1]} : vector<16x9xf32> to vector<16x1xf32>
    %485 = vector.extract_strided_slice %478 {offsets = [0, 16], sizes = [16, 8], strides = [1, 1]} : vector<16x32xf32> to vector<16x8xf32>
    %486 = vector.broadcast %484 : vector<16x1xf32> to vector<16x8xf32>
    %487 = arith.mulf %486, %485 : vector<16x8xf32>
    %488 = arith.addf %483, %487 : vector<16x8xf32>
    %489 = vector.extract_strided_slice %2 {offsets = [0, 6], sizes = [16, 1], strides = [1, 1]} : vector<16x9xf32> to vector<16x1xf32>
    %490 = vector.extract_strided_slice %478 {offsets = [0, 24], sizes = [16, 8], strides = [1, 1]} : vector<16x32xf32> to vector<16x8xf32>
    %491 = vector.broadcast %489 : vector<16x1xf32> to vector<16x8xf32>
    %492 = arith.mulf %491, %490 : vector<16x8xf32>
    %493 = arith.addf %488, %492 : vector<16x8xf32>
    %494 = vector.extract_strided_slice %2 {offsets = [0, 1], sizes = [16, 1], strides = [1, 1]} : vector<16x9xf32> to vector<16x1xf32>
    %495 = vector.extract_strided_slice %478 {offsets = [0, 8], sizes = [16, 8], strides = [1, 1]} : vector<16x32xf32> to vector<16x8xf32>
    %496 = vector.broadcast %494 : vector<16x1xf32> to vector<16x8xf32>
    %497 = arith.mulf %496, %495 : vector<16x8xf32>
    %498 = vector.extract_strided_slice %2 {offsets = [0, 4], sizes = [16, 1], strides = [1, 1]} : vector<16x9xf32> to vector<16x1xf32>
    %499 = vector.extract_strided_slice %478 {offsets = [0, 16], sizes = [16, 8], strides = [1, 1]} : vector<16x32xf32> to vector<16x8xf32>
    %500 = vector.broadcast %498 : vector<16x1xf32> to vector<16x8xf32>
    %501 = arith.mulf %500, %499 : vector<16x8xf32>
    %502 = arith.addf %497, %501 : vector<16x8xf32>
    %503 = vector.extract_strided_slice %2 {offsets = [0, 7], sizes = [16, 1], strides = [1, 1]} : vector<16x9xf32> to vector<16x1xf32>
    %504 = vector.extract_strided_slice %478 {offsets = [0, 24], sizes = [16, 8], strides = [1, 1]} : vector<16x32xf32> to vector<16x8xf32>
    %505 = vector.broadcast %503 : vector<16x1xf32> to vector<16x8xf32>
    %506 = arith.mulf %505, %504 : vector<16x8xf32>
    %507 = arith.addf %502, %506 : vector<16x8xf32>
    %508 = vector.extract_strided_slice %2 {offsets = [0, 2], sizes = [16, 1], strides = [1, 1]} : vector<16x9xf32> to vector<16x1xf32>
    %509 = vector.extract_strided_slice %478 {offsets = [0, 8], sizes = [16, 8], strides = [1, 1]} : vector<16x32xf32> to vector<16x8xf32>
    %510 = vector.broadcast %508 : vector<16x1xf32> to vector<16x8xf32>
    %511 = arith.mulf %510, %509 : vector<16x8xf32>
    %512 = vector.extract_strided_slice %2 {offsets = [0, 5], sizes = [16, 1], strides = [1, 1]} : vector<16x9xf32> to vector<16x1xf32>
    %513 = vector.extract_strided_slice %478 {offsets = [0, 16], sizes = [16, 8], strides = [1, 1]} : vector<16x32xf32> to vector<16x8xf32>
    %514 = vector.broadcast %512 : vector<16x1xf32> to vector<16x8xf32>
    %515 = arith.mulf %514, %513 : vector<16x8xf32>
    %516 = arith.addf %511, %515 : vector<16x8xf32>
    %517 = vector.extract_strided_slice %2 {offsets = [0, 8], sizes = [16, 1], strides = [1, 1]} : vector<16x9xf32> to vector<16x1xf32>
    %518 = vector.extract_strided_slice %478 {offsets = [0, 24], sizes = [16, 8], strides = [1, 1]} : vector<16x32xf32> to vector<16x8xf32>
    %519 = vector.broadcast %517 : vector<16x1xf32> to vector<16x8xf32>
    %520 = arith.mulf %519, %518 : vector<16x8xf32>
    %521 = arith.addf %516, %520 : vector<16x8xf32>
    %522 = tpu.concatenate %479, %493, %507, %521 in 1 : vector<16x8xf32>, vector<16x8xf32>, vector<16x8xf32>, vector<16x8xf32> -> vector<16x32xf32>
    %cst_223 = arith.constant dense<0.000000e+00> : vector<8x32xf32>
    %523 = tpu.matmul %5, %522, %cst_223 {dimension_numbers = #tpu.dot_dimension_numbers<[1], [0], [0], [1], [0, 0, 1, 1], [], []>} : vector<8x16xf32>, vector<16x32xf32>, vector<8x32xf32> -> vector<8x32xf32>
    %524 = vector.extract_strided_slice %523 {offsets = [0, 0], sizes = [8, 8], strides = [1, 1]} : vector<8x32xf32> to vector<8x8xf32>
    %cst_224 = arith.constant dense<0.000000e+00> : vector<8x16xf32>
    %525 = tpu.matmul %524, %21, %cst_224 {dimension_numbers = #tpu.dot_dimension_numbers<[1], [0], [0], [1], [0, 0, 1, 1], [], []>} : vector<8x8xf32>, vector<8x16xf32>, vector<8x16xf32> -> vector<8x16xf32>
    %526 = vector.broadcast %20 : vector<1x16xf32> to vector<8x16xf32>
    %527 = arith.addf %525, %526 : vector<8x16xf32>
    %528 = vector.extract_strided_slice %523 {offsets = [0, 8], sizes = [8, 8], strides = [1, 1]} : vector<8x32xf32> to vector<8x8xf32>
    %cst_225 = arith.constant dense<0.000000e+00> : vector<8x16xf32>
    %529 = tpu.matmul %528, %22, %cst_225 {dimension_numbers = #tpu.dot_dimension_numbers<[1], [0], [0], [1], [0, 0, 1, 1], [], []>} : vector<8x8xf32>, vector<8x16xf32>, vector<8x16xf32> -> vector<8x16xf32>
    %530 = vector.extract_strided_slice %523 {offsets = [0, 16], sizes = [8, 8], strides = [1, 1]} : vector<8x32xf32> to vector<8x8xf32>
    %cst_226 = arith.constant dense<0.000000e+00> : vector<8x16xf32>
    %531 = tpu.matmul %530, %22, %cst_226 {dimension_numbers = #tpu.dot_dimension_numbers<[1], [0], [0], [1], [0, 0, 1, 1], [], []>} : vector<8x8xf32>, vector<8x16xf32>, vector<8x16xf32> -> vector<8x16xf32>
    %532 = vector.extract_strided_slice %523 {offsets = [0, 24], sizes = [8, 8], strides = [1, 1]} : vector<8x32xf32> to vector<8x8xf32>
    %cst_227 = arith.constant dense<0.000000e+00> : vector<8x16xf32>
    %533 = tpu.matmul %532, %22, %cst_227 {dimension_numbers = #tpu.dot_dimension_numbers<[1], [0], [0], [1], [0, 0, 1, 1], [], []>} : vector<8x8xf32>, vector<8x16xf32>, vector<8x16xf32> -> vector<8x16xf32>
    %534 = tpu.concatenate %527, %529, %531, %533 in 1 : vector<8x16xf32>, vector<8x16xf32>, vector<8x16xf32>, vector<8x16xf32> -> vector<8x64xf32>
    %535 = arith.addf %170, %534 : vector<8x64xf32>
    %536 = vector.extract_strided_slice %535 {offsets = [0, 0], sizes = [8, 16], strides = [1, 1]} : vector<8x64xf32> to vector<8x16xf32>
    %537 = arith.mulf %536, %536 : vector<8x16xf32>
    %cst_228 = arith.constant dense<0.000000e+00> : vector<8xf32>
    %538 = vector.multi_reduction <add>, %537, %cst_228 [1] : vector<8x16xf32> to vector<8xf32>
    %539 = vector.shape_cast %538 : vector<8xf32> to vector<8x1xf32>
    %cst_229 = arith.constant 1.600000e+01 : f32
    %540 = vector.broadcast %cst_229 : f32 to vector<8x1xf32>
    %541 = arith.divf %539, %540 : vector<8x1xf32>
    %cst_230 = arith.constant 5.000000e-01 : f32
    %542 = vector.broadcast %cst_230 : f32 to vector<8x1xf32>
    %543 = arith.mulf %541, %542 : vector<8x1xf32>
    %544 = vector.extract_strided_slice %535 {offsets = [0, 16], sizes = [8, 16], strides = [1, 1]} : vector<8x64xf32> to vector<8x16xf32>
    %545 = arith.mulf %544, %544 : vector<8x16xf32>
    %cst_231 = arith.constant dense<0.000000e+00> : vector<8xf32>
    %546 = vector.multi_reduction <add>, %545, %cst_231 [1] : vector<8x16xf32> to vector<8xf32>
    %547 = vector.shape_cast %546 : vector<8xf32> to vector<8x1xf32>
    %cst_232 = arith.constant 1.600000e+01 : f32
    %548 = vector.broadcast %cst_232 : f32 to vector<8x1xf32>
    %549 = arith.divf %547, %548 : vector<8x1xf32>
    %cst_233 = arith.constant 0.166666672 : f32
    %550 = vector.broadcast %cst_233 : f32 to vector<8x1xf32>
    %551 = arith.mulf %549, %550 : vector<8x1xf32>
    %552 = arith.addf %543, %551 : vector<8x1xf32>
    %553 = vector.extract_strided_slice %535 {offsets = [0, 32], sizes = [8, 16], strides = [1, 1]} : vector<8x64xf32> to vector<8x16xf32>
    %554 = arith.mulf %553, %553 : vector<8x16xf32>
    %cst_234 = arith.constant dense<0.000000e+00> : vector<8xf32>
    %555 = vector.multi_reduction <add>, %554, %cst_234 [1] : vector<8x16xf32> to vector<8xf32>
    %556 = vector.shape_cast %555 : vector<8xf32> to vector<8x1xf32>
    %cst_235 = arith.constant 1.600000e+01 : f32
    %557 = vector.broadcast %cst_235 : f32 to vector<8x1xf32>
    %558 = arith.divf %556, %557 : vector<8x1xf32>
    %cst_236 = arith.constant 0.166666672 : f32
    %559 = vector.broadcast %cst_236 : f32 to vector<8x1xf32>
    %560 = arith.mulf %558, %559 : vector<8x1xf32>
    %561 = arith.addf %552, %560 : vector<8x1xf32>
    %562 = vector.extract_strided_slice %535 {offsets = [0, 48], sizes = [8, 16], strides = [1, 1]} : vector<8x64xf32> to vector<8x16xf32>
    %563 = arith.mulf %562, %562 : vector<8x16xf32>
    %cst_237 = arith.constant dense<0.000000e+00> : vector<8xf32>
    %564 = vector.multi_reduction <add>, %563, %cst_237 [1] : vector<8x16xf32> to vector<8xf32>
    %565 = vector.shape_cast %564 : vector<8xf32> to vector<8x1xf32>
    %cst_238 = arith.constant 1.600000e+01 : f32
    %566 = vector.broadcast %cst_238 : f32 to vector<8x1xf32>
    %567 = arith.divf %565, %566 : vector<8x1xf32>
    %cst_239 = arith.constant 0.166666672 : f32
    %568 = vector.broadcast %cst_239 : f32 to vector<8x1xf32>
    %569 = arith.mulf %567, %568 : vector<8x1xf32>
    %570 = arith.addf %561, %569 : vector<8x1xf32>
    %cst_240 = arith.constant 9.99999996E-13 : f32
    %571 = vector.broadcast %cst_240 : f32 to vector<8x1xf32>
    %572 = arith.addf %570, %571 : vector<8x1xf32>
    %573 = math.rsqrt %572 : vector<8x1xf32>
    %574 = vector.broadcast %573 : vector<8x1xf32> to vector<8x64xf32>
    %575 = arith.mulf %535, %574 : vector<8x64xf32>
    %576 = vector.broadcast %36 : vector<1x64xf32> to vector<8x64xf32>
    %577 = arith.mulf %575, %576 : vector<8x64xf32>
    %578 = vector.extract_strided_slice %577 {offsets = [0, 0], sizes = [8, 16], strides = [1, 1]} : vector<8x64xf32> to vector<8x16xf32>
    %cst_241 = arith.constant dense<0.000000e+00> : vector<8x32xf32>
    %579 = tpu.matmul %578, %30, %cst_241 {dimension_numbers = #tpu.dot_dimension_numbers<[1], [0], [0], [1], [0, 0, 1, 1], [], []>} : vector<8x16xf32>, vector<16x32xf32>, vector<8x32xf32> -> vector<8x32xf32>
    %580 = vector.broadcast %29 : vector<1x32xf32> to vector<8x32xf32>
    %581 = arith.addf %579, %580 : vector<8x32xf32>
    %582 = vector.extract_strided_slice %577 {offsets = [0, 16], sizes = [8, 16], strides = [1, 1]} : vector<8x64xf32> to vector<8x16xf32>
    %cst_242 = arith.constant dense<0.000000e+00> : vector<8x32xf32>
    %583 = tpu.matmul %582, %31, %cst_242 {dimension_numbers = #tpu.dot_dimension_numbers<[1], [0], [0], [1], [0, 0, 1, 1], [], []>} : vector<8x16xf32>, vector<16x32xf32>, vector<8x32xf32> -> vector<8x32xf32>
    %584 = vector.extract_strided_slice %577 {offsets = [0, 32], sizes = [8, 16], strides = [1, 1]} : vector<8x64xf32> to vector<8x16xf32>
    %cst_243 = arith.constant dense<0.000000e+00> : vector<8x32xf32>
    %585 = tpu.matmul %584, %31, %cst_243 {dimension_numbers = #tpu.dot_dimension_numbers<[1], [0], [0], [1], [0, 0, 1, 1], [], []>} : vector<8x16xf32>, vector<16x32xf32>, vector<8x32xf32> -> vector<8x32xf32>
    %586 = vector.extract_strided_slice %577 {offsets = [0, 48], sizes = [8, 16], strides = [1, 1]} : vector<8x64xf32> to vector<8x16xf32>
    %cst_244 = arith.constant dense<0.000000e+00> : vector<8x32xf32>
    %587 = tpu.matmul %586, %31, %cst_244 {dimension_numbers = #tpu.dot_dimension_numbers<[1], [0], [0], [1], [0, 0, 1, 1], [], []>} : vector<8x16xf32>, vector<16x32xf32>, vector<8x32xf32> -> vector<8x32xf32>
    %588 = tpu.concatenate %581, %583, %585, %587 in 1 : vector<8x32xf32>, vector<8x32xf32>, vector<8x32xf32>, vector<8x32xf32> -> vector<8x128xf32>
    %589 = vector.extract_strided_slice %588 {offsets = [0, 0], sizes = [8, 32], strides = [1, 1]} : vector<8x128xf32> to vector<8x32xf32>
    %590 = arith.negf %589 : vector<8x32xf32>
    %591 = math.exp %590 : vector<8x32xf32>
    %cst_245 = arith.constant 1.000000e+00 : f32
    %592 = vector.broadcast %cst_245 : f32 to vector<8x32xf32>
    %593 = arith.addf %592, %591 : vector<8x32xf32>
    %594 = arith.divf %592, %593 : vector<8x32xf32>
    %595 = arith.mulf %589, %594 : vector<8x32xf32>
    %596 = vector.extract_strided_slice %588 {offsets = [0, 32], sizes = [8, 32], strides = [1, 1]} : vector<8x128xf32> to vector<8x32xf32>
    %597 = arith.mulf %596, %594 : vector<8x32xf32>
    %598 = vector.extract_strided_slice %588 {offsets = [0, 64], sizes = [8, 32], strides = [1, 1]} : vector<8x128xf32> to vector<8x32xf32>
    %599 = arith.mulf %598, %594 : vector<8x32xf32>
    %600 = vector.extract_strided_slice %588 {offsets = [0, 96], sizes = [8, 32], strides = [1, 1]} : vector<8x128xf32> to vector<8x32xf32>
    %601 = arith.mulf %600, %594 : vector<8x32xf32>
    %602 = tpu.concatenate %595, %597, %599, %601 in 1 : vector<8x32xf32>, vector<8x32xf32>, vector<8x32xf32>, vector<8x32xf32> -> vector<8x128xf32>
    %603 = vector.extract_strided_slice %602 {offsets = [0, 0], sizes = [8, 32], strides = [1, 1]} : vector<8x128xf32> to vector<8x32xf32>
    %cst_246 = arith.constant dense<0.000000e+00> : vector<8x16xf32>
    %604 = tpu.matmul %603, %33, %cst_246 {dimension_numbers = #tpu.dot_dimension_numbers<[1], [0], [0], [1], [0, 0, 1, 1], [], []>} : vector<8x32xf32>, vector<32x16xf32>, vector<8x16xf32> -> vector<8x16xf32>
    %605 = vector.broadcast %32 : vector<1x16xf32> to vector<8x16xf32>
    %606 = arith.addf %604, %605 : vector<8x16xf32>
    %607 = vector.extract_strided_slice %602 {offsets = [0, 32], sizes = [8, 32], strides = [1, 1]} : vector<8x128xf32> to vector<8x32xf32>
    %cst_247 = arith.constant dense<0.000000e+00> : vector<8x16xf32>
    %608 = tpu.matmul %607, %34, %cst_247 {dimension_numbers = #tpu.dot_dimension_numbers<[1], [0], [0], [1], [0, 0, 1, 1], [], []>} : vector<8x32xf32>, vector<32x16xf32>, vector<8x16xf32> -> vector<8x16xf32>
    %609 = vector.extract_strided_slice %602 {offsets = [0, 64], sizes = [8, 32], strides = [1, 1]} : vector<8x128xf32> to vector<8x32xf32>
    %cst_248 = arith.constant dense<0.000000e+00> : vector<8x16xf32>
    %610 = tpu.matmul %609, %34, %cst_248 {dimension_numbers = #tpu.dot_dimension_numbers<[1], [0], [0], [1], [0, 0, 1, 1], [], []>} : vector<8x32xf32>, vector<32x16xf32>, vector<8x16xf32> -> vector<8x16xf32>
    %611 = vector.extract_strided_slice %602 {offsets = [0, 96], sizes = [8, 32], strides = [1, 1]} : vector<8x128xf32> to vector<8x32xf32>
    %cst_249 = arith.constant dense<0.000000e+00> : vector<8x16xf32>
    %612 = tpu.matmul %611, %34, %cst_249 {dimension_numbers = #tpu.dot_dimension_numbers<[1], [0], [0], [1], [0, 0, 1, 1], [], []>} : vector<8x32xf32>, vector<32x16xf32>, vector<8x16xf32> -> vector<8x16xf32>
    %613 = tpu.concatenate %606, %608, %610, %612 in 1 : vector<8x16xf32>, vector<8x16xf32>, vector<8x16xf32>, vector<8x16xf32> -> vector<8x64xf32>
    %614 = arith.addf %535, %613 : vector<8x64xf32>
    %615 = tpu.concatenate %86, %8 in 1 : vector<16x32xf32>, vector<16x32xf32> -> vector<16x64xf32>
    %616 = vector.extract_strided_slice %614 {offsets = [0, 0], sizes = [8, 16], strides = [1, 1]} : vector<8x64xf32> to vector<8x16xf32>
    %617 = arith.mulf %616, %616 : vector<8x16xf32>
    %cst_250 = arith.constant dense<0.000000e+00> : vector<8xf32>
    %618 = vector.multi_reduction <add>, %617, %cst_250 [1] : vector<8x16xf32> to vector<8xf32>
    %619 = vector.shape_cast %618 : vector<8xf32> to vector<8x1xf32>
    %cst_251 = arith.constant 1.600000e+01 : f32
    %620 = vector.broadcast %cst_251 : f32 to vector<8x1xf32>
    %621 = arith.divf %619, %620 : vector<8x1xf32>
    %cst_252 = arith.constant 5.000000e-01 : f32
    %622 = vector.broadcast %cst_252 : f32 to vector<8x1xf32>
    %623 = arith.mulf %621, %622 : vector<8x1xf32>
    %624 = vector.extract_strided_slice %614 {offsets = [0, 16], sizes = [8, 16], strides = [1, 1]} : vector<8x64xf32> to vector<8x16xf32>
    %625 = arith.mulf %624, %624 : vector<8x16xf32>
    %cst_253 = arith.constant dense<0.000000e+00> : vector<8xf32>
    %626 = vector.multi_reduction <add>, %625, %cst_253 [1] : vector<8x16xf32> to vector<8xf32>
    %627 = vector.shape_cast %626 : vector<8xf32> to vector<8x1xf32>
    %cst_254 = arith.constant 1.600000e+01 : f32
    %628 = vector.broadcast %cst_254 : f32 to vector<8x1xf32>
    %629 = arith.divf %627, %628 : vector<8x1xf32>
    %cst_255 = arith.constant 0.166666672 : f32
    %630 = vector.broadcast %cst_255 : f32 to vector<8x1xf32>
    %631 = arith.mulf %629, %630 : vector<8x1xf32>
    %632 = arith.addf %623, %631 : vector<8x1xf32>
    %633 = vector.extract_strided_slice %614 {offsets = [0, 32], sizes = [8, 16], strides = [1, 1]} : vector<8x64xf32> to vector<8x16xf32>
    %634 = arith.mulf %633, %633 : vector<8x16xf32>
    %cst_256 = arith.constant dense<0.000000e+00> : vector<8xf32>
    %635 = vector.multi_reduction <add>, %634, %cst_256 [1] : vector<8x16xf32> to vector<8xf32>
    %636 = vector.shape_cast %635 : vector<8xf32> to vector<8x1xf32>
    %cst_257 = arith.constant 1.600000e+01 : f32
    %637 = vector.broadcast %cst_257 : f32 to vector<8x1xf32>
    %638 = arith.divf %636, %637 : vector<8x1xf32>
    %cst_258 = arith.constant 0.166666672 : f32
    %639 = vector.broadcast %cst_258 : f32 to vector<8x1xf32>
    %640 = arith.mulf %638, %639 : vector<8x1xf32>
    %641 = arith.addf %632, %640 : vector<8x1xf32>
    %642 = vector.extract_strided_slice %614 {offsets = [0, 48], sizes = [8, 16], strides = [1, 1]} : vector<8x64xf32> to vector<8x16xf32>
    %643 = arith.mulf %642, %642 : vector<8x16xf32>
    %cst_259 = arith.constant dense<0.000000e+00> : vector<8xf32>
    %644 = vector.multi_reduction <add>, %643, %cst_259 [1] : vector<8x16xf32> to vector<8xf32>
    %645 = vector.shape_cast %644 : vector<8xf32> to vector<8x1xf32>
    %cst_260 = arith.constant 1.600000e+01 : f32
    %646 = vector.broadcast %cst_260 : f32 to vector<8x1xf32>
    %647 = arith.divf %645, %646 : vector<8x1xf32>
    %cst_261 = arith.constant 0.166666672 : f32
    %648 = vector.broadcast %cst_261 : f32 to vector<8x1xf32>
    %649 = arith.mulf %647, %648 : vector<8x1xf32>
    %650 = arith.addf %641, %649 : vector<8x1xf32>
    %cst_262 = arith.constant 9.99999996E-13 : f32
    %651 = vector.broadcast %cst_262 : f32 to vector<8x1xf32>
    %652 = arith.addf %650, %651 : vector<8x1xf32>
    %653 = math.rsqrt %652 : vector<8x1xf32>
    %654 = vector.broadcast %653 : vector<8x1xf32> to vector<8x64xf32>
    %655 = arith.mulf %614, %654 : vector<8x64xf32>
    %656 = vector.broadcast %63 : vector<1x64xf32> to vector<8x64xf32>
    %657 = arith.mulf %655, %656 : vector<8x64xf32>
    %cst_263 = arith.constant dense<0.000000e+00> : vector<16x64xf32>
    %658 = tpu.matmul %3, %657, %cst_263 {dimension_numbers = #tpu.dot_dimension_numbers<[1], [0], [0], [1], [0, 0, 1, 1], [], []>} : vector<16x8xf32>, vector<8x64xf32>, vector<16x64xf32> -> vector<16x64xf32>
    %cst_264 = arith.constant dense<0.000000e+00> : vector<16x64xf32>
    %659 = tpu.matmul %4, %657, %cst_264 {dimension_numbers = #tpu.dot_dimension_numbers<[1], [0], [0], [1], [0, 0, 1, 1], [], []>} : vector<16x8xf32>, vector<8x64xf32>, vector<16x64xf32> -> vector<16x64xf32>
    %660 = vector.extract_strided_slice %658 {offsets = [0, 0], sizes = [16, 16], strides = [1, 1]} : vector<16x64xf32> to vector<16x16xf32>
    %661 = vector.extract_strided_slice %659 {offsets = [0, 0], sizes = [16, 16], strides = [1, 1]} : vector<16x64xf32> to vector<16x16xf32>
    %662 = tpu.concatenate %660, %661 in 1 : vector<16x16xf32>, vector<16x16xf32> -> vector<16x32xf32>
    %663 = vector.extract_strided_slice %658 {offsets = [0, 16], sizes = [16, 16], strides = [1, 1]} : vector<16x64xf32> to vector<16x16xf32>
    %664 = vector.extract_strided_slice %659 {offsets = [0, 16], sizes = [16, 16], strides = [1, 1]} : vector<16x64xf32> to vector<16x16xf32>
    %665 = tpu.concatenate %663, %664 in 1 : vector<16x16xf32>, vector<16x16xf32> -> vector<16x32xf32>
    %666 = vector.extract_strided_slice %658 {offsets = [0, 32], sizes = [16, 16], strides = [1, 1]} : vector<16x64xf32> to vector<16x16xf32>
    %667 = vector.extract_strided_slice %659 {offsets = [0, 32], sizes = [16, 16], strides = [1, 1]} : vector<16x64xf32> to vector<16x16xf32>
    %668 = tpu.concatenate %666, %667 in 1 : vector<16x16xf32>, vector<16x16xf32> -> vector<16x32xf32>
    %669 = vector.extract_strided_slice %658 {offsets = [0, 48], sizes = [16, 16], strides = [1, 1]} : vector<16x64xf32> to vector<16x16xf32>
    %670 = vector.extract_strided_slice %659 {offsets = [0, 48], sizes = [16, 16], strides = [1, 1]} : vector<16x64xf32> to vector<16x16xf32>
    %671 = tpu.concatenate %669, %670 in 1 : vector<16x16xf32>, vector<16x16xf32> -> vector<16x32xf32>
    %672 = tpu.concatenate %662, %665, %668, %671 in 1 : vector<16x32xf32>, vector<16x32xf32>, vector<16x32xf32>, vector<16x32xf32> -> vector<16x128xf32>
    %673 = vector.extract_strided_slice %672 {offsets = [0, 0], sizes = [16, 32], strides = [1, 1]} : vector<16x128xf32> to vector<16x32xf32>
    %674 = vector.extract_strided_slice %2 {offsets = [0, 0], sizes = [16, 1], strides = [1, 1]} : vector<16x9xf32> to vector<16x1xf32>
    %675 = vector.extract_strided_slice %672 {offsets = [0, 32], sizes = [16, 32], strides = [1, 1]} : vector<16x128xf32> to vector<16x32xf32>
    %676 = vector.broadcast %674 : vector<16x1xf32> to vector<16x32xf32>
    %677 = arith.mulf %676, %675 : vector<16x32xf32>
    %678 = vector.extract_strided_slice %2 {offsets = [0, 1], sizes = [16, 1], strides = [1, 1]} : vector<16x9xf32> to vector<16x1xf32>
    %679 = vector.extract_strided_slice %672 {offsets = [0, 64], sizes = [16, 32], strides = [1, 1]} : vector<16x128xf32> to vector<16x32xf32>
    %680 = vector.broadcast %678 : vector<16x1xf32> to vector<16x32xf32>
    %681 = arith.mulf %680, %679 : vector<16x32xf32>
    %682 = arith.addf %677, %681 : vector<16x32xf32>
    %683 = vector.extract_strided_slice %2 {offsets = [0, 2], sizes = [16, 1], strides = [1, 1]} : vector<16x9xf32> to vector<16x1xf32>
    %684 = vector.extract_strided_slice %672 {offsets = [0, 96], sizes = [16, 32], strides = [1, 1]} : vector<16x128xf32> to vector<16x32xf32>
    %685 = vector.broadcast %683 : vector<16x1xf32> to vector<16x32xf32>
    %686 = arith.mulf %685, %684 : vector<16x32xf32>
    %687 = arith.addf %682, %686 : vector<16x32xf32>
    %688 = vector.extract_strided_slice %2 {offsets = [0, 3], sizes = [16, 1], strides = [1, 1]} : vector<16x9xf32> to vector<16x1xf32>
    %689 = vector.extract_strided_slice %672 {offsets = [0, 32], sizes = [16, 32], strides = [1, 1]} : vector<16x128xf32> to vector<16x32xf32>
    %690 = vector.broadcast %688 : vector<16x1xf32> to vector<16x32xf32>
    %691 = arith.mulf %690, %689 : vector<16x32xf32>
    %692 = vector.extract_strided_slice %2 {offsets = [0, 4], sizes = [16, 1], strides = [1, 1]} : vector<16x9xf32> to vector<16x1xf32>
    %693 = vector.extract_strided_slice %672 {offsets = [0, 64], sizes = [16, 32], strides = [1, 1]} : vector<16x128xf32> to vector<16x32xf32>
    %694 = vector.broadcast %692 : vector<16x1xf32> to vector<16x32xf32>
    %695 = arith.mulf %694, %693 : vector<16x32xf32>
    %696 = arith.addf %691, %695 : vector<16x32xf32>
    %697 = vector.extract_strided_slice %2 {offsets = [0, 5], sizes = [16, 1], strides = [1, 1]} : vector<16x9xf32> to vector<16x1xf32>
    %698 = vector.extract_strided_slice %672 {offsets = [0, 96], sizes = [16, 32], strides = [1, 1]} : vector<16x128xf32> to vector<16x32xf32>
    %699 = vector.broadcast %697 : vector<16x1xf32> to vector<16x32xf32>
    %700 = arith.mulf %699, %698 : vector<16x32xf32>
    %701 = arith.addf %696, %700 : vector<16x32xf32>
    %702 = vector.extract_strided_slice %2 {offsets = [0, 6], sizes = [16, 1], strides = [1, 1]} : vector<16x9xf32> to vector<16x1xf32>
    %703 = vector.extract_strided_slice %672 {offsets = [0, 32], sizes = [16, 32], strides = [1, 1]} : vector<16x128xf32> to vector<16x32xf32>
    %704 = vector.broadcast %702 : vector<16x1xf32> to vector<16x32xf32>
    %705 = arith.mulf %704, %703 : vector<16x32xf32>
    %706 = vector.extract_strided_slice %2 {offsets = [0, 7], sizes = [16, 1], strides = [1, 1]} : vector<16x9xf32> to vector<16x1xf32>
    %707 = vector.extract_strided_slice %672 {offsets = [0, 64], sizes = [16, 32], strides = [1, 1]} : vector<16x128xf32> to vector<16x32xf32>
    %708 = vector.broadcast %706 : vector<16x1xf32> to vector<16x32xf32>
    %709 = arith.mulf %708, %707 : vector<16x32xf32>
    %710 = arith.addf %705, %709 : vector<16x32xf32>
    %711 = vector.extract_strided_slice %2 {offsets = [0, 8], sizes = [16, 1], strides = [1, 1]} : vector<16x9xf32> to vector<16x1xf32>
    %712 = vector.extract_strided_slice %672 {offsets = [0, 96], sizes = [16, 32], strides = [1, 1]} : vector<16x128xf32> to vector<16x32xf32>
    %713 = vector.broadcast %711 : vector<16x1xf32> to vector<16x32xf32>
    %714 = arith.mulf %713, %712 : vector<16x32xf32>
    %715 = arith.addf %710, %714 : vector<16x32xf32>
    %716 = tpu.concatenate %673, %687, %701, %715 in 1 : vector<16x32xf32>, vector<16x32xf32>, vector<16x32xf32>, vector<16x32xf32> -> vector<16x128xf32>
    %cst_265 = arith.constant dense<0.000000e+00> : vector<16x16xf32>
    %717 = tpu.matmul %615, %54, %cst_265 {dimension_numbers = #tpu.dot_dimension_numbers<[1], [0], [0], [1], [0, 0, 1, 1], [], []>} : vector<16x64xf32>, vector<64x16xf32>, vector<16x16xf32> -> vector<16x16xf32>
    %718 = vector.broadcast %51 : vector<1x16xf32> to vector<16x16xf32>
    %719 = arith.addf %717, %718 : vector<16x16xf32>
    %cst_266 = arith.constant dense<0.000000e+00> : vector<16xf32>
    %720 = vector.multi_reduction <add>, %719, %cst_266 [1] : vector<16x16xf32> to vector<16xf32>
    %721 = vector.shape_cast %720 : vector<16xf32> to vector<16x1xf32>
    %cst_267 = arith.constant 1.600000e+01 : f32
    %722 = vector.broadcast %cst_267 : f32 to vector<16x1xf32>
    %723 = arith.divf %721, %722 : vector<16x1xf32>
    %724 = vector.broadcast %723 : vector<16x1xf32> to vector<16x16xf32>
    %725 = arith.subf %719, %724 : vector<16x16xf32>
    %726 = arith.mulf %725, %725 : vector<16x16xf32>
    %cst_268 = arith.constant dense<0.000000e+00> : vector<16xf32>
    %727 = vector.multi_reduction <add>, %726, %cst_268 [1] : vector<16x16xf32> to vector<16xf32>
    %728 = vector.shape_cast %727 : vector<16xf32> to vector<16x1xf32>
    %cst_269 = arith.constant 1.600000e+01 : f32
    %729 = vector.broadcast %cst_269 : f32 to vector<16x1xf32>
    %730 = arith.divf %728, %729 : vector<16x1xf32>
    %731 = vector.broadcast %723 : vector<16x1xf32> to vector<16x16xf32>
    %732 = arith.subf %719, %731 : vector<16x16xf32>
    %cst_270 = arith.constant 9.99999974E-6 : f32
    %733 = vector.broadcast %cst_270 : f32 to vector<16x1xf32>
    %734 = arith.addf %730, %733 : vector<16x1xf32>
    %735 = math.rsqrt %734 : vector<16x1xf32>
    %736 = vector.broadcast %735 : vector<16x1xf32> to vector<16x16xf32>
    %737 = arith.mulf %732, %736 : vector<16x16xf32>
    %738 = vector.broadcast %53 : vector<1x16xf32> to vector<16x16xf32>
    %739 = arith.mulf %737, %738 : vector<16x16xf32>
    %740 = vector.broadcast %52 : vector<1x16xf32> to vector<16x16xf32>
    %741 = arith.addf %739, %740 : vector<16x16xf32>
    %742 = arith.negf %741 : vector<16x16xf32>
    %743 = math.exp %742 : vector<16x16xf32>
    %cst_271 = arith.constant 1.000000e+00 : f32
    %744 = vector.broadcast %cst_271 : f32 to vector<16x16xf32>
    %745 = arith.addf %744, %743 : vector<16x16xf32>
    %746 = arith.divf %744, %745 : vector<16x16xf32>
    %747 = arith.mulf %741, %746 : vector<16x16xf32>
    %cst_272 = arith.constant dense<0.000000e+00> : vector<16x16xf32>
    %748 = tpu.matmul %747, %56, %cst_272 {dimension_numbers = #tpu.dot_dimension_numbers<[1], [0], [0], [1], [0, 0, 1, 1], [], []>} : vector<16x16xf32>, vector<16x16xf32>, vector<16x16xf32> -> vector<16x16xf32>
    %749 = vector.broadcast %55 : vector<1x16xf32> to vector<16x16xf32>
    %750 = arith.addf %748, %749 : vector<16x16xf32>
    %751 = vector.extract_strided_slice %716 {offsets = [0, 0], sizes = [16, 32], strides = [1, 1]} : vector<16x128xf32> to vector<16x32xf32>
    %752 = vector.extract_strided_slice %716 {offsets = [0, 64], sizes = [16, 32], strides = [1, 1]} : vector<16x128xf32> to vector<16x32xf32>
    %753 = tpu.concatenate %751, %752 in 1 : vector<16x32xf32>, vector<16x32xf32> -> vector<16x64xf32>
    %cst_273 = arith.constant dense<0.000000e+00> : vector<16x40xf32>
    %754 = tpu.matmul %753, %41, %cst_273 {dimension_numbers = #tpu.dot_dimension_numbers<[1], [0], [0], [1], [0, 0, 1, 1], [], []>} : vector<16x64xf32>, vector<64x40xf32>, vector<16x40xf32> -> vector<16x40xf32>
    %755 = vector.broadcast %40 : vector<1x40xf32> to vector<16x40xf32>
    %756 = arith.addf %754, %755 : vector<16x40xf32>
    %757 = vector.extract_strided_slice %756 {offsets = [0, 0], sizes = [16, 16], strides = [1, 1]} : vector<16x40xf32> to vector<16x16xf32>
    %758 = vector.extract_strided_slice %756 {offsets = [0, 16], sizes = [16, 16], strides = [1, 1]} : vector<16x40xf32> to vector<16x16xf32>
    %759 = vector.extract_strided_slice %756 {offsets = [0, 32], sizes = [16, 8], strides = [1, 1]} : vector<16x40xf32> to vector<16x8xf32>
    %760 = vector.extract_strided_slice %716 {offsets = [0, 96], sizes = [16, 32], strides = [1, 1]} : vector<16x128xf32> to vector<16x32xf32>
    %761 = vector.extract_strided_slice %716 {offsets = [0, 32], sizes = [16, 32], strides = [1, 1]} : vector<16x128xf32> to vector<16x32xf32>
    %762 = tpu.concatenate %760, %761 in 1 : vector<16x32xf32>, vector<16x32xf32> -> vector<16x64xf32>
    %cst_274 = arith.constant dense<0.000000e+00> : vector<16x32xf32>
    %763 = tpu.matmul %762, %42, %cst_274 {dimension_numbers = #tpu.dot_dimension_numbers<[1], [0], [0], [1], [0, 0, 1, 1], [], []>} : vector<16x64xf32>, vector<64x32xf32>, vector<16x32xf32> -> vector<16x32xf32>
    %764 = vector.extract_strided_slice %763 {offsets = [0, 0], sizes = [16, 16], strides = [1, 1]} : vector<16x32xf32> to vector<16x16xf32>
    %765 = vector.extract_strided_slice %763 {offsets = [0, 16], sizes = [16, 16], strides = [1, 1]} : vector<16x32xf32> to vector<16x16xf32>
    %766 = tpu.concatenate %757, %765, %758, %764 in 1 : vector<16x16xf32>, vector<16x16xf32>, vector<16x16xf32>, vector<16x16xf32> -> vector<16x64xf32>
    %cst_275 = arith.constant dense<0.000000e+00> : vector<16x16xf32>
    %767 = tpu.matmul %750, %47, %cst_275 {dimension_numbers = #tpu.dot_dimension_numbers<[1], [0], [0], [1], [0, 0, 1, 1], [], []>} : vector<16x16xf32>, vector<16x16xf32>, vector<16x16xf32> -> vector<16x16xf32>
    %768 = vector.broadcast %46 : vector<1x16xf32> to vector<16x16xf32>
    %769 = arith.addf %767, %768 : vector<16x16xf32>
    %770 = arith.negf %769 : vector<16x16xf32>
    %771 = math.exp %770 : vector<16x16xf32>
    %cst_276 = arith.constant 1.000000e+00 : f32
    %772 = vector.broadcast %cst_276 : f32 to vector<16x16xf32>
    %773 = arith.addf %772, %771 : vector<16x16xf32>
    %774 = arith.divf %772, %773 : vector<16x16xf32>
    %775 = arith.mulf %769, %774 : vector<16x16xf32>
    %776 = tpu.concatenate %775, %775, %775, %775 in 1 : vector<16x16xf32>, vector<16x16xf32>, vector<16x16xf32>, vector<16x16xf32> -> vector<16x64xf32>
    %777 = arith.mulf %766, %776 : vector<16x64xf32>
    %778 = vector.extract_strided_slice %777 {offsets = [0, 0], sizes = [16, 16], strides = [1, 1]} : vector<16x64xf32> to vector<16x16xf32>
    %779 = arith.negf %778 : vector<16x16xf32>
    %780 = math.exp %779 : vector<16x16xf32>
    %cst_277 = arith.constant 1.000000e+00 : f32
    %781 = vector.broadcast %cst_277 : f32 to vector<16x16xf32>
    %782 = arith.addf %781, %780 : vector<16x16xf32>
    %783 = arith.divf %781, %782 : vector<16x16xf32>
    %784 = arith.mulf %778, %783 : vector<16x16xf32>
    %785 = vector.extract_strided_slice %777 {offsets = [0, 16], sizes = [16, 16], strides = [1, 1]} : vector<16x64xf32> to vector<16x16xf32>
    %786 = arith.mulf %785, %783 : vector<16x16xf32>
    %787 = vector.extract_strided_slice %777 {offsets = [0, 32], sizes = [16, 16], strides = [1, 1]} : vector<16x64xf32> to vector<16x16xf32>
    %788 = arith.mulf %787, %783 : vector<16x16xf32>
    %789 = vector.extract_strided_slice %777 {offsets = [0, 48], sizes = [16, 16], strides = [1, 1]} : vector<16x64xf32> to vector<16x16xf32>
    %790 = arith.mulf %789, %783 : vector<16x16xf32>
    %791 = tpu.concatenate %784, %786, %788, %790 in 1 : vector<16x16xf32>, vector<16x16xf32>, vector<16x16xf32>, vector<16x16xf32> -> vector<16x64xf32>
    %792 = vector.extract_strided_slice %791 {offsets = [0, 0], sizes = [16, 16], strides = [1, 1]} : vector<16x64xf32> to vector<16x16xf32>
    %793 = vector.extract_strided_slice %791 {offsets = [0, 32], sizes = [16, 16], strides = [1, 1]} : vector<16x64xf32> to vector<16x16xf32>
    %794 = tpu.concatenate %792, %793 in 1 : vector<16x16xf32>, vector<16x16xf32> -> vector<16x32xf32>
    %cst_278 = arith.constant dense<0.000000e+00> : vector<16x16xf32>
    %795 = tpu.matmul %794, %44, %cst_278 {dimension_numbers = #tpu.dot_dimension_numbers<[1], [0], [0], [1], [0, 0, 1, 1], [], []>} : vector<16x32xf32>, vector<32x16xf32>, vector<16x16xf32> -> vector<16x16xf32>
    %796 = vector.broadcast %43 : vector<1x16xf32> to vector<16x16xf32>
    %797 = arith.addf %795, %796 : vector<16x16xf32>
    %798 = vector.extract_strided_slice %797 {offsets = [0, 0], sizes = [16, 8], strides = [1, 1]} : vector<16x16xf32> to vector<16x8xf32>
    %799 = vector.extract_strided_slice %797 {offsets = [0, 8], sizes = [16, 8], strides = [1, 1]} : vector<16x16xf32> to vector<16x8xf32>
    %800 = vector.extract_strided_slice %791 {offsets = [0, 48], sizes = [16, 16], strides = [1, 1]} : vector<16x64xf32> to vector<16x16xf32>
    %801 = vector.extract_strided_slice %791 {offsets = [0, 16], sizes = [16, 16], strides = [1, 1]} : vector<16x64xf32> to vector<16x16xf32>
    %802 = tpu.concatenate %800, %801 in 1 : vector<16x16xf32>, vector<16x16xf32> -> vector<16x32xf32>
    %cst_279 = arith.constant dense<0.000000e+00> : vector<16x16xf32>
    %803 = tpu.matmul %802, %45, %cst_279 {dimension_numbers = #tpu.dot_dimension_numbers<[1], [0], [0], [1], [0, 0, 1, 1], [], []>} : vector<16x32xf32>, vector<32x16xf32>, vector<16x16xf32> -> vector<16x16xf32>
    %804 = vector.extract_strided_slice %803 {offsets = [0, 0], sizes = [16, 8], strides = [1, 1]} : vector<16x16xf32> to vector<16x8xf32>
    %805 = vector.extract_strided_slice %803 {offsets = [0, 8], sizes = [16, 8], strides = [1, 1]} : vector<16x16xf32> to vector<16x8xf32>
    %806 = tpu.concatenate %798, %805, %799, %804 in 1 : vector<16x8xf32>, vector<16x8xf32>, vector<16x8xf32>, vector<16x8xf32> -> vector<16x32xf32>
    %807 = vector.extract_strided_slice %759 {offsets = [0, 0], sizes = [16, 4], strides = [1, 1]} : vector<16x8xf32> to vector<16x4xf32>
    %cst_280 = arith.constant dense<0.000000e+00> : vector<16xf32>
    %808 = vector.multi_reduction <add>, %807, %cst_280 [1] : vector<16x4xf32> to vector<16xf32>
    %809 = vector.shape_cast %808 : vector<16xf32> to vector<16x1xf32>
    %cst_281 = arith.constant 4.000000e+00 : f32
    %810 = vector.broadcast %cst_281 : f32 to vector<16x1xf32>
    %811 = arith.divf %809, %810 : vector<16x1xf32>
    %812 = vector.broadcast %811 : vector<16x1xf32> to vector<16x4xf32>
    %813 = arith.subf %807, %812 : vector<16x4xf32>
    %814 = arith.mulf %813, %813 : vector<16x4xf32>
    %cst_282 = arith.constant dense<0.000000e+00> : vector<16xf32>
    %815 = vector.multi_reduction <add>, %814, %cst_282 [1] : vector<16x4xf32> to vector<16xf32>
    %816 = vector.shape_cast %815 : vector<16xf32> to vector<16x1xf32>
    %cst_283 = arith.constant 4.000000e+00 : f32
    %817 = vector.broadcast %cst_283 : f32 to vector<16x1xf32>
    %818 = arith.divf %816, %817 : vector<16x1xf32>
    %819 = vector.broadcast %811 : vector<16x1xf32> to vector<16x4xf32>
    %820 = arith.subf %807, %819 : vector<16x4xf32>
    %cst_284 = arith.constant 9.99999974E-6 : f32
    %821 = vector.broadcast %cst_284 : f32 to vector<16x1xf32>
    %822 = arith.addf %818, %821 : vector<16x1xf32>
    %823 = math.rsqrt %822 : vector<16x1xf32>
    %824 = vector.broadcast %823 : vector<16x1xf32> to vector<16x4xf32>
    %825 = arith.mulf %820, %824 : vector<16x4xf32>
    %826 = vector.broadcast %39 : vector<1x4xf32> to vector<16x4xf32>
    %827 = arith.mulf %825, %826 : vector<16x4xf32>
    %828 = vector.broadcast %38 : vector<1x4xf32> to vector<16x4xf32>
    %829 = arith.addf %827, %828 : vector<16x4xf32>
    %830 = arith.negf %829 : vector<16x4xf32>
    %831 = math.exp %830 : vector<16x4xf32>
    %cst_285 = arith.constant 1.000000e+00 : f32
    %832 = vector.broadcast %cst_285 : f32 to vector<16x4xf32>
    %833 = arith.addf %832, %831 : vector<16x4xf32>
    %834 = arith.divf %832, %833 : vector<16x4xf32>
    %835 = arith.mulf %829, %834 : vector<16x4xf32>
    %cst_286 = arith.constant 1.66666663 : f32
    %836 = vector.broadcast %cst_286 : f32 to vector<16x4xf32>
    %837 = arith.mulf %835, %836 : vector<16x4xf32>
    %838 = vector.extract_strided_slice %37 {offsets = [0, 0], sizes = [1, 4], strides = [1, 1]} : vector<2x4xf32> to vector<1x4xf32>
    %839 = vector.broadcast %838 : vector<1x4xf32> to vector<16x4xf32>
    %840 = arith.mulf %837, %839 : vector<16x4xf32>
    %cst_287 = arith.constant dense<0.000000e+00> : vector<16xf32>
    %841 = vector.multi_reduction <add>, %840, %cst_287 [1] : vector<16x4xf32> to vector<16xf32>
    %842 = vector.shape_cast %841 : vector<16xf32> to vector<16x1xf32>
    %843 = vector.extract_strided_slice %759 {offsets = [0, 4], sizes = [16, 4], strides = [1, 1]} : vector<16x8xf32> to vector<16x4xf32>
    %cst_288 = arith.constant dense<0.000000e+00> : vector<16xf32>
    %844 = vector.multi_reduction <add>, %843, %cst_288 [1] : vector<16x4xf32> to vector<16xf32>
    %845 = vector.shape_cast %844 : vector<16xf32> to vector<16x1xf32>
    %cst_289 = arith.constant 4.000000e+00 : f32
    %846 = vector.broadcast %cst_289 : f32 to vector<16x1xf32>
    %847 = arith.divf %845, %846 : vector<16x1xf32>
    %848 = vector.broadcast %847 : vector<16x1xf32> to vector<16x4xf32>
    %849 = arith.subf %843, %848 : vector<16x4xf32>
    %850 = arith.mulf %849, %849 : vector<16x4xf32>
    %cst_290 = arith.constant dense<0.000000e+00> : vector<16xf32>
    %851 = vector.multi_reduction <add>, %850, %cst_290 [1] : vector<16x4xf32> to vector<16xf32>
    %852 = vector.shape_cast %851 : vector<16xf32> to vector<16x1xf32>
    %cst_291 = arith.constant 4.000000e+00 : f32
    %853 = vector.broadcast %cst_291 : f32 to vector<16x1xf32>
    %854 = arith.divf %852, %853 : vector<16x1xf32>
    %855 = vector.broadcast %847 : vector<16x1xf32> to vector<16x4xf32>
    %856 = arith.subf %843, %855 : vector<16x4xf32>
    %cst_292 = arith.constant 9.99999974E-6 : f32
    %857 = vector.broadcast %cst_292 : f32 to vector<16x1xf32>
    %858 = arith.addf %854, %857 : vector<16x1xf32>
    %859 = math.rsqrt %858 : vector<16x1xf32>
    %860 = vector.broadcast %859 : vector<16x1xf32> to vector<16x4xf32>
    %861 = arith.mulf %856, %860 : vector<16x4xf32>
    %862 = vector.broadcast %39 : vector<1x4xf32> to vector<16x4xf32>
    %863 = arith.mulf %861, %862 : vector<16x4xf32>
    %864 = vector.broadcast %38 : vector<1x4xf32> to vector<16x4xf32>
    %865 = arith.addf %863, %864 : vector<16x4xf32>
    %866 = arith.negf %865 : vector<16x4xf32>
    %867 = math.exp %866 : vector<16x4xf32>
    %cst_293 = arith.constant 1.000000e+00 : f32
    %868 = vector.broadcast %cst_293 : f32 to vector<16x4xf32>
    %869 = arith.addf %868, %867 : vector<16x4xf32>
    %870 = arith.divf %868, %869 : vector<16x4xf32>
    %871 = arith.mulf %865, %870 : vector<16x4xf32>
    %cst_294 = arith.constant 1.66666663 : f32
    %872 = vector.broadcast %cst_294 : f32 to vector<16x4xf32>
    %873 = arith.mulf %871, %872 : vector<16x4xf32>
    %874 = vector.extract_strided_slice %37 {offsets = [1, 0], sizes = [1, 4], strides = [1, 1]} : vector<2x4xf32> to vector<1x4xf32>
    %875 = vector.broadcast %874 : vector<1x4xf32> to vector<16x4xf32>
    %876 = arith.mulf %873, %875 : vector<16x4xf32>
    %cst_295 = arith.constant dense<0.000000e+00> : vector<16xf32>
    %877 = vector.multi_reduction <add>, %876, %cst_295 [1] : vector<16x4xf32> to vector<16xf32>
    %878 = vector.shape_cast %877 : vector<16xf32> to vector<16x1xf32>
    %879 = arith.maximumf %842, %878 : vector<16x1xf32>
    %cst_296 = arith.constant dense<0xFF800000> : vector<1xf32>
    %880 = vector.multi_reduction <maximumf>, %879, %cst_296 [0] : vector<16x1xf32> to vector<1xf32>
    %881 = vector.shape_cast %880 : vector<1xf32> to vector<1x1xf32>
    %882 = vector.broadcast %881 : vector<1x1xf32> to vector<16x1xf32>
    %883 = arith.subf %842, %882 : vector<16x1xf32>
    %884 = math.exp %883 : vector<16x1xf32>
    %cst_297 = arith.constant dense<0.000000e+00> : vector<8x1xf32>
    %885 = tpu.matmul %5, %884, %cst_297 {dimension_numbers = #tpu.dot_dimension_numbers<[1], [0], [0], [1], [0, 0, 1, 1], [], []>} : vector<8x16xf32>, vector<16x1xf32>, vector<8x1xf32> -> vector<8x1xf32>
    %cst_298 = arith.constant dense<0.000000e+00> : vector<16x1xf32>
    %886 = tpu.matmul %4, %885, %cst_298 {dimension_numbers = #tpu.dot_dimension_numbers<[1], [0], [0], [1], [0, 0, 1, 1], [], []>} : vector<16x8xf32>, vector<8x1xf32>, vector<16x1xf32> -> vector<16x1xf32>
    %cst_299 = arith.constant 9.99999971E-10 : f32
    %887 = vector.broadcast %cst_299 : f32 to vector<16x1xf32>
    %888 = arith.addf %886, %887 : vector<16x1xf32>
    %889 = arith.divf %884, %888 : vector<16x1xf32>
    %890 = vector.broadcast %881 : vector<1x1xf32> to vector<16x1xf32>
    %891 = arith.subf %878, %890 : vector<16x1xf32>
    %892 = math.exp %891 : vector<16x1xf32>
    %cst_300 = arith.constant dense<0.000000e+00> : vector<8x1xf32>
    %893 = tpu.matmul %5, %892, %cst_300 {dimension_numbers = #tpu.dot_dimension_numbers<[1], [0], [0], [1], [0, 0, 1, 1], [], []>} : vector<8x16xf32>, vector<16x1xf32>, vector<8x1xf32> -> vector<8x1xf32>
    %cst_301 = arith.constant dense<0.000000e+00> : vector<16x1xf32>
    %894 = tpu.matmul %4, %893, %cst_301 {dimension_numbers = #tpu.dot_dimension_numbers<[1], [0], [0], [1], [0, 0, 1, 1], [], []>} : vector<16x8xf32>, vector<8x1xf32>, vector<16x1xf32> -> vector<16x1xf32>
    %cst_302 = arith.constant 9.99999971E-10 : f32
    %895 = vector.broadcast %cst_302 : f32 to vector<16x1xf32>
    %896 = arith.addf %894, %895 : vector<16x1xf32>
    %897 = arith.divf %892, %896 : vector<16x1xf32>
    %898 = vector.extract_strided_slice %806 {offsets = [0, 0], sizes = [16, 4], strides = [1, 1]} : vector<16x32xf32> to vector<16x4xf32>
    %899 = vector.broadcast %889 : vector<16x1xf32> to vector<16x4xf32>
    %900 = arith.mulf %898, %899 : vector<16x4xf32>
    %901 = vector.extract_strided_slice %806 {offsets = [0, 4], sizes = [16, 4], strides = [1, 1]} : vector<16x32xf32> to vector<16x4xf32>
    %902 = vector.broadcast %897 : vector<16x1xf32> to vector<16x4xf32>
    %903 = arith.mulf %901, %902 : vector<16x4xf32>
    %904 = vector.extract_strided_slice %806 {offsets = [0, 8], sizes = [16, 4], strides = [1, 1]} : vector<16x32xf32> to vector<16x4xf32>
    %905 = vector.broadcast %889 : vector<16x1xf32> to vector<16x4xf32>
    %906 = arith.mulf %904, %905 : vector<16x4xf32>
    %907 = vector.extract_strided_slice %806 {offsets = [0, 12], sizes = [16, 4], strides = [1, 1]} : vector<16x32xf32> to vector<16x4xf32>
    %908 = vector.broadcast %897 : vector<16x1xf32> to vector<16x4xf32>
    %909 = arith.mulf %907, %908 : vector<16x4xf32>
    %910 = vector.extract_strided_slice %806 {offsets = [0, 16], sizes = [16, 4], strides = [1, 1]} : vector<16x32xf32> to vector<16x4xf32>
    %911 = vector.broadcast %889 : vector<16x1xf32> to vector<16x4xf32>
    %912 = arith.mulf %910, %911 : vector<16x4xf32>
    %913 = vector.extract_strided_slice %806 {offsets = [0, 20], sizes = [16, 4], strides = [1, 1]} : vector<16x32xf32> to vector<16x4xf32>
    %914 = vector.broadcast %897 : vector<16x1xf32> to vector<16x4xf32>
    %915 = arith.mulf %913, %914 : vector<16x4xf32>
    %916 = vector.extract_strided_slice %806 {offsets = [0, 24], sizes = [16, 4], strides = [1, 1]} : vector<16x32xf32> to vector<16x4xf32>
    %917 = vector.broadcast %889 : vector<16x1xf32> to vector<16x4xf32>
    %918 = arith.mulf %916, %917 : vector<16x4xf32>
    %919 = vector.extract_strided_slice %806 {offsets = [0, 28], sizes = [16, 4], strides = [1, 1]} : vector<16x32xf32> to vector<16x4xf32>
    %920 = vector.broadcast %897 : vector<16x1xf32> to vector<16x4xf32>
    %921 = arith.mulf %919, %920 : vector<16x4xf32>
    %922 = tpu.concatenate %900, %903, %906, %909, %912, %915, %918, %921 in 1 : vector<16x4xf32>, vector<16x4xf32>, vector<16x4xf32>, vector<16x4xf32>, vector<16x4xf32>, vector<16x4xf32>, vector<16x4xf32>, vector<16x4xf32> -> vector<16x32xf32>
    %923 = vector.extract_strided_slice %922 {offsets = [0, 0], sizes = [16, 8], strides = [1, 1]} : vector<16x32xf32> to vector<16x8xf32>
    %924 = vector.extract_strided_slice %2 {offsets = [0, 0], sizes = [16, 1], strides = [1, 1]} : vector<16x9xf32> to vector<16x1xf32>
    %925 = vector.extract_strided_slice %922 {offsets = [0, 8], sizes = [16, 8], strides = [1, 1]} : vector<16x32xf32> to vector<16x8xf32>
    %926 = vector.broadcast %924 : vector<16x1xf32> to vector<16x8xf32>
    %927 = arith.mulf %926, %925 : vector<16x8xf32>
    %928 = vector.extract_strided_slice %2 {offsets = [0, 3], sizes = [16, 1], strides = [1, 1]} : vector<16x9xf32> to vector<16x1xf32>
    %929 = vector.extract_strided_slice %922 {offsets = [0, 16], sizes = [16, 8], strides = [1, 1]} : vector<16x32xf32> to vector<16x8xf32>
    %930 = vector.broadcast %928 : vector<16x1xf32> to vector<16x8xf32>
    %931 = arith.mulf %930, %929 : vector<16x8xf32>
    %932 = arith.addf %927, %931 : vector<16x8xf32>
    %933 = vector.extract_strided_slice %2 {offsets = [0, 6], sizes = [16, 1], strides = [1, 1]} : vector<16x9xf32> to vector<16x1xf32>
    %934 = vector.extract_strided_slice %922 {offsets = [0, 24], sizes = [16, 8], strides = [1, 1]} : vector<16x32xf32> to vector<16x8xf32>
    %935 = vector.broadcast %933 : vector<16x1xf32> to vector<16x8xf32>
    %936 = arith.mulf %935, %934 : vector<16x8xf32>
    %937 = arith.addf %932, %936 : vector<16x8xf32>
    %938 = vector.extract_strided_slice %2 {offsets = [0, 1], sizes = [16, 1], strides = [1, 1]} : vector<16x9xf32> to vector<16x1xf32>
    %939 = vector.extract_strided_slice %922 {offsets = [0, 8], sizes = [16, 8], strides = [1, 1]} : vector<16x32xf32> to vector<16x8xf32>
    %940 = vector.broadcast %938 : vector<16x1xf32> to vector<16x8xf32>
    %941 = arith.mulf %940, %939 : vector<16x8xf32>
    %942 = vector.extract_strided_slice %2 {offsets = [0, 4], sizes = [16, 1], strides = [1, 1]} : vector<16x9xf32> to vector<16x1xf32>
    %943 = vector.extract_strided_slice %922 {offsets = [0, 16], sizes = [16, 8], strides = [1, 1]} : vector<16x32xf32> to vector<16x8xf32>
    %944 = vector.broadcast %942 : vector<16x1xf32> to vector<16x8xf32>
    %945 = arith.mulf %944, %943 : vector<16x8xf32>
    %946 = arith.addf %941, %945 : vector<16x8xf32>
    %947 = vector.extract_strided_slice %2 {offsets = [0, 7], sizes = [16, 1], strides = [1, 1]} : vector<16x9xf32> to vector<16x1xf32>
    %948 = vector.extract_strided_slice %922 {offsets = [0, 24], sizes = [16, 8], strides = [1, 1]} : vector<16x32xf32> to vector<16x8xf32>
    %949 = vector.broadcast %947 : vector<16x1xf32> to vector<16x8xf32>
    %950 = arith.mulf %949, %948 : vector<16x8xf32>
    %951 = arith.addf %946, %950 : vector<16x8xf32>
    %952 = vector.extract_strided_slice %2 {offsets = [0, 2], sizes = [16, 1], strides = [1, 1]} : vector<16x9xf32> to vector<16x1xf32>
    %953 = vector.extract_strided_slice %922 {offsets = [0, 8], sizes = [16, 8], strides = [1, 1]} : vector<16x32xf32> to vector<16x8xf32>
    %954 = vector.broadcast %952 : vector<16x1xf32> to vector<16x8xf32>
    %955 = arith.mulf %954, %953 : vector<16x8xf32>
    %956 = vector.extract_strided_slice %2 {offsets = [0, 5], sizes = [16, 1], strides = [1, 1]} : vector<16x9xf32> to vector<16x1xf32>
    %957 = vector.extract_strided_slice %922 {offsets = [0, 16], sizes = [16, 8], strides = [1, 1]} : vector<16x32xf32> to vector<16x8xf32>
    %958 = vector.broadcast %956 : vector<16x1xf32> to vector<16x8xf32>
    %959 = arith.mulf %958, %957 : vector<16x8xf32>
    %960 = arith.addf %955, %959 : vector<16x8xf32>
    %961 = vector.extract_strided_slice %2 {offsets = [0, 8], sizes = [16, 1], strides = [1, 1]} : vector<16x9xf32> to vector<16x1xf32>
    %962 = vector.extract_strided_slice %922 {offsets = [0, 24], sizes = [16, 8], strides = [1, 1]} : vector<16x32xf32> to vector<16x8xf32>
    %963 = vector.broadcast %961 : vector<16x1xf32> to vector<16x8xf32>
    %964 = arith.mulf %963, %962 : vector<16x8xf32>
    %965 = arith.addf %960, %964 : vector<16x8xf32>
    %966 = tpu.concatenate %923, %937, %951, %965 in 1 : vector<16x8xf32>, vector<16x8xf32>, vector<16x8xf32>, vector<16x8xf32> -> vector<16x32xf32>
    %cst_303 = arith.constant dense<0.000000e+00> : vector<8x32xf32>
    %967 = tpu.matmul %5, %966, %cst_303 {dimension_numbers = #tpu.dot_dimension_numbers<[1], [0], [0], [1], [0, 0, 1, 1], [], []>} : vector<8x16xf32>, vector<16x32xf32>, vector<8x32xf32> -> vector<8x32xf32>
    %968 = vector.extract_strided_slice %967 {offsets = [0, 0], sizes = [8, 8], strides = [1, 1]} : vector<8x32xf32> to vector<8x8xf32>
    %cst_304 = arith.constant dense<0.000000e+00> : vector<8x16xf32>
    %969 = tpu.matmul %968, %49, %cst_304 {dimension_numbers = #tpu.dot_dimension_numbers<[1], [0], [0], [1], [0, 0, 1, 1], [], []>} : vector<8x8xf32>, vector<8x16xf32>, vector<8x16xf32> -> vector<8x16xf32>
    %970 = vector.broadcast %48 : vector<1x16xf32> to vector<8x16xf32>
    %971 = arith.addf %969, %970 : vector<8x16xf32>
    %972 = vector.extract_strided_slice %967 {offsets = [0, 8], sizes = [8, 8], strides = [1, 1]} : vector<8x32xf32> to vector<8x8xf32>
    %cst_305 = arith.constant dense<0.000000e+00> : vector<8x16xf32>
    %973 = tpu.matmul %972, %50, %cst_305 {dimension_numbers = #tpu.dot_dimension_numbers<[1], [0], [0], [1], [0, 0, 1, 1], [], []>} : vector<8x8xf32>, vector<8x16xf32>, vector<8x16xf32> -> vector<8x16xf32>
    %974 = vector.extract_strided_slice %967 {offsets = [0, 16], sizes = [8, 8], strides = [1, 1]} : vector<8x32xf32> to vector<8x8xf32>
    %cst_306 = arith.constant dense<0.000000e+00> : vector<8x16xf32>
    %975 = tpu.matmul %974, %50, %cst_306 {dimension_numbers = #tpu.dot_dimension_numbers<[1], [0], [0], [1], [0, 0, 1, 1], [], []>} : vector<8x8xf32>, vector<8x16xf32>, vector<8x16xf32> -> vector<8x16xf32>
    %976 = vector.extract_strided_slice %967 {offsets = [0, 24], sizes = [8, 8], strides = [1, 1]} : vector<8x32xf32> to vector<8x8xf32>
    %cst_307 = arith.constant dense<0.000000e+00> : vector<8x16xf32>
    %977 = tpu.matmul %976, %50, %cst_307 {dimension_numbers = #tpu.dot_dimension_numbers<[1], [0], [0], [1], [0, 0, 1, 1], [], []>} : vector<8x8xf32>, vector<8x16xf32>, vector<8x16xf32> -> vector<8x16xf32>
    %978 = tpu.concatenate %971, %973, %975, %977 in 1 : vector<8x16xf32>, vector<8x16xf32>, vector<8x16xf32>, vector<8x16xf32> -> vector<8x64xf32>
    %979 = arith.addf %614, %978 : vector<8x64xf32>
    %980 = vector.extract_strided_slice %979 {offsets = [0, 0], sizes = [8, 16], strides = [1, 1]} : vector<8x64xf32> to vector<8x16xf32>
    %981 = arith.mulf %980, %980 : vector<8x16xf32>
    %cst_308 = arith.constant dense<0.000000e+00> : vector<8xf32>
    %982 = vector.multi_reduction <add>, %981, %cst_308 [1] : vector<8x16xf32> to vector<8xf32>
    %983 = vector.shape_cast %982 : vector<8xf32> to vector<8x1xf32>
    %cst_309 = arith.constant 1.600000e+01 : f32
    %984 = vector.broadcast %cst_309 : f32 to vector<8x1xf32>
    %985 = arith.divf %983, %984 : vector<8x1xf32>
    %cst_310 = arith.constant 5.000000e-01 : f32
    %986 = vector.broadcast %cst_310 : f32 to vector<8x1xf32>
    %987 = arith.mulf %985, %986 : vector<8x1xf32>
    %988 = vector.extract_strided_slice %979 {offsets = [0, 16], sizes = [8, 16], strides = [1, 1]} : vector<8x64xf32> to vector<8x16xf32>
    %989 = arith.mulf %988, %988 : vector<8x16xf32>
    %cst_311 = arith.constant dense<0.000000e+00> : vector<8xf32>
    %990 = vector.multi_reduction <add>, %989, %cst_311 [1] : vector<8x16xf32> to vector<8xf32>
    %991 = vector.shape_cast %990 : vector<8xf32> to vector<8x1xf32>
    %cst_312 = arith.constant 1.600000e+01 : f32
    %992 = vector.broadcast %cst_312 : f32 to vector<8x1xf32>
    %993 = arith.divf %991, %992 : vector<8x1xf32>
    %cst_313 = arith.constant 0.166666672 : f32
    %994 = vector.broadcast %cst_313 : f32 to vector<8x1xf32>
    %995 = arith.mulf %993, %994 : vector<8x1xf32>
    %996 = arith.addf %987, %995 : vector<8x1xf32>
    %997 = vector.extract_strided_slice %979 {offsets = [0, 32], sizes = [8, 16], strides = [1, 1]} : vector<8x64xf32> to vector<8x16xf32>
    %998 = arith.mulf %997, %997 : vector<8x16xf32>
    %cst_314 = arith.constant dense<0.000000e+00> : vector<8xf32>
    %999 = vector.multi_reduction <add>, %998, %cst_314 [1] : vector<8x16xf32> to vector<8xf32>
    %1000 = vector.shape_cast %999 : vector<8xf32> to vector<8x1xf32>
    %cst_315 = arith.constant 1.600000e+01 : f32
    %1001 = vector.broadcast %cst_315 : f32 to vector<8x1xf32>
    %1002 = arith.divf %1000, %1001 : vector<8x1xf32>
    %cst_316 = arith.constant 0.166666672 : f32
    %1003 = vector.broadcast %cst_316 : f32 to vector<8x1xf32>
    %1004 = arith.mulf %1002, %1003 : vector<8x1xf32>
    %1005 = arith.addf %996, %1004 : vector<8x1xf32>
    %1006 = vector.extract_strided_slice %979 {offsets = [0, 48], sizes = [8, 16], strides = [1, 1]} : vector<8x64xf32> to vector<8x16xf32>
    %1007 = arith.mulf %1006, %1006 : vector<8x16xf32>
    %cst_317 = arith.constant dense<0.000000e+00> : vector<8xf32>
    %1008 = vector.multi_reduction <add>, %1007, %cst_317 [1] : vector<8x16xf32> to vector<8xf32>
    %1009 = vector.shape_cast %1008 : vector<8xf32> to vector<8x1xf32>
    %cst_318 = arith.constant 1.600000e+01 : f32
    %1010 = vector.broadcast %cst_318 : f32 to vector<8x1xf32>
    %1011 = arith.divf %1009, %1010 : vector<8x1xf32>
    %cst_319 = arith.constant 0.166666672 : f32
    %1012 = vector.broadcast %cst_319 : f32 to vector<8x1xf32>
    %1013 = arith.mulf %1011, %1012 : vector<8x1xf32>
    %1014 = arith.addf %1005, %1013 : vector<8x1xf32>
    %cst_320 = arith.constant 9.99999996E-13 : f32
    %1015 = vector.broadcast %cst_320 : f32 to vector<8x1xf32>
    %1016 = arith.addf %1014, %1015 : vector<8x1xf32>
    %1017 = math.rsqrt %1016 : vector<8x1xf32>
    %1018 = vector.broadcast %1017 : vector<8x1xf32> to vector<8x64xf32>
    %1019 = arith.mulf %979, %1018 : vector<8x64xf32>
    %1020 = vector.broadcast %64 : vector<1x64xf32> to vector<8x64xf32>
    %1021 = arith.mulf %1019, %1020 : vector<8x64xf32>
    %1022 = vector.extract_strided_slice %1021 {offsets = [0, 0], sizes = [8, 16], strides = [1, 1]} : vector<8x64xf32> to vector<8x16xf32>
    %cst_321 = arith.constant dense<0.000000e+00> : vector<8x32xf32>
    %1023 = tpu.matmul %1022, %58, %cst_321 {dimension_numbers = #tpu.dot_dimension_numbers<[1], [0], [0], [1], [0, 0, 1, 1], [], []>} : vector<8x16xf32>, vector<16x32xf32>, vector<8x32xf32> -> vector<8x32xf32>
    %1024 = vector.broadcast %57 : vector<1x32xf32> to vector<8x32xf32>
    %1025 = arith.addf %1023, %1024 : vector<8x32xf32>
    %1026 = vector.extract_strided_slice %1021 {offsets = [0, 16], sizes = [8, 16], strides = [1, 1]} : vector<8x64xf32> to vector<8x16xf32>
    %cst_322 = arith.constant dense<0.000000e+00> : vector<8x32xf32>
    %1027 = tpu.matmul %1026, %59, %cst_322 {dimension_numbers = #tpu.dot_dimension_numbers<[1], [0], [0], [1], [0, 0, 1, 1], [], []>} : vector<8x16xf32>, vector<16x32xf32>, vector<8x32xf32> -> vector<8x32xf32>
    %1028 = vector.extract_strided_slice %1021 {offsets = [0, 32], sizes = [8, 16], strides = [1, 1]} : vector<8x64xf32> to vector<8x16xf32>
    %cst_323 = arith.constant dense<0.000000e+00> : vector<8x32xf32>
    %1029 = tpu.matmul %1028, %59, %cst_323 {dimension_numbers = #tpu.dot_dimension_numbers<[1], [0], [0], [1], [0, 0, 1, 1], [], []>} : vector<8x16xf32>, vector<16x32xf32>, vector<8x32xf32> -> vector<8x32xf32>
    %1030 = vector.extract_strided_slice %1021 {offsets = [0, 48], sizes = [8, 16], strides = [1, 1]} : vector<8x64xf32> to vector<8x16xf32>
    %cst_324 = arith.constant dense<0.000000e+00> : vector<8x32xf32>
    %1031 = tpu.matmul %1030, %59, %cst_324 {dimension_numbers = #tpu.dot_dimension_numbers<[1], [0], [0], [1], [0, 0, 1, 1], [], []>} : vector<8x16xf32>, vector<16x32xf32>, vector<8x32xf32> -> vector<8x32xf32>
    %1032 = tpu.concatenate %1025, %1027, %1029, %1031 in 1 : vector<8x32xf32>, vector<8x32xf32>, vector<8x32xf32>, vector<8x32xf32> -> vector<8x128xf32>
    %1033 = vector.extract_strided_slice %1032 {offsets = [0, 0], sizes = [8, 32], strides = [1, 1]} : vector<8x128xf32> to vector<8x32xf32>
    %1034 = arith.negf %1033 : vector<8x32xf32>
    %1035 = math.exp %1034 : vector<8x32xf32>
    %cst_325 = arith.constant 1.000000e+00 : f32
    %1036 = vector.broadcast %cst_325 : f32 to vector<8x32xf32>
    %1037 = arith.addf %1036, %1035 : vector<8x32xf32>
    %1038 = arith.divf %1036, %1037 : vector<8x32xf32>
    %1039 = arith.mulf %1033, %1038 : vector<8x32xf32>
    %1040 = vector.extract_strided_slice %1032 {offsets = [0, 32], sizes = [8, 32], strides = [1, 1]} : vector<8x128xf32> to vector<8x32xf32>
    %1041 = arith.mulf %1040, %1038 : vector<8x32xf32>
    %1042 = vector.extract_strided_slice %1032 {offsets = [0, 64], sizes = [8, 32], strides = [1, 1]} : vector<8x128xf32> to vector<8x32xf32>
    %1043 = arith.mulf %1042, %1038 : vector<8x32xf32>
    %1044 = vector.extract_strided_slice %1032 {offsets = [0, 96], sizes = [8, 32], strides = [1, 1]} : vector<8x128xf32> to vector<8x32xf32>
    %1045 = arith.mulf %1044, %1038 : vector<8x32xf32>
    %1046 = tpu.concatenate %1039, %1041, %1043, %1045 in 1 : vector<8x32xf32>, vector<8x32xf32>, vector<8x32xf32>, vector<8x32xf32> -> vector<8x128xf32>
    %1047 = vector.extract_strided_slice %1046 {offsets = [0, 0], sizes = [8, 32], strides = [1, 1]} : vector<8x128xf32> to vector<8x32xf32>
    %cst_326 = arith.constant dense<0.000000e+00> : vector<8x16xf32>
    %1048 = tpu.matmul %1047, %61, %cst_326 {dimension_numbers = #tpu.dot_dimension_numbers<[1], [0], [0], [1], [0, 0, 1, 1], [], []>} : vector<8x32xf32>, vector<32x16xf32>, vector<8x16xf32> -> vector<8x16xf32>
    %1049 = vector.broadcast %60 : vector<1x16xf32> to vector<8x16xf32>
    %1050 = arith.addf %1048, %1049 : vector<8x16xf32>
    %1051 = vector.extract_strided_slice %1046 {offsets = [0, 32], sizes = [8, 32], strides = [1, 1]} : vector<8x128xf32> to vector<8x32xf32>
    %cst_327 = arith.constant dense<0.000000e+00> : vector<8x16xf32>
    %1052 = tpu.matmul %1051, %62, %cst_327 {dimension_numbers = #tpu.dot_dimension_numbers<[1], [0], [0], [1], [0, 0, 1, 1], [], []>} : vector<8x32xf32>, vector<32x16xf32>, vector<8x16xf32> -> vector<8x16xf32>
    %1053 = vector.extract_strided_slice %1046 {offsets = [0, 64], sizes = [8, 32], strides = [1, 1]} : vector<8x128xf32> to vector<8x32xf32>
    %cst_328 = arith.constant dense<0.000000e+00> : vector<8x16xf32>
    %1054 = tpu.matmul %1053, %62, %cst_328 {dimension_numbers = #tpu.dot_dimension_numbers<[1], [0], [0], [1], [0, 0, 1, 1], [], []>} : vector<8x32xf32>, vector<32x16xf32>, vector<8x16xf32> -> vector<8x16xf32>
    %1055 = vector.extract_strided_slice %1046 {offsets = [0, 96], sizes = [8, 32], strides = [1, 1]} : vector<8x128xf32> to vector<8x32xf32>
    %cst_329 = arith.constant dense<0.000000e+00> : vector<8x16xf32>
    %1056 = tpu.matmul %1055, %62, %cst_329 {dimension_numbers = #tpu.dot_dimension_numbers<[1], [0], [0], [1], [0, 0, 1, 1], [], []>} : vector<8x32xf32>, vector<32x16xf32>, vector<8x16xf32> -> vector<8x16xf32>
    %1057 = tpu.concatenate %1050, %1052, %1054, %1056 in 1 : vector<8x16xf32>, vector<8x16xf32>, vector<8x16xf32>, vector<8x16xf32> -> vector<8x64xf32>
    %1058 = arith.addf %979, %1057 : vector<8x64xf32>
    %1059 = vector.extract_strided_slice %1058 {offsets = [0, 0], sizes = [8, 16], strides = [1, 1]} : vector<8x64xf32> to vector<8x16xf32>
    %1060 = arith.mulf %1059, %1059 : vector<8x16xf32>
    %cst_330 = arith.constant dense<0.000000e+00> : vector<8xf32>
    %1061 = vector.multi_reduction <add>, %1060, %cst_330 [1] : vector<8x16xf32> to vector<8xf32>
    %1062 = vector.shape_cast %1061 : vector<8xf32> to vector<8x1xf32>
    %cst_331 = arith.constant 1.600000e+01 : f32
    %1063 = vector.broadcast %cst_331 : f32 to vector<8x1xf32>
    %1064 = arith.divf %1062, %1063 : vector<8x1xf32>
    %cst_332 = arith.constant 5.000000e-01 : f32
    %1065 = vector.broadcast %cst_332 : f32 to vector<8x1xf32>
    %1066 = arith.mulf %1064, %1065 : vector<8x1xf32>
    %1067 = vector.extract_strided_slice %1058 {offsets = [0, 16], sizes = [8, 16], strides = [1, 1]} : vector<8x64xf32> to vector<8x16xf32>
    %1068 = arith.mulf %1067, %1067 : vector<8x16xf32>
    %cst_333 = arith.constant dense<0.000000e+00> : vector<8xf32>
    %1069 = vector.multi_reduction <add>, %1068, %cst_333 [1] : vector<8x16xf32> to vector<8xf32>
    %1070 = vector.shape_cast %1069 : vector<8xf32> to vector<8x1xf32>
    %cst_334 = arith.constant 1.600000e+01 : f32
    %1071 = vector.broadcast %cst_334 : f32 to vector<8x1xf32>
    %1072 = arith.divf %1070, %1071 : vector<8x1xf32>
    %cst_335 = arith.constant 0.166666672 : f32
    %1073 = vector.broadcast %cst_335 : f32 to vector<8x1xf32>
    %1074 = arith.mulf %1072, %1073 : vector<8x1xf32>
    %1075 = arith.addf %1066, %1074 : vector<8x1xf32>
    %1076 = vector.extract_strided_slice %1058 {offsets = [0, 32], sizes = [8, 16], strides = [1, 1]} : vector<8x64xf32> to vector<8x16xf32>
    %1077 = arith.mulf %1076, %1076 : vector<8x16xf32>
    %cst_336 = arith.constant dense<0.000000e+00> : vector<8xf32>
    %1078 = vector.multi_reduction <add>, %1077, %cst_336 [1] : vector<8x16xf32> to vector<8xf32>
    %1079 = vector.shape_cast %1078 : vector<8xf32> to vector<8x1xf32>
    %cst_337 = arith.constant 1.600000e+01 : f32
    %1080 = vector.broadcast %cst_337 : f32 to vector<8x1xf32>
    %1081 = arith.divf %1079, %1080 : vector<8x1xf32>
    %cst_338 = arith.constant 0.166666672 : f32
    %1082 = vector.broadcast %cst_338 : f32 to vector<8x1xf32>
    %1083 = arith.mulf %1081, %1082 : vector<8x1xf32>
    %1084 = arith.addf %1075, %1083 : vector<8x1xf32>
    %1085 = vector.extract_strided_slice %1058 {offsets = [0, 48], sizes = [8, 16], strides = [1, 1]} : vector<8x64xf32> to vector<8x16xf32>
    %1086 = arith.mulf %1085, %1085 : vector<8x16xf32>
    %cst_339 = arith.constant dense<0.000000e+00> : vector<8xf32>
    %1087 = vector.multi_reduction <add>, %1086, %cst_339 [1] : vector<8x16xf32> to vector<8xf32>
    %1088 = vector.shape_cast %1087 : vector<8xf32> to vector<8x1xf32>
    %cst_340 = arith.constant 1.600000e+01 : f32
    %1089 = vector.broadcast %cst_340 : f32 to vector<8x1xf32>
    %1090 = arith.divf %1088, %1089 : vector<8x1xf32>
    %cst_341 = arith.constant 0.166666672 : f32
    %1091 = vector.broadcast %cst_341 : f32 to vector<8x1xf32>
    %1092 = arith.mulf %1090, %1091 : vector<8x1xf32>
    %1093 = arith.addf %1084, %1092 : vector<8x1xf32>
    %cst_342 = arith.constant 9.99999996E-13 : f32
    %1094 = vector.broadcast %cst_342 : f32 to vector<8x1xf32>
    %1095 = arith.addf %1093, %1094 : vector<8x1xf32>
    %1096 = math.rsqrt %1095 : vector<8x1xf32>
    %1097 = vector.broadcast %1096 : vector<8x1xf32> to vector<8x64xf32>
    %1098 = arith.mulf %1058, %1097 : vector<8x64xf32>
    %1099 = vector.broadcast %75 : vector<1x64xf32> to vector<8x64xf32>
    %1100 = arith.mulf %1098, %1099 : vector<8x64xf32>
    %c0_343 = arith.constant 0 : index
    %c0_344 = arith.constant 0 : index
    %1101 = vector.load %arg76[%c0_343, %c0_344] : memref<8x64xf32, #tpu.memory_space<vmem>>, vector<8x64xf32>
    tpu.vector_store %arg76[%c0_343, %c0_344], %1100 {strides = array<i32>} : memref<8x64xf32, #tpu.memory_space<vmem>>, vector<8x64xf32>,
    return
  }
}

</mosaic_0001>

<bundles_post_ra>
// kernel: neg.5
= control target key start
LH: loop header
LB: loop body
LE: loop exit
PB: predicated region body
PF: predicated region fallthrough
CT: control target
= control target key end

     0   :  { %s24_s0 = inlined_call_operand.vmem [shape: f32[16,8], index: 0, kind: input, shape index: {}]   ;;  %s25_s1 = inlined_call_operand.vmem [shape: f32[16,8], index: 1, kind: output, shape index: {}]  }
   0x1   :  { %v2_v0 = vld [vmem:[%s24_s0] sm:$0xff] }
   0x2   :  { %v5_v1 = vxor.u32 2147483648, %v2_v0 }
   0x4   :  { %7 = vst [vmem:[%s25_s1] sm:$0xff] %v5_v1 }

// kernel: neg.4
= control target key start
LH: loop header
LB: loop body
LE: loop exit
PB: predicated region body
PF: predicated region fallthrough
CT: control target
= control target key end

     0   :  { %s40_s0 = inlined_call_operand.vmem [shape: f32[32,16], index: 0, kind: input, shape index: {}]   ;;  %s41_s1 = inlined_call_operand.vmem [shape: f32[32,16], index: 1, kind: output, shape index: {}]  }
   0x1   :  { %v2_v0 = vld [vmem:[%s40_s0] sm:$0xff]  ;;  %v16_v1 = vld [vmem:[%s40_s0 + $0x8] sm:$0xff] }
   0x2   :  { %v5_v2 = vxor.u32 2147483648, %v2_v0  ;;  %v12_v3 = vxor.u32 2147483648, %v16_v1 }
   0x4   :  { %7 = vst [vmem:[%s41_s1] sm:$0xff] %v5_v2  ;;  %17 = vst [vmem:[%s41_s1 + $0x8] sm:$0xff] %v12_v3 }

// kernel: forward.1
= control target key start
LH: loop header
LB: loop body
LE: loop exit
PB: predicated region body
PF: predicated region fallthrough
CT: control target
= control target key end

     0   :  { %s11403_s6 = smov 1   ;;  %s11404_s10 = smov 2   ;;  %s13564_s0 = inlined_call_operand.smem [shape: u32[77], index: -1, kind: input, shape index: {}] }
   0x1   :  { %s11590_s5 = sld [smem:[%s13564_s0]]   ;;  %s11405_s14 = smov 3  }
   0x2   :  { %s11595_s9 = sld [smem:[%s13564_s0 + %s11403_s6]]   ;;  %s11406_s18 = smov 4  }
   0x3   :  { %s11600_s13 = sld [smem:[%s13564_s0 + %s11404_s10]]   ;;  %s11407_s22 = smov 5  }
   0x4   :  { %s11605_s17 = sld [smem:[%s13564_s0 + %s11405_s14]]   ;;  %s11408_s26 = smov 6  }
   0x5   :  { %s11610_s21 = sld [smem:[%s13564_s0 + %s11406_s18]]   ;;  %s11409_s30 = smov 7  }
   0x6   :  { %s11615_s25 = sld [smem:[%s13564_s0 + %s11407_s22]]   ;;  %s11410_s4 = smov 8  }
   0x7   :  { %13624 = sst [smem:[#allocation159_spill]] %s11590_s5  ;;  %s11411_s10 = smov 9  }
   0x8   :  { %s11620_s29 = sld [smem:[%s13564_s0 + %s11408_s26]]   ;;  %s11412_s15 = smov 10  }
   0x9   :  { %13625 = sst [smem:[#allocation160_spill]] %s11600_s13  ;;  %s11413_s20 = smov 11  }
   0xa   :  { %s11625_s3 = sld [smem:[%s13564_s0 + %s11409_s30]]   ;;  %s11414_s26 = smov 12  }
   0xb   :  { %13626 = sst [smem:[#allocation161_spill]] %s11610_s21  ;;  %s11415_s1 = smov 13  }
   0xc   :  { %s11630_s8 = sld [smem:[%s13564_s0 + %s11410_s4]]   ;;  %s11416_s7 = smov 14  }
   0xd   :  { %s11635_s14 = sld [smem:[%s13564_s0 + %s11411_s10]]   ;;  %s11418_s22 = smov 16  }
   0xe   :  { %13627 = sst [smem:[#allocation162_spill]] %s11620_s29  ;;  %s11419_s28 = smov 17  }
   0xf   :  { %s11640_s19 = sld [smem:[%s13564_s0 + %s11412_s15]]   ;;  %s11417_s15 = smov 15  }
  0x10   :  { %s11645_s24 = sld [smem:[%s13564_s0 + %s11413_s20]]  }
  0x11   :  { %s11650_s30 = sld [smem:[%s13564_s0 + %s11414_s26]]  }
  0x12   :  { %13628 = sst [smem:[#allocation163_spill]] %s11630_s8 }
  0x13   :  { %s11655_s6 = sld [smem:[%s13564_s0 + %s11415_s1]]  }
  0x14   :  { %s11660_s12 = sld [smem:[%s13564_s0 + %s11416_s7]]   ;;  %s11420_s7 = smov 18  }
  0x15   :  { %13629 = sst [smem:[#allocation164_spill]] %s11640_s19 }
  0x16   :  { %s11665_s20 = sld [smem:[%s13564_s0 + %s11417_s15]]   ;;  %s11421_s15 = smov 19  }
  0x17   :  { %13630 = sst [smem:[#allocation165_spill]] %s11650_s30 }
  0x18   :  { %s11670_s27 = sld [smem:[%s13564_s0 + %s11418_s22]]   ;;  %s11422_s22 = smov 20  }
  0x19   :  { %s11675_s4 = sld [smem:[%s13564_s0 + %s11419_s28]]   ;;  %s11423_s28 = smov 21  }
  0x1a   :  { %13631 = sst [smem:[#allocation166_spill]] %s11660_s12 }
  0x1b   :  { %s11680_s12 = sld [smem:[%s13564_s0 + %s11420_s7]]   ;;  %s11424_s7 = smov 22  }
  0x1c   :  { %s11685_s30 = sld [smem:[%s13564_s0 + %s11421_s15]]   ;;  %s11425_s15 = smov 23  }
  0x1d   :  { %s11695_s19 = sld [smem:[%s13564_s0 + %s11423_s28]]   ;;  %s11427_s28 = smov 25  }
  0x1e   :  { %13632 = sst [smem:[#allocation167_spill]] %s11670_s27 }
  0x1f   :  { %s11690_s27 = sld [smem:[%s13564_s0 + %s11422_s22]]   ;;  %s11426_s22 = smov 24  }
  0x20   :  { %s11705_s8 = sld [smem:[%s13564_s0 + %s11425_s15]]   ;;  %s11429_s15 = smov 27  }
  0x21   :  { %13633 = sst [smem:[#allocation168_spill]] %s11680_s12 }
  0x22   :  { %s11700_s12 = sld [smem:[%s13564_s0 + %s11424_s7]]   ;;  %s11428_s7 = smov 26  }
  0x23   :  { %s11715_s29 = sld [smem:[%s13564_s0 + %s11427_s28]]   ;;  %s11431_s28 = smov 29  }
  0x24   :  { %s11725_s21 = sld [smem:[%s13564_s0 + %s11429_s15]]   ;;  %s11433_s15 = smov 31  }
  0x25   :  { %13634 = sst [smem:[#allocation169_spill]] %s11690_s27 }
  0x26   :  { %s11710_s27 = sld [smem:[%s13564_s0 + %s11426_s22]]   ;;  %s11430_s22 = smov 28  }
  0x27   :  { %s11735_s13 = sld [smem:[%s13564_s0 + %s11431_s28]]   ;;  %s11435_s28 = smov 33  }
  0x28   :  { %13635 = sst [smem:[#allocation170_spill]] %s11700_s12 }
  0x29   :  { %s11720_s12 = sld [smem:[%s13564_s0 + %s11428_s7]]   ;;  %s11432_s7 = smov 30  }
  0x2a   :  { %s11745_s5 = sld [smem:[%s13564_s0 + %s11433_s15]]   ;;  %s11437_s15 = smov 35  }
  0x2c   :  { %13636 = sst [smem:[#allocation171_spill]] %s11710_s27 }
  0x2d   :  { %s11730_s27 = sld [smem:[%s13564_s0 + %s11430_s22]]   ;;  %s11434_s22 = smov 32  }
  0x2e   :  { %13639 = sst [smem:[#allocation174_spill]] %s11735_s13 }
  0x2f   :  { %13637 = sst [smem:[#allocation172_spill]] %s11720_s12 }
  0x30   :  { %s11740_s12 = sld [smem:[%s13564_s0 + %s11432_s7]]   ;;  %s11436_s7 = smov 34  }
  0x31   :  { %13641 = sst [smem:[#allocation176_spill]] %s11745_s5 }
  0x32   :  { %s11755_s13 = sld [smem:[%s13564_s0 + %s11435_s28]]   ;;  %s11439_s28 = smov 37  }
  0x33   :  { %13638 = sst [smem:[#allocation173_spill]] %s11730_s27 }
  0x34   :  { %s11750_s27 = sld [smem:[%s13564_s0 + %s11434_s22]]   ;;  %s11438_s22 = smov 36  }
  0x35   :  { %s11765_s5 = sld [smem:[%s13564_s0 + %s11437_s15]]   ;;  %s11441_s15 = smov 39  }
  0x36   :  { %13640 = sst [smem:[#allocation175_spill]] %s11740_s12 }
  0x37   :  { %s11760_s12 = sld [smem:[%s13564_s0 + %s11436_s7]]   ;;  %s11440_s7 = smov 38  }
  0x38   :  { %13643 = sst [smem:[#allocation178_spill]] %s11755_s13 }
  0x39   :  { %s11775_s13 = sld [smem:[%s13564_s0 + %s11439_s28]]   ;;  %s11443_s28 = smov 41  }
  0x3a   :  { %13642 = sst [smem:[#allocation177_spill]] %s11750_s27 }
  0x3b   :  { %13645 = sst [smem:[#allocation180_spill]] %s11765_s5 }
  0x3c   :  { %s11770_s27 = sld [smem:[%s13564_s0 + %s11438_s22]]   ;;  %s11442_s22 = smov 40  }
  0x3d   :  { %13644 = sst [smem:[#allocation179_spill]] %s11760_s12 }
  0x3e   :  { %s11780_s12 = sld [smem:[%s13564_s0 + %s11440_s7]]   ;;  %s11444_s7 = smov 42  }
  0x3f   :  { %13647 = sst [smem:[#allocation182_spill]] %s11775_s13 }
  0x40   :  { %s11785_s5 = sld [smem:[%s13564_s0 + %s11441_s15]]   ;;  %s11445_s15 = smov 43  }
  0x41   :  { %s11795_s13 = sld [smem:[%s13564_s0 + %s11443_s28]]   ;;  %s11447_s28 = smov 45  }
  0x42   :  { %13646 = sst [smem:[#allocation181_spill]] %s11770_s27 }
  0x43   :  { %s11790_s27 = sld [smem:[%s13564_s0 + %s11442_s22]]   ;;  %s11446_s22 = smov 44  }
  0x44   :  { %13648 = sst [smem:[#allocation183_spill]] %s11780_s12 }
  0x45   :  { %s11800_s12 = sld [smem:[%s13564_s0 + %s11444_s7]]   ;;  %s11448_s7 = smov 46  }
  0x46   :  { %13649 = sst [smem:[#allocation184_spill]] %s11785_s5 }
  0x47   :  { %13651 = sst [smem:[#allocation186_spill]] %s11795_s13 }
  0x48   :  { %s11805_s5 = sld [smem:[%s13564_s0 + %s11445_s15]]   ;;  %s11449_s15 = smov 47  }
  0x49   :  { %13650 = sst [smem:[#allocation185_spill]] %s11790_s27 }
  0x4a   :  { %s11810_s27 = sld [smem:[%s13564_s0 + %s11446_s22]]   ;;  %s11450_s22 = smov 48  }
  0x4b   :  { %13652 = sst [smem:[#allocation187_spill]] %s11800_s12 }
  0x4c   :  { %s11815_s13 = sld [smem:[%s13564_s0 + %s11447_s28]]   ;;  %s11451_s28 = smov 49  }
  0x4d   :  { %s11820_s12 = sld [smem:[%s13564_s0 + %s11448_s7]]   ;;  %s11452_s7 = smov 50  }
  0x4e   :  { %13653 = sst [smem:[#allocation188_spill]] %s11805_s5 }
  0x4f   :  { %s11825_s5 = sld [smem:[%s13564_s0 + %s11449_s15]]   ;;  %s11453_s15 = smov 51  }
  0x50   :  { %13654 = sst [smem:[#allocation189_spill]] %s11810_s27 }
  0x51   :  { %s11830_s27 = sld [smem:[%s13564_s0 + %s11450_s22]]   ;;  %s11454_s22 = smov 52  }
  0x52   :  { %13655 = sst [smem:[#allocation190_spill]] %s11815_s13 }
  0x53   :  { %13656 = sst [smem:[#allocation191_spill]] %s11820_s12 }
  0x54   :  { %s11835_s13 = sld [smem:[%s13564_s0 + %s11451_s28]]   ;;  %s11455_s28 = smov 53  }
  0x55   :  { %13657 = sst [smem:[#allocation192_spill]] %s11825_s5 }
  0x56   :  { %s11840_s12 = sld [smem:[%s13564_s0 + %s11452_s7]]   ;;  %s11456_s7 = smov 54  }
  0x57   :  { %13658 = sst [smem:[#allocation193_spill]] %s11830_s27 }
  0x58   :  { %s11845_s5 = sld [smem:[%s13564_s0 + %s11453_s15]]   ;;  %s11457_s15 = smov 55  }
  0x59   :  { %s11850_s27 = sld [smem:[%s13564_s0 + %s11454_s22]]   ;;  %s11458_s22 = smov 56  }
  0x5a   :  { %13659 = sst [smem:[#allocation194_spill]] %s11835_s13 }
  0x5b   :  { %s11855_s13 = sld [smem:[%s13564_s0 + %s11455_s28]]   ;;  %s11459_s28 = smov 57  }
  0x5c   :  { %13660 = sst [smem:[#allocation195_spill]] %s11840_s12 }
  0x5d   :  { %s11860_s12 = sld [smem:[%s13564_s0 + %s11456_s7]]   ;;  %s11460_s7 = smov 58  }
  0x5e   :  { %13661 = sst [smem:[#allocation196_spill]] %s11845_s5 }
  0x5f   :  { %13662 = sst [smem:[#allocation197_spill]] %s11850_s27 }
  0x60   :  { %s11865_s5 = sld [smem:[%s13564_s0 + %s11457_s15]]   ;;  %s11461_s15 = smov 59  }
  0x61   :  { %13663 = sst [smem:[#allocation198_spill]] %s11855_s13 }
  0x62   :  { %s11870_s27 = sld [smem:[%s13564_s0 + %s11458_s22]]   ;;  %s11462_s22 = smov 60  }
  0x63   :  { %13664 = sst [smem:[#allocation199_spill]] %s11860_s12 }
  0x64   :  { %s11875_s13 = sld [smem:[%s13564_s0 + %s11459_s28]]   ;;  %s11463_s28 = smov 61  }
  0x65   :  { %s11880_s12 = sld [smem:[%s13564_s0 + %s11460_s7]]   ;;  %s11464_s7 = smov 62  }
  0x66   :  { %13665 = sst [smem:[#allocation200_spill]] %s11865_s5 }
  0x67   :  { %s11885_s5 = sld [smem:[%s13564_s0 + %s11461_s15]]   ;;  %s11465_s15 = smov 63  }
  0x68   :  { %13666 = sst [smem:[#allocation201_spill]] %s11870_s27 }
  0x69   :  { %s11890_s27 = sld [smem:[%s13564_s0 + %s11462_s22]]   ;;  %s11466_s22 = smov 64  }
  0x6a   :  { %13667 = sst [smem:[#allocation202_spill]] %s11875_s13 }
  0x6b   :  { %13668 = sst [smem:[#allocation203_spill]] %s11880_s12 }
  0x6c   :  { %s11895_s13 = sld [smem:[%s13564_s0 + %s11463_s28]]   ;;  %s11467_s28 = smov 65  }
  0x6d   :  { %13669 = sst [smem:[#allocation204_spill]] %s11885_s5 }
  0x6e   :  { %s11900_s12 = sld [smem:[%s13564_s0 + %s11464_s7]]   ;;  %s11468_s7 = smov 66  }
  0x6f   :  { %13670 = sst [smem:[#allocation205_spill]] %s11890_s27 }
  0x70   :  { %s11905_s5 = sld [smem:[%s13564_s0 + %s11465_s15]]   ;;  %s11469_s15 = smov 67  }
  0x71   :  { %s11910_s27 = sld [smem:[%s13564_s0 + %s11466_s22]]   ;;  %s11470_s22 = smov 68  }
  0x72   :  { %13671 = sst [smem:[#allocation206_spill]] %s11895_s13 }
  0x73   :  { %s11915_s13 = sld [smem:[%s13564_s0 + %s11467_s28]]   ;;  %s11471_s28 = smov 69  }
  0x74   :  { %13672 = sst [smem:[#allocation207_spill]] %s11900_s12 }
  0x75   :  { %s11920_s12 = sld [smem:[%s13564_s0 + %s11468_s7]]   ;;  %s11472_s7 = smov 70  }
  0x76   :  { %13673 = sst [smem:[#allocation208_spill]] %s11905_s5 }
  0x77   :  { %13674 = sst [smem:[#allocation209_spill]] %s11910_s27 }
  0x78   :  { %s11925_s5 = sld [smem:[%s13564_s0 + %s11469_s15]]   ;;  %s11473_s15 = smov 71  }
  0x79   :  { %13675 = sst [smem:[#allocation210_spill]] %s11915_s13 }
  0x7a   :  { %s11930_s27 = sld [smem:[%s13564_s0 + %s11470_s22]]   ;;  %s11474_s22 = smov 72  }
  0x7b   :  { %13676 = sst [smem:[#allocation211_spill]] %s11920_s12 }
  0x7c   :  { %s11935_s13 = sld [smem:[%s13564_s0 + %s11471_s28]]   ;;  %s11475_s28 = smov 73  }
  0x7d   :  { %s11940_s12 = sld [smem:[%s13564_s0 + %s11472_s7]]   ;;  %s11476_s7 = smov 74  }
  0x7e   :  { %13677 = sst [smem:[#allocation212_spill]] %s11925_s5 }
  0x7f   :  { %s11945_s5 = sld [smem:[%s13564_s0 + %s11473_s15]]   ;;  %s11477_s15 = smov 75  }
  0x80   :  { %13678 = sst [smem:[#allocation213_spill]] %s11930_s27 }
  0x81   :  { %s11950_s27 = sld [smem:[%s13564_s0 + %s11474_s22]]   ;;  %s11478_s22 = smov 76  }
  0x82   :  { %13679 = sst [smem:[#allocation214_spill]] %s11935_s13 }
  0x83   :  { %13680 = sst [smem:[#allocation215_spill]] %s11940_s12 }
  0x84   :  { %s11955_s13 = sld [smem:[%s13564_s0 + %s11475_s28]]  }
  0x85   :  { %13681 = sst [smem:[#allocation216_spill]] %s11945_s5 }
  0x86   :  { %s11960_s12 = sld [smem:[%s13564_s0 + %s11476_s7]]  }
  0x87   :  { %13682 = sst [smem:[#allocation217_spill]] %s11950_s27 }
  0x88   :  { %s11965_s5 = sld [smem:[%s13564_s0 + %s11477_s15]]  }
  0x89   :  { %s11970_s27 = sld [smem:[%s13564_s0 + %s11478_s22]]  }
  0x8a   :  { %158 = vsyncpa [#allocation3], 0 }
  0x8b   :  { %159 = vsyncpa [#allocation6], 0 }
  0x8c   :  { %160 = vsyncpa [#allocation9], 0 }
  0x8d   :  { %161 = vsyncpa [#allocation12], 0 }
  0x8e   :  { %162 = vsyncpa [#allocation15], 0 }
  0x8f   :  { %163 = vsyncpa [#allocation18], 0 }
  0x90   :  { %164 = vsyncpa [#allocation21], 0 }
  0x91   :  { %165 = vsyncpa [#allocation24], 0 }
  0x92   :  { %166 = vsyncpa [#allocation27], 0 }
  0x93   :  { %167 = vsyncpa [#allocation30], 0 }
  0x94   :  { %168 = vsyncpa [#allocation33], 0 }
  0x95   :  { %169 = vsyncpa [#allocation36], 0 }
  0x96   :  { %170 = vsyncpa [#allocation39], 0 }
  0x97   :  { %171 = vsyncpa [#allocation42], 0 }
  0x98   :  { %172 = vsyncpa [#allocation45], 0 }
  0x99   :  { %173 = vsyncpa [#allocation48], 0 }
  0x9a   :  { %174 = vsyncpa [#allocation51], 0 }
  0x9b   :  { %175 = vsyncpa [#allocation54], 0 }
  0x9c   :  { %176 = vsyncpa [#allocation57], 0 }
  0x9d   :  { %177 = vsyncpa [#allocation60], 0 }
  0x9e   :  { %178 = vsyncpa [#allocation63], 0 }
  0x9f   :  { %179 = vsyncpa [#allocation66], 0 }
  0xa0   :  { %180 = vsyncpa [#allocation69], 0 }
  0xa1   :  { %181 = vsyncpa [#allocation72], 0 }
  0xa2   :  { %182 = vsyncpa [#allocation75], 0 }
  0xa3   :  { %183 = vsyncpa [#allocation78], 0 }
  0xa4   :  { %184 = vsyncpa [#allocation81], 0 }
  0xa5   :  { %185 = vsyncpa [#allocation84], 0 }
  0xa6   :  { %186 = vsyncpa [#allocation87], 0 }
  0xa7   :  { %187 = vsyncpa [#allocation90], 0 }
  0xa8   :  { %188 = vsyncpa [#allocation93], 0 }
  0xa9   :  { %189 = vsyncpa [#allocation96], 0 }
  0xaa   :  { %190 = vsyncpa [#allocation99], 0 }
  0xab   :  { %191 = vsyncpa [#allocation102], 0 }
  0xac   :  { %192 = vsyncpa [#allocation105], 0 }
  0xad   :  { %193 = vsyncpa [#allocation108], 0 }
  0xae   :  { %194 = vsyncpa [#allocation111], 0 }
  0xaf   :  { %195 = vsyncpa [#allocation114], 0 }
  0xb0   :  { %196 = vsyncpa [#allocation117], 0 }
  0xb1   :  { %197 = vsyncpa [#allocation4], 0  ;;  %s11479_s0 = smov [#allocation5]   ;;  %s9629_s1 = scalar_lea.hbm %s11595_s9, 256 }
  0xb2   :  { %s213_s28 = sshll.u32 %s11479_s0, 4  ;;  %p9630_p0 = scmp.ne.s32.totalorder %s11595_s9, %s9629_s1  ;;  %s214_s28 = int_to_ptr.vmem [resolvable:$true] %s213_s28 }
  0xb3   :  { %p9633_p1 = scmp.lt.u32.totalorder %s9629_s1, %s11595_s9 }
  0xb5   :  { %p9635_p2 = pnand %p9633_p1, %p9630_p0 }
  0xb7   :  { %9638 = shalt.err (!%p9635_p2)
}
  0xb8   :  { %s9639_s2 = scalar_lea.vmem %s214_s28, 256  ;;  %p9644_p4 = scmp.lt.s32.totalorder %s214_s28, %s214_s28 }
  0xb9   :  { %p9640_p3 = scmp.ne.s32.totalorder %s214_s28, %s9639_s2  ;;  %p9645_p5 = scmp.lt.s32.totalorder %s9639_s2, %s9639_s2 }
  0xbb   :  { %p9646_p6 = por %p9645_p5, %p9644_p4 }
  0xbd   :  { %p9647_p7 = pnand %p9646_p6, %p9640_p3 }
  0xbf   :  { %9650 = shalt.err (!%p9647_p7)
}
  0xc0   :  { %s11480_s7 = smov 128   ;;  %s11481_s10 = smov 8  }
  0xc1   :  { %219 = dma.hbm_to_vmem [thread:$0]  %s11595_s9, 256, %s214_s28, [#allocation6], %s11480_s7, %s11480_s7, %s11481_s10  }
  0xc2   :  { %s11482_s11 = smov [#allocation8]   ;;  %s11483_s16 = smov [#allocation11]  }
  0xc3   :  { %s237_s15 = sshll.u32 %s11482_s11, 4  ;;  %s262_s18 = sshll.u32 %s11483_s16, 4  ;;  %s238_s15 = int_to_ptr.vmem [resolvable:$true] %s237_s15  ;;  %s263_s18 = int_to_ptr.vmem [resolvable:$true] %s262_s18 }
  0xc4   :  { %s9651_s22 = scalar_lea.hbm %s11605_s17, 256 }
  0xc5   :  { %p9652_p8 = scmp.ne.s32.totalorder %s11605_s17, %s9651_s22  ;;  %p9655_p9 = scmp.lt.u32.totalorder %s9651_s22, %s11605_s17 }
  0xc7   :  { %p9657_p10 = pnand %p9655_p9, %p9652_p8 }
  0xc9   :  { %9660 = shalt.err (!%p9657_p10)
}
  0xca   :  { %s9661_s23 = scalar_lea.vmem %s238_s15, 256  ;;  %p9666_p12 = scmp.lt.s32.totalorder %s238_s15, %s238_s15 }
  0xcb   :  { %p9662_p11 = scmp.ne.s32.totalorder %s238_s15, %s9661_s23  ;;  %p9667_p13 = scmp.lt.s32.totalorder %s9661_s23, %s9661_s23 }
  0xcd   :  { %p9668_p0 = por %p9667_p13, %p9666_p12 }
  0xcf   :  { %p9669_p1 = pnand %p9668_p0, %p9662_p11 }
  0xd1   :  { %9672 = shalt.err (!%p9669_p1)
}
  0xd2   :  { %243 = dma.hbm_to_vmem [thread:$0]  %s11605_s17, 256, %s238_s15, [#allocation9], %s11480_s7, %s11480_s7, %s11481_s10  }
  0xd3   :  { %s9673_s9 = scalar_lea.hbm %s11615_s25, 128 }
  0xd4   :  { %p9674_p2 = scmp.ne.s32.totalorder %s11615_s25, %s9673_s9  ;;  %p9677_p3 = scmp.lt.u32.totalorder %s9673_s9, %s11615_s25 }
  0xd6   :  { %p9679_p4 = pnand %p9677_p3, %p9674_p2 }
  0xd8   :  { %9682 = shalt.err (!%p9679_p4)
}
  0xd9   :  { %s9683_s26 = scalar_lea.vmem %s263_s18, 128  ;;  %p9688_p6 = scmp.lt.s32.totalorder %s263_s18, %s263_s18 }
  0xda   :  { %p9684_p5 = scmp.ne.s32.totalorder %s263_s18, %s9683_s26  ;;  %p9689_p7 = scmp.lt.s32.totalorder %s9683_s26, %s9683_s26 }
  0xdc   :  { %p9690_p8 = por %p9689_p7, %p9688_p6 }
  0xde   :  { %p9691_p9 = pnand %p9690_p8, %p9684_p5 }
  0xe0   :  { %9694 = shalt.err (!%p9691_p9)
}
  0xe1   :  { %265 = dma.hbm_to_vmem [thread:$0]  %s11615_s25, 128, %s263_s18, [#allocation12]  }
  0xe2   :  { %s11484_s0 = smov [#allocation14]   ;;  %s11485_s28 = smov [#allocation17]  }
  0xe3   :  { %s283_s17 = sshll.u32 %s11484_s0, 4  ;;  %s308_s1 = sshll.u32 %s11485_s28, 4  ;;  %s284_s17 = int_to_ptr.vmem [resolvable:$true] %s283_s17  ;;  %s309_s1 = int_to_ptr.vmem [resolvable:$true] %s308_s1 }
  0xe4   :  { %s9695_s2 = scalar_lea.hbm %s11625_s3, 256 }
  0xe5   :  { %p9696_p10 = scmp.ne.s32.totalorder %s11625_s3, %s9695_s2  ;;  %p9699_p11 = scmp.lt.u32.totalorder %s9695_s2, %s11625_s3 }
  0xe7   :  { %p9701_p12 = pnand %p9699_p11, %p9696_p10 }
  0xe9   :  { %9704 = shalt.err (!%p9701_p12)
}
  0xea   :  { %s9705_s11 = scalar_lea.vmem %s284_s17, 256  ;;  %p9710_p0 = scmp.lt.s32.totalorder %s284_s17, %s284_s17 }
  0xeb   :  { %p9706_p13 = scmp.ne.s32.totalorder %s284_s17, %s9705_s11  ;;  %p9711_p1 = scmp.lt.s32.totalorder %s9705_s11, %s9705_s11 }
  0xed   :  { %p9712_p2 = por %p9711_p1, %p9710_p0 }
  0xef   :  { %p9713_p3 = pnand %p9712_p2, %p9706_p13 }
  0xf1   :  { %9716 = shalt.err (!%p9713_p3)
}
  0xf2   :  { %289 = dma.hbm_to_vmem [thread:$0]  %s11625_s3, 256, %s284_s17, [#allocation15], %s11480_s7, %s11480_s7, %s11481_s10  }
  0xf3   :  { %s9717_s25 = scalar_lea.hbm %s11635_s14, 32 }
  0xf4   :  { %p9718_p4 = scmp.ne.s32.totalorder %s11635_s14, %s9717_s25  ;;  %p9721_p5 = scmp.lt.u32.totalorder %s9717_s25, %s11635_s14 }
  0xf6   :  { %p9723_p6 = pnand %p9721_p5, %p9718_p4 }
  0xf8   :  { %9726 = shalt.err (!%p9723_p6)
}
  0xf9   :  { %s9727_s15 = scalar_lea.vmem %s309_s1, 32  ;;  %p9732_p8 = scmp.lt.s32.totalorder %s309_s1, %s309_s1 }
  0xfa   :  { %p9728_p7 = scmp.ne.s32.totalorder %s309_s1, %s9727_s15  ;;  %p9733_p9 = scmp.lt.s32.totalorder %s9727_s15, %s9727_s15 }
  0xfc   :  { %p9734_p10 = por %p9733_p9, %p9732_p8 }
  0xfe   :  { %p9735_p11 = pnand %p9734_p10, %p9728_p7 }
 0x100   :  { %9738 = shalt.err (!%p9735_p11)
}
 0x101   :  { %311 = dma.hbm_to_vmem [thread:$0]  %s11635_s14, 32, %s309_s1, [#allocation18]  }
 0x102   :  { %s11486_s16 = smov [#allocation20]   ;;  %s11487_s18 = smov [#allocation23]  }
 0x103   :  { %s328_s3 = sshll.u32 %s11486_s16, 4  ;;  %s347_s22 = sshll.u32 %s11487_s18, 4  ;;  %s329_s3 = int_to_ptr.vmem [resolvable:$true] %s328_s3  ;;  %s348_s22 = int_to_ptr.vmem [resolvable:$true] %s347_s22 }
 0x104   :  { %s9739_s23 = scalar_lea.hbm %s11645_s24, 16 }
 0x105   :  { %p9740_p12 = scmp.ne.s32.totalorder %s11645_s24, %s9739_s23  ;;  %p9743_p13 = scmp.lt.u32.totalorder %s9739_s23, %s11645_s24 }
 0x107   :  { %p9745_p0 = pnand %p9743_p13, %p9740_p12 }
 0x109   :  { %9748 = shalt.err (!%p9745_p0)
}
 0x10a   :  { %s9749_s9 = scalar_lea.vmem %s329_s3, 16  ;;  %s9753_s26 = scalar_lea.vmem %s329_s3, 32 }
 0x10b   :  { %p9750_p1 = scmp.ne.s32.totalorder %s329_s3, %s9749_s9  ;;  %p9754_p2 = scmp.lt.s32.totalorder %s329_s3, %s329_s3 }
 0x10c   :  { %p9755_p3 = scmp.lt.s32.totalorder %s9753_s26, %s9749_s9 }
 0x10e   :  { %p9756_p4 = por %p9755_p3, %p9754_p2 }
 0x110   :  { %p9757_p5 = pnand %p9756_p4, %p9750_p1 }
 0x112   :  { %9760 = shalt.err (!%p9757_p5)
}
 0x113   :  { %331 = dma.hbm_to_vmem [thread:$0]  %s11645_s24, 16, %s329_s3, [#allocation21]  }
 0x114   :  { %s9761_s14 = scalar_lea.hbm %s11655_s6, 1024 }
 0x115   :  { %p9762_p6 = scmp.ne.s32.totalorder %s11655_s6, %s9761_s14  ;;  %p9765_p7 = scmp.lt.u32.totalorder %s9761_s14, %s11655_s6 }
 0x117   :  { %p9767_p8 = pnand %p9765_p7, %p9762_p6 }
 0x119   :  { %9770 = shalt.err (!%p9767_p8)
}
 0x11a   :  { %s9771_s0 = scalar_lea.vmem %s348_s22, 1024  ;;  %p9776_p10 = scmp.lt.s32.totalorder %s348_s22, %s348_s22 }
 0x11b   :  { %p9772_p9 = scmp.ne.s32.totalorder %s348_s22, %s9771_s0  ;;  %p9777_p11 = scmp.lt.s32.totalorder %s9771_s0, %s9771_s0 }
 0x11d   :  { %p9778_p12 = por %p9777_p11, %p9776_p10 }
 0x11f   :  { %p9779_p13 = pnand %p9778_p12, %p9772_p9 }
 0x121   :  { %9782 = shalt.err (!%p9779_p13)
}
 0x122   :  { %353 = dma.hbm_to_vmem [thread:$0]  %s11655_s6, 1024, %s348_s22, [#allocation24], %s11480_s7, %s11480_s7, %s11481_s10  }
 0x123   :  { %s11488_s24 = smov [#allocation26]   ;;  %s11489_s28 = smov [#allocation29]  }
 0x124   :  { %s372_s17 = sshll.u32 %s11488_s24, 4  ;;  %s393_s1 = sshll.u32 %s11489_s28, 4  ;;  %s373_s17 = int_to_ptr.vmem [resolvable:$true] %s372_s17  ;;  %s394_s1 = int_to_ptr.vmem [resolvable:$true] %s393_s1 }
 0x125   :  { %s9783_s2 = scalar_lea.hbm %s11665_s20, 16 }
 0x126   :  { %p9784_p0 = scmp.ne.s32.totalorder %s11665_s20, %s9783_s2  ;;  %p9787_p1 = scmp.lt.u32.totalorder %s9783_s2, %s11665_s20 }
 0x128   :  { %p9789_p2 = pnand %p9787_p1, %p9784_p0 }
 0x12a   :  { %9792 = shalt.err (!%p9789_p2)
}
 0x12b   :  { %s9793_s11 = scalar_lea.vmem %s373_s17, 16  ;;  %s9797_s25 = scalar_lea.vmem %s373_s17, 32 }
 0x12c   :  { %p9794_p3 = scmp.ne.s32.totalorder %s373_s17, %s9793_s11  ;;  %p9798_p4 = scmp.lt.s32.totalorder %s373_s17, %s373_s17 }
 0x12d   :  { %p9799_p5 = scmp.lt.s32.totalorder %s9797_s25, %s9793_s11 }
 0x12f   :  { %p9800_p6 = por %p9799_p5, %p9798_p4 }
 0x131   :  { %p9801_p7 = pnand %p9800_p6, %p9794_p3 }
 0x133   :  { %9804 = shalt.err (!%p9801_p7)
}
 0x134   :  { %375 = dma.hbm_to_vmem [thread:$0]  %s11665_s20, 16, %s373_s17, [#allocation27]  }
 0x135   :  { %s9805_s6 = scalar_lea.hbm %s11675_s4, 512 }
 0x136   :  { %p9806_p8 = scmp.ne.s32.totalorder %s11675_s4, %s9805_s6  ;;  %p9809_p9 = scmp.lt.u32.totalorder %s9805_s6, %s11675_s4 }
 0x138   :  { %p9811_p10 = pnand %p9809_p9, %p9806_p8 }
 0x13a   :  { %9814 = shalt.err (!%p9811_p10)
}
 0x13b   :  { %s9815_s15 = scalar_lea.vmem %s394_s1, 512  ;;  %p9820_p12 = scmp.lt.s32.totalorder %s394_s1, %s394_s1 }
 0x13c   :  { %p9816_p11 = scmp.ne.s32.totalorder %s394_s1, %s9815_s15  ;;  %p9821_p13 = scmp.lt.s32.totalorder %s9815_s15, %s9815_s15 }
 0x13e   :  { %p9822_p0 = por %p9821_p13, %p9820_p12 }
 0x140   :  { %p9823_p1 = pnand %p9822_p0, %p9816_p11 }
 0x142   :  { %9826 = shalt.err (!%p9823_p1)
}
 0x143   :  { %399 = dma.hbm_to_vmem [thread:$0]  %s11675_s4, 512, %s394_s1, [#allocation30], %s11480_s7, %s11480_s7, %s11481_s10  }
 0x144   :  { %s11490_s20 = smov [#allocation32]   ;;  %s11491_s3 = smov [#allocation35]  }
 0x145   :  { %s415_s16 = sshll.u32 %s11490_s20, 4  ;;  %s438_s18 = sshll.u32 %s11491_s3, 4  ;;  %s416_s16 = int_to_ptr.vmem [resolvable:$true] %s415_s16  ;;  %s439_s18 = int_to_ptr.vmem [resolvable:$true] %s438_s18 }
 0x146   :  { %s9827_s22 = scalar_lea.hbm %s11685_s30, 256 }
 0x147   :  { %p9828_p2 = scmp.ne.s32.totalorder %s11685_s30, %s9827_s22  ;;  %p9831_p3 = scmp.lt.u32.totalorder %s9827_s22, %s11685_s30 }
 0x149   :  { %p9833_p4 = pnand %p9831_p3, %p9828_p2 }
 0x14b   :  { %9836 = shalt.err (!%p9833_p4)
}
 0x14c   :  { %s9837_s23 = scalar_lea.vmem %s416_s16, 256  ;;  %p9842_p6 = scmp.lt.s32.totalorder %s416_s16, %s416_s16 }
 0x14d   :  { %p9838_p5 = scmp.ne.s32.totalorder %s416_s16, %s9837_s23  ;;  %p9843_p7 = scmp.lt.s32.totalorder %s9837_s23, %s9837_s23 }
 0x14f   :  { %p9844_p8 = por %p9843_p7, %p9842_p6 }
 0x151   :  { %p9845_p9 = pnand %p9844_p8, %p9838_p5 }
 0x153   :  { %9848 = shalt.err (!%p9845_p9)
}
 0x154   :  { %421 = dma.hbm_to_vmem [thread:$0]  %s11685_s30, 256, %s416_s16, [#allocation33], %s11480_s7, %s11480_s7, %s11481_s10  }
 0x155   :  { %s9849_s4 = scalar_lea.hbm %s11695_s19, 128 }
 0x156   :  { %p9850_p10 = scmp.ne.s32.totalorder %s11695_s19, %s9849_s4  ;;  %p9853_p11 = scmp.lt.u32.totalorder %s9849_s4, %s11695_s19 }
 0x158   :  { %p9855_p12 = pnand %p9853_p11, %p9850_p10 }
 0x15a   :  { %9858 = shalt.err (!%p9855_p12)
}
 0x15b   :  { %s9859_s9 = scalar_lea.vmem %s439_s18, 128  ;;  %p9864_p0 = scmp.lt.s32.totalorder %s439_s18, %s439_s18 }
 0x15c   :  { %p9860_p13 = scmp.ne.s32.totalorder %s439_s18, %s9859_s9  ;;  %p9865_p1 = scmp.lt.s32.totalorder %s9859_s9, %s9859_s9 }
 0x15e   :  { %p9866_p2 = por %p9865_p1, %p9864_p0 }
 0x160   :  { %p9867_p3 = pnand %p9866_p2, %p9860_p13 }
 0x162   :  { %9870 = shalt.err (!%p9867_p3)
}
 0x163   :  { %441 = dma.hbm_to_vmem [thread:$0]  %s11695_s19, 128, %s439_s18, [#allocation36]  }
 0x164   :  { %s11492_s26 = smov [#allocation38]   ;;  %s11493_s14 = smov [#allocation41]  }
 0x165   :  { %s458_s30 = sshll.u32 %s11492_s26, 4  ;;  %s478_s0 = sshll.u32 %s11493_s14, 4  ;;  %s459_s30 = int_to_ptr.vmem [resolvable:$true] %s458_s30  ;;  %s479_s0 = int_to_ptr.vmem [resolvable:$true] %s478_s0 }
 0x166   :  { %s9871_s24 = scalar_lea.hbm %s11705_s8, 16 }
 0x167   :  { %p9872_p4 = scmp.ne.s32.totalorder %s11705_s8, %s9871_s24  ;;  %p9875_p5 = scmp.lt.u32.totalorder %s9871_s24, %s11705_s8 }
 0x169   :  { %p9877_p6 = pnand %p9875_p5, %p9872_p4 }
 0x16b   :  { %9880 = shalt.err (!%p9877_p6)
}
 0x16c   :  { %s9881_s17 = scalar_lea.vmem %s459_s30, 16  ;;  %s9885_s28 = scalar_lea.vmem %s459_s30, 32 }
 0x16d   :  { %p9882_p7 = scmp.ne.s32.totalorder %s459_s30, %s9881_s17  ;;  %p9886_p8 = scmp.lt.s32.totalorder %s459_s30, %s459_s30 }
 0x16e   :  { %p9887_p9 = scmp.lt.s32.totalorder %s9885_s28, %s9881_s17 }
 0x170   :  { %p9888_p10 = por %p9887_p9, %p9886_p8 }
 0x172   :  { %p9889_p11 = pnand %p9888_p10, %p9882_p7 }
 0x174   :  { %9892 = shalt.err (!%p9889_p11)
}
 0x175   :  { %461 = dma.hbm_to_vmem [thread:$0]  %s11705_s8, 16, %s459_s30, [#allocation39]  }
 0x176   :  { %s9893_s19 = scalar_lea.hbm %s11715_s29, 16 }
 0x177   :  { %p9894_p12 = scmp.ne.s32.totalorder %s11715_s29, %s9893_s19  ;;  %p9897_p13 = scmp.lt.u32.totalorder %s9893_s19, %s11715_s29 }
 0x179   :  { %p9899_p0 = pnand %p9897_p13, %p9894_p12 }
 0x17b   :  { %9902 = shalt.err (!%p9899_p0)
}
 0x17c   :  { %s9903_s1 = scalar_lea.vmem %s479_s0, 16  ;;  %s9907_s2 = scalar_lea.vmem %s479_s0, 32 }
 0x17d   :  { %p9904_p1 = scmp.ne.s32.totalorder %s479_s0, %s9903_s1  ;;  %p9908_p2 = scmp.lt.s32.totalorder %s479_s0, %s479_s0 }
 0x17e   :  { %p9909_p3 = scmp.lt.s32.totalorder %s9907_s2, %s9903_s1 }
 0x180   :  { %p9910_p4 = por %p9909_p3, %p9908_p2 }
 0x182   :  { %p9911_p5 = pnand %p9910_p4, %p9904_p1 }
 0x184   :  { %9914 = shalt.err (!%p9911_p5)
}
 0x185   :  { %481 = dma.hbm_to_vmem [thread:$0]  %s11715_s29, 16, %s479_s0, [#allocation42]  }
 0x186   :  { %s11494_s8 = smov [#allocation44]   ;;  %s11495_s25 = smov [#allocation47]  }
 0x187   :  { %s500_s11 = sshll.u32 %s11494_s8, 4  ;;  %s522_s6 = sshll.u32 %s11495_s25, 4  ;;  %s501_s11 = int_to_ptr.vmem [resolvable:$true] %s500_s11  ;;  %s523_s6 = int_to_ptr.vmem [resolvable:$true] %s522_s6 }
 0x188   :  { %s9915_s15 = scalar_lea.hbm %s11725_s21, 16 }
 0x189   :  { %p9916_p6 = scmp.ne.s32.totalorder %s11725_s21, %s9915_s15  ;;  %p9919_p7 = scmp.lt.u32.totalorder %s9915_s15, %s11725_s21 }
 0x18b   :  { %p9921_p8 = pnand %p9919_p7, %p9916_p6 }
 0x18d   :  { %9924 = shalt.err (!%p9921_p8)
}
 0x18e   :  { %s9925_s20 = scalar_lea.vmem %s501_s11, 16  ;;  %s9929_s16 = scalar_lea.vmem %s501_s11, 32 }
 0x18f   :  { %p9926_p9 = scmp.ne.s32.totalorder %s501_s11, %s9925_s20  ;;  %p9930_p10 = scmp.lt.s32.totalorder %s501_s11, %s501_s11 }
 0x190   :  { %p9931_p11 = scmp.lt.s32.totalorder %s9929_s16, %s9925_s20 }
 0x192   :  { %p9932_p12 = por %p9931_p11, %p9930_p10 }
 0x194   :  { %p9933_p13 = pnand %p9932_p12, %p9926_p9 }
 0x196   :  { %9936 = shalt.err (!%p9933_p13)
}
 0x197   :  { %s13683_s29 = sld [smem:[#allocation174_spill]] }
 0x198   :  { %503 = dma.hbm_to_vmem [thread:$0]  %s11725_s21, 16, %s501_s11, [#allocation45]  }
 0x19d   :  { %s9937_s3 = scalar_lea.hbm %s13683_s29, 16 }
 0x19e   :  { %p9938_p0 = scmp.ne.s32.totalorder %s13683_s29, %s9937_s3  ;;  %p9941_p1 = scmp.lt.u32.totalorder %s9937_s3, %s13683_s29 }
 0x1a0   :  { %p9943_p2 = pnand %p9941_p1, %p9938_p0 }
 0x1a2   :  { %9946 = shalt.err (!%p9943_p2)
}
 0x1a3   :  { %s9947_s18 = scalar_lea.vmem %s523_s6, 16  ;;  %s9951_s22 = scalar_lea.vmem %s523_s6, 32 }
 0x1a4   :  { %p9948_p3 = scmp.ne.s32.totalorder %s523_s6, %s9947_s18  ;;  %p9952_p4 = scmp.lt.s32.totalorder %s523_s6, %s523_s6 }
 0x1a5   :  { %p9953_p5 = scmp.lt.s32.totalorder %s9951_s22, %s9947_s18 }
 0x1a7   :  { %p9954_p6 = por %p9953_p5, %p9952_p4 }
 0x1a9   :  { %p9955_p7 = pnand %p9954_p6, %p9948_p3 }
 0x1ab   :  { %9958 = shalt.err (!%p9955_p7)
}
 0x1ac   :  { %s13684_s23 = sld [smem:[#allocation176_spill]]  ;;  %s11496_s21 = smov [#allocation50]  }
 0x1ad   :  { %525 = dma.hbm_to_vmem [thread:$0]  %s13683_s29, 16, %s523_s6, [#allocation48]  }
 0x1ae   :  { %s543_s4 = sshll.u32 %s11496_s21, 4  ;;  %s11497_s9 = smov [#allocation53]   ;;  %s544_s4 = int_to_ptr.vmem [resolvable:$true] %s543_s4 }
 0x1af   :  { %s565_s26 = sshll.u32 %s11497_s9, 4  ;;  %s566_s26 = int_to_ptr.vmem [resolvable:$true] %s565_s26 }
 0x1b2   :  { %s9959_s30 = scalar_lea.hbm %s13684_s23, 256 }
 0x1b3   :  { %p9960_p8 = scmp.ne.s32.totalorder %s13684_s23, %s9959_s30  ;;  %p9963_p9 = scmp.lt.u32.totalorder %s9959_s30, %s13684_s23 }
 0x1b5   :  { %p9965_p10 = pnand %p9963_p9, %p9960_p8 }
 0x1b7   :  { %9968 = shalt.err (!%p9965_p10)
}
 0x1b8   :  { %s9969_s14 = scalar_lea.vmem %s544_s4, 256  ;;  %p9974_p12 = scmp.lt.s32.totalorder %s544_s4, %s544_s4 }
 0x1b9   :  { %p9970_p11 = scmp.ne.s32.totalorder %s544_s4, %s9969_s14  ;;  %p9975_p13 = scmp.lt.s32.totalorder %s9969_s14, %s9969_s14 }
 0x1bb   :  { %p9976_p0 = por %p9975_p13, %p9974_p12 }
 0x1bd   :  { %p9977_p1 = pnand %p9976_p0, %p9970_p11 }
 0x1bf   :  { %9980 = shalt.err (!%p9977_p1)
}
 0x1c0   :  { %s13685_s0 = sld [smem:[#allocation178_spill]] }
 0x1c1   :  { %549 = dma.hbm_to_vmem [thread:$0]  %s13684_s23, 256, %s544_s4, [#allocation51], %s11480_s7, %s11480_s7, %s11481_s10  }
 0x1c6   :  { %s9981_s24 = scalar_lea.hbm %s13685_s0, 512 }
 0x1c7   :  { %p9982_p2 = scmp.ne.s32.totalorder %s13685_s0, %s9981_s24  ;;  %p9985_p3 = scmp.lt.u32.totalorder %s9981_s24, %s13685_s0 }
 0x1c9   :  { %p9987_p4 = pnand %p9985_p3, %p9982_p2 }
 0x1cb   :  { %9990 = shalt.err (!%p9987_p4)
}
 0x1cc   :  { %s9991_s17 = scalar_lea.vmem %s566_s26, 512  ;;  %p9996_p6 = scmp.lt.s32.totalorder %s566_s26, %s566_s26 }
 0x1cd   :  { %p9992_p5 = scmp.ne.s32.totalorder %s566_s26, %s9991_s17  ;;  %p9997_p7 = scmp.lt.s32.totalorder %s9991_s17, %s9991_s17 }
 0x1cf   :  { %p9998_p8 = por %p9997_p7, %p9996_p6 }
 0x1d1   :  { %p9999_p9 = pnand %p9998_p8, %p9992_p5 }
 0x1d3   :  { %10002 = shalt.err (!%p9999_p9)
}
 0x1d4   :  { %s13686_s28 = sld [smem:[#allocation180_spill]]  ;;  %s11498_s19 = smov [#allocation56]  }
 0x1d5   :  { %571 = dma.hbm_to_vmem [thread:$0]  %s13685_s0, 512, %s566_s26, [#allocation54], %s11480_s7, %s11480_s7, %s11481_s10  }
 0x1d6   :  { %s590_s1 = sshll.u32 %s11498_s19, 4  ;;  %s11499_s2 = smov [#allocation59]   ;;  %s591_s1 = int_to_ptr.vmem [resolvable:$true] %s590_s1 }
 0x1d7   :  { %s610_s8 = sshll.u32 %s11499_s2, 4  ;;  %s611_s8 = int_to_ptr.vmem [resolvable:$true] %s610_s8 }
 0x1da   :  { %s10003_s11 = scalar_lea.hbm %s13686_s28, 16 }
 0x1db   :  { %p10004_p10 = scmp.ne.s32.totalorder %s13686_s28, %s10003_s11  ;;  %p10007_p11 = scmp.lt.u32.totalorder %s10003_s11, %s13686_s28 }
 0x1dd   :  { %p10009_p12 = pnand %p10007_p11, %p10004_p10 }
 0x1df   :  { %10012 = shalt.err (!%p10009_p12)
}
 0x1e0   :  { %s10013_s25 = scalar_lea.vmem %s591_s1, 16  ;;  %s10017_s6 = scalar_lea.vmem %s591_s1, 32 }
 0x1e1   :  { %p10014_p13 = scmp.ne.s32.totalorder %s591_s1, %s10013_s25  ;;  %p10018_p0 = scmp.lt.s32.totalorder %s591_s1, %s591_s1 }
 0x1e2   :  { %p10019_p1 = scmp.lt.s32.totalorder %s10017_s6, %s10013_s25 }
 0x1e4   :  { %p10020_p2 = por %p10019_p1, %p10018_p0 }
 0x1e6   :  { %p10021_p3 = pnand %p10020_p2, %p10014_p13 }
 0x1e8   :  { %10024 = shalt.err (!%p10021_p3)
}
 0x1e9   :  { %s13687_s15 = sld [smem:[#allocation182_spill]] }
 0x1ea   :  { %593 = dma.hbm_to_vmem [thread:$0]  %s13686_s28, 16, %s591_s1, [#allocation57]  }
 0x1ef   :  { %s10025_s20 = scalar_lea.hbm %s13687_s15, 32 }
 0x1f0   :  { %p10026_p4 = scmp.ne.s32.totalorder %s13687_s15, %s10025_s20  ;;  %p10029_p5 = scmp.lt.u32.totalorder %s10025_s20, %s13687_s15 }
 0x1f2   :  { %p10031_p6 = pnand %p10029_p5, %p10026_p4 }
 0x1f4   :  { %10034 = shalt.err (!%p10031_p6)
}
 0x1f5   :  { %s10035_s16 = scalar_lea.vmem %s611_s8, 32  ;;  %p10040_p8 = scmp.lt.s32.totalorder %s611_s8, %s611_s8 }
 0x1f6   :  { %p10036_p7 = scmp.ne.s32.totalorder %s611_s8, %s10035_s16  ;;  %p10041_p9 = scmp.lt.s32.totalorder %s10035_s16, %s10035_s16 }
 0x1f8   :  { %p10042_p10 = por %p10041_p9, %p10040_p8 }
 0x1fa   :  { %p10043_p11 = pnand %p10042_p10, %p10036_p7 }
 0x1fc   :  { %10046 = shalt.err (!%p10043_p11)
}
 0x1fd   :  { %s13688_s29 = sld [smem:[#allocation184_spill]]  ;;  %s11500_s3 = smov [#allocation62]  }
 0x1fe   :  { %613 = dma.hbm_to_vmem [thread:$0]  %s13687_s15, 32, %s611_s8, [#allocation60]  }
 0x1ff   :  { %s630_s18 = sshll.u32 %s11500_s3, 4  ;;  %s11501_s22 = smov [#allocation65]   ;;  %s631_s18 = int_to_ptr.vmem [resolvable:$true] %s630_s18 }
 0x200   :  { %s649_s23 = sshll.u32 %s11501_s22, 4  ;;  %s650_s23 = int_to_ptr.vmem [resolvable:$true] %s649_s23 }
 0x203   :  { %s10047_s21 = scalar_lea.hbm %s13688_s29, 16 }
 0x204   :  { %p10048_p12 = scmp.ne.s32.totalorder %s13688_s29, %s10047_s21  ;;  %p10051_p13 = scmp.lt.u32.totalorder %s10047_s21, %s13688_s29 }
 0x206   :  { %p10053_p0 = pnand %p10051_p13, %p10048_p12 }
 0x208   :  { %10056 = shalt.err (!%p10053_p0)
}
 0x209   :  { %s10057_s4 = scalar_lea.vmem %s631_s18, 16  ;;  %s10061_s9 = scalar_lea.vmem %s631_s18, 32 }
 0x20a   :  { %p10058_p1 = scmp.ne.s32.totalorder %s631_s18, %s10057_s4  ;;  %p10062_p2 = scmp.lt.s32.totalorder %s631_s18, %s631_s18 }
 0x20b   :  { %p10063_p3 = scmp.lt.s32.totalorder %s10061_s9, %s10057_s4 }
 0x20d   :  { %p10064_p4 = por %p10063_p3, %p10062_p2 }
 0x20f   :  { %p10065_p5 = pnand %p10064_p4, %p10058_p1 }
 0x211   :  { %10068 = shalt.err (!%p10065_p5)
}
 0x212   :  { %s13689_s26 = sld [smem:[#allocation186_spill]] }
 0x213   :  { %633 = dma.hbm_to_vmem [thread:$0]  %s13688_s29, 16, %s631_s18, [#allocation63]  }
 0x218   :  { %s10069_s30 = scalar_lea.hbm %s13689_s26, 1024 }
 0x219   :  { %p10070_p6 = scmp.ne.s32.totalorder %s13689_s26, %s10069_s30  ;;  %p10073_p7 = scmp.lt.u32.totalorder %s10069_s30, %s13689_s26 }
 0x21b   :  { %p10075_p8 = pnand %p10073_p7, %p10070_p6 }
 0x21d   :  { %10078 = shalt.err (!%p10075_p8)
}
 0x21e   :  { %s10079_s14 = scalar_lea.vmem %s650_s23, 1024  ;;  %p10084_p10 = scmp.lt.s32.totalorder %s650_s23, %s650_s23 }
 0x21f   :  { %p10080_p9 = scmp.ne.s32.totalorder %s650_s23, %s10079_s14  ;;  %p10085_p11 = scmp.lt.s32.totalorder %s10079_s14, %s10079_s14 }
 0x221   :  { %p10086_p12 = por %p10085_p11, %p10084_p10 }
 0x223   :  { %p10087_p13 = pnand %p10086_p12, %p10080_p9 }
 0x225   :  { %10090 = shalt.err (!%p10087_p13)
}
 0x226   :  { %s13690_s0 = sld [smem:[#allocation188_spill]]  ;;  %s11502_s24 = smov [#allocation68]  }
 0x227   :  { %655 = dma.hbm_to_vmem [thread:$0]  %s13689_s26, 1024, %s650_s23, [#allocation66], %s11480_s7, %s11480_s7, %s11481_s10  }
 0x228   :  { %s674_s17 = sshll.u32 %s11502_s24, 4  ;;  %s11503_s28 = smov [#allocation71]   ;;  %s675_s17 = int_to_ptr.vmem [resolvable:$true] %s674_s17 }
 0x229   :  { %s695_s19 = sshll.u32 %s11503_s28, 4  ;;  %s696_s19 = int_to_ptr.vmem [resolvable:$true] %s695_s19 }
 0x22c   :  { %s10091_s1 = scalar_lea.hbm %s13690_s0, 16 }
 0x22d   :  { %p10092_p0 = scmp.ne.s32.totalorder %s13690_s0, %s10091_s1  ;;  %p10095_p1 = scmp.lt.u32.totalorder %s10091_s1, %s13690_s0 }
 0x22f   :  { %p10097_p2 = pnand %p10095_p1, %p10092_p0 }
 0x231   :  { %10100 = shalt.err (!%p10097_p2)
}
 0x232   :  { %s10101_s2 = scalar_lea.vmem %s675_s17, 16  ;;  %s10105_s8 = scalar_lea.vmem %s675_s17, 32 }
 0x233   :  { %p10102_p3 = scmp.ne.s32.totalorder %s675_s17, %s10101_s2  ;;  %p10106_p4 = scmp.lt.s32.totalorder %s675_s17, %s675_s17 }
 0x234   :  { %p10107_p5 = scmp.lt.s32.totalorder %s10105_s8, %s10101_s2 }
 0x236   :  { %p10108_p6 = por %p10107_p5, %p10106_p4 }
 0x238   :  { %p10109_p7 = pnand %p10108_p6, %p10102_p3 }
 0x23a   :  { %10112 = shalt.err (!%p10109_p7)
}
 0x23b   :  { %s13691_s11 = sld [smem:[#allocation190_spill]] }
 0x23c   :  { %677 = dma.hbm_to_vmem [thread:$0]  %s13690_s0, 16, %s675_s17, [#allocation69]  }
 0x241   :  { %s10113_s25 = scalar_lea.hbm %s13691_s11, 512 }
 0x242   :  { %p10114_p8 = scmp.ne.s32.totalorder %s13691_s11, %s10113_s25  ;;  %p10117_p9 = scmp.lt.u32.totalorder %s10113_s25, %s13691_s11 }
 0x244   :  { %p10119_p10 = pnand %p10117_p9, %p10114_p8 }
 0x246   :  { %10122 = shalt.err (!%p10119_p10)
}
 0x247   :  { %s10123_s6 = scalar_lea.vmem %s696_s19, 512  ;;  %p10128_p12 = scmp.lt.s32.totalorder %s696_s19, %s696_s19 }
 0x248   :  { %p10124_p11 = scmp.ne.s32.totalorder %s696_s19, %s10123_s6  ;;  %p10129_p13 = scmp.lt.s32.totalorder %s10123_s6, %s10123_s6 }
 0x24a   :  { %p10130_p0 = por %p10129_p13, %p10128_p12 }
 0x24c   :  { %p10131_p1 = pnand %p10130_p0, %p10124_p11 }
 0x24e   :  { %10134 = shalt.err (!%p10131_p1)
}
 0x24f   :  { %s13692_s15 = sld [smem:[#allocation192_spill]]  ;;  %s11504_s20 = smov [#allocation74]  }
 0x250   :  { %701 = dma.hbm_to_vmem [thread:$0]  %s13691_s11, 512, %s696_s19, [#allocation72], %s11480_s7, %s11480_s7, %s11481_s10  }
 0x251   :  { %s717_s16 = sshll.u32 %s11504_s20, 4  ;;  %s11505_s29 = smov [#allocation77]   ;;  %s718_s16 = int_to_ptr.vmem [resolvable:$true] %s717_s16 }
 0x252   :  { %s740_s3 = sshll.u32 %s11505_s29, 4  ;;  %s741_s3 = int_to_ptr.vmem [resolvable:$true] %s740_s3 }
 0x255   :  { %s10135_s18 = scalar_lea.hbm %s13692_s15, 256 }
 0x256   :  { %p10136_p2 = scmp.ne.s32.totalorder %s13692_s15, %s10135_s18  ;;  %p10139_p3 = scmp.lt.u32.totalorder %s10135_s18, %s13692_s15 }
 0x258   :  { %p10141_p4 = pnand %p10139_p3, %p10136_p2 }
 0x25a   :  { %10144 = shalt.err (!%p10141_p4)
}
 0x25b   :  { %s10145_s22 = scalar_lea.vmem %s718_s16, 256  ;;  %p10150_p6 = scmp.lt.s32.totalorder %s718_s16, %s718_s16 }
 0x25c   :  { %p10146_p5 = scmp.ne.s32.totalorder %s718_s16, %s10145_s22  ;;  %p10151_p7 = scmp.lt.s32.totalorder %s10145_s22, %s10145_s22 }
 0x25e   :  { %p10152_p8 = por %p10151_p7, %p10150_p6 }
 0x260   :  { %p10153_p9 = pnand %p10152_p8, %p10146_p5 }
 0x262   :  { %10156 = shalt.err (!%p10153_p9)
}
 0x263   :  { %s13693_s23 = sld [smem:[#allocation194_spill]] }
 0x264   :  { %723 = dma.hbm_to_vmem [thread:$0]  %s13692_s15, 256, %s718_s16, [#allocation75], %s11480_s7, %s11480_s7, %s11481_s10  }
 0x269   :  { %s10157_s21 = scalar_lea.hbm %s13693_s23, 128 }
 0x26a   :  { %p10158_p10 = scmp.ne.s32.totalorder %s13693_s23, %s10157_s21  ;;  %p10161_p11 = scmp.lt.u32.totalorder %s10157_s21, %s13693_s23 }
 0x26c   :  { %p10163_p12 = pnand %p10161_p11, %p10158_p10 }
 0x26e   :  { %10166 = shalt.err (!%p10163_p12)
}
 0x26f   :  { %s10167_s4 = scalar_lea.vmem %s741_s3, 128  ;;  %p10172_p0 = scmp.lt.s32.totalorder %s741_s3, %s741_s3 }
 0x270   :  { %p10168_p13 = scmp.ne.s32.totalorder %s741_s3, %s10167_s4  ;;  %p10173_p1 = scmp.lt.s32.totalorder %s10167_s4, %s10167_s4 }
 0x272   :  { %p10174_p2 = por %p10173_p1, %p10172_p0 }
 0x274   :  { %p10175_p3 = pnand %p10174_p2, %p10168_p13 }
 0x276   :  { %10178 = shalt.err (!%p10175_p3)
}
 0x277   :  { %s13694_s9 = sld [smem:[#allocation196_spill]]  ;;  %s11506_s26 = smov [#allocation80]  }
 0x278   :  { %743 = dma.hbm_to_vmem [thread:$0]  %s13693_s23, 128, %s741_s3, [#allocation78]  }
 0x279   :  { %s760_s30 = sshll.u32 %s11506_s26, 4  ;;  %s11507_s14 = smov [#allocation83]   ;;  %s761_s30 = int_to_ptr.vmem [resolvable:$true] %s760_s30 }
 0x27a   :  { %s780_s0 = sshll.u32 %s11507_s14, 4  ;;  %s781_s0 = int_to_ptr.vmem [resolvable:$true] %s780_s0 }
 0x27d   :  { %s10179_s24 = scalar_lea.hbm %s13694_s9, 16 }
 0x27e   :  { %p10180_p4 = scmp.ne.s32.totalorder %s13694_s9, %s10179_s24  ;;  %p10183_p5 = scmp.lt.u32.totalorder %s10179_s24, %s13694_s9 }
 0x280   :  { %p10185_p6 = pnand %p10183_p5, %p10180_p4 }
 0x282   :  { %10188 = shalt.err (!%p10185_p6)
}
 0x283   :  { %s10189_s17 = scalar_lea.vmem %s761_s30, 16  ;;  %s10193_s28 = scalar_lea.vmem %s761_s30, 32 }
 0x284   :  { %p10190_p7 = scmp.ne.s32.totalorder %s761_s30, %s10189_s17  ;;  %p10194_p8 = scmp.lt.s32.totalorder %s761_s30, %s761_s30 }
 0x285   :  { %p10195_p9 = scmp.lt.s32.totalorder %s10193_s28, %s10189_s17 }
 0x287   :  { %p10196_p10 = por %p10195_p9, %p10194_p8 }
 0x289   :  { %p10197_p11 = pnand %p10196_p10, %p10190_p7 }
 0x28b   :  { %10200 = shalt.err (!%p10197_p11)
}
 0x28c   :  { %s13695_s19 = sld [smem:[#allocation198_spill]] }
 0x28d   :  { %763 = dma.hbm_to_vmem [thread:$0]  %s13694_s9, 16, %s761_s30, [#allocation81]  }
 0x292   :  { %s10201_s1 = scalar_lea.hbm %s13695_s19, 16 }
 0x293   :  { %p10202_p12 = scmp.ne.s32.totalorder %s13695_s19, %s10201_s1  ;;  %p10205_p13 = scmp.lt.u32.totalorder %s10201_s1, %s13695_s19 }
 0x295   :  { %p10207_p0 = pnand %p10205_p13, %p10202_p12 }
 0x297   :  { %10210 = shalt.err (!%p10207_p0)
}
 0x298   :  { %s10211_s2 = scalar_lea.vmem %s781_s0, 16  ;;  %s10215_s8 = scalar_lea.vmem %s781_s0, 32 }
 0x299   :  { %p10212_p1 = scmp.ne.s32.totalorder %s781_s0, %s10211_s2  ;;  %p10216_p2 = scmp.lt.s32.totalorder %s781_s0, %s781_s0 }
 0x29a   :  { %p10217_p3 = scmp.lt.s32.totalorder %s10215_s8, %s10211_s2 }
 0x29c   :  { %p10218_p4 = por %p10217_p3, %p10216_p2 }
 0x29e   :  { %p10219_p5 = pnand %p10218_p4, %p10212_p1 }
 0x2a0   :  { %10222 = shalt.err (!%p10219_p5)
}
 0x2a1   :  { %s13696_s11 = sld [smem:[#allocation200_spill]]  ;;  %s11508_s25 = smov [#allocation86]  }
 0x2a2   :  { %783 = dma.hbm_to_vmem [thread:$0]  %s13695_s19, 16, %s781_s0, [#allocation84]  }
 0x2a3   :  { %s802_s6 = sshll.u32 %s11508_s25, 4  ;;  %s11509_s15 = smov [#allocation89]   ;;  %s803_s6 = int_to_ptr.vmem [resolvable:$true] %s802_s6 }
 0x2a4   :  { %s824_s20 = sshll.u32 %s11509_s15, 4  ;;  %s825_s20 = int_to_ptr.vmem [resolvable:$true] %s824_s20 }
 0x2a7   :  { %s10223_s16 = scalar_lea.hbm %s13696_s11, 16 }
 0x2a8   :  { %p10224_p6 = scmp.ne.s32.totalorder %s13696_s11, %s10223_s16  ;;  %p10227_p7 = scmp.lt.u32.totalorder %s10223_s16, %s13696_s11 }
 0x2aa   :  { %p10229_p8 = pnand %p10227_p7, %p10224_p6 }
 0x2ac   :  { %10232 = shalt.err (!%p10229_p8)
}
 0x2ad   :  { %s10233_s29 = scalar_lea.vmem %s803_s6, 16  ;;  %s10237_s3 = scalar_lea.vmem %s803_s6, 32 }
 0x2ae   :  { %p10234_p9 = scmp.ne.s32.totalorder %s803_s6, %s10233_s29  ;;  %p10238_p10 = scmp.lt.s32.totalorder %s803_s6, %s803_s6 }
 0x2af   :  { %p10239_p11 = scmp.lt.s32.totalorder %s10237_s3, %s10233_s29 }
 0x2b1   :  { %p10240_p12 = por %p10239_p11, %p10238_p10 }
 0x2b3   :  { %p10241_p13 = pnand %p10240_p12, %p10234_p9 }
 0x2b5   :  { %10244 = shalt.err (!%p10241_p13)
}
 0x2b6   :  { %s13697_s18 = sld [smem:[#allocation202_spill]] }
 0x2b7   :  { %805 = dma.hbm_to_vmem [thread:$0]  %s13696_s11, 16, %s803_s6, [#allocation87]  }
 0x2bc   :  { %s10245_s22 = scalar_lea.hbm %s13697_s18, 16 }
 0x2bd   :  { %p10246_p0 = scmp.ne.s32.totalorder %s13697_s18, %s10245_s22  ;;  %p10249_p1 = scmp.lt.u32.totalorder %s10245_s22, %s13697_s18 }
 0x2bf   :  { %p10251_p2 = pnand %p10249_p1, %p10246_p0 }
 0x2c1   :  { %10254 = shalt.err (!%p10251_p2)
}
 0x2c2   :  { %s10255_s23 = scalar_lea.vmem %s825_s20, 16  ;;  %s10259_s21 = scalar_lea.vmem %s825_s20, 32 }
 0x2c3   :  { %p10256_p3 = scmp.ne.s32.totalorder %s825_s20, %s10255_s23  ;;  %p10260_p4 = scmp.lt.s32.totalorder %s825_s20, %s825_s20 }
 0x2c4   :  { %p10261_p5 = scmp.lt.s32.totalorder %s10259_s21, %s10255_s23 }
 0x2c6   :  { %p10262_p6 = por %p10261_p5, %p10260_p4 }
 0x2c8   :  { %p10263_p7 = pnand %p10262_p6, %p10256_p3 }
 0x2ca   :  { %10266 = shalt.err (!%p10263_p7)
}
 0x2cb   :  { %s13698_s4 = sld [smem:[#allocation204_spill]]  ;;  %s11510_s9 = smov [#allocation92]  }
 0x2cc   :  { %827 = dma.hbm_to_vmem [thread:$0]  %s13697_s18, 16, %s825_s20, [#allocation90]  }
 0x2cd   :  { %s845_s26 = sshll.u32 %s11510_s9, 4  ;;  %s11511_s30 = smov [#allocation95]   ;;  %s846_s26 = int_to_ptr.vmem [resolvable:$true] %s845_s26 }
 0x2ce   :  { %s867_s14 = sshll.u32 %s11511_s30, 4  ;;  %s868_s14 = int_to_ptr.vmem [resolvable:$true] %s867_s14 }
 0x2d1   :  { %s10267_s0 = scalar_lea.hbm %s13698_s4, 256 }
 0x2d2   :  { %p10268_p8 = scmp.ne.s32.totalorder %s13698_s4, %s10267_s0  ;;  %p10271_p9 = scmp.lt.u32.totalorder %s10267_s0, %s13698_s4 }
 0x2d4   :  { %p10273_p10 = pnand %p10271_p9, %p10268_p8 }
 0x2d6   :  { %10276 = shalt.err (!%p10273_p10)
}
 0x2d7   :  { %s10277_s24 = scalar_lea.vmem %s846_s26, 256  ;;  %p10282_p12 = scmp.lt.s32.totalorder %s846_s26, %s846_s26 }
 0x2d8   :  { %p10278_p11 = scmp.ne.s32.totalorder %s846_s26, %s10277_s24  ;;  %p10283_p13 = scmp.lt.s32.totalorder %s10277_s24, %s10277_s24 }
 0x2da   :  { %p10284_p0 = por %p10283_p13, %p10282_p12 }
 0x2dc   :  { %p10285_p1 = pnand %p10284_p0, %p10278_p11 }
 0x2de   :  { %10288 = shalt.err (!%p10285_p1)
}
 0x2df   :  { %s13699_s17 = sld [smem:[#allocation206_spill]] }
 0x2e0   :  { %851 = dma.hbm_to_vmem [thread:$0]  %s13698_s4, 256, %s846_s26, [#allocation93], %s11480_s7, %s11480_s7, %s11481_s10  }
 0x2e5   :  { %s10289_s28 = scalar_lea.hbm %s13699_s17, 512 }
 0x2e6   :  { %p10290_p2 = scmp.ne.s32.totalorder %s13699_s17, %s10289_s28  ;;  %p10293_p3 = scmp.lt.u32.totalorder %s10289_s28, %s13699_s17 }
 0x2e8   :  { %p10295_p4 = pnand %p10293_p3, %p10290_p2 }
 0x2ea   :  { %10298 = shalt.err (!%p10295_p4)
}
 0x2eb   :  { %s10299_s19 = scalar_lea.vmem %s868_s14, 512  ;;  %p10304_p6 = scmp.lt.s32.totalorder %s868_s14, %s868_s14 }
 0x2ec   :  { %p10300_p5 = scmp.ne.s32.totalorder %s868_s14, %s10299_s19  ;;  %p10305_p7 = scmp.lt.s32.totalorder %s10299_s19, %s10299_s19 }
 0x2ee   :  { %p10306_p8 = por %p10305_p7, %p10304_p6 }
 0x2f0   :  { %p10307_p9 = pnand %p10306_p8, %p10300_p5 }
 0x2f2   :  { %10310 = shalt.err (!%p10307_p9)
}
 0x2f3   :  { %s13700_s1 = sld [smem:[#allocation208_spill]]  ;;  %s11512_s2 = smov [#allocation98]  }
 0x2f4   :  { %873 = dma.hbm_to_vmem [thread:$0]  %s13699_s17, 512, %s868_s14, [#allocation96], %s11480_s7, %s11480_s7, %s11481_s10  }
 0x2f5   :  { %s892_s8 = sshll.u32 %s11512_s2, 4  ;;  %s11513_s11 = smov [#allocation101]   ;;  %s893_s8 = int_to_ptr.vmem [resolvable:$true] %s892_s8 }
 0x2f6   :  { %s912_s25 = sshll.u32 %s11513_s11, 4  ;;  %s913_s25 = int_to_ptr.vmem [resolvable:$true] %s912_s25 }
 0x2f9   :  { %s10311_s6 = scalar_lea.hbm %s13700_s1, 16 }
 0x2fa   :  { %p10312_p10 = scmp.ne.s32.totalorder %s13700_s1, %s10311_s6  ;;  %p10315_p11 = scmp.lt.u32.totalorder %s10311_s6, %s13700_s1 }
 0x2fc   :  { %p10317_p12 = pnand %p10315_p11, %p10312_p10 }
 0x2fe   :  { %10320 = shalt.err (!%p10317_p12)
}
 0x2ff   :  { %s10321_s15 = scalar_lea.vmem %s893_s8, 16  ;;  %s10325_s20 = scalar_lea.vmem %s893_s8, 32 }
 0x300   :  { %p10322_p13 = scmp.ne.s32.totalorder %s893_s8, %s10321_s15  ;;  %p10326_p0 = scmp.lt.s32.totalorder %s893_s8, %s893_s8 }
 0x301   :  { %p10327_p1 = scmp.lt.s32.totalorder %s10325_s20, %s10321_s15 }
 0x303   :  { %p10328_p2 = por %p10327_p1, %p10326_p0 }
 0x305   :  { %p10329_p3 = pnand %p10328_p2, %p10322_p13 }
 0x307   :  { %10332 = shalt.err (!%p10329_p3)
}
 0x308   :  { %s13701_s16 = sld [smem:[#allocation210_spill]] }
 0x309   :  { %895 = dma.hbm_to_vmem [thread:$0]  %s13700_s1, 16, %s893_s8, [#allocation99]  }
 0x30e   :  { %s10333_s29 = scalar_lea.hbm %s13701_s16, 16 }
 0x30f   :  { %p10334_p4 = scmp.ne.s32.totalorder %s13701_s16, %s10333_s29  ;;  %p10337_p5 = scmp.lt.u32.totalorder %s10333_s29, %s13701_s16 }
 0x311   :  { %p10339_p6 = pnand %p10337_p5, %p10334_p4 }
 0x313   :  { %10342 = shalt.err (!%p10339_p6)
}
 0x314   :  { %s10343_s3 = scalar_lea.vmem %s913_s25, 16  ;;  %s10347_s18 = scalar_lea.vmem %s913_s25, 32 }
 0x315   :  { %p10344_p7 = scmp.ne.s32.totalorder %s913_s25, %s10343_s3  ;;  %p10348_p8 = scmp.lt.s32.totalorder %s913_s25, %s913_s25 }
 0x316   :  { %p10349_p9 = scmp.lt.s32.totalorder %s10347_s18, %s10343_s3 }
 0x318   :  { %p10350_p10 = por %p10349_p9, %p10348_p8 }
 0x31a   :  { %p10351_p11 = pnand %p10350_p10, %p10344_p7 }
 0x31c   :  { %10354 = shalt.err (!%p10351_p11)
}
 0x31d   :  { %s13702_s22 = sld [smem:[#allocation212_spill]]  ;;  %s11514_s23 = smov [#allocation104]  }
 0x31e   :  { %915 = dma.hbm_to_vmem [thread:$0]  %s13701_s16, 16, %s913_s25, [#allocation102]  }
 0x31f   :  { %s932_s21 = sshll.u32 %s11514_s23, 4  ;;  %s11515_s4 = smov [#allocation107]   ;;  %s933_s21 = int_to_ptr.vmem [resolvable:$true] %s932_s21 }
 0x320   :  { %s954_s9 = sshll.u32 %s11515_s4, 4  ;;  %s955_s9 = int_to_ptr.vmem [resolvable:$true] %s954_s9 }
 0x323   :  { %s10355_s26 = scalar_lea.hbm %s13702_s22, 16 }
 0x324   :  { %p10356_p12 = scmp.ne.s32.totalorder %s13702_s22, %s10355_s26  ;;  %p10359_p13 = scmp.lt.u32.totalorder %s10355_s26, %s13702_s22 }
 0x326   :  { %p10361_p0 = pnand %p10359_p13, %p10356_p12 }
 0x328   :  { %10364 = shalt.err (!%p10361_p0)
}
 0x329   :  { %s10365_s30 = scalar_lea.vmem %s933_s21, 16  ;;  %s10369_s14 = scalar_lea.vmem %s933_s21, 32 }
 0x32a   :  { %p10366_p1 = scmp.ne.s32.totalorder %s933_s21, %s10365_s30  ;;  %p10370_p2 = scmp.lt.s32.totalorder %s933_s21, %s933_s21 }
 0x32b   :  { %p10371_p3 = scmp.lt.s32.totalorder %s10369_s14, %s10365_s30 }
 0x32d   :  { %p10372_p4 = por %p10371_p3, %p10370_p2 }
 0x32f   :  { %p10373_p5 = pnand %p10372_p4, %p10366_p1 }
 0x331   :  { %10376 = shalt.err (!%p10373_p5)
}
 0x332   :  { %s13703_s0 = sld [smem:[#allocation214_spill]] }
 0x333   :  { %935 = dma.hbm_to_vmem [thread:$0]  %s13702_s22, 16, %s933_s21, [#allocation105]  }
 0x338   :  { %s10377_s24 = scalar_lea.hbm %s13703_s0, 16 }
 0x339   :  { %p10378_p6 = scmp.ne.s32.totalorder %s13703_s0, %s10377_s24  ;;  %p10381_p7 = scmp.lt.u32.totalorder %s10377_s24, %s13703_s0 }
 0x33b   :  { %p10383_p8 = pnand %p10381_p7, %p10378_p6 }
 0x33d   :  { %10386 = shalt.err (!%p10383_p8)
}
 0x33e   :  { %s10387_s17 = scalar_lea.vmem %s955_s9, 16  ;;  %s10391_s28 = scalar_lea.vmem %s955_s9, 32 }
 0x33f   :  { %p10388_p9 = scmp.ne.s32.totalorder %s955_s9, %s10387_s17  ;;  %p10392_p10 = scmp.lt.s32.totalorder %s955_s9, %s955_s9 }
 0x340   :  { %p10393_p11 = scmp.lt.s32.totalorder %s10391_s28, %s10387_s17 }
 0x342   :  { %p10394_p12 = por %p10393_p11, %p10392_p10 }
 0x344   :  { %p10395_p13 = pnand %p10394_p12, %p10388_p9 }
 0x346   :  { %10398 = shalt.err (!%p10395_p13)
}
 0x347   :  { %s13704_s19 = sld [smem:[#allocation216_spill]]  ;;  %s11516_s1 = smov [#allocation110]  }
 0x348   :  { %957 = dma.hbm_to_vmem [thread:$0]  %s13703_s0, 16, %s955_s9, [#allocation108]  }
 0x349   :  { %s974_s2 = sshll.u32 %s11516_s1, 4  ;;  %s11517_s8 = smov [#allocation113]   ;;  %s975_s2 = int_to_ptr.vmem [resolvable:$true] %s974_s2 }
 0x34a   :  { %s996_s11 = sshll.u32 %s11517_s8, 4  ;;  %s997_s11 = int_to_ptr.vmem [resolvable:$true] %s996_s11 }
 0x34d   :  { %s10399_s25 = scalar_lea.hbm %s13704_s19, 16 }
 0x34e   :  { %p10400_p0 = scmp.ne.s32.totalorder %s13704_s19, %s10399_s25  ;;  %p10403_p1 = scmp.lt.u32.totalorder %s10399_s25, %s13704_s19 }
 0x350   :  { %p10405_p2 = pnand %p10403_p1, %p10400_p0 }
 0x352   :  { %10408 = shalt.err (!%p10405_p2)
}
 0x353   :  { %s10409_s6 = scalar_lea.vmem %s975_s2, 16  ;;  %s10413_s15 = scalar_lea.vmem %s975_s2, 32 }
 0x354   :  { %p10410_p3 = scmp.ne.s32.totalorder %s975_s2, %s10409_s6  ;;  %p10414_p4 = scmp.lt.s32.totalorder %s975_s2, %s975_s2 }
 0x355   :  { %p10415_p5 = scmp.lt.s32.totalorder %s10413_s15, %s10409_s6 }
 0x357   :  { %p10416_p6 = por %p10415_p5, %p10414_p4 }
 0x359   :  { %p10417_p7 = pnand %p10416_p6, %p10410_p3 }
 0x35b   :  { %10420 = shalt.err (!%p10417_p7)
}
 0x35c   :  { %977 = dma.hbm_to_vmem [thread:$0]  %s13704_s19, 16, %s975_s2, [#allocation111]  }
 0x35d   :  { %s10421_s20 = scalar_lea.hbm %s11955_s13, 16 }
 0x35e   :  { %p10422_p8 = scmp.ne.s32.totalorder %s11955_s13, %s10421_s20  ;;  %p10425_p9 = scmp.lt.u32.totalorder %s10421_s20, %s11955_s13 }
 0x360   :  { %p10427_p10 = pnand %p10425_p9, %p10422_p8 }
 0x362   :  { %10430 = shalt.err (!%p10427_p10)
}
 0x363   :  { %s10431_s16 = scalar_lea.vmem %s997_s11, 16  ;;  %s10435_s29 = scalar_lea.vmem %s997_s11, 32 }
 0x364   :  { %p10432_p11 = scmp.ne.s32.totalorder %s997_s11, %s10431_s16  ;;  %p10436_p12 = scmp.lt.s32.totalorder %s997_s11, %s997_s11 }
 0x365   :  { %p10437_p13 = scmp.lt.s32.totalorder %s10435_s29, %s10431_s16 }
 0x367   :  { %p10438_p0 = por %p10437_p13, %p10436_p12 }
 0x369   :  { %p10439_p1 = pnand %p10438_p0, %p10432_p11 }
 0x36b   :  { %10442 = shalt.err (!%p10439_p1)
}
 0x36c   :  { %s13705_s3 = sld [smem:[#allocation159_spill]]  ;;  %s11518_s18 = smov [#allocation2]  }
 0x36d   :  { %999 = dma.hbm_to_vmem [thread:$0]  %s11955_s13, 16, %s997_s11, [#allocation114]  }
 0x36e   :  { %s204_s22 = sshll.u32 %s11518_s18, 4  ;;  %s11519_s23 = smov [#allocation7]   ;;  %s205_s22 = int_to_ptr.vmem [resolvable:$true] %s204_s22 }
 0x36f   :  { %s225_s21 = sshll.u32 %s11519_s23, 4  ;;  %s226_s21 = int_to_ptr.vmem [resolvable:$true] %s225_s21 }
 0x372   :  { %s10443_s4 = scalar_lea.hbm %s13705_s3, 128 }
 0x373   :  { %p10444_p2 = scmp.ne.s32.totalorder %s13705_s3, %s10443_s4  ;;  %p10447_p3 = scmp.lt.u32.totalorder %s10443_s4, %s13705_s3 }
 0x375   :  { %p10449_p4 = pnand %p10447_p3, %p10444_p2 }
 0x377   :  { %10452 = shalt.err (!%p10449_p4)
}
 0x378   :  { %s10453_s9 = scalar_lea.vmem %s205_s22, 128  ;;  %p10458_p6 = scmp.lt.s32.totalorder %s205_s22, %s205_s22 }
 0x379   :  { %p10454_p5 = scmp.ne.s32.totalorder %s205_s22, %s10453_s9  ;;  %p10459_p7 = scmp.lt.s32.totalorder %s10453_s9, %s10453_s9 }
 0x37b   :  { %p10460_p8 = por %p10459_p7, %p10458_p6 }
 0x37d   :  { %p10461_p9 = pnand %p10460_p8, %p10454_p5 }
 0x37f   :  { %10464 = shalt.err (!%p10461_p9)
}
 0x380   :  { %s13706_s26 = sld [smem:[#allocation160_spill]] }
 0x381   :  { %207 = dma.hbm_to_vmem [thread:$0]  %s13705_s3, 128, %s205_s22, [#allocation3]  }
 0x386   :  { %s10465_s13 = scalar_lea.hbm %s13706_s26, 256 }
 0x387   :  { %p10466_p10 = scmp.ne.s32.totalorder %s13706_s26, %s10465_s13  ;;  %p10469_p11 = scmp.lt.u32.totalorder %s10465_s13, %s13706_s26 }
 0x389   :  { %p10471_p12 = pnand %p10469_p11, %p10466_p10 }
 0x38b   :  { %10474 = shalt.err (!%p10471_p12)
}
 0x38c   :  { %s10475_s30 = scalar_lea.vmem %s226_s21, 256  ;;  %p10480_p0 = scmp.lt.s32.totalorder %s226_s21, %s226_s21 }
 0x38d   :  { %p10476_p13 = scmp.ne.s32.totalorder %s226_s21, %s10475_s30  ;;  %p10481_p1 = scmp.lt.s32.totalorder %s10475_s30, %s10475_s30 }
 0x38f   :  { %p10482_p2 = por %p10481_p1, %p10480_p0 }
 0x391   :  { %p10483_p3 = pnand %p10482_p2, %p10476_p13 }
 0x393   :  { %10486 = shalt.err (!%p10483_p3)
}
 0x394   :  { %s13707_s14 = sld [smem:[#allocation161_spill]]  ;;  %s11520_s0 = smov [#allocation10]  }
 0x395   :  { %231 = dma.hbm_to_vmem [thread:$0]  %s13706_s26, 256, %s226_s21, [#allocation6], %s11480_s7, %s11480_s7, %s11481_s10  }
 0x396   :  { %s249_s24 = sshll.u32 %s11520_s0, 4  ;;  %s11521_s17 = smov [#allocation13]   ;;  %s250_s24 = int_to_ptr.vmem [resolvable:$true] %s249_s24 }
 0x397   :  { %s271_s28 = sshll.u32 %s11521_s17, 4  ;;  %s272_s28 = int_to_ptr.vmem [resolvable:$true] %s271_s28 }
 0x39a   :  { %s10487_s19 = scalar_lea.hbm %s13707_s14, 256 }
 0x39b   :  { %p10488_p4 = scmp.ne.s32.totalorder %s13707_s14, %s10487_s19  ;;  %p10491_p5 = scmp.lt.u32.totalorder %s10487_s19, %s13707_s14 }
 0x39d   :  { %p10493_p6 = pnand %p10491_p5, %p10488_p4 }
 0x39f   :  { %10496 = shalt.err (!%p10493_p6)
}
 0x3a0   :  { %s10497_s1 = scalar_lea.vmem %s250_s24, 256  ;;  %p10502_p8 = scmp.lt.s32.totalorder %s250_s24, %s250_s24 }
 0x3a1   :  { %p10498_p7 = scmp.ne.s32.totalorder %s250_s24, %s10497_s1  ;;  %p10503_p9 = scmp.lt.s32.totalorder %s10497_s1, %s10497_s1 }
 0x3a3   :  { %p10504_p10 = por %p10503_p9, %p10502_p8 }
 0x3a5   :  { %p10505_p11 = pnand %p10504_p10, %p10498_p7 }
 0x3a7   :  { %10508 = shalt.err (!%p10505_p11)
}
 0x3a8   :  { %s13708_s2 = sld [smem:[#allocation162_spill]] }
 0x3a9   :  { %255 = dma.hbm_to_vmem [thread:$0]  %s13707_s14, 256, %s250_s24, [#allocation9], %s11480_s7, %s11480_s7, %s11481_s10  }
 0x3ae   :  { %s10509_s8 = scalar_lea.hbm %s13708_s2, 256 }
 0x3af   :  { %p10510_p12 = scmp.ne.s32.totalorder %s13708_s2, %s10509_s8  ;;  %p10513_p13 = scmp.lt.u32.totalorder %s10509_s8, %s13708_s2 }
 0x3b1   :  { %p10515_p0 = pnand %p10513_p13, %p10510_p12 }
 0x3b3   :  { %10518 = shalt.err (!%p10515_p0)
}
 0x3b4   :  { %s10519_s11 = scalar_lea.vmem %s272_s28, 256  ;;  %p10524_p2 = scmp.lt.s32.totalorder %s272_s28, %s272_s28 }
 0x3b5   :  { %p10520_p1 = scmp.ne.s32.totalorder %s272_s28, %s10519_s11  ;;  %p10525_p3 = scmp.lt.s32.totalorder %s10519_s11, %s10519_s11 }
 0x3b7   :  { %p10526_p4 = por %p10525_p3, %p10524_p2 }
 0x3b9   :  { %p10527_p5 = pnand %p10526_p4, %p10520_p1 }
 0x3bb   :  { %10530 = shalt.err (!%p10527_p5)
}
 0x3bc   :  { %s13709_s25 = sld [smem:[#allocation163_spill]]  ;;  %s11522_s6 = smov [#allocation16]  }
 0x3bd   :  { %277 = dma.hbm_to_vmem [thread:$0]  %s13708_s2, 256, %s272_s28, [#allocation12], %s11480_s7, %s11480_s7, %s11481_s10  }
 0x3be   :  { %s295_s15 = sshll.u32 %s11522_s6, 4  ;;  %s11523_s20 = smov [#allocation19]   ;;  %s296_s15 = int_to_ptr.vmem [resolvable:$true] %s295_s15 }
 0x3bf   :  { %s318_s16 = sshll.u32 %s11523_s20, 4  ;;  %s319_s16 = int_to_ptr.vmem [resolvable:$true] %s318_s16 }
 0x3c2   :  { %s10531_s29 = scalar_lea.hbm %s13709_s25, 256 }
 0x3c3   :  { %p10532_p6 = scmp.ne.s32.totalorder %s13709_s25, %s10531_s29  ;;  %p10535_p7 = scmp.lt.u32.totalorder %s10531_s29, %s13709_s25 }
 0x3c5   :  { %p10537_p8 = pnand %p10535_p7, %p10532_p6 }
 0x3c7   :  { %10540 = shalt.err (!%p10537_p8)
}
 0x3c8   :  { %s10541_s3 = scalar_lea.vmem %s296_s15, 256  ;;  %p10546_p10 = scmp.lt.s32.totalorder %s296_s15, %s296_s15 }
 0x3c9   :  { %p10542_p9 = scmp.ne.s32.totalorder %s296_s15, %s10541_s3  ;;  %p10547_p11 = scmp.lt.s32.totalorder %s10541_s3, %s10541_s3 }
 0x3cb   :  { %p10548_p12 = por %p10547_p11, %p10546_p10 }
 0x3cd   :  { %p10549_p13 = pnand %p10548_p12, %p10542_p9 }
 0x3cf   :  { %10552 = shalt.err (!%p10549_p13)
}
 0x3d0   :  { %s13710_s18 = sld [smem:[#allocation164_spill]] }
 0x3d1   :  { %301 = dma.hbm_to_vmem [thread:$0]  %s13709_s25, 256, %s296_s15, [#allocation15], %s11480_s7, %s11480_s7, %s11481_s10  }
 0x3d6   :  { %s10553_s22 = scalar_lea.hbm %s13710_s18, 16 }
 0x3d7   :  { %p10554_p0 = scmp.ne.s32.totalorder %s13710_s18, %s10553_s22  ;;  %p10557_p1 = scmp.lt.u32.totalorder %s10553_s22, %s13710_s18 }
 0x3d9   :  { %p10559_p2 = pnand %p10557_p1, %p10554_p0 }
 0x3db   :  { %10562 = shalt.err (!%p10559_p2)
}
 0x3dc   :  { %s10563_s23 = scalar_lea.vmem %s319_s16, 16  ;;  %s10567_s21 = scalar_lea.vmem %s319_s16, 32 }
 0x3dd   :  { %p10564_p3 = scmp.ne.s32.totalorder %s319_s16, %s10563_s23  ;;  %p10568_p4 = scmp.lt.s32.totalorder %s319_s16, %s319_s16 }
 0x3de   :  { %p10569_p5 = scmp.lt.s32.totalorder %s10567_s21, %s10563_s23 }
 0x3e0   :  { %p10570_p6 = por %p10569_p5, %p10568_p4 }
 0x3e2   :  { %p10571_p7 = pnand %p10570_p6, %p10564_p3 }
 0x3e4   :  { %10574 = shalt.err (!%p10571_p7)
}
 0x3e5   :  { %s13711_s4 = sld [smem:[#allocation165_spill]]  ;;  %s11524_s9 = smov [#allocation22]  }
 0x3e6   :  { %321 = dma.hbm_to_vmem [thread:$0]  %s13710_s18, 16, %s319_s16, [#allocation18]  }
 0x3e7   :  { %s338_s26 = sshll.u32 %s11524_s9, 4  ;;  %s11525_s13 = smov [#allocation25]   ;;  %s339_s26 = int_to_ptr.vmem [resolvable:$true] %s338_s26 }
 0x3e8   :  { %s359_s30 = sshll.u32 %s11525_s13, 4  ;;  %s360_s30 = int_to_ptr.vmem [resolvable:$true] %s359_s30 }
 0x3eb   :  { %s10575_s14 = scalar_lea.hbm %s13711_s4, 16 }
 0x3ec   :  { %p10576_p8 = scmp.ne.s32.totalorder %s13711_s4, %s10575_s14  ;;  %p10579_p9 = scmp.lt.u32.totalorder %s10575_s14, %s13711_s4 }
 0x3ee   :  { %p10581_p10 = pnand %p10579_p9, %p10576_p8 }
 0x3f0   :  { %10584 = shalt.err (!%p10581_p10)
}
 0x3f1   :  { %s10585_s0 = scalar_lea.vmem %s339_s26, 16  ;;  %s10589_s24 = scalar_lea.vmem %s339_s26, 32 }
 0x3f2   :  { %p10586_p11 = scmp.ne.s32.totalorder %s339_s26, %s10585_s0  ;;  %p10590_p12 = scmp.lt.s32.totalorder %s339_s26, %s339_s26 }
 0x3f3   :  { %p10591_p13 = scmp.lt.s32.totalorder %s10589_s24, %s10585_s0 }
 0x3f5   :  { %p10592_p0 = por %p10591_p13, %p10590_p12 }
 0x3f7   :  { %p10593_p1 = pnand %p10592_p0, %p10586_p11 }
 0x3f9   :  { %10596 = shalt.err (!%p10593_p1)
}
 0x3fa   :  { %s13712_s17 = sld [smem:[#allocation166_spill]] }
 0x3fb   :  { %341 = dma.hbm_to_vmem [thread:$0]  %s13711_s4, 16, %s339_s26, [#allocation21]  }
 0x400   :  { %s10597_s28 = scalar_lea.hbm %s13712_s17, 1024 }
 0x401   :  { %p10598_p2 = scmp.ne.s32.totalorder %s13712_s17, %s10597_s28  ;;  %p10601_p3 = scmp.lt.u32.totalorder %s10597_s28, %s13712_s17 }
 0x403   :  { %p10603_p4 = pnand %p10601_p3, %p10598_p2 }
 0x405   :  { %10606 = shalt.err (!%p10603_p4)
}
 0x406   :  { %s10607_s19 = scalar_lea.vmem %s360_s30, 1024  ;;  %p10612_p6 = scmp.lt.s32.totalorder %s360_s30, %s360_s30 }
 0x407   :  { %p10608_p5 = scmp.ne.s32.totalorder %s360_s30, %s10607_s19  ;;  %p10613_p7 = scmp.lt.s32.totalorder %s10607_s19, %s10607_s19 }
 0x409   :  { %p10614_p8 = por %p10613_p7, %p10612_p6 }
 0x40b   :  { %p10615_p9 = pnand %p10614_p8, %p10608_p5 }
 0x40d   :  { %10618 = shalt.err (!%p10615_p9)
}
 0x40e   :  { %s13713_s1 = sld [smem:[#allocation167_spill]]  ;;  %s11526_s2 = smov [#allocation28]  }
 0x40f   :  { %365 = dma.hbm_to_vmem [thread:$0]  %s13712_s17, 1024, %s360_s30, [#allocation24], %s11480_s7, %s11480_s7, %s11481_s10  }
 0x410   :  { %s381_s8 = sshll.u32 %s11526_s2, 4  ;;  %s11527_s11 = smov [#allocation31]   ;;  %s382_s8 = int_to_ptr.vmem [resolvable:$true] %s381_s8 }
 0x411   :  { %s406_s25 = sshll.u32 %s11527_s11, 4  ;;  %s407_s25 = int_to_ptr.vmem [resolvable:$true] %s406_s25 }
 0x414   :  { %s10619_s6 = scalar_lea.hbm %s13713_s1, 512 }
 0x415   :  { %p10620_p10 = scmp.ne.s32.totalorder %s13713_s1, %s10619_s6  ;;  %p10623_p11 = scmp.lt.u32.totalorder %s10619_s6, %s13713_s1 }
 0x417   :  { %p10625_p12 = pnand %p10623_p11, %p10620_p10 }
 0x419   :  { %10628 = shalt.err (!%p10625_p12)
}
 0x41a   :  { %s10629_s15 = scalar_lea.vmem %s382_s8, 512  ;;  %p10634_p0 = scmp.lt.s32.totalorder %s382_s8, %s382_s8 }
 0x41b   :  { %p10630_p13 = scmp.ne.s32.totalorder %s382_s8, %s10629_s15  ;;  %p10635_p1 = scmp.lt.s32.totalorder %s10629_s15, %s10629_s15 }
 0x41d   :  { %p10636_p2 = por %p10635_p1, %p10634_p0 }
 0x41f   :  { %p10637_p3 = pnand %p10636_p2, %p10630_p13 }
 0x421   :  { %10640 = shalt.err (!%p10637_p3)
}
 0x422   :  { %s13714_s20 = sld [smem:[#allocation168_spill]] }
 0x423   :  { %387 = dma.hbm_to_vmem [thread:$0]  %s13713_s1, 512, %s382_s8, [#allocation27], %s11480_s7, %s11480_s7, %s11481_s10  }
 0x428   :  { %s10641_s16 = scalar_lea.hbm %s13714_s20, 16 }
 0x429   :  { %p10642_p4 = scmp.ne.s32.totalorder %s13714_s20, %s10641_s16  ;;  %p10645_p5 = scmp.lt.u32.totalorder %s10641_s16, %s13714_s20 }
 0x42b   :  { %p10647_p6 = pnand %p10645_p5, %p10642_p4 }
 0x42d   :  { %10650 = shalt.err (!%p10647_p6)
}
 0x42e   :  { %s10651_s29 = scalar_lea.vmem %s407_s25, 16  ;;  %s10655_s3 = scalar_lea.vmem %s407_s25, 32 }
 0x42f   :  { %p10652_p7 = scmp.ne.s32.totalorder %s407_s25, %s10651_s29  ;;  %p10656_p8 = scmp.lt.s32.totalorder %s407_s25, %s407_s25 }
 0x430   :  { %p10657_p9 = scmp.lt.s32.totalorder %s10655_s3, %s10651_s29 }
 0x432   :  { %p10658_p10 = por %p10657_p9, %p10656_p8 }
 0x434   :  { %p10659_p11 = pnand %p10658_p10, %p10652_p7 }
 0x436   :  { %10662 = shalt.err (!%p10659_p11)
}
 0x437   :  { %s13715_s18 = sld [smem:[#allocation169_spill]]  ;;  %s11528_s22 = smov [#allocation34]  }
 0x438   :  { %409 = dma.hbm_to_vmem [thread:$0]  %s13714_s20, 16, %s407_s25, [#allocation30]  }
 0x439   :  { %s428_s23 = sshll.u32 %s11528_s22, 4  ;;  %s11529_s21 = smov [#allocation37]   ;;  %s429_s23 = int_to_ptr.vmem [resolvable:$true] %s428_s23 }
 0x43a   :  { %s448_s4 = sshll.u32 %s11529_s21, 4  ;;  %s449_s4 = int_to_ptr.vmem [resolvable:$true] %s448_s4 }
 0x43d   :  { %s10663_s9 = scalar_lea.hbm %s13715_s18, 16 }
 0x43e   :  { %p10664_p12 = scmp.ne.s32.totalorder %s13715_s18, %s10663_s9  ;;  %p10667_p13 = scmp.lt.u32.totalorder %s10663_s9, %s13715_s18 }
 0x440   :  { %p10669_p0 = pnand %p10667_p13, %p10664_p12 }
 0x442   :  { %10672 = shalt.err (!%p10669_p0)
}
 0x443   :  { %s10673_s26 = scalar_lea.vmem %s429_s23, 16  ;;  %s10677_s13 = scalar_lea.vmem %s429_s23, 32 }
 0x444   :  { %p10674_p1 = scmp.ne.s32.totalorder %s429_s23, %s10673_s26  ;;  %p10678_p2 = scmp.lt.s32.totalorder %s429_s23, %s429_s23 }
 0x445   :  { %p10679_p3 = scmp.lt.s32.totalorder %s10677_s13, %s10673_s26 }
 0x447   :  { %p10680_p4 = por %p10679_p3, %p10678_p2 }
 0x449   :  { %p10681_p5 = pnand %p10680_p4, %p10674_p1 }
 0x44b   :  { %10684 = shalt.err (!%p10681_p5)
}
 0x44c   :  { %s13716_s30 = sld [smem:[#allocation170_spill]] }
 0x44d   :  { %431 = dma.hbm_to_vmem [thread:$0]  %s13715_s18, 16, %s429_s23, [#allocation33]  }
 0x452   :  { %s10685_s14 = scalar_lea.hbm %s13716_s30, 128 }
 0x453   :  { %p10686_p6 = scmp.ne.s32.totalorder %s13716_s30, %s10685_s14  ;;  %p10689_p7 = scmp.lt.u32.totalorder %s10685_s14, %s13716_s30 }
 0x455   :  { %p10691_p8 = pnand %p10689_p7, %p10686_p6 }
 0x457   :  { %10694 = shalt.err (!%p10691_p8)
}
 0x458   :  { %s10695_s0 = scalar_lea.vmem %s449_s4, 128  ;;  %p10700_p10 = scmp.lt.s32.totalorder %s449_s4, %s449_s4 }
 0x459   :  { %p10696_p9 = scmp.ne.s32.totalorder %s449_s4, %s10695_s0  ;;  %p10701_p11 = scmp.lt.s32.totalorder %s10695_s0, %s10695_s0 }
 0x45b   :  { %p10702_p12 = por %p10701_p11, %p10700_p10 }
 0x45d   :  { %p10703_p13 = pnand %p10702_p12, %p10696_p9 }
 0x45f   :  { %10706 = shalt.err (!%p10703_p13)
}
 0x460   :  { %s13717_s24 = sld [smem:[#allocation171_spill]]  ;;  %s11530_s17 = smov [#allocation40]  }
 0x461   :  { %451 = dma.hbm_to_vmem [thread:$0]  %s13716_s30, 128, %s449_s4, [#allocation36]  }
 0x462   :  { %s468_s28 = sshll.u32 %s11530_s17, 4  ;;  %s11531_s19 = smov [#allocation43]   ;;  %s469_s28 = int_to_ptr.vmem [resolvable:$true] %s468_s28 }
 0x463   :  { %s487_s1 = sshll.u32 %s11531_s19, 4  ;;  %s488_s1 = int_to_ptr.vmem [resolvable:$true] %s487_s1 }
 0x466   :  { %s10707_s2 = scalar_lea.hbm %s13717_s24, 16 }
 0x467   :  { %p10708_p0 = scmp.ne.s32.totalorder %s13717_s24, %s10707_s2  ;;  %p10711_p1 = scmp.lt.u32.totalorder %s10707_s2, %s13717_s24 }
 0x469   :  { %p10713_p2 = pnand %p10711_p1, %p10708_p0 }
 0x46b   :  { %10716 = shalt.err (!%p10713_p2)
}
 0x46c   :  { %s10717_s8 = scalar_lea.vmem %s469_s28, 16  ;;  %s10721_s11 = scalar_lea.vmem %s469_s28, 32 }
 0x46d   :  { %p10718_p3 = scmp.ne.s32.totalorder %s469_s28, %s10717_s8  ;;  %p10722_p4 = scmp.lt.s32.totalorder %s469_s28, %s469_s28 }
 0x46e   :  { %p10723_p5 = scmp.lt.s32.totalorder %s10721_s11, %s10717_s8 }
 0x470   :  { %p10724_p6 = por %p10723_p5, %p10722_p4 }
 0x472   :  { %p10725_p7 = pnand %p10724_p6, %p10718_p3 }
 0x474   :  { %10728 = shalt.err (!%p10725_p7)
}
 0x475   :  { %s13718_s25 = sld [smem:[#allocation172_spill]] }
 0x476   :  { %471 = dma.hbm_to_vmem [thread:$0]  %s13717_s24, 16, %s469_s28, [#allocation39]  }
 0x47b   :  { %s10729_s6 = scalar_lea.hbm %s13718_s25, 1024 }
 0x47c   :  { %p10730_p8 = scmp.ne.s32.totalorder %s13718_s25, %s10729_s6  ;;  %p10733_p9 = scmp.lt.u32.totalorder %s10729_s6, %s13718_s25 }
 0x47e   :  { %p10735_p10 = pnand %p10733_p9, %p10730_p8 }
 0x480   :  { %10738 = shalt.err (!%p10735_p10)
}
 0x481   :  { %s10739_s15 = scalar_lea.vmem %s488_s1, 1024  ;;  %p10744_p12 = scmp.lt.s32.totalorder %s488_s1, %s488_s1 }
 0x482   :  { %p10740_p11 = scmp.ne.s32.totalorder %s488_s1, %s10739_s15  ;;  %p10745_p13 = scmp.lt.s32.totalorder %s10739_s15, %s10739_s15 }
 0x484   :  { %p10746_p0 = por %p10745_p13, %p10744_p12 }
 0x486   :  { %p10747_p1 = pnand %p10746_p0, %p10740_p11 }
 0x488   :  { %10750 = shalt.err (!%p10747_p1)
}
 0x489   :  { %s13719_s20 = sld [smem:[#allocation173_spill]]  ;;  %s11532_s16 = smov [#allocation46]  }
 0x48a   :  { %493 = dma.hbm_to_vmem [thread:$0]  %s13718_s25, 1024, %s488_s1, [#allocation42], %s11480_s7, %s11480_s7, %s11481_s10  }
 0x48b   :  { %s509_s29 = sshll.u32 %s11532_s16, 4  ;;  %s11533_s3 = smov [#allocation49]   ;;  %s510_s29 = int_to_ptr.vmem [resolvable:$true] %s509_s29 }
 0x48c   :  { %s531_s18 = sshll.u32 %s11533_s3, 4  ;;  %s532_s18 = int_to_ptr.vmem [resolvable:$true] %s531_s18 }
 0x48f   :  { %s10751_s22 = scalar_lea.hbm %s13719_s20, 256 }
 0x490   :  { %p10752_p2 = scmp.ne.s32.totalorder %s13719_s20, %s10751_s22  ;;  %p10755_p3 = scmp.lt.u32.totalorder %s10751_s22, %s13719_s20 }
 0x492   :  { %p10757_p4 = pnand %p10755_p3, %p10752_p2 }
 0x494   :  { %10760 = shalt.err (!%p10757_p4)
}
 0x495   :  { %s10761_s23 = scalar_lea.vmem %s510_s29, 256  ;;  %p10766_p6 = scmp.lt.s32.totalorder %s510_s29, %s510_s29 }
 0x496   :  { %p10762_p5 = scmp.ne.s32.totalorder %s510_s29, %s10761_s23  ;;  %p10767_p7 = scmp.lt.s32.totalorder %s10761_s23, %s10761_s23 }
 0x498   :  { %p10768_p8 = por %p10767_p7, %p10766_p6 }
 0x49a   :  { %p10769_p9 = pnand %p10768_p8, %p10762_p5 }
 0x49c   :  { %10772 = shalt.err (!%p10769_p9)
}
 0x49d   :  { %s13720_s21 = sld [smem:[#allocation175_spill]] }
 0x49e   :  { %515 = dma.hbm_to_vmem [thread:$0]  %s13719_s20, 256, %s510_s29, [#allocation45], %s11480_s7, %s11480_s7, %s11481_s10  }
 0x4a3   :  { %s10773_s4 = scalar_lea.hbm %s13720_s21, 256 }
 0x4a4   :  { %p10774_p10 = scmp.ne.s32.totalorder %s13720_s21, %s10773_s4  ;;  %p10777_p11 = scmp.lt.u32.totalorder %s10773_s4, %s13720_s21 }
 0x4a6   :  { %p10779_p12 = pnand %p10777_p11, %p10774_p10 }
 0x4a8   :  { %10782 = shalt.err (!%p10779_p12)
}
 0x4a9   :  { %s10783_s9 = scalar_lea.vmem %s532_s18, 256  ;;  %p10788_p0 = scmp.lt.s32.totalorder %s532_s18, %s532_s18 }
 0x4aa   :  { %p10784_p13 = scmp.ne.s32.totalorder %s532_s18, %s10783_s9  ;;  %p10789_p1 = scmp.lt.s32.totalorder %s10783_s9, %s10783_s9 }
 0x4ac   :  { %p10790_p2 = por %p10789_p1, %p10788_p0 }
 0x4ae   :  { %p10791_p3 = pnand %p10790_p2, %p10784_p13 }
 0x4b0   :  { %10794 = shalt.err (!%p10791_p3)
}
 0x4b1   :  { %s13721_s26 = sld [smem:[#allocation177_spill]]  ;;  %s11534_s13 = smov [#allocation52]  }
 0x4b2   :  { %537 = dma.hbm_to_vmem [thread:$0]  %s13720_s21, 256, %s532_s18, [#allocation48], %s11480_s7, %s11480_s7, %s11481_s10  }
 0x4b3   :  { %s556_s30 = sshll.u32 %s11534_s13, 4  ;;  %s11535_s14 = smov [#allocation55]   ;;  %s557_s30 = int_to_ptr.vmem [resolvable:$true] %s556_s30 }
 0x4b4   :  { %s577_s0 = sshll.u32 %s11535_s14, 4  ;;  %s578_s0 = int_to_ptr.vmem [resolvable:$true] %s577_s0 }
 0x4b7   :  { %s10795_s24 = scalar_lea.hbm %s13721_s26, 16 }
 0x4b8   :  { %p10796_p4 = scmp.ne.s32.totalorder %s13721_s26, %s10795_s24  ;;  %p10799_p5 = scmp.lt.u32.totalorder %s10795_s24, %s13721_s26 }
 0x4ba   :  { %p10801_p6 = pnand %p10799_p5, %p10796_p4 }
 0x4bc   :  { %10804 = shalt.err (!%p10801_p6)
}
 0x4bd   :  { %s10805_s17 = scalar_lea.vmem %s557_s30, 16  ;;  %s10809_s28 = scalar_lea.vmem %s557_s30, 32 }
 0x4be   :  { %p10806_p7 = scmp.ne.s32.totalorder %s557_s30, %s10805_s17  ;;  %p10810_p8 = scmp.lt.s32.totalorder %s557_s30, %s557_s30 }
 0x4bf   :  { %p10811_p9 = scmp.lt.s32.totalorder %s10809_s28, %s10805_s17 }
 0x4c1   :  { %p10812_p10 = por %p10811_p9, %p10810_p8 }
 0x4c3   :  { %p10813_p11 = pnand %p10812_p10, %p10806_p7 }
 0x4c5   :  { %10816 = shalt.err (!%p10813_p11)
}
 0x4c6   :  { %s13722_s19 = sld [smem:[#allocation179_spill]] }
 0x4c7   :  { %559 = dma.hbm_to_vmem [thread:$0]  %s13721_s26, 16, %s557_s30, [#allocation51]  }
 0x4cc   :  { %s10817_s1 = scalar_lea.hbm %s13722_s19, 512 }
 0x4cd   :  { %p10818_p12 = scmp.ne.s32.totalorder %s13722_s19, %s10817_s1  ;;  %p10821_p13 = scmp.lt.u32.totalorder %s10817_s1, %s13722_s19 }
 0x4cf   :  { %p10823_p0 = pnand %p10821_p13, %p10818_p12 }
 0x4d1   :  { %10826 = shalt.err (!%p10823_p0)
}
 0x4d2   :  { %s10827_s2 = scalar_lea.vmem %s578_s0, 512  ;;  %p10832_p2 = scmp.lt.s32.totalorder %s578_s0, %s578_s0 }
 0x4d3   :  { %p10828_p1 = scmp.ne.s32.totalorder %s578_s0, %s10827_s2  ;;  %p10833_p3 = scmp.lt.s32.totalorder %s10827_s2, %s10827_s2 }
 0x4d5   :  { %p10834_p4 = por %p10833_p3, %p10832_p2 }
 0x4d7   :  { %p10835_p5 = pnand %p10834_p4, %p10828_p1 }
 0x4d9   :  { %10838 = shalt.err (!%p10835_p5)
}
 0x4da   :  { %s13723_s8 = sld [smem:[#allocation181_spill]]  ;;  %s11536_s11 = smov [#allocation58]  }
 0x4db   :  { %583 = dma.hbm_to_vmem [thread:$0]  %s13722_s19, 512, %s578_s0, [#allocation54], %s11480_s7, %s11480_s7, %s11481_s10  }
 0x4dc   :  { %s600_s25 = sshll.u32 %s11536_s11, 4  ;;  %s11537_s6 = smov [#allocation61]   ;;  %s601_s25 = int_to_ptr.vmem [resolvable:$true] %s600_s25 }
 0x4dd   :  { %s620_s15 = sshll.u32 %s11537_s6, 4  ;;  %s621_s15 = int_to_ptr.vmem [resolvable:$true] %s620_s15 }
 0x4e0   :  { %s10839_s20 = scalar_lea.hbm %s13723_s8, 16 }
 0x4e1   :  { %p10840_p6 = scmp.ne.s32.totalorder %s13723_s8, %s10839_s20  ;;  %p10843_p7 = scmp.lt.u32.totalorder %s10839_s20, %s13723_s8 }
 0x4e3   :  { %p10845_p8 = pnand %p10843_p7, %p10840_p6 }
 0x4e5   :  { %10848 = shalt.err (!%p10845_p8)
}
 0x4e6   :  { %s10849_s16 = scalar_lea.vmem %s601_s25, 16  ;;  %s10853_s29 = scalar_lea.vmem %s601_s25, 32 }
 0x4e7   :  { %p10850_p9 = scmp.ne.s32.totalorder %s601_s25, %s10849_s16  ;;  %p10854_p10 = scmp.lt.s32.totalorder %s601_s25, %s601_s25 }
 0x4e8   :  { %p10855_p11 = scmp.lt.s32.totalorder %s10853_s29, %s10849_s16 }
 0x4ea   :  { %p10856_p12 = por %p10855_p11, %p10854_p10 }
 0x4ec   :  { %p10857_p13 = pnand %p10856_p12, %p10850_p9 }
 0x4ee   :  { %10860 = shalt.err (!%p10857_p13)
}
 0x4ef   :  { %s13724_s3 = sld [smem:[#allocation183_spill]] }
 0x4f0   :  { %603 = dma.hbm_to_vmem [thread:$0]  %s13723_s8, 16, %s601_s25, [#allocation57]  }
 0x4f5   :  { %s10861_s18 = scalar_lea.hbm %s13724_s3, 16 }
 0x4f6   :  { %p10862_p0 = scmp.ne.s32.totalorder %s13724_s3, %s10861_s18  ;;  %p10865_p1 = scmp.lt.u32.totalorder %s10861_s18, %s13724_s3 }
 0x4f8   :  { %p10867_p2 = pnand %p10865_p1, %p10862_p0 }
 0x4fa   :  { %10870 = shalt.err (!%p10867_p2)
}
 0x4fb   :  { %s10871_s22 = scalar_lea.vmem %s621_s15, 16  ;;  %s10875_s23 = scalar_lea.vmem %s621_s15, 32 }
 0x4fc   :  { %p10872_p3 = scmp.ne.s32.totalorder %s621_s15, %s10871_s22  ;;  %p10876_p4 = scmp.lt.s32.totalorder %s621_s15, %s621_s15 }
 0x4fd   :  { %p10877_p5 = scmp.lt.s32.totalorder %s10875_s23, %s10871_s22 }
 0x4ff   :  { %p10878_p6 = por %p10877_p5, %p10876_p4 }
 0x501   :  { %p10879_p7 = pnand %p10878_p6, %p10872_p3 }
 0x503   :  { %10882 = shalt.err (!%p10879_p7)
}
 0x504   :  { %s13725_s21 = sld [smem:[#allocation185_spill]]  ;;  %s11538_s4 = smov [#allocation64]  }
 0x505   :  { %623 = dma.hbm_to_vmem [thread:$0]  %s13724_s3, 16, %s621_s15, [#allocation60]  }
 0x506   :  { %s640_s9 = sshll.u32 %s11538_s4, 4  ;;  %s11539_s26 = smov [#allocation67]   ;;  %s641_s9 = int_to_ptr.vmem [resolvable:$true] %s640_s9 }
 0x507   :  { %s661_s13 = sshll.u32 %s11539_s26, 4  ;;  %s662_s13 = int_to_ptr.vmem [resolvable:$true] %s661_s13 }
 0x50a   :  { %s10883_s30 = scalar_lea.hbm %s13725_s21, 16 }
 0x50b   :  { %p10884_p8 = scmp.ne.s32.totalorder %s13725_s21, %s10883_s30  ;;  %p10887_p9 = scmp.lt.u32.totalorder %s10883_s30, %s13725_s21 }
 0x50d   :  { %p10889_p10 = pnand %p10887_p9, %p10884_p8 }
 0x50f   :  { %10892 = shalt.err (!%p10889_p10)
}
 0x510   :  { %s10893_s14 = scalar_lea.vmem %s641_s9, 16  ;;  %s10897_s0 = scalar_lea.vmem %s641_s9, 32 }
 0x511   :  { %p10894_p11 = scmp.ne.s32.totalorder %s641_s9, %s10893_s14  ;;  %p10898_p12 = scmp.lt.s32.totalorder %s641_s9, %s641_s9 }
 0x512   :  { %p10899_p13 = scmp.lt.s32.totalorder %s10897_s0, %s10893_s14 }
 0x514   :  { %p10900_p0 = por %p10899_p13, %p10898_p12 }
 0x516   :  { %p10901_p1 = pnand %p10900_p0, %p10894_p11 }
 0x518   :  { %10904 = shalt.err (!%p10901_p1)
}
 0x519   :  { %s13726_s24 = sld [smem:[#allocation187_spill]] }
 0x51a   :  { %643 = dma.hbm_to_vmem [thread:$0]  %s13725_s21, 16, %s641_s9, [#allocation63]  }
 0x51f   :  { %s10905_s17 = scalar_lea.hbm %s13726_s24, 1024 }
 0x520   :  { %p10906_p2 = scmp.ne.s32.totalorder %s13726_s24, %s10905_s17  ;;  %p10909_p3 = scmp.lt.u32.totalorder %s10905_s17, %s13726_s24 }
 0x522   :  { %p10911_p4 = pnand %p10909_p3, %p10906_p2 }
 0x524   :  { %10914 = shalt.err (!%p10911_p4)
}
 0x525   :  { %s10915_s28 = scalar_lea.vmem %s662_s13, 1024  ;;  %p10920_p6 = scmp.lt.s32.totalorder %s662_s13, %s662_s13 }
 0x526   :  { %p10916_p5 = scmp.ne.s32.totalorder %s662_s13, %s10915_s28  ;;  %p10921_p7 = scmp.lt.s32.totalorder %s10915_s28, %s10915_s28 }
 0x528   :  { %p10922_p8 = por %p10921_p7, %p10920_p6 }
 0x52a   :  { %p10923_p9 = pnand %p10922_p8, %p10916_p5 }
 0x52c   :  { %10926 = shalt.err (!%p10923_p9)
}
 0x52d   :  { %s13727_s19 = sld [smem:[#allocation189_spill]]  ;;  %s11540_s1 = smov [#allocation70]  }
 0x52e   :  { %667 = dma.hbm_to_vmem [thread:$0]  %s13726_s24, 1024, %s662_s13, [#allocation66], %s11480_s7, %s11480_s7, %s11481_s10  }
 0x52f   :  { %s683_s2 = sshll.u32 %s11540_s1, 4  ;;  %s11541_s8 = smov [#allocation73]   ;;  %s684_s2 = int_to_ptr.vmem [resolvable:$true] %s683_s2 }
 0x530   :  { %s708_s11 = sshll.u32 %s11541_s8, 4  ;;  %s709_s11 = int_to_ptr.vmem [resolvable:$true] %s708_s11 }
 0x533   :  { %s10927_s25 = scalar_lea.hbm %s13727_s19, 512 }
 0x534   :  { %p10928_p10 = scmp.ne.s32.totalorder %s13727_s19, %s10927_s25  ;;  %p10931_p11 = scmp.lt.u32.totalorder %s10927_s25, %s13727_s19 }
 0x536   :  { %p10933_p12 = pnand %p10931_p11, %p10928_p10 }
 0x538   :  { %10936 = shalt.err (!%p10933_p12)
}
 0x539   :  { %s10937_s6 = scalar_lea.vmem %s684_s2, 512  ;;  %p10942_p0 = scmp.lt.s32.totalorder %s684_s2, %s684_s2 }
 0x53a   :  { %p10938_p13 = scmp.ne.s32.totalorder %s684_s2, %s10937_s6  ;;  %p10943_p1 = scmp.lt.s32.totalorder %s10937_s6, %s10937_s6 }
 0x53c   :  { %p10944_p2 = por %p10943_p1, %p10942_p0 }
 0x53e   :  { %p10945_p3 = pnand %p10944_p2, %p10938_p13 }
 0x540   :  { %10948 = shalt.err (!%p10945_p3)
}
 0x541   :  { %s13728_s15 = sld [smem:[#allocation191_spill]] }
 0x542   :  { %689 = dma.hbm_to_vmem [thread:$0]  %s13727_s19, 512, %s684_s2, [#allocation69], %s11480_s7, %s11480_s7, %s11481_s10  }
 0x547   :  { %s10949_s20 = scalar_lea.hbm %s13728_s15, 16 }
 0x548   :  { %p10950_p4 = scmp.ne.s32.totalorder %s13728_s15, %s10949_s20  ;;  %p10953_p5 = scmp.lt.u32.totalorder %s10949_s20, %s13728_s15 }
 0x54a   :  { %p10955_p6 = pnand %p10953_p5, %p10950_p4 }
 0x54c   :  { %10958 = shalt.err (!%p10955_p6)
}
 0x54d   :  { %s10959_s16 = scalar_lea.vmem %s709_s11, 16  ;;  %s10963_s29 = scalar_lea.vmem %s709_s11, 32 }
 0x54e   :  { %p10960_p7 = scmp.ne.s32.totalorder %s709_s11, %s10959_s16  ;;  %p10964_p8 = scmp.lt.s32.totalorder %s709_s11, %s709_s11 }
 0x54f   :  { %p10965_p9 = scmp.lt.s32.totalorder %s10963_s29, %s10959_s16 }
 0x551   :  { %p10966_p10 = por %p10965_p9, %p10964_p8 }
 0x553   :  { %p10967_p11 = pnand %p10966_p10, %p10960_p7 }
 0x555   :  { %10970 = shalt.err (!%p10967_p11)
}
 0x556   :  { %s13729_s3 = sld [smem:[#allocation193_spill]]  ;;  %s11542_s18 = smov [#allocation76]  }
 0x557   :  { %711 = dma.hbm_to_vmem [thread:$0]  %s13728_s15, 16, %s709_s11, [#allocation72]  }
 0x558   :  { %s730_s22 = sshll.u32 %s11542_s18, 4  ;;  %s11543_s23 = smov [#allocation79]   ;;  %s731_s22 = int_to_ptr.vmem [resolvable:$true] %s730_s22 }
 0x559   :  { %s750_s21 = sshll.u32 %s11543_s23, 4  ;;  %s751_s21 = int_to_ptr.vmem [resolvable:$true] %s750_s21 }
 0x55c   :  { %s10971_s4 = scalar_lea.hbm %s13729_s3, 16 }
 0x55d   :  { %p10972_p12 = scmp.ne.s32.totalorder %s13729_s3, %s10971_s4  ;;  %p10975_p13 = scmp.lt.u32.totalorder %s10971_s4, %s13729_s3 }
 0x55f   :  { %p10977_p0 = pnand %p10975_p13, %p10972_p12 }
 0x561   :  { %10980 = shalt.err (!%p10977_p0)
}
 0x562   :  { %s10981_s9 = scalar_lea.vmem %s731_s22, 16  ;;  %s10985_s26 = scalar_lea.vmem %s731_s22, 32 }
 0x563   :  { %p10982_p1 = scmp.ne.s32.totalorder %s731_s22, %s10981_s9  ;;  %p10986_p2 = scmp.lt.s32.totalorder %s731_s22, %s731_s22 }
 0x564   :  { %p10987_p3 = scmp.lt.s32.totalorder %s10985_s26, %s10981_s9 }
 0x566   :  { %p10988_p4 = por %p10987_p3, %p10986_p2 }
 0x568   :  { %p10989_p5 = pnand %p10988_p4, %p10982_p1 }
 0x56a   :  { %10992 = shalt.err (!%p10989_p5)
}
 0x56b   :  { %s13730_s13 = sld [smem:[#allocation195_spill]] }
 0x56c   :  { %733 = dma.hbm_to_vmem [thread:$0]  %s13729_s3, 16, %s731_s22, [#allocation75]  }
 0x571   :  { %s10993_s30 = scalar_lea.hbm %s13730_s13, 128 }
 0x572   :  { %p10994_p6 = scmp.ne.s32.totalorder %s13730_s13, %s10993_s30  ;;  %p10997_p7 = scmp.lt.u32.totalorder %s10993_s30, %s13730_s13 }
 0x574   :  { %p10999_p8 = pnand %p10997_p7, %p10994_p6 }
 0x576   :  { %11002 = shalt.err (!%p10999_p8)
}
 0x577   :  { %s11003_s14 = scalar_lea.vmem %s751_s21, 128  ;;  %p11008_p10 = scmp.lt.s32.totalorder %s751_s21, %s751_s21 }
 0x578   :  { %p11004_p9 = scmp.ne.s32.totalorder %s751_s21, %s11003_s14  ;;  %p11009_p11 = scmp.lt.s32.totalorder %s11003_s14, %s11003_s14 }
 0x57a   :  { %p11010_p12 = por %p11009_p11, %p11008_p10 }
 0x57c   :  { %p11011_p13 = pnand %p11010_p12, %p11004_p9 }
 0x57e   :  { %11014 = shalt.err (!%p11011_p13)
}
 0x57f   :  { %s13731_s0 = sld [smem:[#allocation197_spill]]  ;;  %s11544_s24 = smov [#allocation82]  }
 0x580   :  { %753 = dma.hbm_to_vmem [thread:$0]  %s13730_s13, 128, %s751_s21, [#allocation78]  }
 0x581   :  { %s770_s17 = sshll.u32 %s11544_s24, 4  ;;  %s11545_s28 = smov [#allocation85]   ;;  %s771_s17 = int_to_ptr.vmem [resolvable:$true] %s770_s17 }
 0x582   :  { %s789_s19 = sshll.u32 %s11545_s28, 4  ;;  %s790_s19 = int_to_ptr.vmem [resolvable:$true] %s789_s19 }
 0x585   :  { %s11015_s1 = scalar_lea.hbm %s13731_s0, 16 }
 0x586   :  { %p11016_p0 = scmp.ne.s32.totalorder %s13731_s0, %s11015_s1  ;;  %p11019_p1 = scmp.lt.u32.totalorder %s11015_s1, %s13731_s0 }
 0x588   :  { %p11021_p2 = pnand %p11019_p1, %p11016_p0 }
 0x58a   :  { %11024 = shalt.err (!%p11021_p2)
}
 0x58b   :  { %s11025_s2 = scalar_lea.vmem %s771_s17, 16  ;;  %s11029_s8 = scalar_lea.vmem %s771_s17, 32 }
 0x58c   :  { %p11026_p3 = scmp.ne.s32.totalorder %s771_s17, %s11025_s2  ;;  %p11030_p4 = scmp.lt.s32.totalorder %s771_s17, %s771_s17 }
 0x58d   :  { %p11031_p5 = scmp.lt.s32.totalorder %s11029_s8, %s11025_s2 }
 0x58f   :  { %p11032_p6 = por %p11031_p5, %p11030_p4 }
 0x591   :  { %p11033_p7 = pnand %p11032_p6, %p11026_p3 }
 0x593   :  { %11036 = shalt.err (!%p11033_p7)
}
 0x594   :  { %s13732_s11 = sld [smem:[#allocation199_spill]] }
 0x595   :  { %773 = dma.hbm_to_vmem [thread:$0]  %s13731_s0, 16, %s771_s17, [#allocation81]  }
 0x59a   :  { %s11037_s25 = scalar_lea.hbm %s13732_s11, 1024 }
 0x59b   :  { %p11038_p8 = scmp.ne.s32.totalorder %s13732_s11, %s11037_s25  ;;  %p11041_p9 = scmp.lt.u32.totalorder %s11037_s25, %s13732_s11 }
 0x59d   :  { %p11043_p10 = pnand %p11041_p9, %p11038_p8 }
 0x59f   :  { %11046 = shalt.err (!%p11043_p10)
}
 0x5a0   :  { %s11047_s6 = scalar_lea.vmem %s790_s19, 1024  ;;  %p11052_p12 = scmp.lt.s32.totalorder %s790_s19, %s790_s19 }
 0x5a1   :  { %p11048_p11 = scmp.ne.s32.totalorder %s790_s19, %s11047_s6  ;;  %p11053_p13 = scmp.lt.s32.totalorder %s11047_s6, %s11047_s6 }
 0x5a3   :  { %p11054_p0 = por %p11053_p13, %p11052_p12 }
 0x5a5   :  { %p11055_p1 = pnand %p11054_p0, %p11048_p11 }
 0x5a7   :  { %11058 = shalt.err (!%p11055_p1)
}
 0x5a8   :  { %s13733_s15 = sld [smem:[#allocation201_spill]]  ;;  %s11546_s20 = smov [#allocation88]  }
 0x5a9   :  { %795 = dma.hbm_to_vmem [thread:$0]  %s13732_s11, 1024, %s790_s19, [#allocation84], %s11480_s7, %s11480_s7, %s11481_s10  }
 0x5aa   :  { %s811_s16 = sshll.u32 %s11546_s20, 4  ;;  %s11547_s29 = smov [#allocation91]   ;;  %s812_s16 = int_to_ptr.vmem [resolvable:$true] %s811_s16 }
 0x5ab   :  { %s833_s3 = sshll.u32 %s11547_s29, 4  ;;  %s834_s3 = int_to_ptr.vmem [resolvable:$true] %s833_s3 }
 0x5ae   :  { %s11059_s18 = scalar_lea.hbm %s13733_s15, 256 }
 0x5af   :  { %p11060_p2 = scmp.ne.s32.totalorder %s13733_s15, %s11059_s18  ;;  %p11063_p3 = scmp.lt.u32.totalorder %s11059_s18, %s13733_s15 }
 0x5b1   :  { %p11065_p4 = pnand %p11063_p3, %p11060_p2 }
 0x5b3   :  { %11068 = shalt.err (!%p11065_p4)
}
 0x5b4   :  { %s11069_s22 = scalar_lea.vmem %s812_s16, 256  ;;  %p11074_p6 = scmp.lt.s32.totalorder %s812_s16, %s812_s16 }
 0x5b5   :  { %p11070_p5 = scmp.ne.s32.totalorder %s812_s16, %s11069_s22  ;;  %p11075_p7 = scmp.lt.s32.totalorder %s11069_s22, %s11069_s22 }
 0x5b7   :  { %p11076_p8 = por %p11075_p7, %p11074_p6 }
 0x5b9   :  { %p11077_p9 = pnand %p11076_p8, %p11070_p5 }
 0x5bb   :  { %11080 = shalt.err (!%p11077_p9)
}
 0x5bc   :  { %s13734_s23 = sld [smem:[#allocation203_spill]] }
 0x5bd   :  { %817 = dma.hbm_to_vmem [thread:$0]  %s13733_s15, 256, %s812_s16, [#allocation87], %s11480_s7, %s11480_s7, %s11481_s10  }
 0x5c2   :  { %s11081_s21 = scalar_lea.hbm %s13734_s23, 256 }
 0x5c3   :  { %p11082_p10 = scmp.ne.s32.totalorder %s13734_s23, %s11081_s21  ;;  %p11085_p11 = scmp.lt.u32.totalorder %s11081_s21, %s13734_s23 }
 0x5c5   :  { %p11087_p12 = pnand %p11085_p11, %p11082_p10 }
 0x5c7   :  { %11090 = shalt.err (!%p11087_p12)
}
 0x5c8   :  { %s11091_s4 = scalar_lea.vmem %s834_s3, 256  ;;  %p11096_p0 = scmp.lt.s32.totalorder %s834_s3, %s834_s3 }
 0x5c9   :  { %p11092_p13 = scmp.ne.s32.totalorder %s834_s3, %s11091_s4  ;;  %p11097_p1 = scmp.lt.s32.totalorder %s11091_s4, %s11091_s4 }
 0x5cb   :  { %p11098_p2 = por %p11097_p1, %p11096_p0 }
 0x5cd   :  { %p11099_p3 = pnand %p11098_p2, %p11092_p13 }
 0x5cf   :  { %11102 = shalt.err (!%p11099_p3)
}
 0x5d0   :  { %s13735_s9 = sld [smem:[#allocation205_spill]]  ;;  %s11548_s26 = smov [#allocation94]  }
 0x5d1   :  { %839 = dma.hbm_to_vmem [thread:$0]  %s13734_s23, 256, %s834_s3, [#allocation90], %s11480_s7, %s11480_s7, %s11481_s10  }
 0x5d2   :  { %s858_s13 = sshll.u32 %s11548_s26, 4  ;;  %s11549_s30 = smov [#allocation97]   ;;  %s859_s13 = int_to_ptr.vmem [resolvable:$true] %s858_s13 }
 0x5d3   :  { %s879_s14 = sshll.u32 %s11549_s30, 4  ;;  %s880_s14 = int_to_ptr.vmem [resolvable:$true] %s879_s14 }
 0x5d6   :  { %s11103_s0 = scalar_lea.hbm %s13735_s9, 16 }
 0x5d7   :  { %p11104_p4 = scmp.ne.s32.totalorder %s13735_s9, %s11103_s0  ;;  %p11107_p5 = scmp.lt.u32.totalorder %s11103_s0, %s13735_s9 }
 0x5d9   :  { %p11109_p6 = pnand %p11107_p5, %p11104_p4 }
 0x5db   :  { %11112 = shalt.err (!%p11109_p6)
}
 0x5dc   :  { %s11113_s24 = scalar_lea.vmem %s859_s13, 16  ;;  %s11117_s17 = scalar_lea.vmem %s859_s13, 32 }
 0x5dd   :  { %p11114_p7 = scmp.ne.s32.totalorder %s859_s13, %s11113_s24  ;;  %p11118_p8 = scmp.lt.s32.totalorder %s859_s13, %s859_s13 }
 0x5de   :  { %p11119_p9 = scmp.lt.s32.totalorder %s11117_s17, %s11113_s24 }
 0x5e0   :  { %p11120_p10 = por %p11119_p9, %p11118_p8 }
 0x5e2   :  { %p11121_p11 = pnand %p11120_p10, %p11114_p7 }
 0x5e4   :  { %11124 = shalt.err (!%p11121_p11)
}
 0x5e5   :  { %s13736_s28 = sld [smem:[#allocation207_spill]] }
 0x5e6   :  { %861 = dma.hbm_to_vmem [thread:$0]  %s13735_s9, 16, %s859_s13, [#allocation93]  }
 0x5eb   :  { %s11125_s19 = scalar_lea.hbm %s13736_s28, 512 }
 0x5ec   :  { %p11126_p12 = scmp.ne.s32.totalorder %s13736_s28, %s11125_s19  ;;  %p11129_p13 = scmp.lt.u32.totalorder %s11125_s19, %s13736_s28 }
 0x5ee   :  { %p11131_p0 = pnand %p11129_p13, %p11126_p12 }
 0x5f0   :  { %11134 = shalt.err (!%p11131_p0)
}
 0x5f1   :  { %s11135_s1 = scalar_lea.vmem %s880_s14, 512  ;;  %p11140_p2 = scmp.lt.s32.totalorder %s880_s14, %s880_s14 }
 0x5f2   :  { %p11136_p1 = scmp.ne.s32.totalorder %s880_s14, %s11135_s1  ;;  %p11141_p3 = scmp.lt.s32.totalorder %s11135_s1, %s11135_s1 }
 0x5f4   :  { %p11142_p4 = por %p11141_p3, %p11140_p2 }
 0x5f6   :  { %p11143_p5 = pnand %p11142_p4, %p11136_p1 }
 0x5f8   :  { %11146 = shalt.err (!%p11143_p5)
}
 0x5f9   :  { %s13737_s2 = sld [smem:[#allocation209_spill]]  ;;  %s11550_s8 = smov [#allocation100]  }
 0x5fa   :  { %885 = dma.hbm_to_vmem [thread:$0]  %s13736_s28, 512, %s880_s14, [#allocation96], %s11480_s7, %s11480_s7, %s11481_s10  }
 0x5fb   :  { %s902_s11 = sshll.u32 %s11550_s8, 4  ;;  %s11551_s25 = smov [#allocation103]   ;;  %s903_s11 = int_to_ptr.vmem [resolvable:$true] %s902_s11 }
 0x5fc   :  { %s922_s6 = sshll.u32 %s11551_s25, 4  ;;  %s923_s6 = int_to_ptr.vmem [resolvable:$true] %s922_s6 }
 0x5ff   :  { %s11147_s15 = scalar_lea.hbm %s13737_s2, 16 }
 0x600   :  { %p11148_p6 = scmp.ne.s32.totalorder %s13737_s2, %s11147_s15  ;;  %p11151_p7 = scmp.lt.u32.totalorder %s11147_s15, %s13737_s2 }
 0x602   :  { %p11153_p8 = pnand %p11151_p7, %p11148_p6 }
 0x604   :  { %11156 = shalt.err (!%p11153_p8)
}
 0x605   :  { %s11157_s20 = scalar_lea.vmem %s903_s11, 16  ;;  %s11161_s16 = scalar_lea.vmem %s903_s11, 32 }
 0x606   :  { %p11158_p9 = scmp.ne.s32.totalorder %s903_s11, %s11157_s20  ;;  %p11162_p10 = scmp.lt.s32.totalorder %s903_s11, %s903_s11 }
 0x607   :  { %p11163_p11 = scmp.lt.s32.totalorder %s11161_s16, %s11157_s20 }
 0x609   :  { %p11164_p12 = por %p11163_p11, %p11162_p10 }
 0x60b   :  { %p11165_p13 = pnand %p11164_p12, %p11158_p9 }
 0x60d   :  { %11168 = shalt.err (!%p11165_p13)
}
 0x60e   :  { %s13738_s29 = sld [smem:[#allocation211_spill]] }
 0x60f   :  { %905 = dma.hbm_to_vmem [thread:$0]  %s13737_s2, 16, %s903_s11, [#allocation99]  }
 0x614   :  { %s11169_s3 = scalar_lea.hbm %s13738_s29, 16 }
 0x615   :  { %p11170_p0 = scmp.ne.s32.totalorder %s13738_s29, %s11169_s3  ;;  %p11173_p1 = scmp.lt.u32.totalorder %s11169_s3, %s13738_s29 }
 0x617   :  { %p11175_p2 = pnand %p11173_p1, %p11170_p0 }
 0x619   :  { %11178 = shalt.err (!%p11175_p2)
}
 0x61a   :  { %s11179_s18 = scalar_lea.vmem %s923_s6, 16  ;;  %s11183_s22 = scalar_lea.vmem %s923_s6, 32 }
 0x61b   :  { %p11180_p3 = scmp.ne.s32.totalorder %s923_s6, %s11179_s18  ;;  %p11184_p4 = scmp.lt.s32.totalorder %s923_s6, %s923_s6 }
 0x61c   :  { %p11185_p5 = scmp.lt.s32.totalorder %s11183_s22, %s11179_s18 }
 0x61e   :  { %p11186_p6 = por %p11185_p5, %p11184_p4 }
 0x620   :  { %p11187_p7 = pnand %p11186_p6, %p11180_p3 }
 0x622   :  { %11190 = shalt.err (!%p11187_p7)
}
 0x623   :  { %s13739_s23 = sld [smem:[#allocation213_spill]]  ;;  %s11552_s21 = smov [#allocation106]  }
 0x624   :  { %925 = dma.hbm_to_vmem [thread:$0]  %s13738_s29, 16, %s923_s6, [#allocation102]  }
 0x625   :  { %s941_s4 = sshll.u32 %s11552_s21, 4  ;;  %s11553_s9 = smov [#allocation109]   ;;  %s942_s4 = int_to_ptr.vmem [resolvable:$true] %s941_s4 }
 0x626   :  { %s964_s26 = sshll.u32 %s11553_s9, 4  ;;  %s965_s26 = int_to_ptr.vmem [resolvable:$true] %s964_s26 }
 0x629   :  { %s11191_s13 = scalar_lea.hbm %s13739_s23, 1024 }
 0x62a   :  { %p11192_p8 = scmp.ne.s32.totalorder %s13739_s23, %s11191_s13  ;;  %p11195_p9 = scmp.lt.u32.totalorder %s11191_s13, %s13739_s23 }
 0x62c   :  { %p11197_p10 = pnand %p11195_p9, %p11192_p8 }
 0x62e   :  { %11200 = shalt.err (!%p11197_p10)
}
 0x62f   :  { %s11201_s30 = scalar_lea.vmem %s942_s4, 1024  ;;  %p11206_p12 = scmp.lt.s32.totalorder %s942_s4, %s942_s4 }
 0x630   :  { %p11202_p11 = scmp.ne.s32.totalorder %s942_s4, %s11201_s30  ;;  %p11207_p13 = scmp.lt.s32.totalorder %s11201_s30, %s11201_s30 }
 0x632   :  { %p11208_p0 = por %p11207_p13, %p11206_p12 }
 0x634   :  { %p11209_p1 = pnand %p11208_p0, %p11202_p11 }
 0x636   :  { %11212 = shalt.err (!%p11209_p1)
}
 0x637   :  { %s13740_s14 = sld [smem:[#allocation215_spill]] }
 0x638   :  { %947 = dma.hbm_to_vmem [thread:$0]  %s13739_s23, 1024, %s942_s4, [#allocation105], %s11480_s7, %s11480_s7, %s11481_s10  }
 0x63d   :  { %s11213_s0 = scalar_lea.hbm %s13740_s14, 16 }
 0x63e   :  { %p11214_p2 = scmp.ne.s32.totalorder %s13740_s14, %s11213_s0  ;;  %p11217_p3 = scmp.lt.u32.totalorder %s11213_s0, %s13740_s14 }
 0x640   :  { %p11219_p4 = pnand %p11217_p3, %p11214_p2 }
 0x642   :  { %11222 = shalt.err (!%p11219_p4)
}
 0x643   :  { %s11223_s24 = scalar_lea.vmem %s965_s26, 16  ;;  %s11227_s17 = scalar_lea.vmem %s965_s26, 32 }
 0x644   :  { %p11224_p5 = scmp.ne.s32.totalorder %s965_s26, %s11223_s24  ;;  %p11228_p6 = scmp.lt.s32.totalorder %s965_s26, %s965_s26 }
 0x645   :  { %p11229_p7 = scmp.lt.s32.totalorder %s11227_s17, %s11223_s24 }
 0x647   :  { %p11230_p8 = por %p11229_p7, %p11228_p6 }
 0x649   :  { %p11231_p9 = pnand %p11230_p8, %p11224_p5 }
 0x64b   :  { %11234 = shalt.err (!%p11231_p9)
}
 0x64c   :  { %s13741_s28 = sld [smem:[#allocation217_spill]]  ;;  %s11554_s19 = smov [#allocation112]  }
 0x64d   :  { %967 = dma.hbm_to_vmem [thread:$0]  %s13740_s14, 16, %s965_s26, [#allocation108]  }
 0x64e   :  { %s983_s1 = sshll.u32 %s11554_s19, 4  ;;  %s11555_s2 = smov [#allocation115]   ;;  %s984_s1 = int_to_ptr.vmem [resolvable:$true] %s983_s1 }
 0x64f   :  { %s1005_s8 = sshll.u32 %s11555_s2, 4  ;;  %s1006_s8 = int_to_ptr.vmem [resolvable:$true] %s1005_s8 }
 0x652   :  { %s11235_s11 = scalar_lea.hbm %s13741_s28, 256 }
 0x653   :  { %p11236_p10 = scmp.ne.s32.totalorder %s13741_s28, %s11235_s11  ;;  %p11239_p11 = scmp.lt.u32.totalorder %s11235_s11, %s13741_s28 }
 0x655   :  { %p11241_p12 = pnand %p11239_p11, %p11236_p10 }
 0x657   :  { %11244 = shalt.err (!%p11241_p12)
}
 0x658   :  { %s11245_s25 = scalar_lea.vmem %s984_s1, 256  ;;  %p11250_p0 = scmp.lt.s32.totalorder %s984_s1, %s984_s1 }
 0x659   :  { %p11246_p13 = scmp.ne.s32.totalorder %s984_s1, %s11245_s25  ;;  %p11251_p1 = scmp.lt.s32.totalorder %s11245_s25, %s11245_s25 }
 0x65b   :  { %p11252_p2 = por %p11251_p1, %p11250_p0 }
 0x65d   :  { %p11253_p3 = pnand %p11252_p2, %p11246_p13 }
 0x65f   :  { %11256 = shalt.err (!%p11253_p3)
}
 0x660   :  { %989 = dma.hbm_to_vmem [thread:$0]  %s13741_s28, 256, %s984_s1, [#allocation111], %s11480_s7, %s11480_s7, %s11481_s10  }
 0x661   :  { %s11257_s6 = scalar_lea.hbm %s11960_s12, 256 }
 0x662   :  { %p11258_p4 = scmp.ne.s32.totalorder %s11960_s12, %s11257_s6  ;;  %p11261_p5 = scmp.lt.u32.totalorder %s11257_s6, %s11960_s12 }
 0x664   :  { %p11263_p6 = pnand %p11261_p5, %p11258_p4 }
 0x666   :  { %11266 = shalt.err (!%p11263_p6)
}
 0x667   :  { %s11267_s15 = scalar_lea.vmem %s1006_s8, 256  ;;  %p11272_p8 = scmp.lt.s32.totalorder %s1006_s8, %s1006_s8 }
 0x668   :  { %p11268_p7 = scmp.ne.s32.totalorder %s1006_s8, %s11267_s15  ;;  %p11273_p9 = scmp.lt.s32.totalorder %s11267_s15, %s11267_s15 }
 0x66a   :  { %p11274_p10 = por %p11273_p9, %p11272_p8 }
 0x66c   :  { %p11275_p11 = pnand %p11274_p10, %p11268_p7 }
 0x66e   :  { %11278 = shalt.err (!%p11275_p11)
}
 0x66f   :  { %1011 = dma.hbm_to_vmem [thread:$0]  %s11960_s12, 256, %s1006_s8, [#allocation114], %s11480_s7, %s11480_s7, %s11481_s10  }
 0x670   :  { %s11556_s20 = smov [#allocation116]   ;;  %s11279_s29 = scalar_lea.hbm %s11965_s5, 16 }
 0x671   :  { %s1018_s16 = sshll.u32 %s11556_s20, 4  ;;  %p11280_p12 = scmp.ne.s32.totalorder %s11965_s5, %s11279_s29  ;;  %s1019_s16 = int_to_ptr.vmem [resolvable:$true] %s1018_s16 }
 0x672   :  { %p11283_p13 = scmp.lt.u32.totalorder %s11279_s29, %s11965_s5 }
 0x674   :  { %p11285_p0 = pnand %p11283_p13, %p11280_p12 }
 0x676   :  { %11288 = shalt.err (!%p11285_p0)
}
 0x677   :  { %s11289_s3 = scalar_lea.vmem %s1019_s16, 16  ;;  %s11293_s18 = scalar_lea.vmem %s1019_s16, 32 }
 0x678   :  { %p11290_p1 = scmp.ne.s32.totalorder %s1019_s16, %s11289_s3  ;;  %p11294_p2 = scmp.lt.s32.totalorder %s1019_s16, %s1019_s16 }
 0x679   :  { %p11295_p3 = scmp.lt.s32.totalorder %s11293_s18, %s11289_s3 }
 0x67b   :  { %p11296_p4 = por %p11295_p3, %p11294_p2 }
 0x67d   :  { %p11297_p5 = pnand %p11296_p4, %p11290_p1 }
 0x67f   :  { %11300 = shalt.err (!%p11297_p5)
}
 0x680   :  { %1021 = dma.hbm_to_vmem [thread:$0]  %s11965_s5, 16, %s1019_s16, [#allocation117]  }
 0x681   :  { %11323 = dma.done.wait [#allocation3], 128  }
 0x682   :  { %11324 = vsyncadd [#allocation3], 4294967168 }
 0x683   :  { %11325 = dma.done.wait [#allocation6], 512  }
 0x684   :  { %11326 = vsyncadd [#allocation6], 4294966784 }
 0x685   :  { %11327 = dma.done.wait [#allocation9], 512  }
 0x686   :  { %11328 = vsyncadd [#allocation9], 4294966784 }
 0x687   :  { %11329 = dma.done.wait [#allocation12], 384  }
 0x688   :  { %11330 = vsyncadd [#allocation12], 4294966912 }
 0x689   :  { %11331 = dma.done.wait [#allocation15], 512  }
 0x68a   :  { %11332 = vsyncadd [#allocation15], 4294966784 }
 0x68b   :  { %11333 = dma.done.wait [#allocation18], 48  }
 0x68c   :  { %11334 = vsyncadd [#allocation18], 4294967248 }
 0x68d   :  { %11335 = dma.done.wait [#allocation21], 32  }
 0x68e   :  { %11336 = vsyncadd [#allocation21], 4294967264 }
 0x68f   :  { %11337 = dma.done.wait [#allocation24], 2048  }
 0x690   :  { %11338 = vsyncadd [#allocation24], 4294965248 }
 0x691   :  { %11339 = dma.done.wait [#allocation27], 528  }
 0x692   :  { %11340 = vsyncadd [#allocation27], 4294966768 }
 0x693   :  { %11341 = dma.done.wait [#allocation30], 528  }
 0x694   :  { %11342 = vsyncadd [#allocation30], 4294966768 }
 0x695   :  { %11343 = dma.done.wait [#allocation33], 272  }
 0x696   :  { %11344 = vsyncadd [#allocation33], 4294967024 }
 0x697   :  { %11345 = dma.done.wait [#allocation36], 256  }
 0x698   :  { %11346 = vsyncadd [#allocation36], 4294967040 }
 0x699   :  { %11347 = dma.done.wait [#allocation39], 32  }
 0x69a   :  { %11348 = vsyncadd [#allocation39], 4294967264 }
 0x69b   :  { %11349 = dma.done.wait [#allocation42], 1040  }
 0x69c   :  { %11350 = vsyncadd [#allocation42], 4294966256 }
 0x69d   :  { %11351 = dma.done.wait [#allocation45], 272  }
 0x69e   :  { %11352 = vsyncadd [#allocation45], 4294967024 }
 0x69f   :  { %11353 = dma.done.wait [#allocation48], 272  }
 0x6a0   :  { %11354 = vsyncadd [#allocation48], 4294967024 }
 0x6a1   :  { %11355 = dma.done.wait [#allocation51], 272  }
 0x6a2   :  { %11356 = vsyncadd [#allocation51], 4294967024 }
 0x6a3   :  { %11357 = dma.done.wait [#allocation54], 1024  }
 0x6a4   :  { %11358 = vsyncadd [#allocation54], 4294966272 }
 0x6a5   :  { %11359 = dma.done.wait [#allocation57], 32  }
 0x6a6   :  { %11360 = vsyncadd [#allocation57], 4294967264 }
 0x6a7   :  { %11361 = dma.done.wait [#allocation60], 48  }
 0x6a8   :  { %11362 = vsyncadd [#allocation60], 4294967248 }
 0x6a9   :  { %11363 = dma.done.wait [#allocation63], 32  }
 0x6aa   :  { %11364 = vsyncadd [#allocation63], 4294967264 }
 0x6ab   :  { %11365 = dma.done.wait [#allocation66], 2048  }
 0x6ac   :  { %11366 = vsyncadd [#allocation66], 4294965248 }
 0x6ad   :  { %11367 = dma.done.wait [#allocation69], 528  }
 0x6ae   :  { %11368 = vsyncadd [#allocation69], 4294966768 }
 0x6af   :  { %11369 = dma.done.wait [#allocation72], 528  }
 0x6b0   :  { %11370 = vsyncadd [#allocation72], 4294966768 }
 0x6b1   :  { %11371 = dma.done.wait [#allocation75], 272  }
 0x6b2   :  { %11372 = vsyncadd [#allocation75], 4294967024 }
 0x6b3   :  { %11373 = dma.done.wait [#allocation78], 256  }
 0x6b4   :  { %11374 = vsyncadd [#allocation78], 4294967040 }
 0x6b5   :  { %11375 = dma.done.wait [#allocation81], 32  }
 0x6b6   :  { %11376 = vsyncadd [#allocation81], 4294967264 }
 0x6b7   :  { %11377 = dma.done.wait [#allocation84], 1040  }
 0x6b8   :  { %11378 = vsyncadd [#allocation84], 4294966256 }
 0x6b9   :  { %11379 = dma.done.wait [#allocation87], 272  }
 0x6ba   :  { %11380 = vsyncadd [#allocation87], 4294967024 }
 0x6bb   :  { %11381 = dma.done.wait [#allocation90], 272  }
 0x6bc   :  { %11382 = vsyncadd [#allocation90], 4294967024 }
 0x6bd   :  { %11383 = dma.done.wait [#allocation93], 272  }
 0x6be   :  { %11384 = vsyncadd [#allocation93], 4294967024 }
 0x6bf   :  { %11385 = dma.done.wait [#allocation96], 1024  }
 0x6c0   :  { %11386 = vsyncadd [#allocation96], 4294966272 }
 0x6c1   :  { %11387 = dma.done.wait [#allocation99], 32  }
 0x6c2   :  { %11388 = vsyncadd [#allocation99], 4294967264 }
 0x6c3   :  { %11389 = dma.done.wait [#allocation102], 32  }
 0x6c4   :  { %11390 = vsyncadd [#allocation102], 4294967264 }
 0x6c5   :  { %11391 = dma.done.wait [#allocation105], 1040  }
 0x6c6   :  { %11392 = vsyncadd [#allocation105], 4294966256 }
 0x6c7   :  { %11393 = dma.done.wait [#allocation108], 32  }
 0x6c8   :  { %11394 = vsyncadd [#allocation108], 4294967264 }
 0x6c9   :  { %11395 = dma.done.wait [#allocation111], 272  }
 0x6ca   :  { %11396 = vsyncadd [#allocation111], 4294967024 }
 0x6cb   :  { %11397 = dma.done.wait [#allocation114], 272  }
 0x6cc   :  { %11398 = vsyncadd [#allocation114], 4294967024 }
 0x6cd   :  { %11399 = dma.done.wait [#allocation117], 16  }
 0x6ce   :  { %11400 = vsyncadd [#allocation117], 4294967280  ;;  %v11557_v0 = vmov 0   ;;  %v1251_v1 = vld [vmem:[#allocation5] sm:$0xff]  ;;  %v1260_v2 = vld [vmem:[#allocation13] sm:$0xff]  ;;  %s11558_s5 = smov 32   ;;  %v1416_v17 = vlaneseq }
 0x6cf   :  { %9392 = vset.pattern.permute.xlu0 %v11557_v0  ;;  %1442 = vrot.lane.b32.xlu1 %v1260_v2, %s11558_s5  ;;  %v1252_v3 = vld [vmem:[#allocation5 + $0x8] sm:$0xff]  ;;  %v1261_v4 = vld [vmem:[#allocation13 + $0x8] sm:$0xff]  ;;  %v1399_v5 = vld [vmem:[#allocation106] sm:$0xff]  ;;  %vm1448_vm0 = vcmask 261120   ;;  %vm1457_vm1 = vcmask 523264   ;;  %vm1539_vm2 = vcmask 130048  }
 0x6d0   :  { %1422 = vperm.xlu0 %9392, %v1251_v1   ;;  %v1400_v6 = vld [vmem:[#allocation106 + $0x8] sm:$0xff]  ;;  %v1401_v8 = vld [vmem:[#allocation106 + $0x10] sm:$0xff]  ;;  %v1402_v9 = vld [vmem:[#allocation106 + $0x18] sm:$0xff]  ;;  %v1417_v18 = vand.u32 127, %v1416_v17  ;;  %vm11563_vm3 = vmmov 0   ;;  %s11565_s12 = smov 16  }
 0x6d1   :  { %v8952_v7 = vpack.c.bf16 %v1400_v6, %v1399_v5  ;;  %v8956_v10 = vpack.c.bf16 %v1402_v9, %v1401_v8  ;;  %v1403_v11 = vld [vmem:[#allocation106 + $0x20] sm:$0xff]  ;;  %v1404_v12 = vld [vmem:[#allocation106 + $0x28] sm:$0xff]  ;;  %v1405_v13 = vld [vmem:[#allocation106 + $0x30] sm:$0xff]  ;;  %vm1879_vm4 = vcmask 392192   ;;  %s11566_s7 = smov 80   ;;  %s11567_s22 = smov 112  }
 0x6d2   :  { %v8960_v14 = vpack.c.bf16 %v1404_v12, %v1403_v11  ;;  %v1406_v15 = vld [vmem:[#allocation106 + $0x38] sm:$0xff]  ;;  %v1418_v19 = vcvt.s32.f32 %v1417_v18  ;;  %v1410_v54 = vld [vmem:[#allocation112] sm:$0xff]  ;;  %v1411_v55 = vld [vmem:[#allocation112 + $0x8] sm:$0xff]  ;;  %s11568_s23 = smov 96   ;;  %vm2012_vm5 = vcmask 64512   ;;  %s11572_s21 = smov 64  }
 0x6d3   :  { %1444 = vrot.lane.b32.xlu1 %v1261_v4, %s11558_s5  ;;  %8953 = vmatprep.subr.bf16.mxu0 %v8952_v7  ;;  %v8964_v16 = vpack.c.bf16 %v1406_v15, %v1405_v13  ;;  %v8074_v37 = vld [vmem:[#allocation101] ss:$0 sm:$0xff]  ;;  %v8968_v56 = vpack.c.bf16 %v1411_v55, %v1410_v54  ;;  %v8077_v1 = vld [vmem:[#allocation104] ss:$0 sm:$0xff]  ;;  %v8084_v55 = vld [vmem:[#allocation110] ss:$0 sm:$0xff] }
 0x6d4   :  { %1427 = vperm.xlu0 %9392, %v1252_v3   ;;  %8955 = vmatpush3.bf16.msra.mxu0 %v8952_v7  ;;  %v1419_v20 = vmul.f32 0.16129032, %v1418_v19  ;;  %v8078_v3 = vld [vmem:[#allocation103] ss:$0 sm:$0xff]  ;;  %vm2251_vm6 = vcmask 785408   ;;  %s11575_s4 = smov 92  }
 0x6d5   :  { %8957 = vmatprep.subr.bf16.mxu0 %v8956_v10  ;;  %8969 = vmatprep.subr.bf16.mxu1 %v8968_v56  ;;  %vm3230_vm7 = vcmask 31744   ;;  %s11576_s9 = smov 36   ;;  %s11577_s26 = smov 48   ;;  %vm3221_vm8 = vcmask 195584   ;;  %vm3763_vm9 = vcmask 97280   ;;  %vm3768_vm10 = vcmask 162816  }
 0x6d6   :  { %8971 = vmatpush3.bf16.msra.mxu1 %v8968_v56  ;;  %s11578_s13 = smov 24   ;;  %vm3773_vm11 = vcmask 228352   ;;  %s11579_s30 = smov 120  }
 0x6d7   :  { %s11580_s14 = smov 104  }
 0x6d8   :  { %8959 = vmatpush3.bf16.msra.mxu0 %v8956_v10 }
 0x6d9   :  { %8961 = vmatprep.subr.bf16.mxu0 %v8960_v14 }
 0x6dc   :  { %8963 = vmatpush3.bf16.msra.mxu0 %v8960_v14 }
 0x6dd   :  { %8965 = vmatprep.subr.bf16.mxu0 %v8964_v16 }
 0x6e0   :  { %8967 = vmatpush3.bf16.msra.mxu0 %v8964_v16 }
 0x741   :  { %v1443_v31 = vpop.permute.xlu1 %1442 }
 0x745   :  { %v1445_v34 = vpop.permute.xlu1 %1444 }
 0x74f   :  { %v1423_v21 = vpop.permute.xlu0 %1422 }
 0x750   :  { %v1430_v22 = vsub.f32 %v1423_v21, %v1419_v20  ;;  %v8081_v21 = vld [vmem:[#allocation107] ss:$0 sm:$0xff] }
 0x752   :  { %v1432_v23 = vmul.f32 -4.805, %v1430_v22 }
 0x753   :  { %v1428_v24 = vpop.permute.xlu0 %1427 }
 0x754   :  { %v1434_v25 = vmul.f32 %v1432_v23, %v1430_v22  ;;  %v1431_v26 = vsub.f32 %v1428_v24, %v1419_v20 }
 0x756   :  { %v1436_v27 = vmul.f32 1.442695, %v1434_v25  ;;  %v1433_v28 = vmul.f32 -4.805, %v1431_v26 }
 0x758   :  { %9439 = vpow2.f32 %v1436_v27  ;;  %v1435_v29 = vmul.f32 %v1433_v28, %v1431_v26 }
 0x75a   :  { %v1438_v30 = vmul.f32 1.442695, %v1435_v29 }
 0x75c   :  { %9441 = vpow2.f32 %v1438_v30 }
 0x762   :  { %v12376_v32 = vpop.eup %9439 }
 0x763   :  { %v1449_v33 = vsel %vm1448_vm0, %v12376_v32, %v1443_v31 }
 0x764   :  { %8476 = vmatprep.mubr.msk.f32.mxu0 %vm1457_vm1, %v1449_v33 }
 0x766   :  { %v12381_v35 = vpop.eup %9441 }
 0x767   :  { %v1450_v36 = vsel %vm1448_vm0, %v12381_v35, %v1445_v34 }
 0x768   :  { %8477 = vmatmul.mubr.msk.f32.vlgmr.msra.gmra.mrb[0].mxu0 %vm1457_vm1, %v1450_v36 }
 0x83b   :  { %v8478_v38 = vpop.f32.mrb[0].mxu0 }
 0x83c   :  { %v1536_v39 = vadd.f32 %v8478_v38, %v8074_v37  ;;  %v1530_v40 = vpop.f32.mrb[1].mxu0 }
 0x83d   :  { %v1531_v41 = vadd.f32 %v8074_v37, %v1530_v40  ;;  %v1413_v40 = vld [vmem:[#allocation115] sm:$0xff] }
 0x83e   :  { %v1543_v42 = vsel %vm1539_vm2, %v1536_v39, 0.0 }
 0x83f   :  { %1544 = vadd.xlane.f32.xlu1 %v1543_v42  ;;  %v1540_v43 = vsel %vm1539_vm2, %v1531_v41, 0.0 }
 0x840   :  { %1541 = vadd.xlane.f32.xlu0 %v1540_v43  ;;  %v12396_v43 = vld [vmem:[#allocation7] sm:$0xff] }
 0x8cc   :  { %v1545_v44 = vpop.xlane.xlu1 %1544 }
 0x8cd   :  { %v1548_v45 = vmul.f32 0.0625, %v1545_v44  ;;  %v1542_v46 = vpop.xlane.xlu0 %1541  ;;  %v11559_v44 = vmov 4  }
 0x8ce   :  { %v1547_v47 = vmul.f32 0.0625, %v1542_v46  ;;  %9393 = vset.pattern.permute.xlu1 %v11559_v44  ;;  %9394 = vset.pattern.permute.xlu0 %v11559_v44  ;;  %v11560_v46 = vmov 5  }
 0x8cf   :  { %v1550_v48 = vsub.f32 %v1536_v39, %v1548_v45  ;;  %v12398_v45 = vld [vmem:[#allocation7 + $0x8] sm:$0xff] }
 0x8d0   :  { %v1549_v49 = vsub.f32 %v1531_v41, %v1547_v47  ;;  %v1414_v41 = vld [vmem:[#allocation115 + $0x8] sm:$0xff]  ;;  %v11561_v47 = vmov 3  }
 0x8d1   :  { %v1552_v52 = vmul.f32 %v1550_v48, %v1550_v48  ;;  %v8972_v42 = vpack.c.bf16 %v1414_v41, %v1413_v40 }
 0x8d2   :  { %v1551_v50 = vmul.f32 %v1549_v49, %v1549_v49 }
 0x8d3   :  { %v1556_v53 = vsel %vm1539_vm2, %v1552_v52, 0.0  ;;  %8973 = vmatprep.subr.bf16.mxu1 %v8972_v42 }
 0x8d4   :  { %v1553_v51 = vsel %vm1539_vm2, %v1551_v50, 0.0 }
 0x8d5   :  { %1554 = vadd.xlane.f32.xlu0 %v1553_v51 }
 0x8d9   :  { %1557 = vadd.xlane.f32.xlu0 %v1556_v53 }
 0x962   :  { %v1555_v57 = vpop.xlane.xlu0 %1554 }
 0x963   :  { %v1559_v58 = vmul.f32 0.0625, %v1555_v57 }
 0x965   :  { %v1561_v59 = vadd.f32 1e-05, %v1559_v58  ;;  %v8085_v58 = vld [vmem:[#allocation109] ss:$0 sm:$0xff] }
 0x966   :  { %v1558_v60 = vpop.xlane.xlu0 %1557 }
 0x967   :  { %9443 = vrsqrt.f32 %v1561_v59  ;;  %v1560_v61 = vmul.f32 0.0625, %v1558_v60 }
 0x969   :  { %v1562_v62 = vadd.f32 1e-05, %v1560_v61 }
 0x96b   :  { %9445 = vrsqrt.f32 %v1562_v62 }
 0x971   :  { %v9444_v63 = vpop.eup %9443 }
 0x972   :  { %v1565_v2 = vmul.f32 %v9444_v63, %v1549_v49 }
 0x974   :  { %v1573_v4 = vmul.f32 %v8077_v1, %v1565_v2 }
 0x975   :  { %v9446_v5 = vpop.eup %9445 }
 0x976   :  { %v1566_v6 = vmul.f32 %v9446_v5, %v1550_v48  ;;  %v1581_v7 = vadd.f32 %v8078_v3, %v1573_v4 }
 0x978   :  { %v1574_v8 = vmul.f32 %v8077_v1, %v1566_v6  ;;  %v8079_v9 = vmul.f32 -1.442695, %v1581_v7 }
 0x97a   :  { %v1582_v10 = vadd.f32 %v8078_v3, %v1574_v8  ;;  %9447 = vpow2.f32 %v8079_v9 }
 0x97c   :  { %v8080_v11 = vmul.f32 -1.442695, %v1582_v10 }
 0x97e   :  { %9449 = vpow2.f32 %v8080_v11 }
 0x984   :  { %v9448_v12 = vpop.eup %9447 }
 0x985   :  { %v1589_v13 = vadd.f32 1.0, %v9448_v12 }
 0x987   :  { %9451 = vrcp.f32 %v1589_v13  ;;  %v8088_v13 = vld [vmem:[#allocation113] ss:$0 sm:$0xff] }
 0x988   :  { %v9450_v14 = vpop.eup %9449 }
 0x989   :  { %v1590_v15 = vadd.f32 1.0, %v9450_v14 }
 0x98b   :  { %9453 = vrcp.f32 %v1590_v15 }
 0x991   :  { %v9452_v16 = vpop.eup %9451 }
 0x992   :  { %v1595_v18 = vmul.f32 %v9452_v16, %v1581_v7 }
 0x994   :  { %8483 = vmatprep.mubr.msk.f32.mxu1 %vm1539_vm2, %v1595_v18 }
 0x995   :  { %v9454_v19 = vpop.eup %9453 }
 0x996   :  { %v1596_v20 = vmul.f32 %v9454_v19, %v1582_v10 }
 0x998   :  { %8484 = vmatmul.mubr.msk.f32.vlgmr.msra.gmra.mrb[0].mxu1 %vm1539_vm2, %v1596_v20 }
 0x999   :  { %8975 = vmatpush3.bf16.msra.mxu1 %v8972_v42 }
 0xa6b   :  { %v8485_v22 = vpop.f32.mrb[0].mxu1 }
 0xa6c   :  { %v1681_v23 = vadd.f32 %v8485_v22, %v8081_v21  ;;  %v1675_v24 = vpop.f32.mrb[1].mxu1 }
 0xa6d   :  { %v1676_v25 = vadd.f32 %v8081_v21, %v1675_v24  ;;  %v11562_v21 = vmov 0.0|0.0  }
 0xa6e   :  { %v1687_v26 = vsel %vm1539_vm2, %v1681_v23, 0.0  ;;  %8976 = vmatprep.subr.bf16.mxu1 %v11562_v21 }
 0xa6f   :  { %1688 = vadd.xlane.f32.xlu0 %v1687_v26  ;;  %v1684_v27 = vsel %vm1539_vm2, %v1676_v25, 0.0 }
 0xa70   :  { %1685 = vadd.xlane.f32.xlu1 %v1684_v27 }
 0xafc   :  { %v1689_v28 = vpop.xlane.xlu0 %1688 }
 0xafd   :  { %v1691_v29 = vmul.f32 0.0625, %v1689_v28  ;;  %v1686_v30 = vpop.xlane.xlu1 %1685  ;;  %v11564_v28 = vmov 0.0  }
 0xafe   :  { %v1690_v31 = vmul.f32 0.0625, %v1686_v30 }
 0xaff   :  { %v1693_v33 = vsub.f32 %v1681_v23, %v1691_v29 }
 0xb00   :  { %v1692_v34 = vsub.f32 %v1676_v25, %v1690_v31 }
 0xb01   :  { %v1695_v36 = vmul.f32 %v1693_v33, %v1693_v33 }
 0xb02   :  { %v1694_v37 = vmul.f32 %v1692_v34, %v1692_v34 }
 0xb03   :  { %v1699_v38 = vsel %vm1539_vm2, %v1695_v36, 0.0 }
 0xb04   :  { %1700 = vadd.xlane.f32.xlu0 %v1699_v38  ;;  %v1696_v39 = vsel %vm1539_vm2, %v1694_v37, 0.0 }
 0xb05   :  { %1697 = vadd.xlane.f32.xlu1 %v1696_v39 }
 0xb16   :  { %1840 = vperm.xlu1 %9393, %v12396_v43  }
 0xb1a   :  { %1844 = vperm.xlu0 %9394, %v12398_v45   ;;  %9395 = vset.pattern.permute.xlu1 %v11560_v46 }
 0xb1b   :  { %1850 = vperm.xlu1 %9395, %v12396_v43  }
 0xb1f   :  { %1854 = vperm.xlu1 %9395, %v12398_v45  }
 0xb23   :  { %9396 = vset.pattern.permute.xlu1 %v11561_v47 }
 0xb24   :  { %1829 = vperm.xlu1 %9396, %v12396_v43  }
 0xb28   :  { %1834 = vperm.xlu1 %9396, %v12398_v45  }
 0xb91   :  { %v1701_v48 = vpop.xlane.xlu0 %1700 }
 0xb92   :  { %v1703_v49 = vmul.f32 0.0625, %v1701_v48  ;;  %v1698_v50 = vpop.xlane.xlu1 %1697 }
 0xb93   :  { %v1702_v51 = vmul.f32 0.0625, %v1698_v50  ;;  %v1259_v50 = vld [vmem:[#allocation11] sm:$0xff] }
 0xb94   :  { %v1705_v52 = vadd.f32 1e-05, %v1703_v49 }
 0xb95   :  { %v1704_v53 = vadd.f32 1e-05, %v1702_v51  ;;  %v1250_v51 = vld [vmem:[#allocation2] sm:$0xff] }
 0xb96   :  { %9455 = vrsqrt.f32 %v1705_v52  ;;  %v12408_v11 = vpop.permute.xlu1 %1840 }
 0xb97   :  { %9457 = vrsqrt.f32 %v1704_v53  ;;  %v1956_v53 = vsel %vm1539_vm2, %v1250_v51, 0.0 }
 0xb99   :  { %v12412_v15 = vpop.permute.xlu0 %1844 }
 0xb9a   :  { %v12410_v12 = vpop.permute.xlu1 %1850 }
 0xb9e   :  { %v12414_v19 = vpop.permute.xlu1 %1854 }
 0xba0   :  { %v9456_v54 = vpop.eup %9455 }
 0xba1   :  { %v9458_v56 = vpop.eup %9457  ;;  %v1709_v57 = vmul.f32 %v9456_v54, %v1693_v33 }
 0xba2   :  { %v1708_v59 = vmul.f32 %v9458_v56, %v1692_v34 }
 0xba3   :  { %v1717_v60 = vmul.f32 %v8084_v55, %v1709_v57  ;;  %v12425_v29 = vpop.permute.xlu1 %1829 }
 0xba4   :  { %v1716_v61 = vmul.f32 %v8084_v55, %v1708_v59 }
 0xba5   :  { %v1725_v62 = vadd.f32 %v8085_v58, %v1717_v60 }
 0xba6   :  { %v1724_v63 = vadd.f32 %v8085_v58, %v1716_v61 }
 0xba7   :  { %v8087_v1 = vmul.f32 -1.442695, %v1725_v62  ;;  %v12427_v30 = vpop.permute.xlu1 %1834 }
 0xba8   :  { %v8086_v2 = vmul.f32 -1.442695, %v1724_v63 }
 0xba9   :  { %9459 = vpow2.f32 %v8087_v1 }
 0xbaa   :  { %9461 = vpow2.f32 %v8086_v2  ;;  %v1263_v2 = vld [vmem:[#allocation14 + $0x8] sm:$0xff] }
 0xbb3   :  { %v9460_v3 = vpop.eup %9459 }
 0xbb4   :  { %v9462_v4 = vpop.eup %9461  ;;  %v1733_v5 = vadd.f32 1.0, %v9460_v3  ;;  %v1262_v3 = vld [vmem:[#allocation14] sm:$0xff] }
 0xbb5   :  { %v1732_v6 = vadd.f32 1.0, %v9462_v4  ;;  %v1255_v4 = vld [vmem:[#allocation8] sm:$0xff] }
 0xbb6   :  { %9463 = vrcp.f32 %v1733_v5  ;;  %v1257_v5 = vld [vmem:[#allocation10] sm:$0xff] }
 0xbb7   :  { %9465 = vrcp.f32 %v1732_v6  ;;  %8507 = vmatprep.mubr.msk.f32.mxu0 %vm2012_vm5, %v1257_v5 }
 0xbc0   :  { %v9464_v7 = vpop.eup %9463 }
 0xbc1   :  { %v9466_v8 = vpop.eup %9465  ;;  %v1739_v10 = vmul.f32 %v9464_v7, %v1725_v62 }
 0xbc2   :  { %v1738_v9 = vmul.f32 %v9466_v8, %v1724_v63 }
 0xbc4   :  { %8490 = vmatprep.mubr.msk.f32.mxu1 %vm1539_vm2, %v1738_v9 }
 0xbc5   :  { %8491 = vmatmul.mubr.msk.f32.vlgmr.msra.gmra.mrb[2].mxu1 %vm1539_vm2, %v1739_v10 }
 0xbc6   :  { %8497 = vmatprep.mubr.msk.f32.mxu1 %vm11563_vm3, %v11564_v28 }
 0xc98   :  { %v8492_v14 = vpop.f32.mrb[2].mxu1 }
 0xc99   :  { %v1824_v16 = vadd.f32 %v8492_v14, %v8088_v13  ;;  %v1818_v18 = vpop.f32.mrb[3].mxu1 }
 0xc9a   :  { %v1819_v20 = vadd.f32 %v8088_v13, %v1818_v18 }
 0xc9b   :  { %v1848_v22 = vmul.f32 %v12412_v15, %v1824_v16  ;;  %v1858_v23 = vmul.f32 %v12414_v19, %v1824_v16  ;;  %v1838_v34 = vmul.f32 %v12427_v30, %v1824_v16 }
 0xc9c   :  { %v1847_v24 = vmul.f32 %v12408_v11, %v1819_v20  ;;  %v1857_v25 = vmul.f32 %v12410_v12, %v1819_v20  ;;  %v1837_v33 = vmul.f32 %v12425_v29, %v1819_v20 }
 0xc9d   :  { %v1876_v40 = vsel %vm1539_vm2, %v1824_v16, %v1838_v34  ;;  %v1304_v34 = vld [vmem:[#allocation43] sm:$0xff] }
 0xc9e   :  { %v9397_v26 = vpack.i.bf16 %v1848_v22, %v1847_v24  ;;  %v9402_v27 = vpack.i.bf16 %v1858_v23, %v1857_v25  ;;  %v1875_v39 = vsel %vm1539_vm2, %v1819_v20, %v1837_v33  ;;  %v8092_v33 = vld [vmem:[#allocation56] ss:$0 sm:$0xff] }
 0xca0   :  { %9398 = vrot.lane.b32.xlu1 %v9397_v26, %s11565_s12 }
 0xca4   :  { %9403 = vrot.lane.b32.xlu1 %v9402_v27, %s11558_s5 }
 0xd12   :  { %v9399_v31 = vpop.permute.xlu1 %9398 }
 0xd13   :  { %v9401_v36 = vunpack.i.h.bf16 %v9399_v31  ;;  %v9400_v37 = vunpack.i.l.bf16 %v9399_v31 }
 0xd15   :  { %v1878_v44 = vsel %vm1448_vm0, %v1876_v40, %v9401_v36  ;;  %v1877_v46 = vsel %vm1448_vm0, %v1875_v39, %v9400_v37  ;;  %v1305_v36 = vld [vmem:[#allocation43 + $0x8] sm:$0xff]  ;;  %v1307_v39 = vld [vmem:[#allocation43 + $0x18] sm:$0xff] }
 0xd16   :  { %v9404_v38 = vpop.permute.xlu1 %9403 }
 0xd17   :  { %v9406_v41 = vunpack.i.h.bf16 %v9404_v38  ;;  %v9405_v42 = vunpack.i.l.bf16 %v9404_v38  ;;  %v1306_v38 = vld [vmem:[#allocation43 + $0x10] sm:$0xff] }
 0xd19   :  { %v1880_v47 = vsel %vm1879_vm4, %v1877_v46, %v9405_v42  ;;  %v1881_v48 = vsel %vm1879_vm4, %v1878_v44, %v9406_v41  ;;  %v8979_v41 = vpack.c.bf16 %v1305_v36, %v1304_v34  ;;  %v1256_v44 = vld [vmem:[#allocation8 + $0x8] sm:$0xff]  ;;  %v8983_v46 = vpack.c.bf16 %v1307_v39, %v1306_v38 }
 0xd1a   :  { %v8977_v49 = vpack.c.bf16 %v1881_v48, %v1880_v47  ;;  %v1258_v47 = vld [vmem:[#allocation10 + $0x8] sm:$0xff]  ;;  %v1308_v48 = vld [vmem:[#allocation43 + $0x20] sm:$0xff]  ;;  %v11573_v36 = vmov 2  }
 0xd1c   :  { %8978 = vmatpush3.bf16.msra.mxu1 %v8977_v49  ;;  %v1309_v49 = vld [vmem:[#allocation43 + $0x28] sm:$0xff] }
 0xd1d   :  { %v8987_v51 = vpack.c.bf16 %v1309_v49, %v1308_v48 }
 0xd1f   :  { %8498 = vmatmul.mubr.msk.f32.vlgmr.msra.gmra.mrb[4].mxu1 %vm1539_vm2, %v1259_v50 }
 0xd20   :  { %8502 = vmatprep.mubr.msk.f32.mxu1 %vm2012_vm5, %v1255_v4 }
 0xdf2   :  { %v1951_v52 = vpop.f32.mrb[4].mxu1 }
 0xdf3   :  { %v1955_v54 = vmul.f32 0.04274374, %v1951_v52  ;;  %v8499_v55 = vpop.f32.mrb[5].mxu1  ;;  %v1310_v52 = vld [vmem:[#allocation43 + $0x30] sm:$0xff] }
 0xdf5   :  { %v12439_v56 = vadd.f32 %v1956_v53, %v1955_v54  ;;  %v1311_v53 = vld [vmem:[#allocation43 + $0x38] sm:$0xff] }
 0xdf6   :  { %v8991_v54 = vpack.c.bf16 %v1311_v53, %v1310_v52 }
 0xdf7   :  { %v1968_v57 = vmul.f32 %v12439_v56, %v12439_v56 }
 0xdf9   :  { %1993 = vrot.lane.b32.xlu0 %v1968_v57, %s11566_s7  ;;  %1975 = vrot.lane.b32.xlu1 %v1968_v57, %s11567_s22  ;;  %v1969_v58 = vsel %vm1539_vm2, %v1968_v57, 0.0 }
 0xdfd   :  { %1984 = vrot.lane.b32.xlu1 %v1968_v57, %s11568_s23 }
 0xe21   :  { %1970 = vadd.xlane.f32.xlu1 %v1969_v58  ;;  %v11569_v58 = vmov 7  }
 0xe22   :  { %9408 = vset.pattern.permute.xlu0 %v11569_v58  ;;  %9407 = vset.pattern.permute.xlu1 %v11569_v58 }
 0xe6b   :  { %v1994_v59 = vpop.permute.xlu0 %1993  ;;  %v1976_v60 = vpop.permute.xlu1 %1975 }
 0xe6c   :  { %v1978_v61 = vsel %vm1539_vm2, %v1976_v60, 0.0  ;;  %v1996_v62 = vsel %vm1539_vm2, %v1994_v59, 0.0 }
 0xe6d   :  { %1979 = vadd.xlane.f32.xlu0 %v1978_v61  ;;  %1997 = vadd.xlane.f32.xlu1 %v1996_v62 }
 0xe6f   :  { %v1985_v63 = vpop.permute.xlu1 %1984 }
 0xe70   :  { %v1987_v1 = vsel %vm1539_vm2, %v1985_v63, 0.0 }
 0xe71   :  { %1988 = vadd.xlane.f32.xlu0 %v1987_v1 }
 0xe7e   :  { %1962 = vrot.lane.b32.xlu1 %v1263_v2, %s11558_s5  ;;  %v11570_v2 = vmov 8  }
 0xe87   :  { %1960 = vrot.lane.b32.xlu0 %v1262_v3, %s11558_s5  ;;  %v11571_v3 = vmov 1  }
 0xeae   :  { %v1971_v6 = vpop.xlane.xlu1 %1970 }
 0xeaf   :  { %v1972_v8 = vmul.f32 0.0625, %v1971_v6 }
 0xeb1   :  { %v1973_v16 = vmul.f32 0.5, %v1972_v8 }
 0xefa   :  { %v1980_v7 = vpop.xlane.xlu0 %1979  ;;  %v1998_v10 = vpop.xlane.xlu1 %1997 }
 0xefb   :  { %v1981_v9 = vmul.f32 0.0625, %v1980_v7  ;;  %v1999_v18 = vmul.f32 0.0625, %v1998_v10 }
 0xefd   :  { %v1982_v13 = vmul.f32 0.16666667, %v1981_v9  ;;  %v2000_v24 = vmul.f32 0.16666667, %v1999_v18 }
 0xefe   :  { %v1989_v14 = vpop.xlane.xlu0 %1988  ;;  %v1963_v55 = vpop.permute.xlu1 %1962 }
 0xeff   :  { %v1990_v20 = vmul.f32 0.0625, %v1989_v14  ;;  %v1983_v22 = vadd.f32 %v1982_v13, %v1973_v16  ;;  %v1967_v57 = vsel %vm1448_vm0, %v12381_v35, %v1963_v55 }
 0xf01   :  { %v1991_v23 = vmul.f32 0.16666667, %v1990_v20 }
 0xf02   :  { %v1961_v42 = vpop.permute.xlu0 %1960 }
 0xf03   :  { %v1992_v25 = vadd.f32 %v1991_v23, %v1983_v22  ;;  %v1966_v50 = vsel %vm1448_vm0, %v12376_v32, %v1961_v42 }
 0xf05   :  { %v2001_v26 = vadd.f32 %v2000_v24, %v1992_v25 }
 0xf07   :  { %v2002_v27 = vadd.f32 1e-12, %v2001_v26  ;;  %v8097_v26 = vld [vmem:[#allocation38] ss:$0 sm:$0xff] }
 0xf09   :  { %9467 = vrsqrt.f32 %v2002_v27 }
 0xf13   :  { %v9468_v31 = vpop.eup %9467 }
 0xf14   :  { %v2004_v37 = vmul.f32 %v9468_v31, %v12439_v56 }
 0xf16   :  { %v2011_v40 = vmul.f32 %v8092_v33, %v2004_v37  ;;  %v11574_v37 = vmov 6  }
 0xf18   :  { %8500 = vmatprep.subr.mxu1 %v2011_v40  ;;  %8505 = vmatprep.subr.mxu0 %v2011_v40 }
 0xf19   :  { %8501 = vmatpush3.msra.mxu1 %v2011_v40  ;;  %8506 = vmatpush3.msra.mxu0 %v2011_v40 }
 0xf1a   :  { %8503 = vmatmul.mubr.msk.f32.vlgmr.msra.gmra.mrb[6].mxu1 %vm2012_vm5, %v1256_v44  ;;  %8980 = vmatprep.subr.bf16.mxu1 %v8979_v41 }
 0xf1b   :  { %8982 = vmatpush3.bf16.msra.mxu1 %v8979_v41  ;;  %8526 = vmatprep.mubr.msk.f32.mxu1 %vm1457_vm1, %v1966_v50 }
 0xf1c   :  { %8508 = vmatmul.mubr.msk.f32.vlgmr.msra.gmra.mrb[2].mxu0 %vm2012_vm5, %v1258_v47  ;;  %8984 = vmatprep.subr.bf16.mxu1 %v8983_v46 }
 0xf1f   :  { %8986 = vmatpush3.bf16.msra.mxu1 %v8983_v46 }
 0xf20   :  { %8988 = vmatprep.subr.bf16.mxu1 %v8987_v51 }
 0xf23   :  { %8990 = vmatpush3.bf16.msra.mxu1 %v8987_v51 }
 0xf24   :  { %8992 = vmatprep.subr.bf16.mxu1 %v8991_v54 }
 0xf27   :  { %8994 = vmatpush3.bf16.msra.mxu1 %v8991_v54 }
 0xf2a   :  { %8527 = vmatmul.mubr.msk.f32.vlgmr.msra.gmra.mrb[8].mxu1 %vm1457_vm1, %v1967_v57 }
 0xfed   :  { %v12463_v59 = vpop.f32.mrb[6].mxu1 }
 0xfee   :  { %2197 = vrot.lane.b32.xlu1 %v12463_v59, %s11568_s23  ;;  %2189 = vrot.lane.b32.xlu0 %v12463_v59, %s11567_s22  ;;  %v12469_v60 = vpop.f32.mrb[7].mxu1 }
 0xfef   :  { %v8509_v61 = vpop.f32.mrb[2].mxu0 }
 0xff0   :  { %v2166_v62 = vpop.f32.mrb[3].mxu0 }
 0xff2   :  { %2211 = vrot.lane.b32.xlu1 %v12463_v59, %s11566_s7  ;;  %2203 = vrot.lane.b32.xlu0 %v8509_v61, %s11567_s22 }
 0xff6   :  { %2201 = vrot.lane.b32.xlu0 %v2166_v62, %s11567_s22  ;;  %2187 = vrot.lane.b32.xlu1 %v12469_v60, %s11567_s22 }
 0xffa   :  { %2215 = vrot.lane.b32.xlu0 %v2166_v62, %s11568_s23  ;;  %2195 = vrot.lane.b32.xlu1 %v12469_v60, %s11568_s23 }
 0xffd   :  { %v8528_v63 = vpop.f32.mrb[8].mxu1 }
 0xffe   :  { %2217 = vrot.lane.b32.xlu0 %v8509_v61, %s11568_s23  ;;  %2209 = vrot.lane.b32.xlu1 %v12469_v60, %s11566_s7  ;;  %v2480_v1 = vpop.f32.mrb[9].mxu1  ;;  %v2486_v27 = vadd.f32 %v8528_v63, %v8097_v26 }
 0xfff   :  { %v2481_v33 = vadd.f32 %v8097_v26, %v2480_v1 }
0x1000   :  { %v2492_v31 = vsel %vm1539_vm2, %v2486_v27, 0.0 }
0x1001   :  { %v2489_v34 = vsel %vm1539_vm2, %v2481_v33, 0.0 }
0x1002   :  { %2345 = vperm.xlu0 %9408, %v12398_v45   ;;  %2341 = vperm.xlu1 %9407, %v12396_v43  }
0x1006   :  { %2179 = vrot.lane.b32.xlu0 %v8509_v61, %s11565_s12  ;;  %9409 = vset.pattern.permute.xlu1 %v11570_v2 }
0x1007   :  { %2361 = vperm.xlu1 %9409, %v12396_v43   ;;  %9410 = vset.pattern.permute.xlu0 %v11570_v2 }
0x100a   :  { %2365 = vperm.xlu0 %9410, %v12398_v45  }
0x100b   :  { %2177 = vrot.lane.b32.xlu1 %v2166_v62, %s11565_s12 }
0x100c   :  { %9412 = vset.pattern.permute.xlu1 %v11571_v3 }
0x100e   :  { %9411 = vset.pattern.permute.xlu0 %v11571_v3 }
0x1060   :  { %v2190_v4 = vpop.permute.xlu0 %2189  ;;  %v2198_v5 = vpop.permute.xlu1 %2197 }
0x1061   :  { %v2194_v6 = vsel %vm1539_vm2, %v2190_v4, %v8509_v61 }
0x1062   :  { %2227 = vrot.lane.b32.xlu1 %v2194_v6, %s11558_s5 }
0x1064   :  { %v2204_v7 = vpop.permute.xlu0 %2203  ;;  %v2212_v8 = vpop.permute.xlu1 %2211 }
0x1065   :  { %v2208_v9 = vsel %vm1539_vm2, %v2198_v5, %v2204_v7 }
0x1066   :  { %2235 = vrot.lane.b32.xlu0 %v2208_v9, %s11572_s21 }
0x1068   :  { %v2202_v10 = vpop.permute.xlu0 %2201  ;;  %v2188_v13 = vpop.permute.xlu1 %2187 }
0x1069   :  { %v2193_v14 = vsel %vm1539_vm2, %v2188_v13, %v2166_v62 }
0x106a   :  { %2225 = vrot.lane.b32.xlu1 %v2193_v14, %s11558_s5 }
0x106c   :  { %v2216_v16 = vpop.permute.xlu0 %2215  ;;  %v2196_v18 = vpop.permute.xlu1 %2195 }
0x106d   :  { %v2207_v20 = vsel %vm1539_vm2, %v2196_v18, %v2202_v10 }
0x106e   :  { %2233 = vrot.lane.b32.xlu1 %v2207_v20, %s11572_s21 }
0x1070   :  { %v2218_v22 = vpop.permute.xlu0 %2217  ;;  %v2210_v23 = vpop.permute.xlu1 %2209 }
0x1071   :  { %v2222_v24 = vsel %vm1539_vm2, %v2212_v8, %v2218_v22  ;;  %v2221_v25 = vsel %vm1539_vm2, %v2210_v23, %v2216_v16 }
0x1072   :  { %2243 = vrot.lane.b32.xlu0 %v2222_v24, %s11568_s23  ;;  %2241 = vrot.lane.b32.xlu1 %v2221_v25, %s11568_s23 }
0x1081   :  { %v12511_v38 = vpop.permute.xlu1 %2341  ;;  %v12515_v40 = vpop.permute.xlu0 %2345 }
0x1085   :  { %v2180_v42 = vpop.permute.xlu0 %2179 }
0x1086   :  { %v12513_v39 = vpop.permute.xlu1 %2361  ;;  %v2184_v50 = vsel %vm1539_vm2, %v12463_v59, %v2180_v42 }
0x1089   :  { %v12517_v46 = vpop.permute.xlu0 %2365 }
0x108a   :  { %v2178_v41 = vpop.permute.xlu1 %2177 }
0x108b   :  { %v2183_v51 = vsel %vm1539_vm2, %v12469_v60, %v2178_v41 }
0x1091   :  { %2493 = vadd.xlane.f32.xlu0 %v2492_v31 }
0x1096   :  { %2490 = vadd.xlane.f32.xlu1 %v2489_v34 }
0x10a7   :  { %2265 = vperm.xlu0 %9411, %v12396_v43   ;;  %2269 = vperm.xlu1 %9412, %v12398_v45  }
0x10ab   :  { %9413 = vset.pattern.permute.xlu1 %v11573_v36  ;;  %9417 = vset.pattern.permute.xlu0 %v11557_v0 }
0x10ac   :  { %2285 = vperm.xlu1 %9413, %v12396_v43  }
0x10b0   :  { %9414 = vset.pattern.permute.xlu1 %v11574_v37 }
0x10b1   :  { %2331 = vperm.xlu1 %9414, %v12396_v43  }
0x10b5   :  { %9415 = vset.pattern.permute.xlu1 %v11573_v36 }
0x10b6   :  { %2289 = vperm.xlu1 %9415, %v12398_v45  }
0x10ba   :  { %9416 = vset.pattern.permute.xlu1 %v11574_v37 }
0x10bb   :  { %2335 = vperm.xlu1 %9416, %v12398_v45  }
0x10bf   :  { %9418 = vset.pattern.permute.xlu1 %v11557_v0 }
0x10d4   :  { %v2228_v44 = vpop.permute.xlu1 %2227 }
0x10d5   :  { %v2248_v0 = vsel %vm1448_vm0, %v2184_v50, %v2228_v44 }
0x10d8   :  { %v2236_v48 = vpop.permute.xlu0 %2235 }
0x10d9   :  { %v2250_v52 = vsel %vm1457_vm1, %v2248_v0, %v2236_v48 }
0x10dc   :  { %v2226_v47 = vpop.permute.xlu1 %2225 }
0x10dd   :  { %v2247_v55 = vsel %vm1448_vm0, %v2183_v51, %v2226_v47  ;;  %v1313_v51 = vld [vmem:[#allocation46] sm:$0xff] }
0x10e0   :  { %v2234_v49 = vpop.permute.xlu1 %2233 }
0x10e1   :  { %v2249_v58 = vsel %vm1457_vm1, %v2247_v55, %v2234_v49 }
0x10e4   :  { %v2244_v53 = vpop.permute.xlu0 %2243  ;;  %v2242_v54 = vpop.permute.xlu1 %2241 }
0x10e5   :  { %v12527_v57 = vsel %vm2251_vm6, %v2250_v52, %v2244_v53  ;;  %v12535_v62 = vsel %vm2251_vm6, %v2249_v58, %v2242_v54  ;;  %v1314_v52 = vld [vmem:[#allocation46 + $0x8] sm:$0xff] }
0x10e6   :  { %v2349_v59 = vmul.f32 %v12515_v40, %v12527_v57  ;;  %v2307_v61 = vmul.f32 %v12527_v57, %v12412_v15  ;;  %v2319_v60 = vmul.f32 %v12527_v57, %v12414_v19  ;;  %v2348_v63 = vmul.f32 %v12511_v38, %v12535_v62 }
0x10e7   :  { %v2369_v1 = vmul.f32 %v12517_v46, %v12527_v57  ;;  %v2368_v2 = vmul.f32 %v12513_v39, %v12535_v62  ;;  %v2306_v3 = vmul.f32 %v12535_v62, %v12408_v11  ;;  %v2318_v4 = vmul.f32 %v12535_v62, %v12410_v12 }
0x10e8   :  { %2354 = vrot.lane.b32.xlu0 %v2349_v59, %s11568_s23  ;;  %2312 = vrot.lane.b32.xlu1 %v2307_v61, %s11568_s23  ;;  %v2305_v37 = vmul.f32 %v12527_v57, %v12427_v30  ;;  %v8995_v54 = vpack.c.bf16 %v1314_v52, %v1313_v51  ;;  %v2304_v55 = vmul.f32 %v12535_v62, %v12425_v29 }
0x10ea   :  { %8996 = vmatprep.subr.bf16.mxu0 %v8995_v54 }
0x10eb   :  { %8998 = vmatpush3.bf16.msra.mxu0 %v8995_v54 }
0x10ec   :  { %2324 = vrot.lane.b32.xlu1 %v2319_v60, %s11572_s21  ;;  %2352 = vrot.lane.b32.xlu0 %v2348_v63, %s11568_s23  ;;  %v1270_v63 = vld [vmem:[#allocation23] sm:$0xff] }
0x10f0   :  { %2374 = vrot.lane.b32.xlu1 %v2369_v1, %s11572_s21  ;;  %2372 = vrot.lane.b32.xlu0 %v2368_v2, %s11572_s21  ;;  %v1271_v1 = vld [vmem:[#allocation23 + $0x8] sm:$0xff] }
0x10f1   :  { %v12603_v2 = vpack.c.bf16 %v1271_v1, %v1270_v63 }
0x10f3   :  { %9000 = vmatprep.subr.bf16.mxu0 %v12603_v2 }
0x10f4   :  { %2310 = vrot.lane.b32.xlu1 %v2306_v3, %s11568_s23 }
0x10f8   :  { %2322 = vrot.lane.b32.xlu1 %v2318_v4, %s11572_s21 }
0x111e   :  { %v2494_v5 = vpop.xlane.xlu0 %2493 }
0x111f   :  { %v2496_v6 = vmul.f32 0.0625, %v2494_v5 }
0x1121   :  { %v12557_v7 = vsub.f32 %v2486_v27, %v2496_v6 }
0x1123   :  { %v2491_v8 = vpop.xlane.xlu1 %2490  ;;  %v2500_v9 = vmul.f32 %v12557_v7, %v12557_v7 }
0x1124   :  { %v2495_v10 = vmul.f32 0.0625, %v2491_v8 }
0x1125   :  { %v2504_v13 = vsel %vm1539_vm2, %v2500_v9, 0.0 }
0x1126   :  { %v12562_v14 = vsub.f32 %v2481_v33, %v2495_v10  ;;  %2505 = vadd.xlane.f32.xlu1 %v2504_v13  ;;  %v12581_v27 = vpop.permute.xlu0 %2265 }
0x1127   :  { %v12564_v16 = vpop.permute.xlu1 %2269  ;;  %v2272_v31 = vmul.f32 %v12581_v27, %v12535_v62 }
0x1128   :  { %v2499_v18 = vmul.f32 %v12562_v14, %v12562_v14  ;;  %v2273_v24 = vmul.f32 %v12564_v16, %v12527_v57 }
0x112a   :  { %v2501_v20 = vsel %vm1539_vm2, %v2499_v18, 0.0 }
0x112b   :  { %2502 = vadd.xlane.f32.xlu0 %v2501_v20  ;;  %v12569_v22 = vpop.permute.xlu1 %2285 }
0x1130   :  { %v12571_v23 = vpop.permute.xlu1 %2331 }
0x1131   :  { %v2338_v44 = vmul.f32 %v12571_v23, %v12535_v62 }
0x1135   :  { %v12576_v25 = vpop.permute.xlu1 %2289 }
0x1136   :  { %v2293_v26 = vmul.f32 %v12576_v25, %v12527_v57 }
0x1137   :  { %2259 = vperm.xlu1 %9418, %v12398_v45   ;;  %v2292_v45 = vmul.f32 %v12569_v22, %v12535_v62 }
0x113a   :  { %v12591_v33 = vpop.permute.xlu1 %2335 }
0x113b   :  { %2278 = vrot.lane.b32.xlu1 %v2273_v24, %s11568_s23  ;;  %v2339_v61 = vmul.f32 %v12591_v33, %v12527_v57  ;;  %v8100_v24 = vld [vmem:[#allocation41] ss:$0 sm:$0xff] }
0x113f   :  { %2298 = vrot.lane.b32.xlu1 %v2293_v26, %s11572_s21 }
0x1141   :  { %2255 = vperm.xlu0 %9417, %v12396_v43  }
0x1143   :  { %2276 = vrot.lane.b32.xlu1 %v2272_v31, %s11568_s23  ;;  %v8101_v31 = vld [vmem:[#allocation40] ss:$0 sm:$0xff] }
0x1147   :  { %2296 = vrot.lane.b32.xlu1 %v2292_v45, %s11572_s21 }
0x115a   :  { %v2355_v34 = vpop.permute.xlu0 %2354  ;;  %v2313_v36 = vpop.permute.xlu1 %2312 }
0x115b   :  { %v2317_v41 = vadd.f32 %v2313_v36, %v2305_v37  ;;  %v2359_v3 = vadd.f32 %v2355_v34, %v2339_v61 }
0x115e   :  { %v2353_v42 = vpop.permute.xlu0 %2352  ;;  %v2325_v43 = vpop.permute.xlu1 %2324 }
0x115f   :  { %v2329_v47 = vadd.f32 %v2325_v43, %v2317_v41  ;;  %v2358_v48 = vadd.f32 %v2353_v42, %v2338_v44 }
0x1161   :  { %2384 = vrot.lane.b32.xlu1 %v2329_v47, %s11558_s5 }
0x1162   :  { %v2373_v49 = vpop.permute.xlu0 %2372  ;;  %v2375_v50 = vpop.permute.xlu1 %2374 }
0x1163   :  { %v2378_v0 = vadd.f32 %v2373_v49, %v2358_v48  ;;  %v2379_v4 = vadd.f32 %v2375_v50, %v2359_v3 }
0x1165   :  { %2390 = vrot.lane.b32.xlu0 %v2378_v0, %s11572_s21 }
0x1166   :  { %v2311_v53 = vpop.permute.xlu1 %2310 }
0x1167   :  { %v2316_v58 = vadd.f32 %v2311_v53, %v2304_v55 }
0x116a   :  { %v2323_v59 = vpop.permute.xlu1 %2322 }
0x116b   :  { %v2328_v60 = vadd.f32 %v2323_v59, %v2316_v58 }
0x116d   :  { %2382 = vrot.lane.b32.xlu1 %v2328_v60, %s11558_s5 }
0x1171   :  { %2392 = vrot.lane.b32.xlu1 %v2379_v4, %s11572_s21 }
0x11b3   :  { %v2506_v5 = vpop.xlane.xlu1 %2505 }
0x11b4   :  { %v2508_v6 = vmul.f32 0.0625, %v2506_v5 }
0x11b6   :  { %v2510_v8 = vadd.f32 1e-05, %v2508_v6 }
0x11b7   :  { %v12608_v18 = vpop.permute.xlu1 %2259 }
0x11b8   :  { %9469 = vrsqrt.f32 %v2510_v8  ;;  %v2503_v9 = vpop.xlane.xlu0 %2502 }
0x11b9   :  { %v2507_v10 = vmul.f32 0.0625, %v2503_v9 }
0x11bb   :  { %v2509_v13 = vadd.f32 1e-05, %v2507_v10  ;;  %v2279_v45 = vpop.permute.xlu1 %2278 }
0x11bd   :  { %9471 = vrsqrt.f32 %v2509_v13  ;;  %v1272_v13 = vld [vmem:[#allocation23 + $0x10] sm:$0xff] }
0x11bf   :  { %v2299_v44 = vpop.permute.xlu1 %2298 }
0x11c0   :  { %v12612_v50 = vpop.permute.xlu0 %2255 }
0x11c2   :  { %v9470_v20 = vpop.eup %9469 }
0x11c3   :  { %v2514_v26 = vmul.f32 %v9470_v20, %v12557_v7  ;;  %v2277_v49 = vpop.permute.xlu1 %2276  ;;  %v2262_v7 = vmul.f32 %v12612_v50, %v12535_v62  ;;  %v1273_v20 = vld [vmem:[#allocation23 + $0x18] sm:$0xff] }
0x11c5   :  { %v2522_v34 = vmul.f32 %v8100_v24, %v2514_v26  ;;  %v2282_v53 = vadd.f32 %v2277_v49, %v2262_v7  ;;  %v8104_v7 = vld [vmem:[#allocation44] ss:$0 sm:$0xff] }
0x11c7   :  { %v9472_v36 = vpop.eup %9471  ;;  %v2530_v37 = vadd.f32 %v8101_v31, %v2522_v34  ;;  %v2297_v51 = vpop.permute.xlu1 %2296  ;;  %v1275_v34 = vld [vmem:[#allocation23 + $0x28] sm:$0xff] }
0x11c8   :  { %v2513_v41 = vmul.f32 %v9472_v36, %v12562_v14  ;;  %v2263_v14 = vmul.f32 %v12608_v18, %v12527_v57  ;;  %v2302_v55 = vadd.f32 %v2297_v51, %v2282_v53 }
0x11c9   :  { %v8103_v42 = vmul.f32 -1.442695, %v2530_v37 }
0x11ca   :  { %v2521_v43 = vmul.f32 %v8100_v24, %v2513_v41  ;;  %v2283_v61 = vadd.f32 %v2279_v45, %v2263_v14  ;;  %v2396_v63 = vsel %vm1448_vm0, %v12535_v62, %v2302_v55  ;;  %v9003_v45 = vpack.c.bf16 %v1273_v20, %v1272_v13  ;;  %v1276_v41 = vld [vmem:[#allocation23 + $0x30] sm:$0xff]  ;;  %v1278_v14 = vld [vmem:[#allocation25] sm:$0xff]  ;;  %v1279_v55 = vld [vmem:[#allocation25 + $0x8] sm:$0xff] }
0x11cb   :  { %9473 = vpow2.f32 %v8103_v42  ;;  %v1277_v42 = vld [vmem:[#allocation23 + $0x38] sm:$0xff] }
0x11cc   :  { %v2529_v47 = vadd.f32 %v8101_v31, %v2521_v43  ;;  %v2303_v60 = vadd.f32 %v2299_v44, %v2283_v61  ;;  %v9011_v43 = vpack.c.bf16 %v1277_v42, %v1276_v41  ;;  %v1297_v44 = vld [vmem:[#allocation32 + $0x8] sm:$0xff]  ;;  %v1281_v61 = vld [vmem:[#allocation25 + $0x18] sm:$0xff] }
0x11ce   :  { %v8102_v48 = vmul.f32 -1.442695, %v2529_v47  ;;  %v2397_v6 = vsel %vm1448_vm0, %v12527_v57, %v2303_v60  ;;  %v1274_v57 = vld [vmem:[#allocation23 + $0x20] sm:$0xff] }
0x11cf   :  { %v9007_v36 = vpack.c.bf16 %v1275_v34, %v1274_v57 }
0x11d0   :  { %9475 = vpow2.f32 %v8102_v48 }
0x11d3   :  { %v2385_v58 = vpop.permute.xlu1 %2384 }
0x11d4   :  { %v2399_v8 = vsel %vm1457_vm1, %v2397_v6, %v2385_v58  ;;  %v9015_v58 = vpack.c.bf16 %v1279_v55, %v1278_v14  ;;  %v1285_v6 = vld [vmem:[#allocation25 + $0x38] sm:$0xff] }
0x11d5   :  { %v9474_v0 = vpop.eup %9473 }
0x11d6   :  { %v2538_v52 = vadd.f32 1.0, %v9474_v0  ;;  %9016 = vmatprep.subr.bf16.mxu1 %v9015_v58 }
0x11d7   :  { %v2391_v3 = vpop.permute.xlu0 %2390  ;;  %9018 = vmatpush3.bf16.msra.mxu1 %v9015_v58 }
0x11d8   :  { %9477 = vrcp.f32 %v2538_v52 }
0x11da   :  { %v9476_v54 = vpop.eup %9475 }
0x11db   :  { %v2537_v59 = vadd.f32 1.0, %v9476_v54 }
0x11dd   :  { %9479 = vrcp.f32 %v2537_v59  ;;  %v1280_v59 = vld [vmem:[#allocation25 + $0x10] sm:$0xff] }
0x11de   :  { %v9019_v60 = vpack.c.bf16 %v1281_v61, %v1280_v59 }
0x11df   :  { %v2383_v1 = vpop.permute.xlu1 %2382 }
0x11e0   :  { %v2398_v4 = vsel %vm1457_vm1, %v2396_v63, %v2383_v1  ;;  %9020 = vmatprep.subr.bf16.mxu1 %v9019_v60  ;;  %v1282_v63 = vld [vmem:[#allocation25 + $0x20] sm:$0xff]  ;;  %v1283_v1 = vld [vmem:[#allocation25 + $0x28] sm:$0xff] }
0x11e1   :  { %v12622_v5 = vsel %vm2251_vm6, %v2398_v4, %v2391_v3  ;;  %9022 = vmatpush3.bf16.msra.mxu1 %v9019_v60  ;;  %v9023_v3 = vpack.c.bf16 %v1283_v1, %v1282_v63  ;;  %v1284_v4 = vld [vmem:[#allocation25 + $0x30] sm:$0xff]  ;;  %v8124_v1 = vld [vmem:[#allocation20] ss:$0 sm:$0xff] }
0x11e2   :  { %2634 = vrot.lane.b32.xlu0 %v12622_v5, %s11568_s23  ;;  %v9478_v62 = vpop.eup %9477 }
0x11e3   :  { %v2393_v9 = vpop.permute.xlu1 %2392  ;;  %v2544_v31 = vmul.f32 %v9478_v62, %v2530_v37  ;;  %v1296_v37 = vld [vmem:[#allocation32] sm:$0xff]  ;;  %9024 = vmatprep.subr.bf16.mxu1 %v9023_v3 }
0x11e4   :  { %v12630_v10 = vsel %vm2251_vm6, %v2399_v8, %v2393_v9  ;;  %v9027_v8 = vpack.c.bf16 %v1285_v6, %v1284_v4  ;;  %v8107_v9 = vld [vmem:[#allocation22] ss:$0 sm:$0xff]  ;;  %v8112_v6 = vld [vmem:[#allocation31] ss:$0 sm:$0xff] }
0x11e5   :  { %2636 = vrot.lane.b32.xlu1 %v12630_v10, %s11568_s23  ;;  %9026 = vmatpush3.bf16.msra.mxu1 %v9023_v3 }
0x11e6   :  { %9028 = vmatprep.subr.bf16.mxu1 %v9027_v8 }
0x11e7   :  { %v9480_v24 = vpop.eup %9479 }
0x11e8   :  { %v2543_v26 = vmul.f32 %v9480_v24, %v2529_v47  ;;  %v9031_v47 = vpack.c.bf16 %v1297_v44, %v1296_v37 }
0x11e9   :  { %9030 = vmatpush3.bf16.msra.mxu1 %v9027_v8 }
0x11ea   :  { %8533 = vmatprep.mubr.msk.f32.mxu0 %vm1539_vm2, %v2543_v26 }
0x11eb   :  { %8534 = vmatmul.mubr.msk.f32.vlgmr.msra.gmra.mrb[4].mxu0 %vm1539_vm2, %v2544_v31 }
0x11ec   :  { %9002 = vmatpush3.bf16.msra.mxu0 %v12603_v2 }
0x11ed   :  { %9004 = vmatprep.subr.bf16.mxu0 %v9003_v45 }
0x11f0   :  { %9006 = vmatpush3.bf16.msra.mxu0 %v9003_v45 }
0x11f1   :  { %9008 = vmatprep.subr.bf16.mxu0 %v9007_v36 }
0x11f4   :  { %9010 = vmatpush3.bf16.msra.mxu0 %v9007_v36 }
0x11f5   :  { %9012 = vmatprep.subr.bf16.mxu0 %v9011_v43 }
0x11f8   :  { %9014 = vmatpush3.bf16.msra.mxu0 %v9011_v43 }
0x11f9   :  { %9032 = vmatprep.subr.bf16.mxu0 %v9031_v47 }
0x1254   :  { %v2635_v48 = vpop.permute.xlu0 %2634 }
0x1255   :  { %v2640_v49 = vsel %vm1448_vm0, %v12622_v5, %v2635_v48 }
0x1256   :  { %8552 = vmatprep.mubr.msk.f32.mxu0 %vm1457_vm1, %v2640_v49 }
0x1257   :  { %v2637_v2 = vpop.permute.xlu1 %2636 }
0x1258   :  { %v2641_v0 = vsel %vm1448_vm0, %v12630_v10, %v2637_v2 }
0x1259   :  { %8553 = vmatmul.mubr.msk.f32.vlgmr.msra.gmra.mrb[6].mxu0 %vm1457_vm1, %v2641_v0 }
0x125a   :  { %9034 = vmatpush3.bf16.msra.mxu0 %v9031_v47 }
0x12be   :  { %v8535_v51 = vpop.f32.mrb[4].mxu0 }
0x12bf   :  { %v2623_v52 = vpop.f32.mrb[5].mxu0  ;;  %v2629_v54 = vadd.f32 %v8535_v51, %v8104_v7 }
0x12c0   :  { %v2624_v53 = vadd.f32 %v8104_v7, %v2623_v52 }
0x12c2   :  { %8578 = vmatprep.mubr.msk.f32.mxu0 %vm1539_vm2, %v2624_v53 }
0x12c3   :  { %8579 = vmatmul.mubr.msk.f32.vlgmr.msra.gmra.mrb[8].mxu0 %vm1539_vm2, %v2629_v54 }
0x132c   :  { %v8554_v62 = vpop.f32.mrb[6].mxu0 }
0x132d   :  { %v12645_v13 = vadd.f32 %v8554_v62, %v8107_v9  ;;  %v2720_v20 = vpop.f32.mrb[7].mxu0 }
0x132e   :  { %v12647_v24 = vadd.f32 %v8107_v9, %v2720_v20 }
0x132f   :  { %3226 = vrot.lane.b32.xlu1 %v12645_v13, %s11568_s23 }
0x1330   :  { %3224 = vrot.lane.b32.xlu0 %v12647_v24, %s11568_s23 }
0x1333   :  { %3328 = vrot.lane.b32.xlu1 %v12645_v13, %s11575_s4 }
0x1334   :  { %3326 = vrot.lane.b32.xlu0 %v12647_v24, %s11575_s4 }
0x1337   :  { %2731 = vrot.lane.b32.xlu1 %v12630_v10, %s11558_s5 }
0x1338   :  { %2729 = vrot.lane.b32.xlu0 %v12622_v5, %s11558_s5 }
0x1396   :  { %v8580_v26 = vpop.f32.mrb[8].mxu0 }
0x1397   :  { %v2918_v31 = vpop.f32.mrb[9].mxu0 }
0x1398   :  { %v2919_v8 = vadd.f32 %v8112_v6, %v2918_v31 }
0x139a   :  { %v8115_v9 = vmul.f32 -1.442695, %v2919_v8 }
0x139c   :  { %9481 = vpow2.f32 %v8115_v9 }
0x13a1   :  { %v3227_v45 = vpop.permute.xlu1 %3226 }
0x13a2   :  { %v3225_v57 = vpop.permute.xlu0 %3224  ;;  %v3234_v34 = vsel %vm3230_vm7, %v3227_v45, 0.0 }
0x13a3   :  { %3235 = vadd.xlane.f32.xlu1 %v3234_v34  ;;  %v3231_v36 = vsel %vm3230_vm7, %v3225_v57, 0.0  ;;  %v2924_v34 = vadd.f32 %v8580_v26, %v8112_v6 }
0x13a4   :  { %3232 = vadd.xlane.f32.xlu0 %v3231_v36 }
0x13a5   :  { %v3329_v41 = vpop.permute.xlu1 %3328 }
0x13a6   :  { %v3327_v42 = vpop.permute.xlu0 %3326  ;;  %v3335_v48 = vsel %vm3230_vm7, %v3329_v41, 0.0 }
0x13a7   :  { %v3332_v43 = vsel %vm3230_vm7, %v3327_v42, 0.0  ;;  %v8116_v42 = vmul.f32 -1.442695, %v2924_v34 }
0x13a8   :  { %3333 = vadd.xlane.f32.xlu0 %v3332_v43  ;;  %v9482_v43 = vpop.eup %9481 }
0x13a9   :  { %v2732_v37 = vpop.permute.xlu1 %2731  ;;  %9483 = vpow2.f32 %v8116_v42  ;;  %v2933_v31 = vadd.f32 1.0, %v9482_v43 }
0x13aa   :  { %v2730_v44 = vpop.permute.xlu0 %2729  ;;  %v2736_v49 = vsel %vm1448_vm0, %v2732_v37, %v12630_v10 }
0x13ab   :  { %v2735_v47 = vsel %vm1448_vm0, %v2730_v44, %v12622_v5  ;;  %v12704_v44 = vshrl.u32 %v1416_v17, 7  ;;  %9485 = vrcp.f32 %v2933_v31 }
0x13ac   :  { %3336 = vadd.xlane.f32.xlu0 %v3335_v48  ;;  %8571 = vmatprep.mubr.msk.f32.mxu1 %vm1457_vm1, %v2735_v47  ;;  %v8125_v47 = vld [vmem:[#allocation19] ss:$0 sm:$0xff] }
0x13ad   :  { %8572 = vmatmul.mubr.msk.f32.vlgmr.msra.gmra.mrb[10].mxu1 %vm1457_vm1, %v2736_v49  ;;  %v3394_v26 = vsub.s32 1, %v12704_v44  ;;  %v1266_v49 = vld [vmem:[#allocation17] sm:$0x3] }
0x13af   :  { %v3395_v17 = vrot.slane %v1266_v49, %v3394_v26 }
0x1430   :  { %v3236_v2 = vpop.xlane.xlu1 %3235 }
0x1431   :  { %v3239_v0 = vmul.f32 0.25, %v3236_v2  ;;  %v3233_v7 = vpop.xlane.xlu0 %3232  ;;  %v9484_v2 = vpop.eup %9483 }
0x1432   :  { %v3238_v51 = vmul.f32 0.25, %v3233_v7  ;;  %v9486_v7 = vpop.eup %9485 }
0x1433   :  { %v12672_v52 = vsub.f32 %v12645_v13, %v3239_v0  ;;  %v2934_v0 = vadd.f32 1.0, %v9484_v2 }
0x1434   :  { %v12675_v53 = vsub.f32 %v12647_v24, %v3238_v51  ;;  %v2939_v51 = vmul.f32 %v9486_v7, %v2919_v8 }
0x1435   :  { %v3334_v5 = vpop.xlane.xlu0 %3333  ;;  %v3243_v54 = vmul.f32 %v12672_v52, %v12672_v52  ;;  %9487 = vrcp.f32 %v2934_v0 }
0x1436   :  { %v3242_v10 = vmul.f32 %v12675_v53, %v12675_v53  ;;  %v3338_v14 = vmul.f32 0.25, %v3334_v5  ;;  %v3304_v5 = vsub.s32 0, %v12704_v44 }
0x1437   :  { %3248 = vrot.lane.b32.xlu0 %v3243_v54, %s11568_s23 }
0x1438   :  { %v12683_v55 = vsub.f32 %v12647_v24, %v3338_v14  ;;  %3246 = vrot.lane.b32.xlu1 %v3242_v10, %s11568_s23  ;;  %v3305_v54 = vrot.slane %v1266_v49, %v3304_v5 }
0x1439   :  { %v3337_v58 = vpop.xlane.xlu0 %3336 }
0x143a   :  { %v3342_v59 = vmul.f32 %v12683_v55, %v12683_v55  ;;  %v3339_v61 = vmul.f32 0.25, %v3337_v58 }
0x143c   :  { %v12689_v60 = vsub.f32 %v12645_v13, %v3339_v61  ;;  %3346 = vrot.lane.b32.xlu1 %v3342_v59, %s11575_s4 }
0x143e   :  { %v3343_v63 = vmul.f32 %v12689_v60, %v12689_v60 }
0x143f   :  { %v9488_v10 = vpop.eup %9487 }
0x1440   :  { %3348 = vrot.lane.b32.xlu1 %v3343_v63, %s11575_s4  ;;  %v12723_v14 = vmul.f32 %v9488_v10, %v2924_v34 }
0x1444   :  { %3271 = vrot.lane.b32.xlu1 %v8124_v1, %s11558_s5 }
0x1480   :  { %v12696_v3 = vpop.f32.mrb[10].mxu1 }
0x1481   :  { %v12698_v4 = vpop.f32.mrb[11].mxu1 }
0x14a9   :  { %v3249_v62 = vpop.permute.xlu0 %3248 }
0x14aa   :  { %v3247_v20 = vpop.permute.xlu1 %3246  ;;  %v3255_v45 = vsel %vm3230_vm7, %v3249_v62, 0.0 }
0x14ab   :  { %3256 = vadd.xlane.f32.xlu1 %v3255_v45  ;;  %v3252_v37 = vsel %vm3230_vm7, %v3247_v20, 0.0 }
0x14ae   :  { %v3347_v57 = vpop.permute.xlu1 %3346 }
0x14af   :  { %v3352_v48 = vsel %vm3230_vm7, %v3347_v57, 0.0 }
0x14b2   :  { %v3349_v36 = vpop.permute.xlu1 %3348 }
0x14b3   :  { %v3355_v41 = vsel %vm3230_vm7, %v3349_v36, 0.0 }
0x14b4   :  { %3356 = vadd.xlane.f32.xlu0 %v3355_v41 }
0x14b6   :  { %v3272_v58 = vpop.permute.xlu1 %3271 }
0x14b8   :  { %3253 = vadd.xlane.f32.xlu0 %v3252_v37 }
0x14bc   :  { %3353 = vadd.xlane.f32.xlu0 %v3352_v48  ;;  %3281 = vrot.lane.b32.xlu1 %v8125_v47, %s11558_s5 }
0x14c0   :  { %3371 = vrot.lane.b32.xlu1 %v8125_v47, %s11576_s9 }
0x14c4   :  { %3397 = vrot.lane.b32.xlu1 %v3395_v17, %s11576_s9 }
0x14c8   :  { %2820 = vrot.lane.b32.xlu1 %v12647_v24, %s11565_s12 }
0x14cc   :  { %2949 = vrot.lane.b32.xlu1 %v2939_v51, %s11558_s5 }
0x14d0   :  { %2828 = vrot.lane.b32.xlu1 %v12698_v4, %s11577_s26 }
0x14d2   :  { %3366 = vrot.lane.b32.xlu0 %v8124_v1, %s11576_s9 }
0x14d4   :  { %2955 = vrot.lane.b32.xlu1 %v2939_v51, %s11577_s26 }
0x14d6   :  { %3307 = vrot.lane.b32.xlu0 %v3305_v54, %s11558_s5 }
0x14d8   :  { %2957 = vrot.lane.b32.xlu1 %v12723_v14, %s11577_s26 }
0x14da   :  { %2943 = vrot.lane.b32.xlu0 %v2939_v51, %s11565_s12 }
0x14de   :  { %2945 = vrot.lane.b32.xlu0 %v12723_v14, %s11565_s12 }
0x14e2   :  { %2822 = vrot.lane.b32.xlu0 %v12645_v13, %s11565_s12 }
0x14e6   :  { %2951 = vrot.lane.b32.xlu0 %v12723_v14, %s11558_s5 }
0x14ea   :  { %2830 = vrot.lane.b32.xlu0 %v12696_v3, %s11577_s26 }
0x1538   :  { %v3257_v59 = vpop.xlane.xlu1 %3256 }
0x1539   :  { %v3259_v61 = vmul.f32 0.25, %v3257_v59 }
0x153b   :  { %v3261_v63 = vadd.f32 1e-05, %v3259_v61 }
0x153c   :  { %v3282_v1 = vpop.permute.xlu1 %3281 }
0x153d   :  { %9489 = vrsqrt.f32 %v3261_v63 }
0x1540   :  { %v3372_v6 = vpop.permute.xlu1 %3371 }
0x1541   :  { %v3357_v8 = vpop.xlane.xlu0 %3356 }
0x1542   :  { %v3359_v9 = vmul.f32 0.25, %v3357_v8 }
0x1544   :  { %v3361_v62 = vadd.f32 1e-05, %v3359_v9  ;;  %v12737_v20 = vpop.permute.xlu1 %3397 }
0x1545   :  { %v3254_v45 = vpop.xlane.xlu0 %3253 }
0x1546   :  { %9491 = vrsqrt.f32 %v3361_v62  ;;  %v3258_v57 = vmul.f32 0.25, %v3254_v45 }
0x1547   :  { %v9490_v34 = vpop.eup %9489 }
0x1548   :  { %v3265_v36 = vmul.f32 %v9490_v34, %v12672_v52  ;;  %v3260_v41 = vadd.f32 1e-05, %v3258_v57  ;;  %v2821_v37 = vpop.permute.xlu1 %2820 }
0x1549   :  { %v3354_v42 = vpop.xlane.xlu0 %3353 }
0x154a   :  { %v3275_v43 = vmul.f32 %v3272_v58, %v3265_v36  ;;  %9493 = vrsqrt.f32 %v3260_v41  ;;  %v3358_v31 = vmul.f32 0.25, %v3354_v42 }
0x154c   :  { %v3285_v47 = vadd.f32 %v3282_v1, %v3275_v43  ;;  %v3360_v48 = vadd.f32 1e-05, %v3358_v31  ;;  %v2950_v0 = vpop.permute.xlu1 %2949 }
0x154d   :  { %v3367_v49 = vpop.permute.xlu0 %3366 }
0x154e   :  { %v8127_v17 = vmul.f32 -1.442695, %v3285_v47  ;;  %9495 = vrsqrt.f32 %v3360_v48 }
0x1550   :  { %v9492_v2 = vpop.eup %9491  ;;  %9497 = vpow2.f32 %v8127_v17  ;;  %v2829_v8 = vpop.permute.xlu1 %2828 }
0x1551   :  { %v3365_v7 = vmul.f32 %v9492_v2, %v12689_v60  ;;  %v12741_v54 = vpop.permute.xlu0 %3307 }
0x1553   :  { %v3370_v10 = vmul.f32 %v3367_v49, %v3365_v7 }
0x1554   :  { %v9494_v52 = vpop.eup %9493  ;;  %v2956_v17 = vpop.permute.xlu1 %2955 }
0x1555   :  { %v3375_v59 = vadd.f32 %v3372_v6, %v3370_v10  ;;  %v3264_v61 = vmul.f32 %v9494_v52, %v12675_v53  ;;  %v2944_v63 = vpop.permute.xlu0 %2943  ;;  %v2834_v53 = vsel %vm1539_vm2, %v12647_v24, %v12698_v4  ;;  %v2835_v4 = vsel %vm1539_vm2, %v12645_v13, %v12696_v3 }
0x1556   :  { %v2961_v45 = vsel %vm1539_vm2, %v2939_v51, %v2944_v63 }
0x1557   :  { %v8129_v9 = vmul.f32 -1.442695, %v3375_v59  ;;  %v3274_v62 = vmul.f32 %v3272_v58, %v3264_v61  ;;  %v2963_v42 = vsel %vm1448_vm0, %v2961_v45, %v2950_v0 }
0x1558   :  { %v9496_v57 = vpop.eup %9495  ;;  %v2965_v51 = vsel %vm1879_vm4, %v2963_v42, %v2956_v17  ;;  %v2958_v61 = vpop.permute.xlu1 %2957 }
0x1559   :  { %v3364_v34 = vmul.f32 %v9496_v57, %v12683_v55  ;;  %9499 = vpow2.f32 %v8129_v9  ;;  %v3284_v36 = vadd.f32 %v3282_v1, %v3274_v62  ;;  %v2946_v41 = vpop.permute.xlu0 %2945  ;;  %v2836_v55 = vsel %vm1448_vm0, %v2834_v53, %v2821_v37 }
0x155a   :  { %v9498_v60 = vpop.eup %9497  ;;  %v2838_v7 = vsel %vm1879_vm4, %v2836_v55, %v2829_v8  ;;  %v2962_v10 = vsel %vm1539_vm2, %v12723_v14, %v2946_v41 }
0x155b   :  { %v3293_v43 = vadd.f32 1.0, %v9498_v60  ;;  %v3369_v31 = vmul.f32 %v3367_v49, %v3364_v34  ;;  %v8126_v48 = vmul.f32 -1.442695, %v3284_v36  ;;  %v12753_v0 = vmul.f32 %v2965_v51, %v2838_v7 }
0x155d   :  { %9501 = vrcp.f32 %v3293_v43  ;;  %v3374_v58 = vadd.f32 %v3372_v6, %v3369_v31  ;;  %v2823_v2 = vpop.permute.xlu0 %2822  ;;  %v8117_v37 = vmul.f32 -1.442695, %v12753_v0 }
0x155e   :  { %9503 = vpow2.f32 %v8126_v48  ;;  %v2837_v63 = vsel %vm1448_vm0, %v2835_v4, %v2823_v2 }
0x155f   :  { %v8128_v1 = vmul.f32 -1.442695, %v3374_v58 }
0x1561   :  { %9505 = vpow2.f32 %v8128_v1  ;;  %v2952_v49 = vpop.permute.xlu0 %2951 }
0x1562   :  { %v2964_v24 = vsel %vm1448_vm0, %v2962_v10, %v2952_v49 }
0x1563   :  { %v9500_v52 = vpop.eup %9499  ;;  %v2966_v9 = vsel %vm1879_vm4, %v2964_v24, %v2958_v61 }
0x1564   :  { %v3383_v6 = vadd.f32 1.0, %v9500_v52 }
0x1565   :  { %v2831_v8 = vpop.permute.xlu0 %2830 }
0x1566   :  { %9507 = vrcp.f32 %v3383_v6  ;;  %v2839_v62 = vsel %vm1879_vm4, %v2837_v63, %v2831_v8 }
0x1567   :  { %v9502_v14 = vpop.eup %9501  ;;  %v12765_v45 = vmul.f32 %v2966_v9, %v2839_v62  ;;  %9509 = vpow2.f32 %v8117_v37  ;;  %v1291_v9 = vld [vmem:[#allocation29] sm:$0xff]  ;;  %v1292_v62 = vld [vmem:[#allocation29 + $0x8] sm:$0xff] }
0x1568   :  { %v9504_v57 = vpop.eup %9503  ;;  %v3299_v34 = vmul.f32 %v9502_v14, %v3285_v47  ;;  %v9043_v14 = vpack.c.bf16 %v1292_v62, %v1291_v9 }
0x1569   :  { %v3292_v41 = vadd.f32 1.0, %v9504_v57  ;;  %v8118_v13 = vmul.f32 -1.442695, %v12765_v45 }
0x156a   :  { %v3301_v3 = vmul.f32 1.6666666, %v3299_v34  ;;  %9044 = vmatprep.subr.bf16.mxu1 %v9043_v14 }
0x156b   :  { %v9506_v60 = vpop.eup %9505  ;;  %9511 = vrcp.f32 %v3292_v41  ;;  %9046 = vmatpush3.bf16.msra.mxu1 %v9043_v14 }
0x156c   :  { %v3382_v42 = vadd.f32 1.0, %v9506_v60  ;;  %v3311_v43 = vmul.f32 %v12741_v54, %v3301_v3  ;;  %9513 = vpow2.f32 %v8118_v13  ;;  %v1293_v13 = vld [vmem:[#allocation29 + $0x10] sm:$0xff]  ;;  %v1294_v3 = vld [vmem:[#allocation29 + $0x18] sm:$0xff] }
0x156d   :  { %v9047_v60 = vpack.c.bf16 %v1294_v3, %v1293_v13 }
0x156e   :  { %9515 = vrcp.f32 %v3382_v42  ;;  %3316 = vrot.lane.b32.xlu1 %v3311_v43, %s11568_s23 }
0x156f   :  { %9048 = vmatprep.subr.bf16.mxu1 %v9047_v60 }
0x1570   :  { %v9508_v31 = vpop.eup %9507  ;;  %9050 = vmatpush3.bf16.msra.mxu1 %v9047_v60 }
0x1571   :  { %v3389_v48 = vmul.f32 %v9508_v31, %v3375_v59  ;;  %v9510_v17 = vpop.eup %9509  ;;  %9054 = vmatprep.subr.bf16.mxu1 %v11562_v21 }
0x1572   :  { %v2975_v47 = vadd.f32 1.0, %v9510_v17 }
0x1573   :  { %v3391_v53 = vmul.f32 1.6666666, %v3389_v48 }
0x1574   :  { %9517 = vrcp.f32 %v2975_v47 }
0x1575   :  { %v9512_v51 = vpop.eup %9511  ;;  %v3401_v2 = vmul.f32 %v12737_v20, %v3391_v53 }
0x1576   :  { %v3298_v55 = vmul.f32 %v9512_v51, %v3284_v36  ;;  %v9514_v1 = vpop.eup %9513 }
0x1577   :  { %3406 = vrot.lane.b32.xlu1 %v3401_v2, %s11575_s4  ;;  %v2976_v10 = vadd.f32 1.0, %v9514_v1  ;;  %v1287_v1 = vld [vmem:[#allocation28] sm:$0xff] }
0x1578   :  { %v9516_v7 = vpop.eup %9515  ;;  %v3300_v49 = vmul.f32 1.6666666, %v3298_v55 }
0x1579   :  { %v3388_v52 = vmul.f32 %v9516_v7, %v3374_v58  ;;  %9519 = vrcp.f32 %v2976_v10  ;;  %v1288_v7 = vld [vmem:[#allocation28 + $0x8] sm:$0xff] }
0x157a   :  { %v3310_v24 = vmul.f32 %v12741_v54, %v3300_v49  ;;  %v9035_v10 = vpack.c.bf16 %v1288_v7, %v1287_v1 }
0x157b   :  { %v3390_v4 = vmul.f32 1.6666666, %v3388_v52 }
0x157c   :  { %3314 = vrot.lane.b32.xlu0 %v3310_v24, %s11568_s23  ;;  %9036 = vmatprep.subr.bf16.mxu0 %v9035_v10 }
0x157d   :  { %v3400_v59 = vmul.f32 %v12737_v20, %v3390_v4  ;;  %9038 = vmatpush3.bf16.msra.mxu0 %v9035_v10 }
0x157e   :  { %v9518_v6 = vpop.eup %9517 }
0x157f   :  { %v2981_v17 = vmul.f32 %v9518_v6, %v12753_v0 }
0x1580   :  { %3404 = vrot.lane.b32.xlu0 %v3400_v59, %s11575_s4 }
0x1583   :  { %v9520_v36 = vpop.eup %9519 }
0x1584   :  { %2985 = vrot.lane.b32.xlu0 %v9518_v6, %s11565_s12  ;;  %2987 = vrot.lane.b32.xlu1 %v9520_v36, %s11565_s12  ;;  %v2982_v4 = vmul.f32 %v9520_v36, %v12765_v45 }
0x1588   :  { %2993 = vrot.lane.b32.xlu0 %v9518_v6, %s11558_s5  ;;  %2995 = vrot.lane.b32.xlu1 %v9520_v36, %s11558_s5 }
0x158c   :  { %3001 = vrot.lane.b32.xlu0 %v9518_v6, %s11577_s26  ;;  %3003 = vrot.lane.b32.xlu1 %v9520_v36, %s11577_s26  ;;  %v1290_v6 = vld [vmem:[#allocation28 + $0x18] sm:$0xff] }
0x15e0   :  { %v3317_v54 = vpop.permute.xlu1 %3316 }
0x15e1   :  { %v3323_v58 = vsel %vm3230_vm7, %v3317_v54, 0.0 }
0x15e2   :  { %3324 = vadd.xlane.f32.xlu1 %v3323_v58 }
0x15e9   :  { %v3407_v63 = vpop.permute.xlu1 %3406 }
0x15ea   :  { %v3413_v41 = vsel %vm3230_vm7, %v3407_v63, 0.0 }
0x15ee   :  { %v3315_v20 = vpop.permute.xlu0 %3314 }
0x15ef   :  { %v3320_v37 = vsel %vm3230_vm7, %v3315_v20, 0.0 }
0x15f0   :  { %3321 = vadd.xlane.f32.xlu0 %v3320_v37 }
0x15f2   :  { %v3405_v61 = vpop.permute.xlu0 %3404 }
0x15f3   :  { %v3410_v8 = vsel %vm3230_vm7, %v3405_v61, 0.0 }
0x15f4   :  { %3411 = vadd.xlane.f32.xlu0 %v3410_v8 }
0x15f6   :  { %v2986_v57 = vpop.permute.xlu0 %2985  ;;  %v2988_v34 = vpop.permute.xlu1 %2987 }
0x15f7   :  { %v2991_v43 = vmul.f32 %v2986_v57, %v12753_v0  ;;  %v2992_v52 = vmul.f32 %v2988_v34, %v12765_v45 }
0x15f8   :  { %3414 = vadd.xlane.f32.xlu0 %v3413_v41 }
0x15f9   :  { %v3009_v51 = vsel %vm1539_vm2, %v2981_v17, %v2991_v43  ;;  %v3010_v58 = vsel %vm1539_vm2, %v2982_v4, %v2992_v52 }
0x15fa   :  { %v2994_v42 = vpop.permute.xlu0 %2993  ;;  %v2996_v31 = vpop.permute.xlu1 %2995 }
0x15fb   :  { %v2999_v48 = vmul.f32 %v2994_v42, %v12753_v0  ;;  %v3000_v24 = vmul.f32 %v2996_v31, %v12765_v45 }
0x15fd   :  { %v3011_v2 = vsel %vm1448_vm0, %v3009_v51, %v2999_v48  ;;  %v3012_v20 = vsel %vm1448_vm0, %v3010_v58, %v3000_v24  ;;  %v12819_v58 = vld [vmem:[#allocation11] sm:$0xff] }
0x15fe   :  { %v3002_v53 = vpop.permute.xlu0 %3001  ;;  %v3004_v49 = vpop.permute.xlu1 %3003 }
0x15ff   :  { %v3007_v47 = vmul.f32 %v3002_v53, %v12753_v0  ;;  %v3008_v59 = vmul.f32 %v3004_v49, %v12765_v45  ;;  %v1289_v0 = vld [vmem:[#allocation28 + $0x10] sm:$0xff] }
0x1600   :  { %v9039_v54 = vpack.c.bf16 %v1290_v6, %v1289_v0 }
0x1601   :  { %v3013_v55 = vsel %vm1879_vm4, %v3011_v2, %v3007_v47  ;;  %v3014_v37 = vsel %vm1879_vm4, %v3012_v20, %v3008_v59  ;;  %v12825_v20 = vld [vmem:[#allocation10] sm:$0xff] }
0x1602   :  { %3017 = vrot.lane.b32.xlu1 %v3013_v55, %s11567_s22  ;;  %9040 = vmatprep.subr.bf16.mxu0 %v9039_v54 }
0x1603   :  { %9042 = vmatpush3.bf16.msra.mxu0 %v9039_v54 }
0x1604   :  { %9051 = vmatprep.subr.bf16.mxu0 %v11562_v21 }
0x1606   :  { %3112 = vrot.lane.b32.xlu1 %v3013_v55, %s11566_s7 }
0x160a   :  { %3114 = vrot.lane.b32.xlu1 %v3014_v37, %s11566_s7 }
0x160e   :  { %3019 = vrot.lane.b32.xlu0 %v3014_v37, %s11567_s22 }
0x166f   :  { %v3325_v45 = vpop.xlane.xlu1 %3324 }
0x1674   :  { %v3018_v36 = vpop.permute.xlu1 %3017 }
0x1675   :  { %v3023_v61 = vsel %vm1539_vm2, %v3013_v55, %v3018_v36 }
0x1676   :  { %8589 = vmatprep.mubr.msk.f32.mxu0 %vm1448_vm0, %v3023_v61 }
0x1678   :  { %v3113_v63 = vpop.permute.xlu1 %3112 }
0x1679   :  { %v3118_v8 = vsel %vm1539_vm2, %v3113_v63, %v3013_v55 }
0x167a   :  { %8600 = vmatprep.mubr.msk.f32.mxu1 %vm1448_vm0, %v3118_v8 }
0x167c   :  { %v3115_v9 = vpop.permute.xlu1 %3114 }
0x167d   :  { %v3119_v62 = vsel %vm1539_vm2, %v3115_v9, %v3014_v37  ;;  %v3322_v14 = vpop.xlane.xlu0 %3321 }
0x167e   :  { %8601 = vmatmul.mubr.msk.f32.vlgmr.msra.gmra.mrb[12].mxu1 %vm1448_vm0, %v3119_v62 }
0x167f   :  { %8619 = vmatprep.mubr.msk.f32.mxu1 %vm11563_vm3, %v11564_v28 }
0x1681   :  { %v3412_v57 = vpop.xlane.xlu0 %3411 }
0x1682   :  { %v3416_v41 = vmax.f32 %v3322_v14, %v3412_v57 }
0x1685   :  { %v3415_v34 = vpop.xlane.xlu0 %3414 }
0x1686   :  { %v3417_v13 = vmax.f32 %v3325_v45, %v3415_v34 }
0x1688   :  { %v3418_v3 = vmax.f32 %v3416_v41, %v3417_v13 }
0x1689   :  { %v3020_v60 = vpop.permute.xlu0 %3019 }
0x168a   :  { %v3419_v42 = vrot.slane %v3418_v3, 4  ;;  %v3024_v43 = vsel %vm1539_vm2, %v3014_v37, %v3020_v60 }
0x168b   :  { %8590 = vmatmul.mubr.msk.f32.vlgmr.msra.gmra.mrb[10].mxu0 %vm1448_vm0, %v3024_v43 }
0x168c   :  { %v3420_v31 = vmax.f32 %v3418_v3, %v3419_v42  ;;  %8607 = vmatprep.mubr.msk.f32.mxu0 %vm11563_vm3, %v11564_v28 }
0x168e   :  { %v3421_v48 = vrot.slane %v3420_v31, 2 }
0x1690   :  { %v3422_v17 = vmax.f32 %v3420_v31, %v3421_v48 }
0x1692   :  { %v3423_v53 = vrot.slane %v3422_v17, 1 }
0x1694   :  { %v3424_v51 = vmax.f32 %v3422_v17, %v3423_v53 }
0x1696   :  { %v3581_v47 = vsub.f32 %v3415_v34, %v3424_v51  ;;  %v3425_v2 = vsub.f32 %v3322_v14, %v3424_v51  ;;  %v3426_v55 = vsub.f32 %v3325_v45, %v3424_v51  ;;  %v3580_v1 = vsub.f32 %v3412_v57, %v3424_v51  ;;  %v12831_v14 = vld [vmem:[#allocation10 + $0x8] sm:$0xff] }
0x1698   :  { %v3584_v7 = vmul.f32 1.442695, %v3581_v47  ;;  %v3427_v49 = vmul.f32 1.442695, %v3425_v2  ;;  %v3429_v10 = vmul.f32 1.442695, %v3426_v55 }
0x1699   :  { %v3582_v52 = vmul.f32 1.442695, %v3580_v1  ;;  %v8119_v55 = vld [vmem:[#allocation26] ss:$0 sm:$0xff] }
0x169a   :  { %9521 = vpow2.f32 %v3584_v7 }
0x169b   :  { %9523 = vpow2.f32 %v3427_v49 }
0x169c   :  { %9525 = vpow2.f32 %v3429_v10 }
0x169d   :  { %9527 = vpow2.f32 %v3582_v52 }
0x16a4   :  { %v9522_v24 = vpop.eup %9521 }
0x16a5   :  { %v9524_v4 = vpop.eup %9523 }
0x16a6   :  { %v9526_v59 = vpop.eup %9525 }
0x16a7   :  { %v9528_v0 = vpop.eup %9527  ;;  %v9052_v6 = vpack.c.bf16 %v9526_v59, %v9524_v4 }
0x16a8   :  { %v9055_v54 = vpack.c.bf16 %v9522_v24, %v9528_v0 }
0x16a9   :  { %9053 = vmatpush3.bf16.msra.mxu0 %v9052_v6 }
0x16aa   :  { %9056 = vmatpush3.bf16.msra.mxu1 %v9055_v54 }
0x16ab   :  { %9057 = vmatprep.subr.bf16.mxu1 %v11562_v21 }
0x16ac   :  { %8608 = vmatmul.mubr.msk.f32.vlgmr.msra.gmra.mrb[12].mxu0 %vm1539_vm2, %v12819_v58 }
0x16ad   :  { %8620 = vmatmul.mubr.msk.f32.vlgmr.msra.gmra.mrb[14].mxu1 %vm1539_vm2, %v12819_v58  ;;  %8612 = vmatprep.mubr.msk.f32.mxu0 %vm2012_vm5, %v12825_v20 }
0x16ae   :  { %8631 = vmatprep.mubr.msk.f32.mxu1 %vm11563_vm3, %v11564_v28 }
0x1751   :  { %v8602_v37 = vpop.f32.mrb[12].mxu1 }
0x1752   :  { %v3192_v45 = vpop.f32.mrb[13].mxu1 }
0x175e   :  { %v8591_v36 = vpop.f32.mrb[10].mxu0 }
0x175f   :  { %v3103_v61 = vpop.f32.mrb[11].mxu0  ;;  %v3109_v7 = vadd.f32 %v8591_v36, %v8119_v55 }
0x1760   :  { %v3104_v49 = vadd.f32 %v8119_v55, %v3103_v61 }
0x1762   :  { %v3217_v36 = vsel %vm2012_vm5, %v3104_v49, %v3192_v45 }
0x177f   :  { %v3497_v63 = vpop.f32.mrb[12].mxu0 }
0x1780   :  { %v8609_v8 = vpop.f32.mrb[13].mxu0  ;;  %8610 = vmatprep.subr.mxu0 %v3497_v63  ;;  %v3652_v9 = vpop.f32.mrb[14].mxu1 }
0x1781   :  { %8611 = vmatpush3.msra.mxu0 %v3497_v63  ;;  %v8621_v62 = vpop.f32.mrb[15].mxu1 }
0x1782   :  { %8613 = vmatmul.mubr.msk.f32.vlgmr.msra.gmra.mrb[14].mxu0 %vm2012_vm5, %v12831_v14  ;;  %8622 = vmatprep.subr.mxu0 %v3652_v9 }
0x1783   :  { %8623 = vmatpush3.msra.mxu0 %v3652_v9  ;;  %8624 = vmatprep.mubr.msk.f32.mxu0 %vm2012_vm5, %v12825_v20 }
0x1784   :  { %8634 = vmatprep.subr.mxu0 %v11564_v28 }
0x1786   :  { %8625 = vmatmul.mubr.msk.f32.vlgmr.msra.gmra.mrb[16].mxu0 %vm2012_vm5, %v12831_v14 }
0x1787   :  { %8636 = vmatprep.mubr.msk.f32.mxu0 %vm11563_vm3, %v11564_v28 }
0x1855   :  { %v8614_v57 = vpop.f32.mrb[14].mxu0 }
0x1856   :  { %v3573_v34 = vadd.f32 1e-09, %v8614_v57  ;;  %v3567_v41 = vpop.f32.mrb[15].mxu0 }
0x1857   :  { %v3568_v13 = vadd.f32 1e-09, %v3567_v41 }
0x1858   :  { %9529 = vrcp.f32 %v3573_v34 }
0x1859   :  { %9531 = vrcp.f32 %v3568_v13  ;;  %v8626_v3 = vpop.f32.mrb[16].mxu0 }
0x185a   :  { %v3728_v60 = vadd.f32 1e-09, %v8626_v3  ;;  %v3722_v42 = vpop.f32.mrb[17].mxu0 }
0x185b   :  { %v3723_v43 = vadd.f32 1e-09, %v3722_v42 }
0x185c   :  { %9533 = vrcp.f32 %v3728_v60 }
0x185d   :  { %9535 = vrcp.f32 %v3723_v43 }
0x1862   :  { %v9530_v31 = vpop.eup %9529 }
0x1863   :  { %v9532_v48 = vpop.eup %9531  ;;  %v3579_v17 = vmul.f32 %v9530_v31, %v9526_v59 }
0x1864   :  { %v3577_v53 = vmul.f32 %v9532_v48, %v9524_v4 }
0x1865   :  { %3742 = vperm.xlu1 %9418, %v3579_v17  }
0x1866   :  { %v9534_v51 = vpop.eup %9533  ;;  %3737 = vperm.xlu0 %9417, %v3577_v53  }
0x1867   :  { %v9536_v47 = vpop.eup %9535  ;;  %v3734_v2 = vmul.f32 %v9534_v51, %v9522_v24 }
0x1868   :  { %v3732_v1 = vmul.f32 %v9536_v47, %v9528_v0  ;;  %v3218_v0 = vsel %vm2012_vm5, %v3109_v7, %v8602_v37 }
0x1869   :  { %3754 = vperm.xlu1 %9418, %v3734_v2  }
0x186a   :  { %3749 = vperm.xlu0 %9417, %v3732_v1  }
0x186d   :  { %3205 = vrot.lane.b32.xlu1 %v3109_v7, %s11481_s10 }
0x186e   :  { %3203 = vrot.lane.b32.xlu0 %v3104_v49, %s11481_s10 }
0x1871   :  { %3213 = vrot.lane.b32.xlu1 %v8602_v37, %s11578_s13 }
0x1872   :  { %3211 = vrot.lane.b32.xlu0 %v3192_v45, %s11578_s13 }
0x18e4   :  { %v3743_v10 = vpop.permute.xlu1 %3742 }
0x18e5   :  { %v3738_v52 = vpop.permute.xlu0 %3737 }
0x18e8   :  { %v3755_v4 = vpop.permute.xlu1 %3754 }
0x18e9   :  { %v3750_v59 = vpop.permute.xlu0 %3749 }
0x18ec   :  { %v3206_v24 = vpop.permute.xlu1 %3205 }
0x18ed   :  { %v3204_v6 = vpop.permute.xlu0 %3203  ;;  %v3220_v54 = vsel %vm1539_vm2, %v3218_v0, %v3206_v24 }
0x18ee   :  { %v3219_v63 = vsel %vm1539_vm2, %v3217_v36, %v3204_v6 }
0x18f0   :  { %v3214_v61 = vpop.permute.xlu1 %3213 }
0x18f1   :  { %v3223_v8 = vsel %vm3221_vm8, %v3220_v54, %v3214_v61  ;;  %v3212_v9 = vpop.permute.xlu0 %3211 }
0x18f2   :  { %v3746_v62 = vmul.f32 %v3743_v10, %v3223_v8  ;;  %v3758_v57 = vmul.f32 %v3755_v4, %v3223_v8  ;;  %v3222_v34 = vsel %vm3221_vm8, %v3219_v63, %v3212_v9 }
0x18f3   :  { %v3745_v41 = vmul.f32 %v3738_v52, %v3222_v34  ;;  %v3757_v13 = vmul.f32 %v3750_v59, %v3222_v34 }
0x18f4   :  { %v3760_v3 = vsel %vm3230_vm7, %v3746_v62, %v3758_v57 }
0x18f5   :  { %v3762_v37 = vsel %vm2012_vm5, %v3760_v3, %v3746_v62  ;;  %v3759_v45 = vsel %vm3230_vm7, %v3745_v41, %v3757_v13 }
0x18f6   :  { %v3765_v60 = vsel %vm3763_vm9, %v3762_v37, %v3758_v57  ;;  %v3761_v42 = vsel %vm2012_vm5, %v3759_v45, %v3745_v41 }
0x18f7   :  { %v3767_v43 = vsel %vm1539_vm2, %v3765_v60, %v3746_v62  ;;  %v3764_v31 = vsel %vm3763_vm9, %v3761_v42, %v3757_v13 }
0x18f8   :  { %v3770_v48 = vsel %vm3768_vm10, %v3767_v43, %v3758_v57  ;;  %v3766_v17 = vsel %vm1539_vm2, %v3764_v31, %v3745_v41 }
0x18f9   :  { %v3772_v53 = vsel %vm3221_vm8, %v3770_v48, %v3746_v62  ;;  %v3769_v51 = vsel %vm3768_vm10, %v3766_v17, %v3757_v13 }
0x18fa   :  { %v12864_v47 = vsel %vm3773_vm11, %v3772_v53, %v3758_v57  ;;  %v3771_v2 = vsel %vm3221_vm8, %v3769_v51, %v3745_v41 }
0x18fb   :  { %v12868_v55 = vsel %vm3773_vm11, %v3771_v2, %v3757_v13  ;;  %v3805_v1 = vmul.f32 %v12864_v47, %v12412_v15  ;;  %v3831_v49 = vmul.f32 %v12864_v47, %v12414_v19  ;;  %v3817_v52 = vmul.f32 %v12864_v47, %v12515_v40 }
0x18fc   :  { %v3804_v7 = vmul.f32 %v12868_v55, %v12408_v11  ;;  %v3830_v10 = vmul.f32 %v12868_v55, %v12410_v12  ;;  %v3816_v4 = vmul.f32 %v12868_v55, %v12511_v38  ;;  %v3843_v59 = vmul.f32 %v12864_v47, %v12517_v46 }
0x18fd   :  { %3810 = vrot.lane.b32.xlu1 %v3805_v1, %s11579_s30  ;;  %v3842_v24 = vmul.f32 %v12868_v55, %v12513_v39  ;;  %v3779_v6 = vmul.f32 %v12864_v47, %v12427_v30  ;;  %v3778_v0 = vmul.f32 %v12868_v55, %v12425_v29  ;;  %v3791_v54 = vmul.f32 %v12864_v47, %v12591_v33 }
0x18fe   :  { %3808 = vrot.lane.b32.xlu0 %v3804_v7, %s11579_s30  ;;  %v3790_v36 = vmul.f32 %v12868_v55, %v12571_v23  ;;  %v3803_v9 = vmul.f32 %v12864_v47, %v12564_v16  ;;  %v3802_v57 = vmul.f32 %v12868_v55, %v12581_v27  ;;  %v3829_v3 = vmul.f32 %v12864_v47, %v12576_v25 }
0x18ff   :  { %v3828_v60 = vmul.f32 %v12868_v55, %v12569_v22 }
0x1901   :  { %3836 = vrot.lane.b32.xlu1 %v3831_v49, %s11579_s30 }
0x1902   :  { %3834 = vrot.lane.b32.xlu0 %v3830_v10, %s11579_s30 }
0x1905   :  { %3822 = vrot.lane.b32.xlu1 %v3817_v52, %s11567_s22  ;;  %v3777_v52 = vmul.f32 %v12864_v47, %v12608_v18 }
0x1906   :  { %3820 = vrot.lane.b32.xlu0 %v3816_v4, %s11567_s22  ;;  %v3776_v4 = vmul.f32 %v12868_v55, %v12612_v50 }
0x1909   :  { %3848 = vrot.lane.b32.xlu1 %v3843_v59, %s11567_s22 }
0x190a   :  { %3846 = vrot.lane.b32.xlu0 %v3842_v24, %s11567_s22 }
0x190d   :  { %3784 = vrot.lane.b32.xlu1 %v3779_v6, %s11579_s30 }
0x190e   :  { %3782 = vrot.lane.b32.xlu0 %v3778_v0, %s11579_s30 }
0x1911   :  { %3796 = vrot.lane.b32.xlu1 %v3791_v54, %s11567_s22 }
0x1912   :  { %3794 = vrot.lane.b32.xlu0 %v3790_v36, %s11567_s22 }
0x196f   :  { %v3811_v61 = vpop.permute.xlu1 %3810 }
0x1970   :  { %v3809_v63 = vpop.permute.xlu0 %3808  ;;  %v3815_v34 = vadd.f32 %v3811_v61, %v3803_v9 }
0x1971   :  { %v3814_v41 = vadd.f32 %v3809_v63, %v3802_v57 }
0x1973   :  { %v3837_v8 = vpop.permute.xlu1 %3836 }
0x1974   :  { %v3835_v62 = vpop.permute.xlu0 %3834  ;;  %v3841_v43 = vadd.f32 %v3837_v8, %v3829_v3 }
0x1975   :  { %v3840_v31 = vadd.f32 %v3835_v62, %v3828_v60 }
0x1977   :  { %v3823_v13 = vpop.permute.xlu1 %3822 }
0x1978   :  { %v3827_v37 = vadd.f32 %v3823_v13, %v3815_v34  ;;  %v3821_v45 = vpop.permute.xlu0 %3820 }
0x1979   :  { %v3826_v42 = vadd.f32 %v3821_v45, %v3814_v41 }
0x197b   :  { %v9419_v48 = vpack.i.bf16 %v3827_v37, %v3826_v42  ;;  %v3849_v17 = vpop.permute.xlu1 %3848 }
0x197c   :  { %v3853_v53 = vadd.f32 %v3849_v17, %v3841_v43  ;;  %v3847_v51 = vpop.permute.xlu0 %3846 }
0x197d   :  { %v3852_v2 = vadd.f32 %v3847_v51, %v3840_v31  ;;  %9420 = vrot.lane.b32.xlu0 %v9419_v48, %s11481_s10 }
0x197f   :  { %v9424_v1 = vpack.i.bf16 %v3853_v53, %v3852_v2  ;;  %v3785_v49 = vpop.permute.xlu1 %3784 }
0x1980   :  { %v3783_v7 = vpop.permute.xlu0 %3782  ;;  %v3789_v24 = vadd.f32 %v3785_v49, %v3777_v52 }
0x1981   :  { %9425 = vrot.lane.b32.xlu1 %v9424_v1, %s11565_s12  ;;  %v3788_v6 = vadd.f32 %v3783_v7, %v3776_v4 }
0x1983   :  { %v3797_v59 = vpop.permute.xlu1 %3796 }
0x1984   :  { %v3795_v10 = vpop.permute.xlu0 %3794  ;;  %v3801_v54 = vadd.f32 %v3797_v59, %v3789_v24 }
0x1985   :  { %v3800_v36 = vadd.f32 %v3795_v10, %v3788_v6  ;;  %v8137_v10 = vld [vmem:[#allocation34] ss:$0 sm:$0xff] }
0x1986   :  { %v3871_v9 = vsel %vm2012_vm5, %v12864_v47, %v3801_v54  ;;  %v1299_v47 = vld [vmem:[#allocation35] sm:$0xff] }
0x1987   :  { %v3870_v62 = vsel %vm2012_vm5, %v12868_v55, %v3800_v36  ;;  %8635 = vmatpush3.msra.mxu0 %v1299_v47  ;;  %v1300_v55 = vld [vmem:[#allocation37] sm:$0xff] }
0x1988   :  { %8644 = vmatprep.subr.mxu0 %v11564_v28 }
0x19ef   :  { %v9421_v0 = vpop.permute.xlu0 %9420 }
0x19f0   :  { %v9423_v61 = vunpack.i.h.bf16 %v9421_v0  ;;  %v9422_v63 = vunpack.i.l.bf16 %v9421_v0 }
0x19f2   :  { %v3873_v41 = vsel %vm1539_vm2, %v3871_v9, %v9423_v61  ;;  %v3872_v13 = vsel %vm1539_vm2, %v3870_v62, %v9422_v63 }
0x19f3   :  { %v9426_v8 = vpop.permute.xlu1 %9425 }
0x19f4   :  { %v9428_v57 = vunpack.i.h.bf16 %v9426_v8  ;;  %v9427_v34 = vunpack.i.l.bf16 %v9426_v8 }
0x19f6   :  { %v3874_v3 = vsel %vm3221_vm8, %v3872_v13, %v9427_v34  ;;  %v3875_v37 = vsel %vm3221_vm8, %v3873_v41, %v9428_v57  ;;  %v1316_v41 = vld [vmem:[#allocation49] sm:$0xff]  ;;  %v1317_v13 = vld [vmem:[#allocation49 + $0x8] sm:$0xff] }
0x19f7   :  { %v9058_v45 = vpack.c.bf16 %v3875_v37, %v3874_v3  ;;  %v9061_v3 = vpack.c.bf16 %v1317_v13, %v1316_v41  ;;  %v1318_v37 = vld [vmem:[#allocation50] sm:$0xff]  ;;  %v8143_v13 = vld [vmem:[#allocation47] ss:$0 sm:$0xff] }
0x19f9   :  { %9059 = vmatpush3.bf16.msra.mxu1 %v9058_v45  ;;  %v1319_v45 = vld [vmem:[#allocation50 + $0x8] sm:$0xff] }
0x19fa   :  { %8639 = vmatprep.subr.mxu1 %v11564_v28  ;;  %v9064_v47 = vpack.c.bf16 %v1319_v45, %v1318_v37 }
0x19fc   :  { %8632 = vmatmul.mubr.msk.f32.vlgmr.msra.gmra.mrb[16].mxu1 %vm1539_vm2, %v12819_v58 }
0x19fd   :  { %8641 = vmatprep.mubr.msk.f32.mxu1 %vm11563_vm3, %v11564_v28  ;;  %8640 = vmatpush3.msra.mxu1 %v1300_v55 }
0x19fe   :  { %8649 = vmatprep.subr.mxu1 %v11564_v28 }
0x1acf   :  { %v3942_v60 = vpop.f32.mrb[16].mxu1 }
0x1ad0   :  { %4099 = vrot.lane.b32.xlu1 %v3942_v60, %s11567_s22  ;;  %4025 = vrot.lane.b32.xlu0 %v3942_v60, %s11579_s30  ;;  %v8633_v42 = vpop.f32.mrb[17].mxu1 }
0x1ad1   :  { %8637 = vmatmul.mubr.msk.f32.vlgmr.msra.gmra.mrb[18].mxu0 %vm2012_vm5, %v3942_v60 }
0x1ad2   :  { %8645 = vmatpush3.msra.mxu0 %v1300_v55  ;;  %8646 = vmatprep.mubr.msk.f32.mxu0 %vm11563_vm3, %v11564_v28 }
0x1ad3   :  { %9060 = vmatprep.subr.bf16.mxu0 %v11562_v21 }
0x1ad4   :  { %4173 = vrot.lane.b32.xlu0 %v3942_v60, %s11580_s14 }
0x1b42   :  { %v4100_v58 = vpop.permute.xlu1 %4099  ;;  %v4026_v43 = vpop.permute.xlu0 %4025 }
0x1b43   :  { %8642 = vmatmul.mubr.msk.f32.vlgmr.msra.gmra.mrb[18].mxu1 %vm2012_vm5, %v4026_v43  ;;  %8647 = vmatmul.mubr.msk.f32.vlgmr.msra.gmra.mrb[20].mxu0 %vm2012_vm5, %v4100_v58 }
0x1b44   :  { %8650 = vmatpush3.msra.mxu1 %v1300_v55  ;;  %8651 = vmatprep.mubr.msk.f32.mxu1 %vm11563_vm3, %v11564_v28 }
0x1b45   :  { %8658 = vmatprep.mubr.msk.f32.mxu0 %vm11563_vm3, %v11564_v28  ;;  %9063 = vmatprep.subr.bf16.mxu1 %v11562_v21 }
0x1b46   :  { %v4174_v31 = vpop.permute.xlu0 %4173  ;;  %9062 = vmatpush3.bf16.msra.mxu0 %v9061_v3 }
0x1b47   :  { %8652 = vmatmul.mubr.msk.f32.vlgmr.msra.gmra.mrb[20].mxu1 %vm2012_vm5, %v4174_v31  ;;  %9066 = vmatprep.subr.bf16.mxu0 %v11562_v21 }
0x1b48   :  { %8665 = vmatprep.mubr.msk.f32.mxu1 %vm11563_vm3, %v11564_v28  ;;  %9065 = vmatpush3.bf16.msra.mxu1 %v9064_v47 }
0x1b49   :  { %9069 = vmatprep.subr.bf16.mxu1 %v11562_v21 }
0x1ba4   :  { %v4021_v48 = vpop.f32.mrb[18].mxu0 }
0x1ba5   :  { %v8638_v17 = vpop.f32.mrb[19].mxu0  ;;  %v4022_v52 = vadd.f32 %v8137_v10, %v4021_v48 }
0x1c16   :  { %v4095_v53 = vpop.f32.mrb[18].mxu1  ;;  %v4169_v51 = vpop.f32.mrb[20].mxu0 }
0x1c17   :  { %4252 = vrot.lane.b32.xlu0 %v4169_v51, %s11558_s5  ;;  %v8648_v2 = vpop.f32.mrb[21].mxu0  ;;  %4248 = vrot.lane.b32.xlu1 %v4095_v53, %s11565_s12  ;;  %v8643_v1 = vpop.f32.mrb[19].mxu1 }
0x1c1a   :  { %v4243_v7 = vpop.f32.mrb[20].mxu1 }
0x1c1b   :  { %4256 = vrot.lane.b32.xlu1 %v4243_v7, %s11577_s26  ;;  %v8653_v49 = vpop.f32.mrb[21].mxu1 }
0x1c89   :  { %v4249_v4 = vpop.permute.xlu1 %4248  ;;  %v4253_v59 = vpop.permute.xlu0 %4252 }
0x1c8a   :  { %v4259_v24 = vsel %vm1539_vm2, %v4022_v52, %v4249_v4 }
0x1c8b   :  { %v4260_v6 = vsel %vm1448_vm0, %v4259_v24, %v4253_v59  ;;  %v8142_v59 = vld [vmem:[#allocation58] ss:$0 sm:$0xff] }
0x1c8d   :  { %v4257_v0 = vpop.permute.xlu1 %4256 }
0x1c8e   :  { %v4261_v54 = vsel %vm1879_vm4, %v4260_v6, %v4257_v0 }
0x1c8f   :  { %v12959_v36 = vadd.f32 %v4261_v54, %v12439_v56 }
0x1c91   :  { %v4263_v61 = vmul.f32 %v12959_v36, %v12959_v36 }
0x1c93   :  { %4279 = vrot.lane.b32.xlu1 %v4263_v61, %s11568_s23  ;;  %4270 = vrot.lane.b32.xlu0 %v4263_v61, %s11567_s22  ;;  %v4264_v63 = vsel %vm1539_vm2, %v4263_v61, 0.0 }
0x1c97   :  { %4288 = vrot.lane.b32.xlu0 %v4263_v61, %s11566_s7 }
0x1cb7   :  { %4265 = vadd.xlane.f32.xlu1 %v4264_v63 }
0x1d05   :  { %v4271_v8 = vpop.permute.xlu0 %4270  ;;  %v4280_v62 = vpop.permute.xlu1 %4279 }
0x1d06   :  { %v4273_v9 = vsel %vm1539_vm2, %v4271_v8, 0.0  ;;  %v4282_v56 = vsel %vm1539_vm2, %v4280_v62, 0.0 }
0x1d07   :  { %4274 = vadd.xlane.f32.xlu0 %v4273_v9 }
0x1d09   :  { %v4289_v57 = vpop.permute.xlu0 %4288 }
0x1d0a   :  { %v4291_v34 = vsel %vm1539_vm2, %v4289_v57, 0.0 }
0x1d0b   :  { %4283 = vadd.xlane.f32.xlu0 %v4282_v56  ;;  %4292 = vadd.xlane.f32.xlu1 %v4291_v34 }
0x1d44   :  { %v4266_v55 = vpop.xlane.xlu1 %4265 }
0x1d45   :  { %v4267_v42 = vmul.f32 0.0625, %v4266_v55 }
0x1d47   :  { %v4268_v17 = vmul.f32 0.5, %v4267_v42 }
0x1d94   :  { %v4275_v60 = vpop.xlane.xlu0 %4274 }
0x1d95   :  { %v4276_v58 = vmul.f32 0.0625, %v4275_v60 }
0x1d97   :  { %v4277_v43 = vmul.f32 0.16666667, %v4276_v58 }
0x1d98   :  { %v4284_v31 = vpop.xlane.xlu0 %4283  ;;  %v4293_v48 = vpop.xlane.xlu1 %4292 }
0x1d99   :  { %v4285_v53 = vmul.f32 0.0625, %v4284_v31  ;;  %v4294_v51 = vmul.f32 0.0625, %v4293_v48  ;;  %v4278_v2 = vadd.f32 %v4277_v43, %v4268_v17  ;;  %v1321_v48 = vld [vmem:[#allocation53] sm:$0xff]  ;;  %v1322_v17 = vld [vmem:[#allocation53 + $0x8] sm:$0xff] }
0x1d9b   :  { %v4286_v1 = vmul.f32 0.16666667, %v4285_v53  ;;  %v4295_v49 = vmul.f32 0.16666667, %v4294_v51  ;;  %v9073_v53 = vpack.c.bf16 %v1322_v17, %v1321_v48  ;;  %v1323_v51 = vld [vmem:[#allocation53 + $0x10] sm:$0xff] }
0x1d9d   :  { %v4287_v7 = vadd.f32 %v4286_v1, %v4278_v2  ;;  %v1324_v2 = vld [vmem:[#allocation53 + $0x18] sm:$0xff] }
0x1d9e   :  { %v9076_v1 = vpack.c.bf16 %v1324_v2, %v1323_v51 }
0x1d9f   :  { %v4296_v10 = vadd.f32 %v4295_v49, %v4287_v7  ;;  %v1325_v7 = vld [vmem:[#allocation55] sm:$0xff]  ;;  %v1326_v49 = vld [vmem:[#allocation55 + $0x8] sm:$0xff] }
0x1da1   :  { %v4297_v52 = vadd.f32 1e-12, %v4296_v10  ;;  %v1327_v10 = vld [vmem:[#allocation55 + $0x10] sm:$0xff] }
0x1da3   :  { %9537 = vrsqrt.f32 %v4297_v52 }
0x1dad   :  { %v9538_v4 = vpop.eup %9537 }
0x1dae   :  { %v4299_v24 = vmul.f32 %v9538_v4, %v12959_v36  ;;  %v9079_v4 = vpack.c.bf16 %v1326_v49, %v1325_v7 }
0x1db0   :  { %v4306_v6 = vmul.f32 %v8142_v59, %v4299_v24  ;;  %v1328_v59 = vld [vmem:[#allocation55 + $0x18] sm:$0xff] }
0x1db1   :  { %v9082_v24 = vpack.c.bf16 %v1328_v59, %v1327_v10 }
0x1db2   :  { %4460 = vrot.lane.b32.xlu1 %v4306_v6, %s11568_s23  ;;  %4386 = vrot.lane.b32.xlu0 %v4306_v6, %s11567_s22 }
0x1db3   :  { %8659 = vmatmul.mubr.msk.f32.vlgmr.msra.gmra.mrb[22].mxu0 %vm1539_vm2, %v4306_v6 }
0x1db4   :  { %9068 = vmatpush3.bf16.msra.mxu0 %v9064_v47  ;;  %8672 = vmatprep.mubr.msk.f32.mxu0 %vm11563_vm3, %v11564_v28 }
0x1db5   :  { %9072 = vmatprep.subr.bf16.mxu0 %v11562_v21 }
0x1db6   :  { %4534 = vrot.lane.b32.xlu1 %v4306_v6, %s11566_s7 }
0x1e24   :  { %v4461_v0 = vpop.permute.xlu1 %4460  ;;  %v4387_v54 = vpop.permute.xlu0 %4386 }
0x1e25   :  { %8666 = vmatmul.mubr.msk.f32.vlgmr.msra.gmra.mrb[22].mxu1 %vm1539_vm2, %v4387_v54  ;;  %8673 = vmatmul.mubr.msk.f32.vlgmr.msra.gmra.mrb[24].mxu0 %vm1539_vm2, %v4461_v0 }
0x1e26   :  { %9071 = vmatpush3.bf16.msra.mxu1 %v9064_v47  ;;  %8679 = vmatprep.mubr.msk.f32.mxu1 %vm11563_vm3, %v11564_v28 }
0x1e27   :  { %8690 = vmatprep.mubr.msk.f32.mxu0 %vm11563_vm3, %v11564_v28  ;;  %9078 = vmatprep.subr.bf16.mxu1 %v11562_v21 }
0x1e28   :  { %v4535_v61 = vpop.permute.xlu1 %4534  ;;  %9074 = vmatpush3.bf16.msra.mxu0 %v9073_v53 }
0x1e29   :  { %8680 = vmatmul.mubr.msk.f32.vlgmr.msra.gmra.mrb[24].mxu1 %vm1539_vm2, %v4535_v61  ;;  %9075 = vmatprep.subr.bf16.mxu0 %v11562_v21 }
0x1e2a   :  { %8701 = vmatprep.mubr.msk.f32.mxu1 %vm11563_vm3, %v11564_v28  ;;  %9080 = vmatpush3.bf16.msra.mxu1 %v9079_v4 }
0x1e2b   :  { %9081 = vmatprep.subr.bf16.mxu1 %v11562_v21 }
0x1e2c   :  { %9077 = vmatpush3.bf16.msra.mxu0 %v9076_v1 }
0x1e2d   :  { %9084 = vmatprep.subr.bf16.mxu0 %v11562_v21 }
0x1e2e   :  { %9083 = vmatpush3.bf16.msra.mxu1 %v9082_v24 }
0x1e2f   :  { %9090 = vmatprep.subr.bf16.mxu1 %v11562_v21 }
0x1e86   :  { %v4382_v63 = vpop.f32.mrb[22].mxu0 }
0x1e87   :  { %v8660_v8 = vpop.f32.mrb[23].mxu0  ;;  %v4383_v3 = vadd.f32 %v8143_v13, %v4382_v63  ;;  %v9624_v13 = vld [vmem:[#allocation8] sm:$0xff] }
0x1ef8   :  { %v4456_v9 = vpop.f32.mrb[22].mxu1  ;;  %v4530_v62 = vpop.f32.mrb[24].mxu0 }
0x1ef9   :  { %4613 = vrot.lane.b32.xlu1 %v4530_v62, %s11572_s21  ;;  %v8674_v57 = vpop.f32.mrb[25].mxu0  ;;  %4609 = vrot.lane.b32.xlu0 %v4456_v9, %s11558_s5  ;;  %v8667_v56 = vpop.f32.mrb[23].mxu1 }
0x1efc   :  { %v4604_v34 = vpop.f32.mrb[24].mxu1 }
0x1efd   :  { %4617 = vrot.lane.b32.xlu0 %v4604_v34, %s11568_s23  ;;  %v8681_v41 = vpop.f32.mrb[25].mxu1 }
0x1f6b   :  { %v4610_v37 = vpop.permute.xlu0 %4609  ;;  %v4614_v45 = vpop.permute.xlu1 %4613 }
0x1f6c   :  { %v4620_v47 = vsel %vm1448_vm0, %v4383_v3, %v4610_v37 }
0x1f6d   :  { %v4621_v55 = vsel %vm1457_vm1, %v4620_v47, %v4614_v45 }
0x1f6f   :  { %v4618_v60 = vpop.permute.xlu0 %4617 }
0x1f70   :  { %v4622_v42 = vsel %vm2251_vm6, %v4621_v55, %v4618_v60 }
0x1f71   :  { %v8148_v58 = vmul.f32 -1.442695, %v4622_v42 }
0x1f73   :  { %9539 = vpow2.f32 %v8148_v58 }
0x1f7d   :  { %v9540_v43 = vpop.eup %9539 }
0x1f7e   :  { %v4626_v31 = vadd.f32 1.0, %v9540_v43 }
0x1f80   :  { %9541 = vrcp.f32 %v4626_v31  ;;  %v8149_v31 = vld [vmem:[#allocation52] ss:$0 sm:$0xff] }
0x1f8a   :  { %v9542_v52 = vpop.eup %9541 }
0x1f8b   :  { %4635 = vrot.lane.b32.xlu0 %v9542_v52, %s11572_s21  ;;  %4631 = vrot.lane.b32.xlu1 %v9542_v52, %s11558_s5  ;;  %v4629_v54 = vmul.f32 %v9542_v52, %v4622_v42 }
0x1f8f   :  { %4639 = vrot.lane.b32.xlu1 %v9542_v52, %s11568_s23 }
0x1ffd   :  { %v4636_v6 = vpop.permute.xlu0 %4635  ;;  %v4632_v0 = vpop.permute.xlu1 %4631 }
0x1ffe   :  { %v4634_v61 = vmul.f32 %v4632_v0, %v4622_v42  ;;  %v4638_v63 = vmul.f32 %v4636_v6, %v4622_v42  ;;  %v1265_v0 = vld [vmem:[#allocation16 + $0x8] sm:$0xff] }
0x2000   :  { %v4643_v8 = vsel %vm1448_vm0, %v4629_v54, %v4634_v61  ;;  %v1264_v54 = vld [vmem:[#allocation16] sm:$0xff] }
0x2001   :  { %v4640_v9 = vpop.permute.xlu1 %4639  ;;  %v4644_v57 = vsel %vm1457_vm1, %v4643_v8, %v4638_v63 }
0x2002   :  { %v4642_v62 = vmul.f32 %v4640_v9, %v4622_v42 }
0x2004   :  { %v4645_v56 = vsel %vm2251_vm6, %v4644_v57, %v4642_v62 }
0x2005   :  { %4799 = vrot.lane.b32.xlu1 %v4645_v56, %s11572_s21  ;;  %4725 = vrot.lane.b32.xlu0 %v4645_v56, %s11568_s23 }
0x2006   :  { %8691 = vmatmul.mubr.msk.f32.vlgmr.msra.gmra.mrb[26].mxu0 %vm1448_vm0, %v4645_v56 }
0x2007   :  { %9086 = vmatpush3.bf16.msra.mxu0 %v9079_v4  ;;  %8712 = vmatprep.mubr.msk.f32.mxu0 %vm11563_vm3, %v11564_v28 }
0x2008   :  { %9087 = vmatprep.subr.bf16.mxu0 %v11562_v21 }
0x2009   :  { %4873 = vrot.lane.b32.xlu0 %v4645_v56, %s11558_s5 }
0x200b   :  { %9089 = vmatpush3.bf16.msra.mxu0 %v9082_v24 }
0x2077   :  { %v4800_v34 = vpop.permute.xlu1 %4799  ;;  %v4726_v41 = vpop.permute.xlu0 %4725 }
0x2078   :  { %8702 = vmatmul.mubr.msk.f32.vlgmr.msra.gmra.mrb[26].mxu1 %vm1448_vm0, %v4726_v41  ;;  %8713 = vmatmul.mubr.msk.f32.vlgmr.msra.gmra.mrb[28].mxu0 %vm1448_vm0, %v4800_v34 }
0x2079   :  { %9092 = vmatpush3.bf16.msra.mxu1 %v9079_v4  ;;  %8723 = vmatprep.mubr.msk.f32.mxu1 %vm11563_vm3, %v11564_v28 }
0x207a   :  { %9093 = vmatprep.subr.bf16.mxu1 %v11562_v21  ;;  %8728 = vmatprep.mubr.msk.f32.mxu0 %vm2012_vm5, %v9624_v13 }
0x207b   :  { %v4874_v3 = vpop.permute.xlu0 %4873 }
0x207d   :  { %9095 = vmatpush3.bf16.msra.mxu1 %v9082_v24 }
0x2080   :  { %8724 = vmatmul.mubr.msk.f32.vlgmr.msra.gmra.mrb[28].mxu1 %vm1448_vm0, %v4874_v3 }
0x2081   :  { %8733 = vmatprep.mubr.msk.f32.mxu1 %vm2012_vm5, %v12825_v20 }
0x20d9   :  { %v4721_v37 = vpop.f32.mrb[26].mxu0 }
0x20da   :  { %v8692_v45 = vpop.f32.mrb[27].mxu0  ;;  %v4722_v17 = vadd.f32 %v8149_v31, %v4721_v37  ;;  %v1370_v31 = vld [vmem:[#allocation85 + $0x8] sm:$0xff] }
0x214b   :  { %v4795_v47 = vpop.f32.mrb[26].mxu1  ;;  %v4869_v55 = vpop.f32.mrb[28].mxu0 }
0x214c   :  { %4952 = vrot.lane.b32.xlu0 %v4869_v55, %s11558_s5  ;;  %v8714_v60 = vpop.f32.mrb[29].mxu0  ;;  %4948 = vrot.lane.b32.xlu1 %v4795_v47, %s11565_s12  ;;  %v8703_v42 = vpop.f32.mrb[27].mxu1 }
0x2153   :  { %v4943_v58 = vpop.f32.mrb[28].mxu1 }
0x2154   :  { %4956 = vrot.lane.b32.xlu1 %v4943_v58, %s11577_s26  ;;  %v8725_v43 = vpop.f32.mrb[29].mxu1  ;;  %v8154_v58 = vld [vmem:[#allocation98] ss:$0 sm:$0xff] }
0x2155   :  { %v1369_v43 = vld [vmem:[#allocation85] sm:$0xff] }
0x21be   :  { %v4949_v48 = vpop.permute.xlu1 %4948  ;;  %v4953_v53 = vpop.permute.xlu0 %4952 }
0x21bf   :  { %v4959_v20 = vsel %vm1539_vm2, %v4722_v17, %v4949_v48  ;;  %v1371_v17 = vld [vmem:[#allocation85 + $0x10] sm:$0xff] }
0x21c0   :  { %v4960_v51 = vsel %vm1448_vm0, %v4959_v20, %v4953_v53  ;;  %v1372_v53 = vld [vmem:[#allocation85 + $0x18] sm:$0xff] }
0x21c6   :  { %v4957_v2 = vpop.permute.xlu1 %4956 }
0x21c7   :  { %v4961_v1 = vsel %vm1879_vm4, %v4960_v51, %v4957_v2  ;;  %v9096_v51 = vpack.c.bf16 %v1370_v31, %v1369_v43  ;;  %v8159_v31 = vld [vmem:[#allocation80] ss:$0 sm:$0xff] }
0x21c8   :  { %v13029_v7 = vadd.f32 %v4961_v1, %v12959_v36  ;;  %v9100_v1 = vpack.c.bf16 %v1372_v53, %v1371_v17 }
0x21ca   :  { %v4973_v49 = vmul.f32 %v13029_v7, %v13029_v7 }
0x21cc   :  { %4989 = vrot.lane.b32.xlu1 %v4973_v49, %s11568_s23  ;;  %4980 = vrot.lane.b32.xlu0 %v4973_v49, %s11567_s22  ;;  %v4974_v10 = vsel %vm1539_vm2, %v4973_v49, 0.0 }
0x21d0   :  { %4998 = vrot.lane.b32.xlu0 %v4973_v49, %s11566_s7  ;;  %v1373_v49 = vld [vmem:[#allocation85 + $0x20] sm:$0xff] }
0x21f0   :  { %4975 = vadd.xlane.f32.xlu1 %v4974_v10  ;;  %v1374_v10 = vld [vmem:[#allocation85 + $0x28] sm:$0xff] }
0x223e   :  { %v4981_v52 = vpop.permute.xlu0 %4980  ;;  %v4990_v59 = vpop.permute.xlu1 %4989 }
0x223f   :  { %v4983_v4 = vsel %vm1539_vm2, %v4981_v52, 0.0  ;;  %v4992_v36 = vsel %vm1539_vm2, %v4990_v59, 0.0  ;;  %v9104_v59 = vpack.c.bf16 %v1374_v10, %v1373_v49 }
0x2240   :  { %4984 = vadd.xlane.f32.xlu0 %v4983_v4  ;;  %v9625_v4 = vld [vmem:[#allocation8 + $0x8] sm:$0xff] }
0x2242   :  { %v4999_v24 = vpop.permute.xlu0 %4998 }
0x2243   :  { %v5001_v6 = vsel %vm1539_vm2, %v4999_v24, 0.0  ;;  %v1375_v24 = vld [vmem:[#allocation85 + $0x30] sm:$0xff] }
0x2244   :  { %4993 = vadd.xlane.f32.xlu0 %v4992_v36  ;;  %5002 = vadd.xlane.f32.xlu1 %v5001_v6  ;;  %v1376_v36 = vld [vmem:[#allocation85 + $0x38] sm:$0xff] }
0x2245   :  { %v9108_v6 = vpack.c.bf16 %v1376_v36, %v1375_v24 }
0x2255   :  { %4967 = vrot.lane.b32.xlu1 %v1265_v0, %s11558_s5 }
0x225a   :  { %4965 = vrot.lane.b32.xlu0 %v1264_v54, %s11558_s5 }
0x227d   :  { %v4976_v61 = vpop.xlane.xlu1 %4975 }
0x227e   :  { %v4977_v8 = vmul.f32 0.0625, %v4976_v61 }
0x2280   :  { %v4978_v34 = vmul.f32 0.5, %v4977_v8 }
0x22cd   :  { %v4985_v63 = vpop.xlane.xlu0 %4984 }
0x22ce   :  { %v4986_v9 = vmul.f32 0.0625, %v4985_v63 }
0x22d0   :  { %v4987_v62 = vmul.f32 0.16666667, %v4986_v9 }
0x22d1   :  { %v4994_v57 = vpop.xlane.xlu0 %4993  ;;  %v5003_v56 = vpop.xlane.xlu1 %5002 }
0x22d2   :  { %v4995_v41 = vmul.f32 0.0625, %v4994_v57  ;;  %v5004_v13 = vmul.f32 0.0625, %v5003_v56  ;;  %v4988_v3 = vadd.f32 %v4987_v62, %v4978_v34 }
0x22d4   :  { %v4996_v37 = vmul.f32 0.16666667, %v4995_v41  ;;  %v5005_v47 = vmul.f32 0.16666667, %v5004_v13 }
0x22d5   :  { %v4966_v2 = vpop.permute.xlu0 %4965 }
0x22d6   :  { %v4997_v45 = vadd.f32 %v4996_v37, %v4988_v3  ;;  %v4971_v52 = vsel %vm1448_vm0, %v12376_v32, %v4966_v2  ;;  %v4968_v32 = vpop.permute.xlu1 %4967 }
0x22d7   :  { %v4972_v0 = vsel %vm1448_vm0, %v12381_v35, %v4968_v32 }
0x22d8   :  { %v5006_v55 = vadd.f32 %v5005_v47, %v4997_v45 }
0x22da   :  { %v5007_v60 = vadd.f32 1e-12, %v5006_v55 }
0x22dc   :  { %9543 = vrsqrt.f32 %v5007_v60 }
0x22e6   :  { %v9544_v42 = vpop.eup %9543 }
0x22e7   :  { %v5009_v48 = vmul.f32 %v9544_v42, %v13029_v7 }
0x22e9   :  { %v5016_v20 = vmul.f32 %v8154_v58, %v5009_v48 }
0x22eb   :  { %8726 = vmatprep.subr.mxu0 %v5016_v20  ;;  %8731 = vmatprep.subr.mxu1 %v5016_v20 }
0x22ec   :  { %8727 = vmatpush3.msra.mxu0 %v5016_v20  ;;  %8732 = vmatpush3.msra.mxu1 %v5016_v20 }
0x22ed   :  { %8729 = vmatmul.mubr.msk.f32.vlgmr.msra.gmra.mrb[30].mxu0 %vm2012_vm5, %v9625_v4  ;;  %9097 = vmatprep.subr.bf16.mxu0 %v9096_v51 }
0x22ee   :  { %9099 = vmatpush3.bf16.msra.mxu0 %v9096_v51  ;;  %8752 = vmatprep.mubr.msk.f32.mxu0 %vm1457_vm1, %v4971_v52 }
0x22ef   :  { %8734 = vmatmul.mubr.msk.f32.vlgmr.msra.gmra.mrb[30].mxu1 %vm2012_vm5, %v12831_v14  ;;  %9101 = vmatprep.subr.bf16.mxu0 %v9100_v1 }
0x22f2   :  { %9103 = vmatpush3.bf16.msra.mxu0 %v9100_v1 }
0x22f3   :  { %9105 = vmatprep.subr.bf16.mxu0 %v9104_v59 }
0x22f6   :  { %9107 = vmatpush3.bf16.msra.mxu0 %v9104_v59 }
0x22f7   :  { %9109 = vmatprep.subr.bf16.mxu0 %v9108_v6 }
0x22fa   :  { %9111 = vmatpush3.bf16.msra.mxu0 %v9108_v6 }
0x22fd   :  { %8753 = vmatmul.mubr.msk.f32.vlgmr.msra.gmra.mrb[32].mxu0 %vm1457_vm1, %v4972_v0 }
0x23c0   :  { %v8730_v54 = vpop.f32.mrb[30].mxu0 }
0x23c1   :  { %5189 = vrot.lane.b32.xlu1 %v8730_v54, %s11568_s23  ;;  %5181 = vrot.lane.b32.xlu0 %v8730_v54, %s11567_s22  ;;  %v5083_v14 = vpop.f32.mrb[31].mxu0 }
0x23c2   :  { %v8735_v61 = vpop.f32.mrb[30].mxu1 }
0x23c3   :  { %v5158_v63 = vpop.f32.mrb[31].mxu1 }
0x23c5   :  { %5179 = vrot.lane.b32.xlu1 %v5083_v14, %s11567_s22  ;;  %5195 = vrot.lane.b32.xlu0 %v8735_v61, %s11567_s22 }
0x23c9   :  { %5187 = vrot.lane.b32.xlu1 %v5083_v14, %s11568_s23  ;;  %5193 = vrot.lane.b32.xlu0 %v5158_v63, %s11567_s22 }
0x23cd   :  { %5201 = vrot.lane.b32.xlu1 %v5083_v14, %s11566_s7  ;;  %5207 = vrot.lane.b32.xlu0 %v5158_v63, %s11568_s23 }
0x23d0   :  { %v8754_v35 = vpop.f32.mrb[32].mxu0 }
0x23d1   :  { %5203 = vrot.lane.b32.xlu1 %v8730_v54, %s11566_s7  ;;  %v5423_v8 = vpop.f32.mrb[33].mxu0  ;;  %5209 = vrot.lane.b32.xlu0 %v8735_v61, %s11568_s23  ;;  %v5429_v48 = vadd.f32 %v8754_v35, %v8159_v31 }
0x23d2   :  { %v5424_v17 = vadd.f32 %v8159_v31, %v5423_v8 }
0x23d3   :  { %v5435_v53 = vsel %vm1539_vm2, %v5429_v48, 0.0 }
0x23d4   :  { %v5432_v20 = vsel %vm1539_vm2, %v5424_v17, 0.0 }
0x23d5   :  { %5169 = vrot.lane.b32.xlu1 %v5158_v63, %s11565_s12  ;;  %5171 = vrot.lane.b32.xlu0 %v8735_v61, %s11565_s12 }
0x2433   :  { %v5182_v9 = vpop.permute.xlu0 %5181  ;;  %v5190_v62 = vpop.permute.xlu1 %5189 }
0x2434   :  { %v5186_v57 = vsel %vm1539_vm2, %v5182_v9, %v8735_v61 }
0x2435   :  { %5219 = vrot.lane.b32.xlu0 %v5186_v57, %s11558_s5 }
0x2437   :  { %v5180_v56 = vpop.permute.xlu1 %5179  ;;  %v5196_v34 = vpop.permute.xlu0 %5195 }
0x2438   :  { %v5185_v41 = vsel %vm1539_vm2, %v5180_v56, %v5158_v63  ;;  %v5200_v13 = vsel %vm1539_vm2, %v5190_v62, %v5196_v34 }
0x2439   :  { %5227 = vrot.lane.b32.xlu0 %v5200_v13, %s11572_s21  ;;  %5217 = vrot.lane.b32.xlu1 %v5185_v41, %s11558_s5 }
0x243b   :  { %v5188_v3 = vpop.permute.xlu1 %5187  ;;  %v5194_v37 = vpop.permute.xlu0 %5193 }
0x243c   :  { %v5199_v45 = vsel %vm1539_vm2, %v5188_v3, %v5194_v37 }
0x243d   :  { %5225 = vrot.lane.b32.xlu1 %v5199_v45, %s11572_s21 }
0x243f   :  { %v5202_v47 = vpop.permute.xlu1 %5201  ;;  %v5208_v55 = vpop.permute.xlu0 %5207 }
0x2440   :  { %v5213_v60 = vsel %vm1539_vm2, %v5202_v47, %v5208_v55 }
0x2441   :  { %5233 = vrot.lane.b32.xlu1 %v5213_v60, %s11568_s23 }
0x2443   :  { %v5204_v42 = vpop.permute.xlu1 %5203  ;;  %v5210_v58 = vpop.permute.xlu0 %5209 }
0x2444   :  { %v5214_v43 = vsel %vm1539_vm2, %v5204_v42, %v5210_v58 }
0x2445   :  { %5235 = vrot.lane.b32.xlu0 %v5214_v43, %s11568_s23 }
0x2447   :  { %v5172_v51 = vpop.permute.xlu0 %5171  ;;  %v5170_v2 = vpop.permute.xlu1 %5169 }
0x2448   :  { %v5176_v52 = vsel %vm1539_vm2, %v8730_v54, %v5172_v51  ;;  %v5175_v61 = vsel %vm1539_vm2, %v5083_v14, %v5170_v2 }
0x2464   :  { %5436 = vadd.xlane.f32.xlu0 %v5435_v53 }
0x2465   :  { %5433 = vadd.xlane.f32.xlu1 %v5432_v20 }
0x24a7   :  { %v5220_v1 = vpop.permute.xlu0 %5219 }
0x24a8   :  { %v5240_v59 = vsel %vm1448_vm0, %v5176_v52, %v5220_v1 }
0x24ab   :  { %v5218_v49 = vpop.permute.xlu1 %5217  ;;  %v5228_v10 = vpop.permute.xlu0 %5227 }
0x24ac   :  { %v5242_v24 = vsel %vm1457_vm1, %v5240_v59, %v5228_v10  ;;  %v5239_v54 = vsel %vm1448_vm0, %v5175_v61, %v5218_v49 }
0x24af   :  { %v5226_v4 = vpop.permute.xlu1 %5225 }
0x24b0   :  { %v5241_v35 = vsel %vm1457_vm1, %v5239_v54, %v5226_v4 }
0x24b3   :  { %v5234_v63 = vpop.permute.xlu1 %5233 }
0x24b4   :  { %v13098_v62 = vsel %vm2251_vm6, %v5241_v35, %v5234_v63 }
0x24b5   :  { %v5299_v14 = vmul.f32 %v13098_v62, %v12511_v38  ;;  %v5273_v57 = vmul.f32 %v13098_v62, %v12408_v11  ;;  %v5311_v56 = vmul.f32 %v13098_v62, %v12513_v39  ;;  %v5285_v34 = vmul.f32 %v13098_v62, %v12410_v12 }
0x24b6   :  { %v5271_v63 = vmul.f32 %v13098_v62, %v12425_v29 }
0x24b7   :  { %v5236_v36 = vpop.permute.xlu0 %5235 }
0x24b8   :  { %v13082_v6 = vsel %vm2251_vm6, %v5242_v24, %v5236_v36  ;;  %v1378_v24 = vld [vmem:[#allocation88] sm:$0xff]  ;;  %v1379_v36 = vld [vmem:[#allocation88 + $0x8] sm:$0xff] }
0x24b9   :  { %v5286_v32 = vmul.f32 %v13082_v6, %v12414_v19  ;;  %v5274_v0 = vmul.f32 %v13082_v6, %v12412_v15  ;;  %v5312_v8 = vmul.f32 %v13082_v6, %v12517_v46  ;;  %v5300_v9 = vmul.f32 %v13082_v6, %v12515_v40 }
0x24ba   :  { %v5248_v43 = vmul.f32 %v13082_v6, %v12564_v16  ;;  %v5260_v31 = vmul.f32 %v13082_v6, %v12576_v25  ;;  %v5272_v53 = vmul.f32 %v13082_v6, %v12427_v30  ;;  %v5298_v49 = vmul.f32 %v13082_v6, %v12591_v33 }
0x24bb   :  { %5291 = vrot.lane.b32.xlu0 %v5286_v32, %s11572_s21  ;;  %5279 = vrot.lane.b32.xlu1 %v5274_v0, %s11568_s23  ;;  %v9112_v61 = vpack.c.bf16 %v1379_v36, %v1378_v24 }
0x24bd   :  { %9113 = vmatprep.subr.bf16.mxu1 %v9112_v61 }
0x24be   :  { %9115 = vmatpush3.bf16.msra.mxu1 %v9112_v61 }
0x24bf   :  { %5317 = vrot.lane.b32.xlu0 %v5312_v8, %s11572_s21  ;;  %5305 = vrot.lane.b32.xlu1 %v5300_v9, %s11568_s23  ;;  %v5297_v8 = vmul.f32 %v13098_v62, %v12571_v23 }
0x24c3   :  { %5303 = vrot.lane.b32.xlu1 %v5299_v14, %s11568_s23  ;;  %5277 = vrot.lane.b32.xlu0 %v5273_v57, %s11568_s23  ;;  %v1335_v14 = vld [vmem:[#allocation65] sm:$0xff]  ;;  %v1336_v57 = vld [vmem:[#allocation65 + $0x8] sm:$0xff] }
0x24c7   :  { %5315 = vrot.lane.b32.xlu1 %v5311_v56, %s11572_s21  ;;  %5289 = vrot.lane.b32.xlu0 %v5285_v34, %s11572_s21  ;;  %v13138_v34 = vpack.c.bf16 %v1336_v57, %v1335_v14 }
0x24c9   :  { %9117 = vmatprep.subr.bf16.mxu1 %v13138_v34 }
0x24f1   :  { %v5437_v41 = vpop.xlane.xlu0 %5436 }
0x24f2   :  { %v5439_v13 = vmul.f32 0.0625, %v5437_v41  ;;  %v5434_v3 = vpop.xlane.xlu1 %5433 }
0x24f3   :  { %v5438_v37 = vmul.f32 0.0625, %v5434_v3 }
0x24f4   :  { %v5441_v45 = vsub.f32 %v5429_v48, %v5439_v13  ;;  %v5259_v48 = vmul.f32 %v13098_v62, %v12569_v22 }
0x24f5   :  { %v5440_v47 = vsub.f32 %v5424_v17, %v5438_v37  ;;  %v5247_v17 = vmul.f32 %v13098_v62, %v12581_v27 }
0x24f6   :  { %v5443_v55 = vmul.f32 %v5441_v45, %v5441_v45 }
0x24f7   :  { %v5442_v60 = vmul.f32 %v5440_v47, %v5440_v47 }
0x24f8   :  { %v5447_v42 = vsel %vm1539_vm2, %v5443_v55, 0.0 }
0x24f9   :  { %5448 = vadd.xlane.f32.xlu0 %v5447_v42  ;;  %v5444_v58 = vsel %vm1539_vm2, %v5442_v60, 0.0 }
0x24fa   :  { %5445 = vadd.xlane.f32.xlu1 %v5444_v58 }
0x250b   :  { %5253 = vrot.lane.b32.xlu1 %v5248_v43, %s11568_s23 }
0x250f   :  { %5265 = vrot.lane.b32.xlu0 %v5260_v31, %s11572_s21  ;;  %5263 = vrot.lane.b32.xlu1 %v5259_v48, %s11572_s21  ;;  %v8162_v31 = vld [vmem:[#allocation83] ss:$0 sm:$0xff] }
0x2513   :  { %5251 = vrot.lane.b32.xlu0 %v5247_v17, %s11568_s23 }
0x252d   :  { %v5292_v20 = vpop.permute.xlu0 %5291  ;;  %v5280_v51 = vpop.permute.xlu1 %5279 }
0x252e   :  { %v5284_v2 = vadd.f32 %v5280_v51, %v5272_v53  ;;  %v8163_v53 = vld [vmem:[#allocation82] ss:$0 sm:$0xff] }
0x2530   :  { %v5296_v1 = vadd.f32 %v5292_v20, %v5284_v2 }
0x2531   :  { %v5318_v10 = vpop.permute.xlu0 %5317  ;;  %v5306_v52 = vpop.permute.xlu1 %5305 }
0x2532   :  { %v5310_v4 = vadd.f32 %v5306_v52, %v5298_v49  ;;  %5327 = vrot.lane.b32.xlu0 %v5296_v1, %s11558_s5 }
0x2534   :  { %v5322_v59 = vadd.f32 %v5318_v10, %v5310_v4 }
0x2535   :  { %v5278_v32 = vpop.permute.xlu0 %5277  ;;  %v5304_v0 = vpop.permute.xlu1 %5303 }
0x2536   :  { %5335 = vrot.lane.b32.xlu0 %v5322_v59, %s11572_s21  ;;  %v5283_v54 = vadd.f32 %v5278_v32, %v5271_v63  ;;  %v5309_v41 = vadd.f32 %v5304_v0, %v5297_v8  ;;  %v5246_v59 = vmul.f32 %v13082_v6, %v12608_v18 }
0x2539   :  { %v5290_v35 = vpop.permute.xlu0 %5289  ;;  %v5316_v56 = vpop.permute.xlu1 %5315 }
0x253a   :  { %v5295_v9 = vadd.f32 %v5290_v35, %v5283_v54  ;;  %v5321_v13 = vadd.f32 %v5316_v56, %v5309_v41 }
0x253c   :  { %5325 = vrot.lane.b32.xlu1 %v5295_v9, %s11558_s5 }
0x2540   :  { %5333 = vrot.lane.b32.xlu1 %v5321_v13, %s11572_s21 }
0x2586   :  { %v5449_v3 = vpop.xlane.xlu0 %5448 }
0x2587   :  { %v5451_v37 = vmul.f32 0.0625, %v5449_v3  ;;  %v5446_v55 = vpop.xlane.xlu1 %5445 }
0x2588   :  { %v5450_v60 = vmul.f32 0.0625, %v5446_v55 }
0x2589   :  { %v5453_v42 = vadd.f32 1e-05, %v5451_v37 }
0x258a   :  { %v5452_v58 = vadd.f32 1e-05, %v5450_v60  ;;  %v5266_v1 = vpop.permute.xlu0 %5265 }
0x258b   :  { %9545 = vrsqrt.f32 %v5453_v42  ;;  %v5254_v52 = vpop.permute.xlu1 %5253 }
0x258c   :  { %9547 = vrsqrt.f32 %v5452_v58  ;;  %v5258_v36 = vadd.f32 %v5254_v52, %v5246_v59  ;;  %v1337_v58 = vld [vmem:[#allocation65 + $0x10] sm:$0xff] }
0x258e   :  { %v5252_v32 = vpop.permute.xlu0 %5251  ;;  %v5270_v0 = vadd.f32 %v5266_v1, %v5258_v36  ;;  %v1342_v1 = vld [vmem:[#allocation65 + $0x38] sm:$0xff] }
0x258f   :  { %v5264_v56 = vpop.permute.xlu1 %5263 }
0x2595   :  { %v9546_v43 = vpop.eup %9545 }
0x2596   :  { %v9548_v48 = vpop.eup %9547  ;;  %v5457_v17 = vmul.f32 %v9546_v43, %v5441_v45  ;;  %v5245_v45 = vmul.f32 %v13098_v62, %v12612_v50  ;;  %v1338_v43 = vld [vmem:[#allocation65 + $0x18] sm:$0xff] }
0x2597   :  { %v5456_v20 = vmul.f32 %v9548_v48, %v5440_v47  ;;  %v5340_v47 = vsel %vm1448_vm0, %v13082_v6, %v5270_v0 }
0x2598   :  { %v5465_v51 = vmul.f32 %v8162_v31, %v5457_v17  ;;  %v5257_v9 = vadd.f32 %v5252_v32, %v5245_v45  ;;  %v8166_v32 = vld [vmem:[#allocation86] ss:$0 sm:$0xff] }
0x2599   :  { %v5464_v2 = vmul.f32 %v8162_v31, %v5456_v20  ;;  %v1339_v20 = vld [vmem:[#allocation65 + $0x20] sm:$0xff] }
0x259a   :  { %v5473_v49 = vadd.f32 %v8163_v53, %v5465_v51  ;;  %v5269_v13 = vadd.f32 %v5264_v56, %v5257_v9  ;;  %v1346_v9 = vld [vmem:[#allocation67 + $0x18] sm:$0xff]  ;;  %v1347_v56 = vld [vmem:[#allocation67 + $0x20] sm:$0xff] }
0x259b   :  { %v5472_v10 = vadd.f32 %v8163_v53, %v5464_v2  ;;  %v9120_v53 = vpack.c.bf16 %v1338_v43, %v1337_v58  ;;  %v1341_v2 = vld [vmem:[#allocation65 + $0x30] sm:$0xff] }
0x259c   :  { %v8165_v4 = vmul.f32 -1.442695, %v5473_v49  ;;  %v5339_v6 = vsel %vm1448_vm0, %v13098_v62, %v5269_v13  ;;  %v1340_v62 = vld [vmem:[#allocation65 + $0x28] sm:$0xff]  ;;  %v9128_v52 = vpack.c.bf16 %v1342_v1, %v1341_v2 }
0x259d   :  { %v8164_v24 = vmul.f32 -1.442695, %v5472_v10  ;;  %v9124_v51 = vpack.c.bf16 %v1340_v62, %v1339_v20 }
0x259e   :  { %9549 = vpow2.f32 %v8165_v4 }
0x259f   :  { %9551 = vpow2.f32 %v8164_v24 }
0x25a4   :  { %v5328_v61 = vpop.permute.xlu0 %5327 }
0x25a5   :  { %v5342_v54 = vsel %vm1457_vm1, %v5340_v47, %v5328_v61 }
0x25a8   :  { %v9550_v63 = vpop.eup %9549  ;;  %v5336_v35 = vpop.permute.xlu0 %5335 }
0x25a9   :  { %v9552_v8 = vpop.eup %9551  ;;  %v13151_v14 = vsel %vm2251_vm6, %v5342_v54, %v5336_v35  ;;  %v5481_v57 = vadd.f32 1.0, %v9550_v63  ;;  %v1343_v63 = vld [vmem:[#allocation67] sm:$0xff]  ;;  %v1344_v54 = vld [vmem:[#allocation67 + $0x8] sm:$0xff] }
0x25aa   :  { %5579 = vrot.lane.b32.xlu0 %v13151_v14, %s11568_s23  ;;  %v5480_v41 = vadd.f32 1.0, %v9552_v8  ;;  %v9132_v35 = vpack.c.bf16 %v1344_v54, %v1343_v63  ;;  %v1345_v8 = vld [vmem:[#allocation67 + $0x10] sm:$0xff] }
0x25ab   :  { %9553 = vrcp.f32 %v5481_v57  ;;  %v9136_v57 = vpack.c.bf16 %v1346_v9, %v1345_v8 }
0x25ac   :  { %9555 = vrcp.f32 %v5480_v41  ;;  %9133 = vmatprep.subr.bf16.mxu0 %v9132_v35  ;;  %v1348_v41 = vld [vmem:[#allocation67 + $0x28] sm:$0xff] }
0x25ad   :  { %9135 = vmatpush3.bf16.msra.mxu0 %v9132_v35  ;;  %v9140_v13 = vpack.c.bf16 %v1348_v41, %v1347_v56 }
0x25ae   :  { %v5326_v3 = vpop.permute.xlu1 %5325  ;;  %9137 = vmatprep.subr.bf16.mxu0 %v9136_v57 }
0x25af   :  { %v5341_v37 = vsel %vm1457_vm1, %v5339_v6, %v5326_v3  ;;  %v1349_v3 = vld [vmem:[#allocation67 + $0x30] sm:$0xff]  ;;  %v1350_v6 = vld [vmem:[#allocation67 + $0x38] sm:$0xff] }
0x25b1   :  { %9139 = vmatpush3.bf16.msra.mxu0 %v9136_v57 }
0x25b2   :  { %v5334_v55 = vpop.permute.xlu1 %5333  ;;  %9141 = vmatprep.subr.bf16.mxu0 %v9140_v13 }
0x25b3   :  { %v13159_v60 = vsel %vm2251_vm6, %v5341_v37, %v5334_v55  ;;  %v8169_v37 = vld [vmem:[#allocation64] ss:$0 sm:$0xff]  ;;  %v9144_v55 = vpack.c.bf16 %v1350_v6, %v1349_v3  ;;  %v8174_v3 = vld [vmem:[#allocation73] ss:$0 sm:$0xff] }
0x25b4   :  { %5577 = vrot.lane.b32.xlu1 %v13159_v60, %s11568_s23 }
0x25b5   :  { %v9554_v42 = vpop.eup %9553  ;;  %9143 = vmatpush3.bf16.msra.mxu0 %v9140_v13 }
0x25b6   :  { %v9556_v31 = vpop.eup %9555  ;;  %v5487_v17 = vmul.f32 %v9554_v42, %v5473_v49  ;;  %v1361_v49 = vld [vmem:[#allocation74] sm:$0xff]  ;;  %9145 = vmatprep.subr.bf16.mxu0 %v9144_v55 }
0x25b7   :  { %v5486_v48 = vmul.f32 %v9556_v31, %v5472_v10  ;;  %v1362_v10 = vld [vmem:[#allocation74 + $0x8] sm:$0xff] }
0x25b8   :  { %v9148_v4 = vpack.c.bf16 %v1362_v10, %v1361_v49 }
0x25b9   :  { %8759 = vmatprep.mubr.msk.f32.mxu1 %vm1539_vm2, %v5486_v48  ;;  %9147 = vmatpush3.bf16.msra.mxu0 %v9144_v55 }
0x25ba   :  { %8760 = vmatmul.mubr.msk.f32.vlgmr.msra.gmra.mrb[32].mxu1 %vm1539_vm2, %v5487_v17 }
0x25bb   :  { %9119 = vmatpush3.bf16.msra.mxu1 %v13138_v34 }
0x25bc   :  { %9121 = vmatprep.subr.bf16.mxu1 %v9120_v53 }
0x25bf   :  { %9123 = vmatpush3.bf16.msra.mxu1 %v9120_v53 }
0x25c0   :  { %9125 = vmatprep.subr.bf16.mxu1 %v9124_v51 }
0x25c3   :  { %9127 = vmatpush3.bf16.msra.mxu1 %v9124_v51 }
0x25c4   :  { %9129 = vmatprep.subr.bf16.mxu1 %v9128_v52 }
0x25c7   :  { %9131 = vmatpush3.bf16.msra.mxu1 %v9128_v52 }
0x25c8   :  { %9149 = vmatprep.subr.bf16.mxu1 %v9148_v4 }
0x261c   :  { %v5580_v59 = vpop.permute.xlu0 %5579 }
0x261d   :  { %v5584_v34 = vsel %vm1448_vm0, %v13151_v14, %v5580_v59 }
0x2626   :  { %v5578_v24 = vpop.permute.xlu1 %5577 }
0x2627   :  { %v5583_v36 = vsel %vm1448_vm0, %v13159_v60, %v5578_v24 }
0x2628   :  { %8778 = vmatprep.mubr.msk.f32.mxu1 %vm1457_vm1, %v5583_v36 }
0x2629   :  { %8779 = vmatmul.mubr.msk.f32.vlgmr.msra.gmra.mrb[34].mxu1 %vm1457_vm1, %v5584_v34 }
0x262a   :  { %9151 = vmatpush3.bf16.msra.mxu1 %v9148_v4 }
0x268d   :  { %v8761_v0 = vpop.f32.mrb[32].mxu1 }
0x268e   :  { %v5566_v61 = vpop.f32.mrb[33].mxu1  ;;  %v5572_v47 = vadd.f32 %v8761_v0, %v8166_v32 }
0x268f   :  { %v5567_v45 = vadd.f32 %v8166_v32, %v5566_v61 }
0x2691   :  { %8804 = vmatprep.mubr.msk.f32.mxu1 %vm1539_vm2, %v5567_v45 }
0x2692   :  { %8805 = vmatmul.mubr.msk.f32.vlgmr.msra.gmra.mrb[36].mxu1 %vm1539_vm2, %v5572_v47 }
0x26fc   :  { %v8780_v42 = vpop.f32.mrb[34].mxu1 }
0x26fd   :  { %v13174_v58 = vadd.f32 %v8780_v42, %v8169_v37  ;;  %v5663_v43 = vpop.f32.mrb[35].mxu1 }
0x26fe   :  { %v13176_v31 = vadd.f32 %v8169_v37, %v5663_v43 }
0x26ff   :  { %6168 = vrot.lane.b32.xlu0 %v13174_v58, %s11568_s23 }
0x2700   :  { %6166 = vrot.lane.b32.xlu1 %v13176_v31, %s11568_s23 }
0x2703   :  { %6268 = vrot.lane.b32.xlu0 %v13174_v58, %s11575_s4 }
0x2704   :  { %6266 = vrot.lane.b32.xlu1 %v13176_v31, %s11575_s4 }
0x2707   :  { %5674 = vrot.lane.b32.xlu0 %v13151_v14, %s11558_s5 }
0x2708   :  { %5672 = vrot.lane.b32.xlu1 %v13159_v60, %s11558_s5 }
0x2765   :  { %v8806_v48 = vpop.f32.mrb[36].mxu1 }
0x2766   :  { %v5861_v17 = vpop.f32.mrb[37].mxu1  ;;  %v5867_v43 = vadd.f32 %v8806_v48, %v8174_v3  ;;  %v8186_v48 = vld [vmem:[#allocation62] ss:$0 sm:$0xff] }
0x2767   :  { %v5862_v6 = vadd.f32 %v8174_v3, %v5861_v17 }
0x2771   :  { %v6169_v53 = vpop.permute.xlu0 %6168 }
0x2772   :  { %v6167_v20 = vpop.permute.xlu1 %6166  ;;  %v6175_v62 = vsel %vm3230_vm7, %v6169_v53, 0.0  ;;  %v8177_v53 = vmul.f32 -1.442695, %v5862_v6 }
0x2773   :  { %6176 = vadd.xlane.f32.xlu0 %v6175_v62  ;;  %v6172_v51 = vsel %vm3230_vm7, %v6167_v20, 0.0 }
0x2774   :  { %6173 = vadd.xlane.f32.xlu1 %v6172_v51  ;;  %9557 = vpow2.f32 %v8177_v53 }
0x2775   :  { %v6269_v2 = vpop.permute.xlu0 %6268 }
0x2776   :  { %v6267_v1 = vpop.permute.xlu1 %6266  ;;  %v6275_v52 = vsel %vm3230_vm7, %v6269_v2, 0.0 }
0x2777   :  { %v6272_v49 = vsel %vm3230_vm7, %v6267_v1, 0.0  ;;  %v8178_v1 = vmul.f32 -1.442695, %v5867_v43 }
0x2778   :  { %6276 = vadd.xlane.f32.xlu1 %v6275_v52  ;;  %6273 = vadd.xlane.f32.xlu0 %v6272_v49 }
0x2779   :  { %v5675_v10 = vpop.permute.xlu0 %5674  ;;  %9559 = vpow2.f32 %v8178_v1 }
0x277a   :  { %v5673_v4 = vpop.permute.xlu1 %5672  ;;  %v5679_v24 = vsel %vm1448_vm0, %v5675_v10, %v13151_v14 }
0x277b   :  { %v5678_v59 = vsel %vm1448_vm0, %v5673_v4, %v13159_v60 }
0x277c   :  { %8797 = vmatprep.mubr.msk.f32.mxu0 %vm1457_vm1, %v5678_v59  ;;  %v8187_v59 = vld [vmem:[#allocation61] ss:$0 sm:$0xff] }
0x277d   :  { %8798 = vmatmul.mubr.msk.f32.vlgmr.msra.gmra.mrb[34].mxu0 %vm1457_vm1, %v5679_v24  ;;  %v1331_v24 = vld [vmem:[#allocation59] sm:$0x3] }
0x277e   :  { %v9558_v17 = vpop.eup %9557 }
0x277f   :  { %v5876_v49 = vadd.f32 1.0, %v9558_v17 }
0x2781   :  { %9561 = vrcp.f32 %v5876_v49 }
0x2783   :  { %v9560_v10 = vpop.eup %9559 }
0x2784   :  { %v5877_v4 = vadd.f32 1.0, %v9560_v10 }
0x2786   :  { %9563 = vrcp.f32 %v5877_v4 }
0x2800   :  { %v6177_v36 = vpop.xlane.xlu0 %6176 }
0x2801   :  { %v6179_v34 = vmul.f32 0.25, %v6177_v36  ;;  %v6174_v32 = vpop.xlane.xlu1 %6173  ;;  %v6245_v36 = vrot.slane %v1331_v24, %v3304_v5 }
0x2802   :  { %v6178_v0 = vmul.f32 0.25, %v6174_v32  ;;  %v9562_v32 = vpop.eup %9561 }
0x2803   :  { %v13201_v61 = vsub.f32 %v13174_v58, %v6179_v34  ;;  %v6335_v34 = vrot.slane %v1331_v24, %v3394_v26 }
0x2804   :  { %v13204_v45 = vsub.f32 %v13176_v31, %v6178_v0  ;;  %v13242_v0 = vmul.f32 %v9562_v32, %v5862_v6 }
0x2805   :  { %v6183_v60 = vmul.f32 %v13201_v61, %v13201_v61  ;;  %v6274_v47 = vpop.xlane.xlu0 %6273  ;;  %v6277_v63 = vpop.xlane.xlu1 %6276 }
0x2806   :  { %v6182_v14 = vmul.f32 %v13204_v45, %v13204_v45  ;;  %v6278_v54 = vmul.f32 0.25, %v6274_v47  ;;  %v6279_v35 = vmul.f32 0.25, %v6277_v63 }
0x2807   :  { %6188 = vrot.lane.b32.xlu1 %v6183_v60, %s11568_s23  ;;  %v9564_v60 = vpop.eup %9563 }
0x2808   :  { %v13212_v8 = vsub.f32 %v13176_v31, %v6278_v54  ;;  %v13215_v9 = vsub.f32 %v13174_v58, %v6279_v35  ;;  %6186 = vrot.lane.b32.xlu0 %v6182_v14, %s11568_s23  ;;  %v13248_v5 = vmul.f32 %v9564_v60, %v5867_v43 }
0x280a   :  { %v6282_v57 = vmul.f32 %v13212_v8, %v13212_v8  ;;  %v6283_v56 = vmul.f32 %v13215_v9, %v13215_v9 }
0x280c   :  { %6286 = vrot.lane.b32.xlu1 %v6282_v57, %s11575_s4  ;;  %6288 = vrot.lane.b32.xlu0 %v6283_v56, %s11575_s4 }
0x2850   :  { %v13224_v41 = vpop.f32.mrb[34].mxu0 }
0x2851   :  { %v13226_v13 = vpop.f32.mrb[35].mxu0 }
0x2879   :  { %v6189_v37 = vpop.permute.xlu1 %6188 }
0x287a   :  { %v6195_v55 = vsel %vm3230_vm7, %v6189_v37, 0.0  ;;  %v6187_v42 = vpop.permute.xlu0 %6186 }
0x287b   :  { %6196 = vadd.xlane.f32.xlu0 %v6195_v55  ;;  %v6192_v52 = vsel %vm3230_vm7, %v6187_v42, 0.0 }
0x287e   :  { %v6289_v20 = vpop.permute.xlu0 %6288  ;;  %v6287_v62 = vpop.permute.xlu1 %6286 }
0x287f   :  { %v6295_v51 = vsel %vm3230_vm7, %v6289_v20, 0.0  ;;  %v6292_v2 = vsel %vm3230_vm7, %v6287_v62, 0.0 }
0x2880   :  { %6296 = vadd.xlane.f32.xlu1 %v6295_v51  ;;  %6293 = vadd.xlane.f32.xlu0 %v6292_v2 }
0x2884   :  { %6193 = vadd.xlane.f32.xlu1 %v6192_v52 }
0x2895   :  { %6306 = vrot.lane.b32.xlu1 %v8186_v48, %s11576_s9 }
0x2896   :  { %6211 = vrot.lane.b32.xlu0 %v8186_v48, %s11558_s5 }
0x2899   :  { %6221 = vrot.lane.b32.xlu1 %v8187_v59, %s11558_s5 }
0x289a   :  { %6311 = vrot.lane.b32.xlu0 %v8187_v59, %s11576_s9 }
0x289d   :  { %6247 = vrot.lane.b32.xlu1 %v6245_v36, %s11558_s5 }
0x289e   :  { %6337 = vrot.lane.b32.xlu0 %v6335_v34, %s11576_s9 }
0x28a1   :  { %5886 = vrot.lane.b32.xlu1 %v13242_v0, %s11565_s12 }
0x28a2   :  { %5763 = vrot.lane.b32.xlu0 %v13176_v31, %s11565_s12 }
0x28a5   :  { %5888 = vrot.lane.b32.xlu1 %v13248_v5, %s11565_s12 }
0x28a6   :  { %5892 = vrot.lane.b32.xlu0 %v13242_v0, %s11558_s5 }
0x28a9   :  { %5765 = vrot.lane.b32.xlu1 %v13174_v58, %s11565_s12 }
0x28aa   :  { %5771 = vrot.lane.b32.xlu0 %v13226_v13, %s11577_s26 }
0x28ad   :  { %5894 = vrot.lane.b32.xlu1 %v13248_v5, %s11558_s5 }
0x28ae   :  { %5898 = vrot.lane.b32.xlu0 %v13242_v0, %s11577_s26 }
0x28b1   :  { %5773 = vrot.lane.b32.xlu1 %v13224_v41, %s11577_s26 }
0x28b2   :  { %5900 = vrot.lane.b32.xlu0 %v13248_v5, %s11577_s26 }
0x2908   :  { %v6197_v44 = vpop.xlane.xlu0 %6196 }
0x2909   :  { %v6199_v26 = vmul.f32 0.25, %v6197_v44 }
0x290b   :  { %v6201_v47 = vadd.f32 1e-05, %v6199_v26 }
0x290d   :  { %9565 = vrsqrt.f32 %v6201_v47  ;;  %v6294_v63 = vpop.xlane.xlu0 %6293  ;;  %v6297_v14 = vpop.xlane.xlu1 %6296 }
0x290e   :  { %v6298_v54 = vmul.f32 0.25, %v6294_v63  ;;  %v6299_v35 = vmul.f32 0.25, %v6297_v14 }
0x2910   :  { %v6300_v57 = vadd.f32 1e-05, %v6298_v54  ;;  %v6301_v56 = vadd.f32 1e-05, %v6299_v35 }
0x2911   :  { %v6212_v3 = vpop.permute.xlu0 %6211  ;;  %v6194_v6 = vpop.xlane.xlu1 %6193 }
0x2912   :  { %9567 = vrsqrt.f32 %v6300_v57  ;;  %v6198_v37 = vmul.f32 0.25, %v6194_v6 }
0x2913   :  { %9569 = vrsqrt.f32 %v6301_v56 }
0x2914   :  { %v6200_v55 = vadd.f32 1e-05, %v6198_v37 }
0x2915   :  { %v6312_v42 = vpop.permute.xlu0 %6311  ;;  %v6307_v43 = vpop.permute.xlu1 %6306 }
0x2916   :  { %9571 = vrsqrt.f32 %v6200_v55 }
0x2917   :  { %v9566_v53 = vpop.eup %9565 }
0x2918   :  { %v6205_v20 = vmul.f32 %v9566_v53, %v13201_v61 }
0x2919   :  { %v13267_v62 = vpop.permute.xlu0 %6337  ;;  %v6222_v51 = vpop.permute.xlu1 %6221 }
0x291a   :  { %v6215_v2 = vmul.f32 %v6212_v3, %v6205_v20 }
0x291c   :  { %v9568_v1 = vpop.eup %9567  ;;  %v6225_v52 = vadd.f32 %v6222_v51, %v6215_v2 }
0x291d   :  { %v9570_v17 = vpop.eup %9569  ;;  %v6304_v49 = vmul.f32 %v9568_v1, %v13212_v8  ;;  %v5764_v10 = vpop.permute.xlu0 %5763 }
0x291e   :  { %v13270_v4 = vpop.permute.xlu1 %6247  ;;  %v6305_v48 = vmul.f32 %v9570_v17, %v13215_v9  ;;  %v8189_v59 = vmul.f32 -1.442695, %v6225_v52 }
0x291f   :  { %v6309_v24 = vmul.f32 %v6307_v43, %v6304_v49  ;;  %v5778_v49 = vsel %vm1539_vm2, %v13174_v58, %v13224_v41 }
0x2920   :  { %v9572_v36 = vpop.eup %9571  ;;  %v6310_v34 = vmul.f32 %v6307_v43, %v6305_v48  ;;  %9573 = vpow2.f32 %v8189_v59 }
0x2921   :  { %v13273_v61 = vadd.f32 %v6312_v42, %v6309_v24  ;;  %v6204_v32 = vmul.f32 %v9572_v36, %v13204_v45  ;;  %v5893_v60 = vpop.permute.xlu0 %5892  ;;  %v5777_v45 = vsel %vm1539_vm2, %v13176_v31, %v13226_v13 }
0x2922   :  { %v5887_v44 = vpop.permute.xlu1 %5886  ;;  %v6315_v26 = vadd.f32 %v6312_v42, %v6310_v34  ;;  %v5779_v56 = vsel %vm1448_vm0, %v5777_v45, %v5764_v10 }
0x2923   :  { %v8190_v47 = vmul.f32 -1.442695, %v13273_v61  ;;  %v6214_v8 = vmul.f32 %v6212_v3, %v6204_v32  ;;  %v5904_v35 = vsel %vm1539_vm2, %v13242_v0, %v5887_v44 }
0x2924   :  { %v8191_v63 = vmul.f32 -1.442695, %v6315_v26  ;;  %v5906_v3 = vsel %vm1448_vm0, %v5904_v35, %v5893_v60 }
0x2925   :  { %9575 = vpow2.f32 %v8190_v47  ;;  %v6224_v14 = vadd.f32 %v6222_v51, %v6214_v8  ;;  %v5772_v54 = vpop.permute.xlu0 %5771 }
0x2926   :  { %v5889_v9 = vpop.permute.xlu1 %5888  ;;  %9577 = vpow2.f32 %v8191_v63  ;;  %v5781_v42 = vsel %vm1879_vm4, %v5779_v56, %v5772_v54 }
0x2927   :  { %v8188_v57 = vmul.f32 -1.442695, %v6224_v14  ;;  %v5905_v31 = vsel %vm1539_vm2, %v13248_v5, %v5889_v9 }
0x2929   :  { %9579 = vpow2.f32 %v8188_v57  ;;  %v5899_v6 = vpop.permute.xlu0 %5898 }
0x292a   :  { %v5766_v37 = vpop.permute.xlu1 %5765  ;;  %v9574_v55 = vpop.eup %9573  ;;  %v5908_v43 = vsel %vm1879_vm4, %v5906_v3, %v5899_v6 }
0x292b   :  { %v6233_v53 = vadd.f32 1.0, %v9574_v55  ;;  %v13286_v20 = vmul.f32 %v5908_v43, %v5781_v42  ;;  %v5780_v59 = vsel %vm1448_vm0, %v5778_v49, %v5766_v37 }
0x292d   :  { %9581 = vrcp.f32 %v6233_v53  ;;  %v8179_v13 = vmul.f32 -1.442695, %v13286_v20  ;;  %v5901_v2 = vpop.permute.xlu0 %5900 }
0x292e   :  { %v5895_v0 = vpop.permute.xlu1 %5894 }
0x292f   :  { %v9576_v51 = vpop.eup %9575  ;;  %v5907_v1 = vsel %vm1448_vm0, %v5905_v31, %v5895_v0  ;;  %9583 = vpow2.f32 %v8179_v13 }
0x2930   :  { %v9578_v17 = vpop.eup %9577  ;;  %v6322_v10 = vadd.f32 1.0, %v9576_v51  ;;  %v5909_v36 = vsel %vm1879_vm4, %v5907_v1, %v5901_v2 }
0x2931   :  { %v6323_v48 = vadd.f32 1.0, %v9578_v17 }
0x2932   :  { %v5774_v24 = vpop.permute.xlu1 %5773 }
0x2933   :  { %v5782_v5 = vsel %vm1879_vm4, %v5780_v59, %v5774_v24  ;;  %v9580_v34 = vpop.eup %9579  ;;  %9585 = vrcp.f32 %v6323_v48  ;;  %v1352_v59 = vld [vmem:[#allocation70] sm:$0xff]  ;;  %v1353_v24 = vld [vmem:[#allocation70 + $0x8] sm:$0xff] }
0x2934   :  { %v13298_v32 = vmul.f32 %v5909_v36, %v5782_v5  ;;  %9587 = vrcp.f32 %v6322_v10  ;;  %v6232_v60 = vadd.f32 1.0, %v9580_v34  ;;  %v9152_v34 = vpack.c.bf16 %v1353_v24, %v1352_v59 }
0x2936   :  { %v8180_v44 = vmul.f32 -1.442695, %v13298_v32  ;;  %9589 = vrcp.f32 %v6232_v60  ;;  %9153 = vmatprep.subr.bf16.mxu1 %v9152_v34 }
0x2937   :  { %v9582_v58 = vpop.eup %9581  ;;  %9155 = vmatpush3.bf16.msra.mxu1 %v9152_v34 }
0x2938   :  { %9591 = vpow2.f32 %v8180_v44  ;;  %v6239_v41 = vmul.f32 %v9582_v58, %v6225_v52 }
0x2939   :  { %v9584_v8 = vpop.eup %9583 }
0x293a   :  { %v6241_v47 = vmul.f32 1.6666666, %v6239_v41  ;;  %v5918_v57 = vadd.f32 1.0, %v9584_v8 }
0x293c   :  { %v6251_v63 = vmul.f32 %v13270_v4, %v6241_v47  ;;  %9593 = vrcp.f32 %v5918_v57 }
0x293d   :  { %v9586_v54 = vpop.eup %9585 }
0x293e   :  { %v9588_v9 = vpop.eup %9587  ;;  %v6329_v35 = vmul.f32 %v9586_v54, %v6315_v26  ;;  %6256 = vrot.lane.b32.xlu0 %v6251_v63, %s11568_s23 }
0x293f   :  { %v6328_v3 = vmul.f32 %v9588_v9, %v13273_v61 }
0x2940   :  { %v9590_v45 = vpop.eup %9589  ;;  %v6331_v56 = vmul.f32 1.6666666, %v6329_v35 }
0x2941   :  { %v6238_v37 = vmul.f32 %v9590_v45, %v6224_v14  ;;  %v6330_v43 = vmul.f32 1.6666666, %v6328_v3  ;;  %v1354_v45 = vld [vmem:[#allocation70 + $0x10] sm:$0xff]  ;;  %v1357_v3 = vld [vmem:[#allocation71 + $0x8] sm:$0xff] }
0x2942   :  { %v9592_v6 = vpop.eup %9591  ;;  %v6341_v55 = vmul.f32 %v13267_v62, %v6331_v56  ;;  %v1355_v56 = vld [vmem:[#allocation70 + $0x18] sm:$0xff] }
0x2943   :  { %v5919_v42 = vadd.f32 1.0, %v9592_v6  ;;  %v6240_v52 = vmul.f32 1.6666666, %v6238_v37  ;;  %v6340_v53 = vmul.f32 %v13267_v62, %v6330_v43  ;;  %v9156_v6 = vpack.c.bf16 %v1355_v56, %v1354_v45  ;;  %v1359_v43 = vld [vmem:[#allocation71 + $0x18] sm:$0xff] }
0x2944   :  { %6346 = vrot.lane.b32.xlu0 %v6341_v55, %s11575_s4 }
0x2945   :  { %9595 = vrcp.f32 %v5919_v42  ;;  %v6250_v26 = vmul.f32 %v13270_v4, %v6240_v52  ;;  %9157 = vmatprep.subr.bf16.mxu1 %v9156_v6 }
0x2946   :  { %v9594_v0 = vpop.eup %9593  ;;  %9159 = vmatpush3.bf16.msra.mxu1 %v9156_v6 }
0x2947   :  { %6254 = vrot.lane.b32.xlu1 %v6250_v26, %s11568_s23  ;;  %v5924_v9 = vmul.f32 %v9594_v0, %v13286_v20  ;;  %9168 = vmatprep.subr.bf16.mxu1 %v11562_v21 }
0x294b   :  { %6344 = vrot.lane.b32.xlu1 %v6340_v53, %s11575_s4 }
0x294f   :  { %v9596_v61 = vpop.eup %9595  ;;  %5928 = vrot.lane.b32.xlu1 %v9594_v0, %s11565_s12 }
0x2950   :  { %5930 = vrot.lane.b32.xlu0 %v9596_v61, %s11565_s12  ;;  %v5925_v44 = vmul.f32 %v9596_v61, %v13298_v32 }
0x2953   :  { %5936 = vrot.lane.b32.xlu1 %v9594_v0, %s11558_s5 }
0x2954   :  { %5938 = vrot.lane.b32.xlu0 %v9596_v61, %s11558_s5 }
0x2957   :  { %5944 = vrot.lane.b32.xlu1 %v9594_v0, %s11577_s26 }
0x2958   :  { %5946 = vrot.lane.b32.xlu0 %v9596_v61, %s11577_s26 }
0x29b0   :  { %v6257_v4 = vpop.permute.xlu0 %6256 }
0x29b1   :  { %v6263_v14 = vsel %vm3230_vm7, %v6257_v4, 0.0 }
0x29b2   :  { %6264 = vadd.xlane.f32.xlu0 %v6263_v14 }
0x29b6   :  { %v6347_v13 = vpop.permute.xlu0 %6346 }
0x29b7   :  { %v6353_v2 = vsel %vm3230_vm7, %v6347_v13, 0.0 }
0x29b9   :  { %v6255_v62 = vpop.permute.xlu1 %6254 }
0x29ba   :  { %v6260_v31 = vsel %vm3230_vm7, %v6255_v62, 0.0 }
0x29bb   :  { %6261 = vadd.xlane.f32.xlu1 %v6260_v31 }
0x29bd   :  { %v6345_v51 = vpop.permute.xlu1 %6344 }
0x29be   :  { %v6350_v1 = vsel %vm3230_vm7, %v6345_v51, 0.0 }
0x29bf   :  { %6354 = vadd.xlane.f32.xlu1 %v6353_v2  ;;  %6351 = vadd.xlane.f32.xlu0 %v6350_v1 }
0x29c1   :  { %v5929_v49 = vpop.permute.xlu1 %5928 }
0x29c2   :  { %v5931_v17 = vpop.permute.xlu0 %5930  ;;  %v5934_v8 = vmul.f32 %v5929_v49, %v13286_v20 }
0x29c3   :  { %v5935_v36 = vmul.f32 %v5931_v17, %v13298_v32 }
0x29c4   :  { %v5952_v37 = vsel %vm1539_vm2, %v5924_v9, %v5934_v8 }
0x29c5   :  { %v5937_v48 = vpop.permute.xlu1 %5936  ;;  %v5953_v47 = vsel %vm1539_vm2, %v5925_v44, %v5935_v36 }
0x29c6   :  { %v5939_v10 = vpop.permute.xlu0 %5938  ;;  %v5942_v54 = vmul.f32 %v5937_v48, %v13286_v20 }
0x29c7   :  { %v5943_v60 = vmul.f32 %v5939_v10, %v13298_v32 }
0x29c8   :  { %v5954_v42 = vsel %vm1448_vm0, %v5952_v37, %v5942_v54  ;;  %v9627_v37 = vld [vmem:[#allocation10] sm:$0xff] }
0x29c9   :  { %v5945_v41 = vpop.permute.xlu1 %5944  ;;  %v5955_v63 = vsel %vm1448_vm0, %v5953_v47, %v5943_v60 }
0x29ca   :  { %v5947_v5 = vpop.permute.xlu0 %5946  ;;  %v5950_v35 = vmul.f32 %v5945_v41, %v13286_v20  ;;  %v1358_v20 = vld [vmem:[#allocation71 + $0x10] sm:$0xff] }
0x29cb   :  { %v5951_v58 = vmul.f32 %v5947_v5, %v13298_v32  ;;  %v1356_v32 = vld [vmem:[#allocation71] sm:$0xff]  ;;  %v9164_v26 = vpack.c.bf16 %v1359_v43, %v1358_v20 }
0x29cc   :  { %v9160_v55 = vpack.c.bf16 %v1357_v3, %v1356_v32  ;;  %v5956_v52 = vsel %vm1879_vm4, %v5954_v42, %v5950_v35  ;;  %v13353_v3 = vld [vmem:[#allocation11] sm:$0xff] }
0x29cd   :  { %v5957_v57 = vsel %vm1879_vm4, %v5955_v63, %v5951_v58 }
0x29ce   :  { %9161 = vmatprep.subr.bf16.mxu0 %v9160_v55 }
0x29cf   :  { %9163 = vmatpush3.bf16.msra.mxu0 %v9160_v55 }
0x29d0   :  { %5962 = vrot.lane.b32.xlu1 %v5957_v57, %s11567_s22  ;;  %9165 = vmatprep.subr.bf16.mxu0 %v9164_v26 }
0x29d3   :  { %9167 = vmatpush3.bf16.msra.mxu0 %v9164_v26 }
0x29d4   :  { %6055 = vrot.lane.b32.xlu1 %v5956_v52, %s11566_s7  ;;  %9171 = vmatprep.subr.bf16.mxu0 %v11562_v21 }
0x29d5   :  { %5960 = vrot.lane.b32.xlu0 %v5956_v52, %s11567_s22 }
0x29d9   :  { %6057 = vrot.lane.b32.xlu0 %v5957_v57, %s11566_s7 }
0x2a3f   :  { %v6265_v53 = vpop.xlane.xlu0 %6264 }
0x2a48   :  { %v6262_v0 = vpop.xlane.xlu1 %6261 }
0x2a4c   :  { %v6352_v61 = vpop.xlane.xlu0 %6351  ;;  %v6355_v4 = vpop.xlane.xlu1 %6354 }
0x2a4d   :  { %v6356_v14 = vmax.f32 %v6262_v0, %v6352_v61  ;;  %v6357_v62 = vmax.f32 %v6265_v53, %v6355_v4 }
0x2a4f   :  { %v6358_v31 = vmax.f32 %v6356_v14, %v6357_v62 }
0x2a50   :  { %v5961_v13 = vpop.permute.xlu0 %5960  ;;  %v5963_v51 = vpop.permute.xlu1 %5962 }
0x2a51   :  { %v6359_v2 = vrot.slane %v6358_v31, 4  ;;  %v5966_v1 = vsel %vm1539_vm2, %v5956_v52, %v5961_v13  ;;  %v5967_v17 = vsel %vm1539_vm2, %v5957_v57, %v5963_v51 }
0x2a52   :  { %8815 = vmatprep.mubr.msk.f32.mxu1 %vm1448_vm0, %v5966_v1 }
0x2a53   :  { %v6360_v49 = vmax.f32 %v6358_v31, %v6359_v2  ;;  %8816 = vmatmul.mubr.msk.f32.vlgmr.msra.gmra.mrb[38].mxu1 %vm1448_vm0, %v5967_v17 }
0x2a54   :  { %v6058_v10 = vpop.permute.xlu0 %6057  ;;  %v6056_v48 = vpop.permute.xlu1 %6055  ;;  %8833 = vmatprep.mubr.msk.f32.mxu1 %vm11563_vm3, %v11564_v28 }
0x2a55   :  { %v6361_v59 = vrot.slane %v6360_v49, 2  ;;  %v6062_v24 = vsel %vm1539_vm2, %v6058_v10, %v5957_v57  ;;  %v6061_v36 = vsel %vm1539_vm2, %v6056_v48, %v5956_v52 }
0x2a56   :  { %8826 = vmatprep.mubr.msk.f32.mxu0 %vm1448_vm0, %v6061_v36 }
0x2a57   :  { %v6362_v5 = vmax.f32 %v6360_v49, %v6361_v59  ;;  %8827 = vmatmul.mubr.msk.f32.vlgmr.msra.gmra.mrb[36].mxu0 %vm1448_vm0, %v6062_v24 }
0x2a58   :  { %8845 = vmatprep.mubr.msk.f32.mxu0 %vm11563_vm3, %v11564_v28 }
0x2a59   :  { %v6363_v34 = vrot.slane %v6362_v5, 1 }
0x2a5b   :  { %v6364_v60 = vmax.f32 %v6362_v5, %v6363_v34  ;;  %v8181_v5 = vld [vmem:[#allocation68] ss:$0 sm:$0xff] }
0x2a5d   :  { %v6365_v44 = vsub.f32 %v6262_v0, %v6364_v60  ;;  %v6366_v58 = vsub.f32 %v6265_v53, %v6364_v60  ;;  %v6520_v41 = vsub.f32 %v6352_v61, %v6364_v60  ;;  %v6521_v47 = vsub.f32 %v6355_v4, %v6364_v60  ;;  %v9628_v61 = vld [vmem:[#allocation10 + $0x8] sm:$0xff] }
0x2a5f   :  { %v6367_v8 = vmul.f32 1.442695, %v6365_v44  ;;  %v6369_v63 = vmul.f32 1.442695, %v6366_v58  ;;  %v6522_v54 = vmul.f32 1.442695, %v6520_v41 }
0x2a60   :  { %v6524_v9 = vmul.f32 1.442695, %v6521_v47 }
0x2a61   :  { %9597 = vpow2.f32 %v6367_v8 }
0x2a62   :  { %9599 = vpow2.f32 %v6524_v9 }
0x2a63   :  { %9601 = vpow2.f32 %v6369_v63 }
0x2a64   :  { %9603 = vpow2.f32 %v6522_v54 }
0x2a6b   :  { %v9598_v35 = vpop.eup %9597 }
0x2a6c   :  { %v9600_v57 = vpop.eup %9599 }
0x2a6d   :  { %v9602_v45 = vpop.eup %9601 }
0x2a6e   :  { %v9604_v56 = vpop.eup %9603  ;;  %v9169_v32 = vpack.c.bf16 %v9602_v45, %v9598_v35 }
0x2a6f   :  { %v9172_v6 = vpack.c.bf16 %v9600_v57, %v9604_v56 }
0x2a70   :  { %9170 = vmatpush3.bf16.msra.mxu1 %v9169_v32 }
0x2a71   :  { %9173 = vmatpush3.bf16.msra.mxu0 %v9172_v6 }
0x2a72   :  { %9174 = vmatprep.subr.bf16.mxu0 %v11562_v21 }
0x2a73   :  { %8834 = vmatmul.mubr.msk.f32.vlgmr.msra.gmra.mrb[40].mxu1 %vm1539_vm2, %v13353_v3 }
0x2a74   :  { %8846 = vmatmul.mubr.msk.f32.vlgmr.msra.gmra.mrb[38].mxu0 %vm1539_vm2, %v13353_v3  ;;  %8838 = vmatprep.mubr.msk.f32.mxu1 %vm2012_vm5, %v9627_v37 }
0x2a75   :  { %8857 = vmatprep.mubr.msk.f32.mxu0 %vm11563_vm3, %v11564_v28 }
0x2b26   :  { %v8817_v55 = vpop.f32.mrb[38].mxu1 }
0x2b27   :  { %v6046_v42 = vpop.f32.mrb[39].mxu1  ;;  %v6052_v60 = vadd.f32 %v8817_v55, %v8181_v5 }
0x2b28   :  { %v6047_v44 = vadd.f32 %v8181_v5, %v6046_v42 }
0x2b2a   :  { %v8828_v52 = vpop.f32.mrb[36].mxu0 }
0x2b2b   :  { %v6135_v20 = vpop.f32.mrb[37].mxu0  ;;  %v6161_v9 = vsel %vm2012_vm5, %v6052_v60, %v8828_v52 }
0x2b46   :  { %v6437_v43 = vpop.f32.mrb[40].mxu1 }
0x2b47   :  { %v8835_v26 = vpop.f32.mrb[41].mxu1  ;;  %8836 = vmatprep.subr.mxu1 %v6437_v43  ;;  %v6592_v53 = vpop.f32.mrb[38].mxu0 }
0x2b48   :  { %8837 = vmatpush3.msra.mxu1 %v6437_v43  ;;  %v8847_v0 = vpop.f32.mrb[39].mxu0 }
0x2b49   :  { %8839 = vmatmul.mubr.msk.f32.vlgmr.msra.gmra.mrb[42].mxu1 %vm2012_vm5, %v9628_v61  ;;  %8848 = vmatprep.subr.mxu1 %v6592_v53 }
0x2b4a   :  { %8849 = vmatpush3.msra.mxu1 %v6592_v53  ;;  %8850 = vmatprep.mubr.msk.f32.mxu1 %vm2012_vm5, %v9627_v37 }
0x2b4b   :  { %8860 = vmatprep.subr.mxu1 %v11564_v28 }
0x2b4d   :  { %8851 = vmatmul.mubr.msk.f32.vlgmr.msra.gmra.mrb[44].mxu1 %vm2012_vm5, %v9628_v61 }
0x2b4e   :  { %8862 = vmatprep.mubr.msk.f32.mxu1 %vm11563_vm3, %v11564_v28 }
0x2c1c   :  { %v8840_v4 = vpop.f32.mrb[42].mxu1 }
0x2c1d   :  { %v6513_v14 = vadd.f32 1e-09, %v8840_v4  ;;  %v6507_v62 = vpop.f32.mrb[43].mxu1 }
0x2c1e   :  { %v6508_v31 = vadd.f32 1e-09, %v6507_v62 }
0x2c1f   :  { %9605 = vrcp.f32 %v6513_v14 }
0x2c20   :  { %9607 = vrcp.f32 %v6508_v31  ;;  %v8852_v13 = vpop.f32.mrb[44].mxu1 }
0x2c21   :  { %v6668_v51 = vadd.f32 1e-09, %v8852_v13  ;;  %v6662_v2 = vpop.f32.mrb[45].mxu1 }
0x2c22   :  { %v6663_v1 = vadd.f32 1e-09, %v6662_v2 }
0x2c23   :  { %9609 = vrcp.f32 %v6668_v51 }
0x2c24   :  { %9611 = vrcp.f32 %v6663_v1 }
0x2c29   :  { %v9606_v17 = vpop.eup %9605 }
0x2c2a   :  { %v9608_v49 = vpop.eup %9607  ;;  %v6519_v10 = vmul.f32 %v9606_v17, %v9602_v45 }
0x2c2b   :  { %v6517_v48 = vmul.f32 %v9608_v49, %v9598_v35  ;;  %v6160_v35 = vsel %vm2012_vm5, %v6047_v44, %v6135_v20 }
0x2c2c   :  { %6682 = vperm.xlu0 %9417, %v6519_v10  }
0x2c2d   :  { %v9610_v59 = vpop.eup %9609  ;;  %6677 = vperm.xlu1 %9418, %v6517_v48  }
0x2c2e   :  { %v9612_v24 = vpop.eup %9611  ;;  %v6674_v36 = vmul.f32 %v9610_v59, %v9600_v57 }
0x2c2f   :  { %v6672_v34 = vmul.f32 %v9612_v24, %v9604_v56 }
0x2c30   :  { %6694 = vperm.xlu0 %9417, %v6674_v36  }
0x2c31   :  { %6689 = vperm.xlu1 %9418, %v6672_v34  }
0x2c34   :  { %6148 = vrot.lane.b32.xlu0 %v6052_v60, %s11481_s10 }
0x2c35   :  { %6146 = vrot.lane.b32.xlu1 %v6047_v44, %s11481_s10 }
0x2c38   :  { %6156 = vrot.lane.b32.xlu0 %v8828_v52, %s11578_s13 }
0x2c39   :  { %6154 = vrot.lane.b32.xlu1 %v6135_v20, %s11578_s13 }
0x2cab   :  { %v6683_v58 = vpop.permute.xlu0 %6682 }
0x2cac   :  { %v6678_v41 = vpop.permute.xlu1 %6677 }
0x2caf   :  { %v6695_v47 = vpop.permute.xlu0 %6694 }
0x2cb0   :  { %v6690_v8 = vpop.permute.xlu1 %6689 }
0x2cb3   :  { %v6149_v63 = vpop.permute.xlu0 %6148 }
0x2cb4   :  { %v6147_v54 = vpop.permute.xlu1 %6146  ;;  %v6163_v57 = vsel %vm1539_vm2, %v6161_v9, %v6149_v63 }
0x2cb5   :  { %v6162_v56 = vsel %vm1539_vm2, %v6160_v35, %v6147_v54 }
0x2cb7   :  { %v6157_v45 = vpop.permute.xlu0 %6156 }
0x2cb8   :  { %v6165_v32 = vsel %vm3221_vm8, %v6163_v57, %v6157_v45  ;;  %v6155_v6 = vpop.permute.xlu1 %6154 }
0x2cb9   :  { %v6686_v37 = vmul.f32 %v6683_v58, %v6165_v32  ;;  %v6698_v55 = vmul.f32 %v6695_v47, %v6165_v32  ;;  %v6164_v42 = vsel %vm3221_vm8, %v6162_v56, %v6155_v6 }
0x2cba   :  { %v6685_v43 = vmul.f32 %v6678_v41, %v6164_v42  ;;  %v6697_v26 = vmul.f32 %v6690_v8, %v6164_v42 }
0x2cbb   :  { %v6700_v53 = vsel %vm3230_vm7, %v6686_v37, %v6698_v55 }
0x2cbc   :  { %v6702_v52 = vsel %vm2012_vm5, %v6700_v53, %v6686_v37  ;;  %v6699_v20 = vsel %vm3230_vm7, %v6685_v43, %v6697_v26 }
0x2cbd   :  { %v6704_v0 = vsel %vm3763_vm9, %v6702_v52, %v6698_v55  ;;  %v6701_v61 = vsel %vm2012_vm5, %v6699_v20, %v6685_v43 }
0x2cbe   :  { %v6706_v4 = vsel %vm1539_vm2, %v6704_v0, %v6686_v37  ;;  %v6703_v14 = vsel %vm3763_vm9, %v6701_v61, %v6697_v26 }
0x2cbf   :  { %v6708_v62 = vsel %vm3768_vm10, %v6706_v4, %v6698_v55  ;;  %v6705_v31 = vsel %vm1539_vm2, %v6703_v14, %v6685_v43 }
0x2cc0   :  { %v6710_v13 = vsel %vm3221_vm8, %v6708_v62, %v6686_v37  ;;  %v6707_v51 = vsel %vm3768_vm10, %v6705_v31, %v6697_v26 }
0x2cc1   :  { %v13390_v2 = vsel %vm3773_vm11, %v6710_v13, %v6698_v55  ;;  %v6709_v1 = vsel %vm3221_vm8, %v6707_v51, %v6685_v43 }
0x2cc2   :  { %v13394_v17 = vsel %vm3773_vm11, %v6709_v1, %v6697_v26  ;;  %v6742_v49 = vmul.f32 %v13390_v2, %v12412_v15  ;;  %v6768_v48 = vmul.f32 %v13390_v2, %v12414_v19  ;;  %v6754_v15 = vmul.f32 %v13390_v2, %v12515_v40  ;;  %v1365_v1 = vld [vmem:[#allocation79] sm:$0xff] }
0x2cc3   :  { %v6741_v10 = vmul.f32 %v13394_v17, %v12408_v11  ;;  %v6767_v59 = vmul.f32 %v13394_v17, %v12410_v12  ;;  %v6753_v11 = vmul.f32 %v13394_v17, %v12511_v38  ;;  %v6780_v19 = vmul.f32 %v13390_v2, %v12517_v46 }
0x2cc4   :  { %6747 = vrot.lane.b32.xlu0 %v6742_v49, %s11579_s30  ;;  %v6779_v12 = vmul.f32 %v13394_v17, %v12513_v39  ;;  %v6716_v40 = vmul.f32 %v13390_v2, %v12427_v30  ;;  %v6715_v38 = vmul.f32 %v13394_v17, %v12425_v29  ;;  %v6728_v46 = vmul.f32 %v13390_v2, %v12591_v33 }
0x2cc5   :  { %6745 = vrot.lane.b32.xlu1 %v6741_v10, %s11579_s30  ;;  %v6727_v39 = vmul.f32 %v13394_v17, %v12571_v23  ;;  %v6740_v29 = vmul.f32 %v13390_v2, %v12564_v16  ;;  %v6739_v34 = vmul.f32 %v13394_v17, %v12581_v27  ;;  %v6766_v23 = vmul.f32 %v13390_v2, %v12576_v25 }
0x2cc6   :  { %v6765_v47 = vmul.f32 %v13394_v17, %v12569_v22  ;;  %v6714_v6 = vmul.f32 %v13390_v2, %v12608_v18  ;;  %v6713_v22 = vmul.f32 %v13394_v17, %v12612_v50 }
0x2cc8   :  { %6773 = vrot.lane.b32.xlu0 %v6768_v48, %s11579_s30 }
0x2cc9   :  { %6771 = vrot.lane.b32.xlu1 %v6767_v59, %s11579_s30 }
0x2ccc   :  { %6759 = vrot.lane.b32.xlu0 %v6754_v15, %s11567_s22 }
0x2ccd   :  { %6757 = vrot.lane.b32.xlu1 %v6753_v11, %s11567_s22 }
0x2cd0   :  { %6785 = vrot.lane.b32.xlu0 %v6780_v19, %s11567_s22 }
0x2cd1   :  { %6783 = vrot.lane.b32.xlu1 %v6779_v12, %s11567_s22 }
0x2cd4   :  { %6721 = vrot.lane.b32.xlu0 %v6716_v40, %s11579_s30 }
0x2cd5   :  { %6719 = vrot.lane.b32.xlu1 %v6715_v38, %s11579_s30 }
0x2cd8   :  { %6733 = vrot.lane.b32.xlu0 %v6728_v46, %s11567_s22 }
0x2cd9   :  { %6731 = vrot.lane.b32.xlu1 %v6727_v39, %s11567_s22  ;;  %v8199_v39 = vld [vmem:[#allocation76] ss:$0 sm:$0xff] }
0x2d36   :  { %v6748_v24 = vpop.permute.xlu0 %6747 }
0x2d37   :  { %v6746_v36 = vpop.permute.xlu1 %6745  ;;  %v6752_v60 = vadd.f32 %v6748_v24, %v6740_v29 }
0x2d38   :  { %v6751_v44 = vadd.f32 %v6746_v36, %v6739_v34 }
0x2d3a   :  { %v6774_v30 = vpop.permute.xlu0 %6773 }
0x2d3b   :  { %v6772_v5 = vpop.permute.xlu1 %6771  ;;  %v6778_v63 = vadd.f32 %v6774_v30, %v6766_v23 }
0x2d3c   :  { %v6777_v54 = vadd.f32 %v6772_v5, %v6765_v47 }
0x2d3e   :  { %v6760_v33 = vpop.permute.xlu0 %6759 }
0x2d3f   :  { %v6764_v58 = vadd.f32 %v6760_v33, %v6752_v60  ;;  %v6758_v41 = vpop.permute.xlu1 %6757 }
0x2d40   :  { %v6763_v8 = vadd.f32 %v6758_v41, %v6751_v44 }
0x2d42   :  { %v9429_v9 = vpack.i.bf16 %v6764_v58, %v6763_v8  ;;  %v6786_v16 = vpop.permute.xlu0 %6785 }
0x2d43   :  { %v6790_v35 = vadd.f32 %v6786_v16, %v6778_v63  ;;  %v6784_v57 = vpop.permute.xlu1 %6783 }
0x2d44   :  { %v6789_v45 = vadd.f32 %v6784_v57, %v6777_v54  ;;  %9430 = vrot.lane.b32.xlu1 %v9429_v9, %s11481_s10  ;;  %v1381_v54 = vld [vmem:[#allocation91] sm:$0xff]  ;;  %v1382_v9 = vld [vmem:[#allocation91 + $0x8] sm:$0xff]  ;;  %v1384_v57 = vld [vmem:[#allocation92 + $0x8] sm:$0xff]  ;;  %s11581_s10 = smov [#allocation118]  }
0x2d45   :  { %v9178_v16 = vpack.c.bf16 %v1382_v9, %v1381_v54  ;;  %s7951_s0 = sshll.u32 %s11581_s10, 4  ;;  %s7952_s0 = int_to_ptr.vmem [resolvable:$true] %s7951_s0 }
0x2d46   :  { %v9434_v27 = vpack.i.bf16 %v6790_v35, %v6789_v45  ;;  %v6722_v25 = vpop.permute.xlu0 %6721  ;;  %v1383_v35 = vld [vmem:[#allocation92] sm:$0xff]  ;;  %s11301_s24 = scalar_lea.vmem %s7952_s0, 128  ;;  %p11306_p7 = scmp.lt.s32.totalorder %s7952_s0, %s7952_s0 }
0x2d47   :  { %v6720_v56 = vpop.permute.xlu1 %6719  ;;  %v6726_v55 = vadd.f32 %v6722_v25, %v6714_v6  ;;  %v9181_v45 = vpack.c.bf16 %v1384_v57, %v1383_v35  ;;  %p11302_p6 = scmp.ne.s32.totalorder %s7952_s0, %s11301_s24  ;;  %p11307_p8 = scmp.lt.s32.totalorder %s11301_s24, %s11301_s24 }
0x2d48   :  { %9435 = vrot.lane.b32.xlu0 %v9434_v27, %s11565_s12  ;;  %v6725_v42 = vadd.f32 %v6720_v56, %v6713_v22 }
0x2d49   :  { %p11308_p9 = por %p11307_p8, %p11306_p7 }
0x2d4a   :  { %v6734_v37 = vpop.permute.xlu0 %6733 }
0x2d4b   :  { %v6732_v32 = vpop.permute.xlu1 %6731  ;;  %v6738_v26 = vadd.f32 %v6734_v37, %v6726_v55  ;;  %p11309_p10 = pnand %p11308_p9, %p11302_p6 }
0x2d4c   :  { %v6737_v53 = vadd.f32 %v6732_v32, %v6725_v42 }
0x2d4d   :  { %v6808_v61 = vsel %vm2012_vm5, %v13390_v2, %v6738_v26  ;;  %v1364_v2 = vld [vmem:[#allocation77] sm:$0xff] }
0x2d4e   :  { %v6807_v4 = vsel %vm2012_vm5, %v13394_v17, %v6737_v53  ;;  %8861 = vmatpush3.msra.mxu1 %v1364_v2 }
0x2d4f   :  { %8870 = vmatprep.subr.mxu1 %v11564_v28 }
0x2db6   :  { %v9431_v43 = vpop.permute.xlu1 %9430 }
0x2db7   :  { %v9433_v52 = vunpack.i.h.bf16 %v9431_v43  ;;  %v9432_v20 = vunpack.i.l.bf16 %v9431_v43 }
0x2db9   :  { %v6810_v62 = vsel %vm1539_vm2, %v6808_v61, %v9433_v52  ;;  %v6809_v50 = vsel %vm1539_vm2, %v6807_v4, %v9432_v20 }
0x2dba   :  { %v9436_v0 = vpop.permute.xlu0 %9435 }
0x2dbb   :  { %v9438_v14 = vunpack.i.h.bf16 %v9436_v0  ;;  %v9437_v18 = vunpack.i.l.bf16 %v9436_v0 }
0x2dbd   :  { %v6811_v31 = vsel %vm3221_vm8, %v6809_v50, %v9437_v18  ;;  %v6812_v13 = vsel %vm3221_vm8, %v6810_v62, %v9438_v14  ;;  %v8204_v14 = vld [vmem:[#allocation100] ss:$0 sm:$0xff] }
0x2dbe   :  { %v9175_v51 = vpack.c.bf16 %v6812_v13, %v6811_v31 }
0x2dc0   :  { %9176 = vmatpush3.bf16.msra.mxu0 %v9175_v51 }
0x2dc1   :  { %8865 = vmatprep.subr.mxu0 %v11564_v28 }
0x2dc3   :  { %8858 = vmatmul.mubr.msk.f32.vlgmr.msra.gmra.mrb[40].mxu0 %vm1539_vm2, %v13353_v3 }
0x2dc4   :  { %8867 = vmatprep.mubr.msk.f32.mxu0 %vm11563_vm3, %v11564_v28  ;;  %8866 = vmatpush3.msra.mxu0 %v1365_v1 }
0x2dc5   :  { %8875 = vmatprep.subr.mxu0 %v11564_v28 }
0x2e96   :  { %v6879_v17 = vpop.f32.mrb[40].mxu0 }
0x2e97   :  { %6962 = vrot.lane.b32.xlu1 %v6879_v17, %s11579_s30  ;;  %7036 = vrot.lane.b32.xlu0 %v6879_v17, %s11567_s22  ;;  %v8859_v49 = vpop.f32.mrb[41].mxu0 }
0x2e98   :  { %8863 = vmatmul.mubr.msk.f32.vlgmr.msra.gmra.mrb[46].mxu1 %vm2012_vm5, %v6879_v17 }
0x2e99   :  { %8871 = vmatpush3.msra.mxu1 %v1365_v1  ;;  %8872 = vmatprep.mubr.msk.f32.mxu1 %vm11563_vm3, %v11564_v28 }
0x2e9a   :  { %9177 = vmatprep.subr.bf16.mxu1 %v11562_v21 }
0x2e9b   :  { %7110 = vrot.lane.b32.xlu1 %v6879_v17, %s11580_s14 }
0x2f09   :  { %v6963_v3 = vpop.permute.xlu1 %6962  ;;  %v7037_v10 = vpop.permute.xlu0 %7036 }
0x2f0a   :  { %8868 = vmatmul.mubr.msk.f32.vlgmr.msra.gmra.mrb[42].mxu0 %vm2012_vm5, %v6963_v3  ;;  %8873 = vmatmul.mubr.msk.f32.vlgmr.msra.gmra.mrb[48].mxu1 %vm2012_vm5, %v7037_v10 }
0x2f0b   :  { %8876 = vmatpush3.msra.mxu0 %v1365_v1  ;;  %8877 = vmatprep.mubr.msk.f32.mxu0 %vm11563_vm3, %v11564_v28 }
0x2f0c   :  { %8884 = vmatprep.mubr.msk.f32.mxu1 %vm11563_vm3, %v11564_v28  ;;  %9180 = vmatprep.subr.bf16.mxu0 %v11562_v21 }
0x2f0d   :  { %v7111_v48 = vpop.permute.xlu1 %7110  ;;  %9179 = vmatpush3.bf16.msra.mxu1 %v9178_v16 }
0x2f0e   :  { %8878 = vmatmul.mubr.msk.f32.vlgmr.msra.gmra.mrb[44].mxu0 %vm2012_vm5, %v7111_v48  ;;  %9183 = vmatprep.subr.bf16.mxu1 %v11562_v21 }
0x2f0f   :  { %8891 = vmatprep.mubr.msk.f32.mxu0 %vm11563_vm3, %v11564_v28  ;;  %9182 = vmatpush3.bf16.msra.mxu0 %v9181_v45 }
0x2f10   :  { %9186 = vmatprep.subr.bf16.mxu0 %v11562_v21 }
0x2f6b   :  { %v6958_v59 = vpop.f32.mrb[46].mxu1 }
0x2f6c   :  { %v8864_v15 = vpop.f32.mrb[47].mxu1  ;;  %v6959_v24 = vadd.f32 %v8199_v39, %v6958_v59  ;;  %v8205_v59 = vld [vmem:[#allocation89] ss:$0 sm:$0xff] }
0x2fdd   :  { %v7032_v11 = vpop.f32.mrb[42].mxu0  ;;  %v7106_v19 = vpop.f32.mrb[48].mxu1 }
0x2fde   :  { %7185 = vrot.lane.b32.xlu0 %v7032_v11, %s11565_s12  ;;  %7189 = vrot.lane.b32.xlu1 %v7106_v19, %s11558_s5  ;;  %v8869_v12 = vpop.f32.mrb[43].mxu0  ;;  %v8874_v40 = vpop.f32.mrb[49].mxu1 }
0x2fe1   :  { %v7180_v38 = vpop.f32.mrb[44].mxu0 }
0x2fe2   :  { %7193 = vrot.lane.b32.xlu0 %v7180_v38, %s11577_s26  ;;  %v8879_v46 = vpop.f32.mrb[45].mxu0 }
0x3050   :  { %v7186_v36 = vpop.permute.xlu0 %7185  ;;  %v7190_v29 = vpop.permute.xlu1 %7189 }
0x3051   :  { %v7196_v30 = vsel %vm1539_vm2, %v6959_v24, %v7186_v36 }
0x3052   :  { %v7197_v5 = vsel %vm1448_vm0, %v7196_v30, %v7190_v29  ;;  %v1386_v30 = vld [vmem:[#allocation95] sm:$0xff]  ;;  %v1387_v29 = vld [vmem:[#allocation95 + $0x8] sm:$0xff] }
0x3054   :  { %v7194_v34 = vpop.permute.xlu0 %7193 }
0x3055   :  { %v7198_v60 = vsel %vm1879_vm4, %v7197_v5, %v7194_v34  ;;  %v9190_v5 = vpack.c.bf16 %v1387_v29, %v1386_v30  ;;  %v1388_v34 = vld [vmem:[#allocation95 + $0x10] sm:$0xff] }
0x3056   :  { %v13485_v44 = vadd.f32 %v7198_v60, %v13029_v7  ;;  %v1389_v60 = vld [vmem:[#allocation95 + $0x18] sm:$0xff] }
0x3058   :  { %v7200_v33 = vmul.f32 %v13485_v44, %v13485_v44 }
0x305a   :  { %7216 = vrot.lane.b32.xlu0 %v7200_v33, %s11568_s23  ;;  %7207 = vrot.lane.b32.xlu1 %v7200_v33, %s11567_s22  ;;  %v7201_v23 = vsel %vm1539_vm2, %v7200_v33, 0.0 }
0x305e   :  { %7225 = vrot.lane.b32.xlu1 %v7200_v33, %s11566_s7  ;;  %v9193_v33 = vpack.c.bf16 %v1389_v60, %v1388_v34  ;;  %v8216_v60 = vld [vmem:[#allocation116] ss:$0 sm:$0xff] }
0x3079   :  { %7202 = vadd.xlane.f32.xlu0 %v7201_v23  ;;  %v1390_v23 = vld [vmem:[#allocation97] sm:$0xff] }
0x30cc   :  { %v7217_v58 = vpop.permute.xlu0 %7216  ;;  %v7208_v41 = vpop.permute.xlu1 %7207 }
0x30cd   :  { %v7219_v47 = vsel %vm1539_vm2, %v7217_v58, 0.0  ;;  %v7210_v8 = vsel %vm1539_vm2, %v7208_v41, 0.0  ;;  %v1391_v58 = vld [vmem:[#allocation97 + $0x8] sm:$0xff]  ;;  %v1392_v41 = vld [vmem:[#allocation97 + $0x10] sm:$0xff] }
0x30ce   :  { %7211 = vadd.xlane.f32.xlu1 %v7210_v8  ;;  %7220 = vadd.xlane.f32.xlu0 %v7219_v47  ;;  %v9196_v8 = vpack.c.bf16 %v1391_v58, %v1390_v23 }
0x30d0   :  { %v7226_v7 = vpop.permute.xlu1 %7225 }
0x30d1   :  { %v7228_v63 = vsel %vm1539_vm2, %v7226_v7, 0.0  ;;  %v1393_v7 = vld [vmem:[#allocation97 + $0x18] sm:$0xff] }
0x30d2   :  { %7229 = vadd.xlane.f32.xlu0 %v7228_v63  ;;  %v9199_v63 = vpack.c.bf16 %v1393_v7, %v1392_v41 }
0x3106   :  { %v7203_v27 = vpop.xlane.xlu0 %7202 }
0x3107   :  { %v7204_v56 = vmul.f32 0.0625, %v7203_v27 }
0x3109   :  { %v7205_v37 = vmul.f32 0.5, %v7204_v56 }
0x315b   :  { %v7212_v25 = vpop.xlane.xlu1 %7211  ;;  %v7221_v32 = vpop.xlane.xlu0 %7220 }
0x315c   :  { %v7213_v6 = vmul.f32 0.0625, %v7212_v25  ;;  %v7222_v22 = vmul.f32 0.0625, %v7221_v32 }
0x315e   :  { %v7214_v55 = vmul.f32 0.16666667, %v7213_v6  ;;  %v7223_v26 = vmul.f32 0.16666667, %v7222_v22 }
0x315f   :  { %v7230_v42 = vpop.xlane.xlu0 %7229 }
0x3160   :  { %v7215_v43 = vadd.f32 %v7214_v55, %v7205_v37  ;;  %v7231_v53 = vmul.f32 0.0625, %v7230_v42 }
0x3162   :  { %v7224_v52 = vadd.f32 %v7223_v26, %v7215_v43  ;;  %v7232_v20 = vmul.f32 0.16666667, %v7231_v53 }
0x3164   :  { %v7233_v0 = vadd.f32 %v7232_v20, %v7224_v52 }
0x3166   :  { %v7234_v61 = vadd.f32 1e-12, %v7233_v0  ;;  %v8211_v0 = vld [vmem:[#allocation94] ss:$0 sm:$0xff] }
0x3168   :  { %9613 = vrsqrt.f32 %v7234_v61 }
0x3172   :  { %v9614_v4 = vpop.eup %9613 }
0x3173   :  { %v7236_v18 = vmul.f32 %v9614_v4, %v13485_v44 }
0x3175   :  { %v7243_v62 = vmul.f32 %v8204_v14, %v7236_v18 }
0x3177   :  { %7397 = vrot.lane.b32.xlu0 %v7243_v62, %s11568_s23  ;;  %7323 = vrot.lane.b32.xlu1 %v7243_v62, %s11567_s22 }
0x3178   :  { %8885 = vmatmul.mubr.msk.f32.vlgmr.msra.gmra.mrb[50].mxu1 %vm1539_vm2, %v7243_v62 }
0x3179   :  { %9185 = vmatpush3.bf16.msra.mxu1 %v9181_v45  ;;  %8898 = vmatprep.mubr.msk.f32.mxu1 %vm11563_vm3, %v11564_v28 }
0x317a   :  { %9189 = vmatprep.subr.bf16.mxu1 %v11562_v21 }
0x317b   :  { %7471 = vrot.lane.b32.xlu1 %v7243_v62, %s11566_s7 }
0x31e9   :  { %v7398_v50 = vpop.permute.xlu0 %7397  ;;  %v7324_v31 = vpop.permute.xlu1 %7323 }
0x31ea   :  { %8892 = vmatmul.mubr.msk.f32.vlgmr.msra.gmra.mrb[46].mxu0 %vm1539_vm2, %v7324_v31  ;;  %8899 = vmatmul.mubr.msk.f32.vlgmr.msra.gmra.mrb[52].mxu1 %vm1539_vm2, %v7398_v50 }
0x31eb   :  { %9188 = vmatpush3.bf16.msra.mxu0 %v9181_v45  ;;  %8905 = vmatprep.mubr.msk.f32.mxu0 %vm11563_vm3, %v11564_v28 }
0x31ec   :  { %8916 = vmatprep.mubr.msk.f32.mxu1 %vm11563_vm3, %v11564_v28  ;;  %9195 = vmatprep.subr.bf16.mxu0 %v11562_v21 }
0x31ed   :  { %v7472_v13 = vpop.permute.xlu1 %7471  ;;  %9191 = vmatpush3.bf16.msra.mxu1 %v9190_v5 }
0x31ee   :  { %8906 = vmatmul.mubr.msk.f32.vlgmr.msra.gmra.mrb[48].mxu0 %vm1539_vm2, %v7472_v13  ;;  %9192 = vmatprep.subr.bf16.mxu1 %v11562_v21 }
0x31ef   :  { %8927 = vmatprep.mubr.msk.f32.mxu0 %vm11563_vm3, %v11564_v28  ;;  %9197 = vmatpush3.bf16.msra.mxu0 %v9196_v8 }
0x31f0   :  { %9198 = vmatprep.subr.bf16.mxu0 %v11562_v21 }
0x31f1   :  { %9194 = vmatpush3.bf16.msra.mxu1 %v9193_v33 }
0x31f2   :  { %9201 = vmatprep.subr.bf16.mxu1 %v11562_v21 }
0x31f3   :  { %9200 = vmatpush3.bf16.msra.mxu0 %v9199_v63 }
0x31f4   :  { %9207 = vmatprep.subr.bf16.mxu0 %v11562_v21 }
0x324b   :  { %v7319_v51 = vpop.f32.mrb[50].mxu1 }
0x324c   :  { %v8886_v2 = vpop.f32.mrb[51].mxu1  ;;  %v7320_v15 = vadd.f32 %v8205_v59, %v7319_v51 }
0x32bd   :  { %v7393_v1 = vpop.f32.mrb[46].mxu0  ;;  %v7467_v17 = vpop.f32.mrb[52].mxu1 }
0x32be   :  { %7550 = vrot.lane.b32.xlu0 %v7467_v17, %s11572_s21  ;;  %v8900_v49 = vpop.f32.mrb[53].mxu1  ;;  %7546 = vrot.lane.b32.xlu1 %v7393_v1, %s11558_s5  ;;  %v8893_v3 = vpop.f32.mrb[47].mxu0 }
0x32c1   :  { %v7541_v10 = vpop.f32.mrb[48].mxu0 }
0x32c2   :  { %7554 = vrot.lane.b32.xlu1 %v7541_v10, %s11568_s23  ;;  %v8907_v48 = vpop.f32.mrb[49].mxu0 }
0x3330   :  { %v7547_v11 = vpop.permute.xlu1 %7546  ;;  %v7551_v19 = vpop.permute.xlu0 %7550 }
0x3331   :  { %v7557_v12 = vsel %vm1448_vm0, %v7320_v15, %v7547_v11 }
0x3332   :  { %v7558_v40 = vsel %vm1457_vm1, %v7557_v12, %v7551_v19 }
0x3334   :  { %v7555_v38 = vpop.permute.xlu1 %7554 }
0x3335   :  { %v7559_v46 = vsel %vm2251_vm6, %v7558_v40, %v7555_v38 }
0x3336   :  { %v8210_v39 = vmul.f32 -1.442695, %v7559_v46 }
0x3338   :  { %9615 = vpow2.f32 %v8210_v39 }
0x3342   :  { %v9616_v24 = vpop.eup %9615 }
0x3343   :  { %v7563_v36 = vadd.f32 1.0, %v9616_v24 }
0x3345   :  { %9617 = vrcp.f32 %v7563_v36 }
0x334f   :  { %v9618_v47 = vpop.eup %9617 }
0x3350   :  { %7572 = vrot.lane.b32.xlu1 %v9618_v47, %s11572_s21  ;;  %7568 = vrot.lane.b32.xlu0 %v9618_v47, %s11558_s5  ;;  %v7566_v16 = vmul.f32 %v9618_v47, %v7559_v46 }
0x3354   :  { %7576 = vrot.lane.b32.xlu0 %v9618_v47, %s11568_s23 }
0x33c2   :  { %v7573_v54 = vpop.permute.xlu1 %7572  ;;  %v7569_v9 = vpop.permute.xlu0 %7568 }
0x33c3   :  { %v7571_v35 = vmul.f32 %v7569_v9, %v7559_v46  ;;  %v7575_v57 = vmul.f32 %v7573_v54, %v7559_v46 }
0x33c5   :  { %v7580_v45 = vsel %vm1448_vm0, %v7566_v16, %v7571_v35 }
0x33c6   :  { %v7577_v27 = vpop.permute.xlu0 %7576  ;;  %v7581_v25 = vsel %vm1457_vm1, %v7580_v45, %v7575_v57 }
0x33c7   :  { %v7579_v56 = vmul.f32 %v7577_v27, %v7559_v46 }
0x33c9   :  { %v7582_v32 = vsel %vm2251_vm6, %v7581_v25, %v7579_v56 }
0x33ca   :  { %7736 = vrot.lane.b32.xlu0 %v7582_v32, %s11572_s21  ;;  %7662 = vrot.lane.b32.xlu1 %v7582_v32, %s11568_s23 }
0x33cb   :  { %8917 = vmatmul.mubr.msk.f32.vlgmr.msra.gmra.mrb[54].mxu1 %vm1448_vm0, %v7582_v32 }
0x33cc   :  { %9203 = vmatpush3.bf16.msra.mxu1 %v9196_v8  ;;  %8938 = vmatprep.mubr.msk.f32.mxu1 %vm11563_vm3, %v11564_v28 }
0x33cd   :  { %9204 = vmatprep.subr.bf16.mxu1 %v11562_v21 }
0x33ce   :  { %7810 = vrot.lane.b32.xlu1 %v7582_v32, %s11558_s5 }
0x33d0   :  { %9206 = vmatpush3.bf16.msra.mxu1 %v9199_v63 }
0x343c   :  { %v7737_v6 = vpop.permute.xlu0 %7736  ;;  %v7663_v22 = vpop.permute.xlu1 %7662 }
0x343d   :  { %8928 = vmatmul.mubr.msk.f32.vlgmr.msra.gmra.mrb[50].mxu0 %vm1448_vm0, %v7663_v22  ;;  %8939 = vmatmul.mubr.msk.f32.vlgmr.msra.gmra.mrb[56].mxu1 %vm1448_vm0, %v7737_v6 }
0x343e   :  { %9209 = vmatpush3.bf16.msra.mxu0 %v9196_v8  ;;  %8949 = vmatprep.mubr.msk.f32.mxu0 %vm11563_vm3, %v11564_v28 }
0x343f   :  { %9210 = vmatprep.subr.bf16.mxu0 %v11562_v21 }
0x3440   :  { %v7811_v37 = vpop.permute.xlu1 %7810 }
0x3442   :  { %9212 = vmatpush3.bf16.msra.mxu0 %v9199_v63 }
0x3445   :  { %8950 = vmatmul.mubr.msk.f32.vlgmr.msra.gmra.mrb[52].mxu0 %vm1448_vm0, %v7811_v37 }
0x349e   :  { %v7658_v55 = vpop.f32.mrb[54].mxu1 }
0x349f   :  { %v8918_v42 = vpop.f32.mrb[55].mxu1  ;;  %v7659_v61 = vadd.f32 %v8211_v0, %v7658_v55 }
0x3510   :  { %v7732_v43 = vpop.f32.mrb[50].mxu0  ;;  %v7806_v26 = vpop.f32.mrb[56].mxu1 }
0x3511   :  { %7889 = vrot.lane.b32.xlu1 %v7806_v26, %s11558_s5  ;;  %v8940_v53 = vpop.f32.mrb[57].mxu1  ;;  %7885 = vrot.lane.b32.xlu0 %v7732_v43, %s11565_s12  ;;  %v8929_v52 = vpop.f32.mrb[51].mxu0 }
0x3518   :  { %v7880_v20 = vpop.f32.mrb[52].mxu0 }
0x3519   :  { %7893 = vrot.lane.b32.xlu0 %v7880_v20, %s11577_s26  ;;  %v8951_v28 = vpop.f32.mrb[53].mxu0 }
0x3583   :  { %v7886_v21 = vpop.permute.xlu0 %7885  ;;  %v7890_v4 = vpop.permute.xlu1 %7889 }
0x3584   :  { %v7896_v14 = vsel %vm1539_vm2, %v7659_v61, %v7886_v21 }
0x3585   :  { %v7897_v18 = vsel %vm1448_vm0, %v7896_v14, %v7890_v4 }
0x358b   :  { %v7894_v62 = vpop.permute.xlu0 %7893 }
0x358c   :  { %v7898_v50 = vsel %vm1879_vm4, %v7897_v18, %v7894_v62 }
0x358d   :  { %v7899_v31 = vadd.f32 %v7898_v50, %v13485_v44 }
0x358f   :  { %v7900_v13 = vmul.f32 %v7899_v31, %v7899_v31 }
0x3591   :  { %7916 = vrot.lane.b32.xlu1 %v7900_v13, %s11568_s23  ;;  %7907 = vrot.lane.b32.xlu0 %v7900_v13, %s11567_s22  ;;  %v7901_v51 = vsel %vm1539_vm2, %v7900_v13, 0.0 }
0x35b5   :  { %7902 = vadd.xlane.f32.xlu1 %v7901_v51 }
0x3603   :  { %v7908_v2 = vpop.permute.xlu0 %7907  ;;  %v7917_v17 = vpop.permute.xlu1 %7916 }
0x3604   :  { %v7910_v1 = vsel %vm1539_vm2, %v7908_v2, 0.0  ;;  %v7919_v49 = vsel %vm1539_vm2, %v7917_v17, 0.0 }
0x3605   :  { %7911 = vadd.xlane.f32.xlu0 %v7910_v1 }
0x3609   :  { %7920 = vadd.xlane.f32.xlu0 %v7919_v49 }
0x361f   :  { %7925 = vrot.lane.b32.xlu0 %v7900_v13, %s11566_s7 }
0x3642   :  { %v7903_v3 = vpop.xlane.xlu1 %7902 }
0x3643   :  { %v7904_v10 = vmul.f32 0.0625, %v7903_v3 }
0x3645   :  { %v7905_v11 = vmul.f32 0.5, %v7904_v10 }
0x3692   :  { %v7912_v44 = vpop.xlane.xlu0 %7911 }
0x3693   :  { %v7913_v48 = vmul.f32 0.0625, %v7912_v44 }
0x3695   :  { %v7914_v59 = vmul.f32 0.16666667, %v7913_v48 }
0x3696   :  { %v7921_v15 = vpop.xlane.xlu0 %7920 }
0x3697   :  { %v7922_v19 = vmul.f32 0.0625, %v7921_v15  ;;  %v7915_v12 = vadd.f32 %v7914_v59, %v7905_v11 }
0x3699   :  { %v7923_v40 = vmul.f32 0.16666667, %v7922_v19 }
0x369a   :  { %v7926_v38 = vpop.permute.xlu0 %7925 }
0x369b   :  { %v7924_v46 = vadd.f32 %v7923_v40, %v7915_v12  ;;  %v7928_v39 = vsel %vm1539_vm2, %v7926_v38, 0.0 }
0x369c   :  { %7929 = vadd.xlane.f32.xlu1 %v7928_v39 }
0x3729   :  { %v7930_v24 = vpop.xlane.xlu1 %7929 }
0x372a   :  { %v7931_v36 = vmul.f32 0.0625, %v7930_v24 }
0x372c   :  { %v7932_v30 = vmul.f32 0.16666667, %v7931_v36 }
0x372e   :  { %v7933_v29 = vadd.f32 %v7932_v30, %v7924_v46 }
0x3730   :  { %v7934_v5 = vadd.f32 1e-12, %v7933_v29 }
0x3732   :  { %9619 = vrsqrt.f32 %v7934_v5 }
0x373c   :  { %v9620_v34 = vpop.eup %9619 }
0x373d   :  { %v7936_v33 = vmul.f32 %v9620_v34, %v7899_v31 }
0x373f   :  { %v7943_v23 = vmul.f32 %v8216_v60, %v7936_v33 }
0x3741   :  { %7944 = vst.msk [vmem:[#allocation118] sm:$0xff] %vm1457_vm1, %v7943_v23 }
0x3742   :  { %11312 = shalt.err (!%p11309_p10)
}
0x3743   :  { %s11313_s17 = scalar_lea.hbm %s11970_s27, 128 }
0x3744   :  { %p11314_p11 = scmp.ne.s32.totalorder %s11970_s27, %s11313_s17  ;;  %p11317_p12 = scmp.lt.u32.totalorder %s11313_s17, %s11970_s27 }
0x3746   :  { %p11319_p13 = pnand %p11317_p12, %p11314_p11 }
0x3748   :  { %11322 = shalt.err (!%p11319_p13)
}
0x3749   :  { %7954 = dma.vmem_to_hbm [thread:$0]  %s7952_s0, 128, %s11970_s27, [#allocation4]  }
0x374a   :  { %11401 = dma.done.wait [#allocation4], 128  }
0x374b   :  { %11402 = vsyncadd [#allocation4], 4294967168 }
0x374c   :  { %7958 = vsyncpa [#allocation3], 1 }
0x374d   :  { %7959 = vsyncpa [#allocation6], 1 }
0x374e   :  { %7960 = vsyncpa [#allocation9], 1 }
0x374f   :  { %7961 = vsyncpa [#allocation12], 1 }
0x3750   :  { %7962 = vsyncpa [#allocation15], 1 }
0x3751   :  { %7963 = vsyncpa [#allocation18], 1 }
0x3752   :  { %7964 = vsyncpa [#allocation21], 1 }
0x3753   :  { %7965 = vsyncpa [#allocation24], 1 }
0x3754   :  { %7966 = vsyncpa [#allocation27], 1 }
0x3755   :  { %7967 = vsyncpa [#allocation30], 1 }
0x3756   :  { %7968 = vsyncpa [#allocation33], 1 }
0x3757   :  { %7969 = vsyncpa [#allocation36], 1 }
0x3758   :  { %7970 = vsyncpa [#allocation39], 1 }
0x3759   :  { %7971 = vsyncpa [#allocation42], 1 }
0x375a   :  { %7972 = vsyncpa [#allocation45], 1 }
0x375b   :  { %7973 = vsyncpa [#allocation48], 1 }
0x375c   :  { %7974 = vsyncpa [#allocation51], 1 }
0x375d   :  { %7975 = vsyncpa [#allocation54], 1 }
0x375e   :  { %7976 = vsyncpa [#allocation57], 1 }
0x375f   :  { %7977 = vsyncpa [#allocation60], 1 }
0x3760   :  { %7978 = vsyncpa [#allocation63], 1 }
0x3761   :  { %7979 = vsyncpa [#allocation66], 1 }
0x3762   :  { %7980 = vsyncpa [#allocation69], 1 }
0x3763   :  { %7981 = vsyncpa [#allocation72], 1 }
0x3764   :  { %7982 = vsyncpa [#allocation75], 1 }
0x3765   :  { %7983 = vsyncpa [#allocation78], 1 }
0x3766   :  { %7984 = vsyncpa [#allocation81], 1 }
0x3767   :  { %7985 = vsyncpa [#allocation84], 1 }
0x3768   :  { %7986 = vsyncpa [#allocation87], 1 }
0x3769   :  { %7987 = vsyncpa [#allocation90], 1 }
0x376a   :  { %7988 = vsyncpa [#allocation93], 1 }
0x376b   :  { %7989 = vsyncpa [#allocation96], 1 }
0x376c   :  { %7990 = vsyncpa [#allocation99], 1 }
0x376d   :  { %7991 = vsyncpa [#allocation102], 1 }
0x376e   :  { %7992 = vsyncpa [#allocation105], 1 }
0x376f   :  { %7993 = vsyncpa [#allocation108], 1 }
0x3770   :  { %7994 = vsyncpa [#allocation111], 1 }
0x3771   :  { %7995 = vsyncpa [#allocation114], 1 }
0x3772   :  { %7996 = vsyncpa [#allocation117], 1 }
0x3773   :  { %7997 = vsyncpa [#allocation4], 1 }

</bundles_post_ra>
